<compile_context>
chip_gen: v7x
topology: tpu7x:2x2x1
jax: 0.10.0
libtpu: 0.0.40
codegen_flags: <defaults>
</compile_context>

<pallas_src>
import functools
import math

import jax
import jax.numpy as jnp
from jax.experimental import pallas as pl
from jax.experimental.pallas import tpu as pltpu


# ----------------------------- in-kernel math ------------------------------

def _erf(x):
    # Abramowitz & Stegun 7.1.26 polynomial erf (abs err < 1.5e-7), matches
    # torch's exact GELU (approximate='none') to float32 tolerance.
    p = 0.3275911
    a1, a2, a3, a4, a5 = (0.254829592, -0.284496736, 1.421413741,
                          -1.453152027, 1.061405429)
    sgn = jnp.where(x >= 0.0, 1.0, -1.0)
    ax = jnp.abs(x)
    t = 1.0 / (1.0 + p * ax)
    poly = ((((a5 * t + a4) * t + a3) * t + a2) * t + a1) * t
    return sgn * (1.0 - poly * jnp.exp(-ax * ax))


def _gelu(x):
    return 0.5 * x * (1.0 + _erf(x * (1.0 / math.sqrt(2.0))))


def _layernorm(x, w, b, eps=1e-5):
    # exact form (division), used by the pure-JAX reference
    mean = jnp.mean(x, axis=-1, keepdims=True)
    var = jnp.mean(jnp.square(x - mean), axis=-1, keepdims=True)
    return (x - mean) / jnp.sqrt(var + eps) * w + b


def _layernorm_k(x, w, b, eps=1e-5):
    # kernel form: rsqrt goes to the EUP slot; same math within f32 rounding
    mean = jnp.mean(x, axis=-1, keepdims=True)
    var = jnp.mean(jnp.square(x - mean), axis=-1, keepdims=True)
    return (x - mean) * jax.lax.rsqrt(var + eps) * w + b


def _mm(a, b):
    # a @ b on the MXU (contract last dim of a with first dim of b)
    return jax.lax.dot_general(a, b, (((1,), (0,)), ((), ())),
                               preferred_element_type=jnp.float32)


def _mm_t(a, b):
    # a @ b.T without an explicit transpose
    return jax.lax.dot_general(a, b, (((1,), (1,)), ((), ())),
                               preferred_element_type=jnp.float32)


# ------------------------------- fused kernel -------------------------------

def _vit_kernel(patches_ref, in_w_ref, in_b_ref, cls_ref, pos_ref,
                ln1w, ln1b, wqkv, bqkv, wo, bo,
                ln2w, ln2b, w1, b1, w2, b2,
                hln_w, hln_b, head_w, head_b,
                out_ref, h_sc,
                *, num_heads, head_size, num_layers, b_tile):
    S, D = pos_ref.shape
    hs = head_size
    scale = 1.0 / math.sqrt(hs)

    # --- patch embedding + cls token + positional embedding ----------------
    # Write directly into scratch row slices (no sublane concatenate).
    in_w = in_w_ref[...]
    in_b = in_b_ref[...]
    cls_row = cls_ref[...] + pos_ref[0:1, :]           # (1, D)
    pos_rest = pos_ref[1:S, :]                         # (T, D)
    for b in range(b_tile):                            # static unroll
        emb = _mm(patches_ref[b], in_w) + in_b         # (T, D)
        h_sc[b * S:b * S + 1, :] = cls_row
        h_sc[b * S + 1:(b + 1) * S, :] = emb + pos_rest
    # TODO(synk): nn.Dropout is identity at p=0.0 / eval mode; omitted.

    # --- transformer blocks (weights VMEM-resident; static layer loop) -----
    for l in range(num_layers):
        ln1w_l, ln1b_l = ln1w[l], ln1b[l]
        wqkv_l, bqkv_l = wqkv[l], bqkv[l]
        wo_l, bo_l = wo[l], bo[l]
        ln2w_l, ln2b_l = ln2w[l], ln2b[l]
        w1_l, b1_l = w1[l], b1[l]
        w2_l, b2_l = w2[l], b2[l]

        x = h_sc[...]                                   # (B_TILE*S, D)
        n = _layernorm_k(x, ln1w_l, ln1b_l)
        qkv = _mm(n, wqkv_l) + bqkv_l                   # (B_TILE*S, 3D), fused QKV

        # attention is block-diagonal over batch: short static unroll
        for b in range(b_tile):
            r0, r1 = b * S, (b + 1) * S
            acc = None
            for hh in range(num_heads):
                c0 = hh * hs
                q_bh = qkv[r0:r1, c0:c0 + hs]
                k_bh = qkv[r0:r1, D + c0:D + c0 + hs]
                v_bh = qkv[r0:r1, 2 * D + c0:2 * D + c0 + hs]
                s = _mm_t(q_bh, k_bh) * scale                       # (S, S)
                s = s - jnp.max(s, axis=-1, keepdims=True)
                e = jnp.exp(s)
                p = e * pl.reciprocal(jnp.sum(e, axis=-1, keepdims=True),
                                      approx=False)
                head = _mm(p, v_bh)                                 # (S, hs)
                # accumulate head @ W_O[rows of this head] -> no lane concat
                contrib = _mm(head, wo_l[c0:c0 + hs, :])            # (S, D)
                acc = contrib if acc is None else acc + contrib
            h_sc[r0:r1, :] = h_sc[r0:r1, :] + acc + bo_l            # residual 1

        x2 = h_sc[...]
        n2 = _layernorm_k(x2, ln2w_l, ln2b_l)
        m = _gelu(_mm(n2, w1_l) + b1_l)
        h_sc[...] = x2 + _mm(m, w2_l) + b2_l                        # residual 2

    # --- classifier head on the cls rows; lane-dense padded output ----------
    cls_rows = jnp.concatenate(
        [h_sc[b * S:b * S + 1, :] for b in range(b_tile)], axis=0)   # (B_TILE, D)
    c = _layernorm_k(cls_rows, hln_w[...], hln_b[...])
    out_ref[0] = _mm(c, head_w[...]) + head_b[...]                   # (B_TILE, Cpad)


# ------------------------------- wrapper ------------------------------------

def _pick_b_tile(B, max_tile=8):
    # largest divisor of B <= max_tile, preferring >=2 grid steps so v7x's
    # two TensorCores both get work (on v5e/v6e it makes no difference)
    divs = [d for d in range(1, min(B, max_tile) + 1) if B % d == 0]
    pref = [d for d in divs if B // d >= 2]
    return max(pref) if pref else max(divs)


def vit_forward(x, params, *, patch_size, num_heads, b_tile=None):
    patches = get_patches(x.astype(jnp.float32), patch_size)       # (B, T, F)
    B, T, F = patches.shape
    D = params['in_w'].shape[1]
    S = T + 1
    C = params['head_w'].shape[1]
    L = len(params['blocks'])
    hs = D // num_heads
    Cpad = max(128, ((C + 127) // 128) * 128)                       # lane-dense out

    if b_tile is None:
        b_tile = _pick_b_tile(B)
    assert B % b_tile == 0
    nb = B // b_tile

    blocks = params['blocks']

    def stack(name):
        return jnp.stack([blk[name] for blk in blocks], axis=0)

    # fused QKV weight/bias: (L, D, 3D) / (L, 1, 3D)
    wqkv = jnp.stack([jnp.concatenate([blk['wq'], blk['wk'], blk['wv']], axis=1)
                      for blk in blocks], axis=0)
    bqkv = jnp.stack([jnp.concatenate([blk['bq'], blk['bk'], blk['bv']], axis=1)
                      for blk in blocks], axis=0)
    weight_args = [stack('ln1_w'), stack('ln1_b'), wqkv, bqkv,
                   stack('wo'), stack('bo'), stack('ln2_w'), stack('ln2_b'),
                   stack('w1'), stack('b1'), stack('w2'), stack('b2')]

    # pad classifier weights to 128 lanes (zeros -> extra logits are sliced off)
    head_w = jnp.zeros((D, Cpad), jnp.float32).at[:, :C].set(params['head_w'])
    head_b = jnp.zeros((1, Cpad), jnp.float32).at[:, :C].set(params['head_b'])

    cls2d = params['cls'].reshape(1, D)
    pos2d = params['pos'][0, :S, :]                                 # (S, D)

    kernel = functools.partial(_vit_kernel, num_heads=num_heads, head_size=hs,
                               num_layers=L, b_tile=b_tile)

    def full(arr):
        # full-array block, constant index_map -> VMEM-resident across steps
        nd = arr.ndim
        return pl.BlockSpec(arr.shape, lambda i, _nd=nd: (0,) * _nd)

    in_specs = [pl.BlockSpec((b_tile, T, F), lambda i: (i, 0, 0)),   # patches
                full(params['in_w']), full(params['in_b']),
                full(cls2d), full(pos2d)]
    in_specs += [full(a) for a in weight_args]
    in_specs += [full(params['head_ln_w']), full(params['head_ln_b']),
                 full(head_w), full(head_b)]

    args = [patches, params['in_w'], params['in_b'], cls2d, pos2d]
    args += weight_args
    args += [params['head_ln_w'], params['head_ln_b'], head_w, head_b]

    out = pl.pallas_call(
        kernel,
        out_shape=jax.ShapeDtypeStruct((nb, b_tile, Cpad), jnp.float32),
        grid=(nb,),
        in_specs=in_specs,
        out_specs=pl.BlockSpec((1, b_tile, Cpad), lambda i: (i, 0, 0)),
        scratch_shapes=[pltpu.VMEM((b_tile * S, D), jnp.float32)],   # resident act.
        compiler_params=pltpu.CompilerParams(
            dimension_semantics=("parallel",)),
    )(*args)
    return out.reshape(B, Cpad)[:, :C]


# ------------------------------ parameters ----------------------------------

def init_params(key, *, embed_dim, hidden_dim, num_channels, patch_size,
                num_layers, num_classes, num_patches):
    seq_len = 1 + num_patches
    keys = iter(jax.random.split(key, 8 * (num_layers + 2)))

    def dense(k, fan_in, fan_out):
        bound = 1.0 / math.sqrt(fan_in)
        kw, kb = jax.random.split(k)
        w = jax.random.uniform(kw, (fan_in, fan_out), jnp.float32, -bound, bound)
        b = jax.random.uniform(kb, (1, fan_out), jnp.float32, -bound, bound)
        return w, b

    params = {}
    params['in_w'], params['in_b'] = dense(next(keys),
                                           num_channels * patch_size ** 2,
                                           embed_dim)
    params['cls'] = jax.random.normal(next(keys), (1, 1, embed_dim), jnp.float32)
    params['pos'] = jax.random.normal(next(keys), (1, seq_len, embed_dim),
                                      jnp.float32)
    blocks = []
    for _ in range(num_layers):
        blk = {
            'ln1_w': jnp.ones((1, embed_dim), jnp.float32),
            'ln1_b': jnp.zeros((1, embed_dim), jnp.float32),
            'ln2_w': jnp.ones((1, embed_dim), jnp.float32),
            'ln2_b': jnp.zeros((1, embed_dim), jnp.float32),
        }
        blk['wq'], blk['bq'] = dense(next(keys), embed_dim, embed_dim)
        blk['wk'], blk['bk'] = dense(next(keys), embed_dim, embed_dim)
        blk['wv'], blk['bv'] = dense(next(keys), embed_dim, embed_dim)
        blk['wo'], blk['bo'] = dense(next(keys), embed_dim, embed_dim)
        blk['w1'], blk['b1'] = dense(next(keys), embed_dim, hidden_dim)
        blk['w2'], blk['b2'] = dense(next(keys), hidden_dim, embed_dim)
        blocks.append(blk)
    params['blocks'] = blocks
    params['head_ln_w'] = jnp.ones((1, embed_dim), jnp.float32)
    params['head_ln_b'] = jnp.zeros((1, embed_dim), jnp.float32)
    params['head_w'], params['head_b'] = dense(next(keys), embed_dim, num_classes)
    return params


# ------------------------------- glue ----------------------------------------

def get_patches(x, patch_size):
    # equivalent of image.unfold(2,P,P).unfold(3,P,P).flatten(2,3)
    #   .permute(0,2,1,3,4).flatten(-3,-1)   (NCHW in, [B, T, C*P*P] out)
    B, C, H, W = x.shape
    P = patch_size
    p = x.reshape(B, C, H // P, P, W // P, P)
    p = p.transpose(0, 2, 4, 1, 3, 5)              # (B, Hp, Wp, C, P, P)
    return p.reshape(B, (H // P) * (W // P), C * P * P)


# pure-JAX reference (same math) to validate the Pallas lowering
def vit_forward_ref(x, params, *, patch_size, num_heads):
    patches = get_patches(x.astype(jnp.float32), patch_size)
    B, T, F = patches.shape
    D = params['in_w'].shape[1]
    hs = D // num_heads
    h = patches @ params['in_w'] + params['in_b']
    cls = jnp.broadcast_to(params['cls'], (B, 1, D))
    h = jnp.concatenate([cls, h], axis=1) + params['pos'][:, :T + 1]
    for blk in params['blocks']:
        n = _layernorm(h, blk['ln1_w'], blk['ln1_b'])
        q = n @ blk['wq'] + blk['bq']
        k = n @ blk['wk'] + blk['bk']
        v = n @ blk['wv'] + blk['bv']
        S = h.shape[1]
        q = q.reshape(B, S, num_heads, hs).transpose(0, 2, 1, 3)
        k = k.reshape(B, S, num_heads, hs).transpose(0, 2, 1, 3)
        v = v.reshape(B, S, num_heads, hs).transpose(0, 2, 1, 3)
        w = jax.nn.softmax(q @ k.transpose(0, 1, 3, 2) / math.sqrt(hs), axis=-1)
        a = (w @ v).transpose(0, 2, 1, 3).reshape(B, S, D)
        h = h + (a @ blk['wo'] + blk['bo'])
        n2 = _layernorm(h, blk['ln2_w'], blk['ln2_b'])
        m = _gelu(n2 @ blk['w1'] + blk['b1']) @ blk['w2'] + blk['b2']
        h = h + m
    cls_rep = h[:, 0, :]
    return _layernorm(cls_rep, params['head_ln_w'],
                      params['head_ln_b']) @ params['head_w'] + params['head_b']


# --------------------------------- main --------------------------------------

if __name__ == "__main__":
    # small ViT config consistent with the module's constructor
    embed_dim, hidden_dim = 32, 64
    num_channels, num_heads, num_layers, num_classes = 3, 4, 2, 10
    patch_size = 4
    H = W = 16
    num_patches = (H // patch_size) * (W // patch_size)   # 16 -> seq_len 17
    batch = 4                                             # -> 2 batch-tiles of 2

    key = jax.random.PRNGKey(0)
    kx, kp = jax.random.split(key)
    x = jax.random.normal(kx, (batch, num_channels, H, W), jnp.float32)
    params = init_params(kp, embed_dim=embed_dim, hidden_dim=hidden_dim,
                         num_channels=num_channels, patch_size=patch_size,
                         num_layers=num_layers, num_classes=num_classes,
                         num_patches=num_patches)

    out = vit_forward(x, params, patch_size=patch_size, num_heads=num_heads)
    out = jax.block_until_ready(out)

    ref = vit_forward_ref(x, params, patch_size=patch_size, num_heads=num_heads)
    assert out.shape == (batch, num_classes)
    assert bool(jnp.all(jnp.isfinite(out)))
    assert bool(jnp.allclose(out, ref, atol=1e-4, rtol=1e-4)), \
        f"max abs diff {float(jnp.max(jnp.abs(out - ref)))}"
    print("KERNEL_OK")
</pallas_src>

<mosaic_0001>
module attributes {stable_mosaic.version = 11 : i64} {
  func.func @_vit_kernel(%arg0: i32, %arg1: memref<2x16x48xf32, #tpu.memory_space<vmem>>, %arg2: memref<48x32xf32, #tpu.memory_space<vmem>>, %arg3: memref<1x32xf32, #tpu.memory_space<vmem>>, %arg4: memref<1x32xf32, #tpu.memory_space<vmem>>, %arg5: memref<17x32xf32, #tpu.memory_space<vmem>>, %arg6: memref<2x1x32xf32, #tpu.memory_space<vmem>>, %arg7: memref<2x1x32xf32, #tpu.memory_space<vmem>>, %arg8: memref<2x32x96xf32, #tpu.memory_space<vmem>>, %arg9: memref<2x1x96xf32, #tpu.memory_space<vmem>>, %arg10: memref<2x32x32xf32, #tpu.memory_space<vmem>>, %arg11: memref<2x1x32xf32, #tpu.memory_space<vmem>>, %arg12: memref<2x1x32xf32, #tpu.memory_space<vmem>>, %arg13: memref<2x1x32xf32, #tpu.memory_space<vmem>>, %arg14: memref<2x32x64xf32, #tpu.memory_space<vmem>>, %arg15: memref<2x1x64xf32, #tpu.memory_space<vmem>>, %arg16: memref<2x64x32xf32, #tpu.memory_space<vmem>>, %arg17: memref<2x1x32xf32, #tpu.memory_space<vmem>>, %arg18: memref<1x32xf32, #tpu.memory_space<vmem>>, %arg19: memref<1x32xf32, #tpu.memory_space<vmem>>, %arg20: memref<32x128xf32, #tpu.memory_space<vmem>>, %arg21: memref<1x128xf32, #tpu.memory_space<vmem>>, %arg22: memref<1x2x128xf32, #tpu.memory_space<vmem>>, %arg23: memref<34x32xf32, #tpu.memory_space<vmem>>) attributes {dimension_semantics = [#tpu.dimension_semantics<parallel>], iteration_bounds = array<i64: 2>, scalar_prefetch = 0 : i64, scratch_operands = 1 : i64, tpu.core_type = #tpu.core_type<tc>, window_params = [{transform_indices = @transform_0, window_bounds = array<i64: 2, 16, 48>}, {pipeline_mode = #tpu.pipeline_mode<synchronous>, transform_indices = @transform_1, window_bounds = array<i64: 48, 32>}, {pipeline_mode = #tpu.pipeline_mode<synchronous>, transform_indices = @transform_2, window_bounds = array<i64: 1, 32>}, {pipeline_mode = #tpu.pipeline_mode<synchronous>, transform_indices = @transform_3, window_bounds = array<i64: 1, 32>}, {pipeline_mode = #tpu.pipeline_mode<synchronous>, transform_indices = @transform_4, window_bounds = array<i64: 17, 32>}, {pipeline_mode = #tpu.pipeline_mode<synchronous>, transform_indices = @transform_5, window_bounds = array<i64: 2, 1, 32>}, {pipeline_mode = #tpu.pipeline_mode<synchronous>, transform_indices = @transform_6, window_bounds = array<i64: 2, 1, 32>}, {pipeline_mode = #tpu.pipeline_mode<synchronous>, transform_indices = @transform_7, window_bounds = array<i64: 2, 32, 96>}, {pipeline_mode = #tpu.pipeline_mode<synchronous>, transform_indices = @transform_8, window_bounds = array<i64: 2, 1, 96>}, {pipeline_mode = #tpu.pipeline_mode<synchronous>, transform_indices = @transform_9, window_bounds = array<i64: 2, 32, 32>}, {pipeline_mode = #tpu.pipeline_mode<synchronous>, transform_indices = @transform_10, window_bounds = array<i64: 2, 1, 32>}, {pipeline_mode = #tpu.pipeline_mode<synchronous>, transform_indices = @transform_11, window_bounds = array<i64: 2, 1, 32>}, {pipeline_mode = #tpu.pipeline_mode<synchronous>, transform_indices = @transform_12, window_bounds = array<i64: 2, 1, 32>}, {pipeline_mode = #tpu.pipeline_mode<synchronous>, transform_indices = @transform_13, window_bounds = array<i64: 2, 32, 64>}, {pipeline_mode = #tpu.pipeline_mode<synchronous>, transform_indices = @transform_14, window_bounds = array<i64: 2, 1, 64>}, {pipeline_mode = #tpu.pipeline_mode<synchronous>, transform_indices = @transform_15, window_bounds = array<i64: 2, 64, 32>}, {pipeline_mode = #tpu.pipeline_mode<synchronous>, transform_indices = @transform_16, window_bounds = array<i64: 2, 1, 32>}, {pipeline_mode = #tpu.pipeline_mode<synchronous>, transform_indices = @transform_17, window_bounds = array<i64: 1, 32>}, {pipeline_mode = #tpu.pipeline_mode<synchronous>, transform_indices = @transform_18, window_bounds = array<i64: 1, 32>}, {pipeline_mode = #tpu.pipeline_mode<synchronous>, transform_indices = @transform_19, window_bounds = array<i64: 32, 128>}, {pipeline_mode = #tpu.pipeline_mode<synchronous>, transform_indices = @transform_20, window_bounds = array<i64: 1, 128>}, {transform_indices = @transform_21, window_bounds = array<i64: 1, 2, 128>}]} {
    %c0 = arith.constant 0 : index
    %c0_0 = arith.constant 0 : index
    %0 = vector.load %arg2[%c0, %c0_0] : memref<48x32xf32, #tpu.memory_space<vmem>>, vector<48x32xf32>
    %c0_1 = arith.constant 0 : index
    %c0_2 = arith.constant 0 : index
    %1 = vector.load %arg3[%c0_1, %c0_2] : memref<1x32xf32, #tpu.memory_space<vmem>>, vector<1x32xf32>
    %c0_3 = arith.constant 0 : index
    %c0_4 = arith.constant 0 : index
    %2 = vector.load %arg4[%c0_3, %c0_4] : memref<1x32xf32, #tpu.memory_space<vmem>>, vector<1x32xf32>
    %c0_5 = arith.constant 0 : index
    %c0_6 = arith.constant 0 : index
    %3 = vector.load %arg5[%c0_5, %c0_6] : memref<17x32xf32, #tpu.memory_space<vmem>>, vector<1x32xf32>
    %4 = arith.addf %2, %3 : vector<1x32xf32>
    %c1 = arith.constant 1 : index
    %c0_7 = arith.constant 0 : index
    %5 = vector.load %arg5[%c1, %c0_7] : memref<17x32xf32, #tpu.memory_space<vmem>>, vector<16x32xf32>
    %c0_8 = arith.constant 0 : index
    %c0_9 = arith.constant 0 : index
    %c0_10 = arith.constant 0 : index
    %6 = vector.load %arg1[%c0_8, %c0_9, %c0_10] : memref<2x16x48xf32, #tpu.memory_space<vmem>>, vector<1x16x48xf32>
    %7 = vector.shape_cast %6 : vector<1x16x48xf32> to vector<16x48xf32>
    %cst = arith.constant dense<0.000000e+00> : vector<16x32xf32>
    %8 = tpu.matmul %7, %0, %cst {dimension_numbers = #tpu.dot_dimension_numbers<[1], [0], [0], [1], [0, 0, 1, 1], [], []>} : vector<16x48xf32>, vector<48x32xf32>, vector<16x32xf32> -> vector<16x32xf32>
    %9 = vector.broadcast %1 : vector<1x32xf32> to vector<16x32xf32>
    %10 = arith.addf %8, %9 : vector<16x32xf32>
    %c0_11 = arith.constant 0 : index
    %c0_12 = arith.constant 0 : index
    %11 = vector.load %arg23[%c0_11, %c0_12] : memref<34x32xf32, #tpu.memory_space<vmem>>, vector<1x32xf32>
    tpu.vector_store %arg23[%c0_11, %c0_12], %4 {strides = array<i32>} : memref<34x32xf32, #tpu.memory_space<vmem>>, vector<1x32xf32>,
    %12 = arith.addf %10, %5 : vector<16x32xf32>
    %c1_13 = arith.constant 1 : index
    %c0_14 = arith.constant 0 : index
    %13 = vector.load %arg23[%c1_13, %c0_14] : memref<34x32xf32, #tpu.memory_space<vmem>>, vector<16x32xf32>
    tpu.vector_store %arg23[%c1_13, %c0_14], %12 {strides = array<i32>} : memref<34x32xf32, #tpu.memory_space<vmem>>, vector<16x32xf32>,
    %c1_15 = arith.constant 1 : index
    %c0_16 = arith.constant 0 : index
    %c0_17 = arith.constant 0 : index
    %14 = vector.load %arg1[%c1_15, %c0_16, %c0_17] : memref<2x16x48xf32, #tpu.memory_space<vmem>>, vector<1x16x48xf32>
    %15 = vector.shape_cast %14 : vector<1x16x48xf32> to vector<16x48xf32>
    %cst_18 = arith.constant dense<0.000000e+00> : vector<16x32xf32>
    %16 = tpu.matmul %15, %0, %cst_18 {dimension_numbers = #tpu.dot_dimension_numbers<[1], [0], [0], [1], [0, 0, 1, 1], [], []>} : vector<16x48xf32>, vector<48x32xf32>, vector<16x32xf32> -> vector<16x32xf32>
    %17 = vector.broadcast %1 : vector<1x32xf32> to vector<16x32xf32>
    %18 = arith.addf %16, %17 : vector<16x32xf32>
    %c17 = arith.constant 17 : index
    %c0_19 = arith.constant 0 : index
    %19 = vector.load %arg23[%c17, %c0_19] : memref<34x32xf32, #tpu.memory_space<vmem>>, vector<1x32xf32>
    tpu.vector_store %arg23[%c17, %c0_19], %4 {strides = array<i32>} : memref<34x32xf32, #tpu.memory_space<vmem>>, vector<1x32xf32>,
    %20 = arith.addf %18, %5 : vector<16x32xf32>
    %c18 = arith.constant 18 : index
    %c0_20 = arith.constant 0 : index
    %21 = vector.load %arg23[%c18, %c0_20] : memref<34x32xf32, #tpu.memory_space<vmem>>, vector<16x32xf32>
    tpu.vector_store %arg23[%c18, %c0_20], %20 {strides = array<i32>} : memref<34x32xf32, #tpu.memory_space<vmem>>, vector<16x32xf32>,
    %c0_21 = arith.constant 0 : index
    %c0_22 = arith.constant 0 : index
    %c0_23 = arith.constant 0 : index
    %22 = vector.load %arg6[%c0_21, %c0_22, %c0_23] : memref<2x1x32xf32, #tpu.memory_space<vmem>>, vector<1x1x32xf32>
    %23 = vector.shape_cast %22 : vector<1x1x32xf32> to vector<1x32xf32>
    %c0_24 = arith.constant 0 : index
    %c0_25 = arith.constant 0 : index
    %c0_26 = arith.constant 0 : index
    %24 = vector.load %arg7[%c0_24, %c0_25, %c0_26] : memref<2x1x32xf32, #tpu.memory_space<vmem>>, vector<1x1x32xf32>
    %25 = vector.shape_cast %24 : vector<1x1x32xf32> to vector<1x32xf32>
    %c0_27 = arith.constant 0 : index
    %c0_28 = arith.constant 0 : index
    %c0_29 = arith.constant 0 : index
    %26 = vector.load %arg8[%c0_27, %c0_28, %c0_29] : memref<2x32x96xf32, #tpu.memory_space<vmem>>, vector<1x32x96xf32>
    %27 = vector.shape_cast %26 : vector<1x32x96xf32> to vector<32x96xf32>
    %c0_30 = arith.constant 0 : index
    %c0_31 = arith.constant 0 : index
    %c0_32 = arith.constant 0 : index
    %28 = vector.load %arg9[%c0_30, %c0_31, %c0_32] : memref<2x1x96xf32, #tpu.memory_space<vmem>>, vector<1x1x96xf32>
    %29 = vector.shape_cast %28 : vector<1x1x96xf32> to vector<1x96xf32>
    %c0_33 = arith.constant 0 : index
    %c0_34 = arith.constant 0 : index
    %c0_35 = arith.constant 0 : index
    %30 = vector.load %arg10[%c0_33, %c0_34, %c0_35] : memref<2x32x32xf32, #tpu.memory_space<vmem>>, vector<1x32x32xf32>
    %31 = vector.shape_cast %30 : vector<1x32x32xf32> to vector<32x32xf32>
    %c0_36 = arith.constant 0 : index
    %c0_37 = arith.constant 0 : index
    %c0_38 = arith.constant 0 : index
    %32 = vector.load %arg11[%c0_36, %c0_37, %c0_38] : memref<2x1x32xf32, #tpu.memory_space<vmem>>, vector<1x1x32xf32>
    %33 = vector.shape_cast %32 : vector<1x1x32xf32> to vector<1x32xf32>
    %c0_39 = arith.constant 0 : index
    %c0_40 = arith.constant 0 : index
    %c0_41 = arith.constant 0 : index
    %34 = vector.load %arg12[%c0_39, %c0_40, %c0_41] : memref<2x1x32xf32, #tpu.memory_space<vmem>>, vector<1x1x32xf32>
    %35 = vector.shape_cast %34 : vector<1x1x32xf32> to vector<1x32xf32>
    %c0_42 = arith.constant 0 : index
    %c0_43 = arith.constant 0 : index
    %c0_44 = arith.constant 0 : index
    %36 = vector.load %arg13[%c0_42, %c0_43, %c0_44] : memref<2x1x32xf32, #tpu.memory_space<vmem>>, vector<1x1x32xf32>
    %37 = vector.shape_cast %36 : vector<1x1x32xf32> to vector<1x32xf32>
    %c0_45 = arith.constant 0 : index
    %c0_46 = arith.constant 0 : index
    %c0_47 = arith.constant 0 : index
    %38 = vector.load %arg14[%c0_45, %c0_46, %c0_47] : memref<2x32x64xf32, #tpu.memory_space<vmem>>, vector<1x32x64xf32>
    %39 = vector.shape_cast %38 : vector<1x32x64xf32> to vector<32x64xf32>
    %c0_48 = arith.constant 0 : index
    %c0_49 = arith.constant 0 : index
    %c0_50 = arith.constant 0 : index
    %40 = vector.load %arg15[%c0_48, %c0_49, %c0_50] : memref<2x1x64xf32, #tpu.memory_space<vmem>>, vector<1x1x64xf32>
    %41 = vector.shape_cast %40 : vector<1x1x64xf32> to vector<1x64xf32>
    %c0_51 = arith.constant 0 : index
    %c0_52 = arith.constant 0 : index
    %c0_53 = arith.constant 0 : index
    %42 = vector.load %arg16[%c0_51, %c0_52, %c0_53] : memref<2x64x32xf32, #tpu.memory_space<vmem>>, vector<1x64x32xf32>
    %43 = vector.shape_cast %42 : vector<1x64x32xf32> to vector<64x32xf32>
    %c0_54 = arith.constant 0 : index
    %c0_55 = arith.constant 0 : index
    %c0_56 = arith.constant 0 : index
    %44 = vector.load %arg17[%c0_54, %c0_55, %c0_56] : memref<2x1x32xf32, #tpu.memory_space<vmem>>, vector<1x1x32xf32>
    %45 = vector.shape_cast %44 : vector<1x1x32xf32> to vector<1x32xf32>
    %c0_57 = arith.constant 0 : index
    %c0_58 = arith.constant 0 : index
    %46 = vector.load %arg23[%c0_57, %c0_58] : memref<34x32xf32, #tpu.memory_space<vmem>>, vector<34x32xf32>
    %cst_59 = arith.constant dense<0.000000e+00> : vector<34xf32>
    %47 = vector.multi_reduction <add>, %46, %cst_59 [1] : vector<34x32xf32> to vector<34xf32>
    %48 = vector.shape_cast %47 : vector<34xf32> to vector<34x1xf32>
    %cst_60 = arith.constant 3.200000e+01 : f32
    %49 = vector.broadcast %cst_60 : f32 to vector<34x1xf32>
    %50 = arith.divf %48, %49 : vector<34x1xf32>
    %51 = vector.broadcast %50 : vector<34x1xf32> to vector<34x32xf32>
    %52 = arith.subf %46, %51 : vector<34x32xf32>
    %53 = arith.mulf %52, %52 : vector<34x32xf32>
    %cst_61 = arith.constant dense<0.000000e+00> : vector<34xf32>
    %54 = vector.multi_reduction <add>, %53, %cst_61 [1] : vector<34x32xf32> to vector<34xf32>
    %55 = vector.shape_cast %54 : vector<34xf32> to vector<34x1xf32>
    %cst_62 = arith.constant 3.200000e+01 : f32
    %56 = vector.broadcast %cst_62 : f32 to vector<34x1xf32>
    %57 = arith.divf %55, %56 : vector<34x1xf32>
    %58 = vector.broadcast %50 : vector<34x1xf32> to vector<34x32xf32>
    %59 = arith.subf %46, %58 : vector<34x32xf32>
    %cst_63 = arith.constant 9.99999974E-6 : f32
    %60 = vector.broadcast %cst_63 : f32 to vector<34x1xf32>
    %61 = arith.addf %57, %60 : vector<34x1xf32>
    %62 = math.rsqrt %61 : vector<34x1xf32>
    %63 = vector.broadcast %62 : vector<34x1xf32> to vector<34x32xf32>
    %64 = arith.mulf %59, %63 : vector<34x32xf32>
    %65 = vector.broadcast %23 : vector<1x32xf32> to vector<34x32xf32>
    %66 = arith.mulf %64, %65 : vector<34x32xf32>
    %67 = vector.broadcast %25 : vector<1x32xf32> to vector<34x32xf32>
    %68 = arith.addf %66, %67 : vector<34x32xf32>
    %cst_64 = arith.constant dense<0.000000e+00> : vector<34x96xf32>
    %69 = tpu.matmul %68, %27, %cst_64 {dimension_numbers = #tpu.dot_dimension_numbers<[1], [0], [0], [1], [0, 0, 1, 1], [], []>} : vector<34x32xf32>, vector<32x96xf32>, vector<34x96xf32> -> vector<34x96xf32>
    %70 = vector.broadcast %29 : vector<1x96xf32> to vector<34x96xf32>
    %71 = arith.addf %69, %70 : vector<34x96xf32>
    %72 = vector.extract_strided_slice %71 {offsets = [0, 0], sizes = [17, 8], strides = [1, 1]} : vector<34x96xf32> to vector<17x8xf32>
    %73 = vector.extract_strided_slice %71 {offsets = [0, 32], sizes = [17, 8], strides = [1, 1]} : vector<34x96xf32> to vector<17x8xf32>
    %74 = vector.extract_strided_slice %71 {offsets = [0, 64], sizes = [17, 8], strides = [1, 1]} : vector<34x96xf32> to vector<17x8xf32>
    %cst_65 = arith.constant dense<0.000000e+00> : vector<17x17xf32>
    %75 = tpu.matmul %72, %73, %cst_65 {dimension_numbers = #tpu.dot_dimension_numbers<[1], [1], [0], [0], [0, 0, 1, 0], [], []>} : vector<17x8xf32>, vector<17x8xf32>, vector<17x17xf32> -> vector<17x17xf32>
    %cst_66 = arith.constant 0.353553385 : f32
    %76 = vector.broadcast %cst_66 : f32 to vector<17x17xf32>
    %77 = arith.mulf %75, %76 : vector<17x17xf32>
    %cst_67 = arith.constant dense<0xFF800000> : vector<17xf32>
    %78 = vector.multi_reduction <maximumf>, %77, %cst_67 [1] : vector<17x17xf32> to vector<17xf32>
    %79 = vector.shape_cast %78 : vector<17xf32> to vector<17x1xf32>
    %80 = vector.broadcast %79 : vector<17x1xf32> to vector<17x17xf32>
    %81 = arith.subf %77, %80 : vector<17x17xf32>
    %82 = math.exp %81 : vector<17x17xf32>
    %cst_68 = arith.constant dense<0.000000e+00> : vector<17xf32>
    %83 = vector.multi_reduction <add>, %82, %cst_68 [1] : vector<17x17xf32> to vector<17xf32>
    %84 = vector.shape_cast %83 : vector<17xf32> to vector<17x1xf32>
    %85 = tpu.reciprocal %84 : vector<17x1xf32> -> vector<17x1xf32>
    %86 = vector.broadcast %85 : vector<17x1xf32> to vector<17x17xf32>
    %87 = arith.mulf %82, %86 : vector<17x17xf32>
    %cst_69 = arith.constant dense<0.000000e+00> : vector<17x8xf32>
    %88 = tpu.matmul %87, %74, %cst_69 {dimension_numbers = #tpu.dot_dimension_numbers<[1], [0], [0], [1], [0, 0, 1, 1], [], []>} : vector<17x17xf32>, vector<17x8xf32>, vector<17x8xf32> -> vector<17x8xf32>
    %89 = vector.extract_strided_slice %31 {offsets = [0, 0], sizes = [8, 32], strides = [1, 1]} : vector<32x32xf32> to vector<8x32xf32>
    %cst_70 = arith.constant dense<0.000000e+00> : vector<17x32xf32>
    %90 = tpu.matmul %88, %89, %cst_70 {dimension_numbers = #tpu.dot_dimension_numbers<[1], [0], [0], [1], [0, 0, 1, 1], [], []>} : vector<17x8xf32>, vector<8x32xf32>, vector<17x32xf32> -> vector<17x32xf32>
    %91 = vector.extract_strided_slice %71 {offsets = [0, 8], sizes = [17, 8], strides = [1, 1]} : vector<34x96xf32> to vector<17x8xf32>
    %92 = vector.extract_strided_slice %71 {offsets = [0, 40], sizes = [17, 8], strides = [1, 1]} : vector<34x96xf32> to vector<17x8xf32>
    %93 = vector.extract_strided_slice %71 {offsets = [0, 72], sizes = [17, 8], strides = [1, 1]} : vector<34x96xf32> to vector<17x8xf32>
    %cst_71 = arith.constant dense<0.000000e+00> : vector<17x17xf32>
    %94 = tpu.matmul %91, %92, %cst_71 {dimension_numbers = #tpu.dot_dimension_numbers<[1], [1], [0], [0], [0, 0, 1, 0], [], []>} : vector<17x8xf32>, vector<17x8xf32>, vector<17x17xf32> -> vector<17x17xf32>
    %cst_72 = arith.constant 0.353553385 : f32
    %95 = vector.broadcast %cst_72 : f32 to vector<17x17xf32>
    %96 = arith.mulf %94, %95 : vector<17x17xf32>
    %cst_73 = arith.constant dense<0xFF800000> : vector<17xf32>
    %97 = vector.multi_reduction <maximumf>, %96, %cst_73 [1] : vector<17x17xf32> to vector<17xf32>
    %98 = vector.shape_cast %97 : vector<17xf32> to vector<17x1xf32>
    %99 = vector.broadcast %98 : vector<17x1xf32> to vector<17x17xf32>
    %100 = arith.subf %96, %99 : vector<17x17xf32>
    %101 = math.exp %100 : vector<17x17xf32>
    %cst_74 = arith.constant dense<0.000000e+00> : vector<17xf32>
    %102 = vector.multi_reduction <add>, %101, %cst_74 [1] : vector<17x17xf32> to vector<17xf32>
    %103 = vector.shape_cast %102 : vector<17xf32> to vector<17x1xf32>
    %104 = tpu.reciprocal %103 : vector<17x1xf32> -> vector<17x1xf32>
    %105 = vector.broadcast %104 : vector<17x1xf32> to vector<17x17xf32>
    %106 = arith.mulf %101, %105 : vector<17x17xf32>
    %cst_75 = arith.constant dense<0.000000e+00> : vector<17x8xf32>
    %107 = tpu.matmul %106, %93, %cst_75 {dimension_numbers = #tpu.dot_dimension_numbers<[1], [0], [0], [1], [0, 0, 1, 1], [], []>} : vector<17x17xf32>, vector<17x8xf32>, vector<17x8xf32> -> vector<17x8xf32>
    %108 = vector.extract_strided_slice %31 {offsets = [8, 0], sizes = [8, 32], strides = [1, 1]} : vector<32x32xf32> to vector<8x32xf32>
    %cst_76 = arith.constant dense<0.000000e+00> : vector<17x32xf32>
    %109 = tpu.matmul %107, %108, %cst_76 {dimension_numbers = #tpu.dot_dimension_numbers<[1], [0], [0], [1], [0, 0, 1, 1], [], []>} : vector<17x8xf32>, vector<8x32xf32>, vector<17x32xf32> -> vector<17x32xf32>
    %110 = arith.addf %90, %109 : vector<17x32xf32>
    %111 = vector.extract_strided_slice %71 {offsets = [0, 16], sizes = [17, 8], strides = [1, 1]} : vector<34x96xf32> to vector<17x8xf32>
    %112 = vector.extract_strided_slice %71 {offsets = [0, 48], sizes = [17, 8], strides = [1, 1]} : vector<34x96xf32> to vector<17x8xf32>
    %113 = vector.extract_strided_slice %71 {offsets = [0, 80], sizes = [17, 8], strides = [1, 1]} : vector<34x96xf32> to vector<17x8xf32>
    %cst_77 = arith.constant dense<0.000000e+00> : vector<17x17xf32>
    %114 = tpu.matmul %111, %112, %cst_77 {dimension_numbers = #tpu.dot_dimension_numbers<[1], [1], [0], [0], [0, 0, 1, 0], [], []>} : vector<17x8xf32>, vector<17x8xf32>, vector<17x17xf32> -> vector<17x17xf32>
    %cst_78 = arith.constant 0.353553385 : f32
    %115 = vector.broadcast %cst_78 : f32 to vector<17x17xf32>
    %116 = arith.mulf %114, %115 : vector<17x17xf32>
    %cst_79 = arith.constant dense<0xFF800000> : vector<17xf32>
    %117 = vector.multi_reduction <maximumf>, %116, %cst_79 [1] : vector<17x17xf32> to vector<17xf32>
    %118 = vector.shape_cast %117 : vector<17xf32> to vector<17x1xf32>
    %119 = vector.broadcast %118 : vector<17x1xf32> to vector<17x17xf32>
    %120 = arith.subf %116, %119 : vector<17x17xf32>
    %121 = math.exp %120 : vector<17x17xf32>
    %cst_80 = arith.constant dense<0.000000e+00> : vector<17xf32>
    %122 = vector.multi_reduction <add>, %121, %cst_80 [1] : vector<17x17xf32> to vector<17xf32>
    %123 = vector.shape_cast %122 : vector<17xf32> to vector<17x1xf32>
    %124 = tpu.reciprocal %123 : vector<17x1xf32> -> vector<17x1xf32>
    %125 = vector.broadcast %124 : vector<17x1xf32> to vector<17x17xf32>
    %126 = arith.mulf %121, %125 : vector<17x17xf32>
    %cst_81 = arith.constant dense<0.000000e+00> : vector<17x8xf32>
    %127 = tpu.matmul %126, %113, %cst_81 {dimension_numbers = #tpu.dot_dimension_numbers<[1], [0], [0], [1], [0, 0, 1, 1], [], []>} : vector<17x17xf32>, vector<17x8xf32>, vector<17x8xf32> -> vector<17x8xf32>
    %128 = vector.extract_strided_slice %31 {offsets = [16, 0], sizes = [8, 32], strides = [1, 1]} : vector<32x32xf32> to vector<8x32xf32>
    %cst_82 = arith.constant dense<0.000000e+00> : vector<17x32xf32>
    %129 = tpu.matmul %127, %128, %cst_82 {dimension_numbers = #tpu.dot_dimension_numbers<[1], [0], [0], [1], [0, 0, 1, 1], [], []>} : vector<17x8xf32>, vector<8x32xf32>, vector<17x32xf32> -> vector<17x32xf32>
    %130 = arith.addf %110, %129 : vector<17x32xf32>
    %131 = vector.extract_strided_slice %71 {offsets = [0, 24], sizes = [17, 8], strides = [1, 1]} : vector<34x96xf32> to vector<17x8xf32>
    %132 = vector.extract_strided_slice %71 {offsets = [0, 56], sizes = [17, 8], strides = [1, 1]} : vector<34x96xf32> to vector<17x8xf32>
    %133 = vector.extract_strided_slice %71 {offsets = [0, 88], sizes = [17, 8], strides = [1, 1]} : vector<34x96xf32> to vector<17x8xf32>
    %cst_83 = arith.constant dense<0.000000e+00> : vector<17x17xf32>
    %134 = tpu.matmul %131, %132, %cst_83 {dimension_numbers = #tpu.dot_dimension_numbers<[1], [1], [0], [0], [0, 0, 1, 0], [], []>} : vector<17x8xf32>, vector<17x8xf32>, vector<17x17xf32> -> vector<17x17xf32>
    %cst_84 = arith.constant 0.353553385 : f32
    %135 = vector.broadcast %cst_84 : f32 to vector<17x17xf32>
    %136 = arith.mulf %134, %135 : vector<17x17xf32>
    %cst_85 = arith.constant dense<0xFF800000> : vector<17xf32>
    %137 = vector.multi_reduction <maximumf>, %136, %cst_85 [1] : vector<17x17xf32> to vector<17xf32>
    %138 = vector.shape_cast %137 : vector<17xf32> to vector<17x1xf32>
    %139 = vector.broadcast %138 : vector<17x1xf32> to vector<17x17xf32>
    %140 = arith.subf %136, %139 : vector<17x17xf32>
    %141 = math.exp %140 : vector<17x17xf32>
    %cst_86 = arith.constant dense<0.000000e+00> : vector<17xf32>
    %142 = vector.multi_reduction <add>, %141, %cst_86 [1] : vector<17x17xf32> to vector<17xf32>
    %143 = vector.shape_cast %142 : vector<17xf32> to vector<17x1xf32>
    %144 = tpu.reciprocal %143 : vector<17x1xf32> -> vector<17x1xf32>
    %145 = vector.broadcast %144 : vector<17x1xf32> to vector<17x17xf32>
    %146 = arith.mulf %141, %145 : vector<17x17xf32>
    %cst_87 = arith.constant dense<0.000000e+00> : vector<17x8xf32>
    %147 = tpu.matmul %146, %133, %cst_87 {dimension_numbers = #tpu.dot_dimension_numbers<[1], [0], [0], [1], [0, 0, 1, 1], [], []>} : vector<17x17xf32>, vector<17x8xf32>, vector<17x8xf32> -> vector<17x8xf32>
    %148 = vector.extract_strided_slice %31 {offsets = [24, 0], sizes = [8, 32], strides = [1, 1]} : vector<32x32xf32> to vector<8x32xf32>
    %cst_88 = arith.constant dense<0.000000e+00> : vector<17x32xf32>
    %149 = tpu.matmul %147, %148, %cst_88 {dimension_numbers = #tpu.dot_dimension_numbers<[1], [0], [0], [1], [0, 0, 1, 1], [], []>} : vector<17x8xf32>, vector<8x32xf32>, vector<17x32xf32> -> vector<17x32xf32>
    %150 = arith.addf %130, %149 : vector<17x32xf32>
    %c0_89 = arith.constant 0 : index
    %c0_90 = arith.constant 0 : index
    %151 = vector.load %arg23[%c0_89, %c0_90] : memref<34x32xf32, #tpu.memory_space<vmem>>, vector<17x32xf32>
    %152 = arith.addf %151, %150 : vector<17x32xf32>
    %153 = vector.broadcast %33 : vector<1x32xf32> to vector<17x32xf32>
    %154 = arith.addf %152, %153 : vector<17x32xf32>
    %c0_91 = arith.constant 0 : index
    %c0_92 = arith.constant 0 : index
    %155 = vector.load %arg23[%c0_91, %c0_92] : memref<34x32xf32, #tpu.memory_space<vmem>>, vector<17x32xf32>
    tpu.vector_store %arg23[%c0_91, %c0_92], %154 {strides = array<i32>} : memref<34x32xf32, #tpu.memory_space<vmem>>, vector<17x32xf32>,
    %156 = vector.extract_strided_slice %71 {offsets = [17, 0], sizes = [17, 8], strides = [1, 1]} : vector<34x96xf32> to vector<17x8xf32>
    %157 = vector.extract_strided_slice %71 {offsets = [17, 32], sizes = [17, 8], strides = [1, 1]} : vector<34x96xf32> to vector<17x8xf32>
    %158 = vector.extract_strided_slice %71 {offsets = [17, 64], sizes = [17, 8], strides = [1, 1]} : vector<34x96xf32> to vector<17x8xf32>
    %cst_93 = arith.constant dense<0.000000e+00> : vector<17x17xf32>
    %159 = tpu.matmul %156, %157, %cst_93 {dimension_numbers = #tpu.dot_dimension_numbers<[1], [1], [0], [0], [0, 0, 1, 0], [], []>} : vector<17x8xf32>, vector<17x8xf32>, vector<17x17xf32> -> vector<17x17xf32>
    %cst_94 = arith.constant 0.353553385 : f32
    %160 = vector.broadcast %cst_94 : f32 to vector<17x17xf32>
    %161 = arith.mulf %159, %160 : vector<17x17xf32>
    %cst_95 = arith.constant dense<0xFF800000> : vector<17xf32>
    %162 = vector.multi_reduction <maximumf>, %161, %cst_95 [1] : vector<17x17xf32> to vector<17xf32>
    %163 = vector.shape_cast %162 : vector<17xf32> to vector<17x1xf32>
    %164 = vector.broadcast %163 : vector<17x1xf32> to vector<17x17xf32>
    %165 = arith.subf %161, %164 : vector<17x17xf32>
    %166 = math.exp %165 : vector<17x17xf32>
    %cst_96 = arith.constant dense<0.000000e+00> : vector<17xf32>
    %167 = vector.multi_reduction <add>, %166, %cst_96 [1] : vector<17x17xf32> to vector<17xf32>
    %168 = vector.shape_cast %167 : vector<17xf32> to vector<17x1xf32>
    %169 = tpu.reciprocal %168 : vector<17x1xf32> -> vector<17x1xf32>
    %170 = vector.broadcast %169 : vector<17x1xf32> to vector<17x17xf32>
    %171 = arith.mulf %166, %170 : vector<17x17xf32>
    %cst_97 = arith.constant dense<0.000000e+00> : vector<17x8xf32>
    %172 = tpu.matmul %171, %158, %cst_97 {dimension_numbers = #tpu.dot_dimension_numbers<[1], [0], [0], [1], [0, 0, 1, 1], [], []>} : vector<17x17xf32>, vector<17x8xf32>, vector<17x8xf32> -> vector<17x8xf32>
    %173 = vector.extract_strided_slice %31 {offsets = [0, 0], sizes = [8, 32], strides = [1, 1]} : vector<32x32xf32> to vector<8x32xf32>
    %cst_98 = arith.constant dense<0.000000e+00> : vector<17x32xf32>
    %174 = tpu.matmul %172, %173, %cst_98 {dimension_numbers = #tpu.dot_dimension_numbers<[1], [0], [0], [1], [0, 0, 1, 1], [], []>} : vector<17x8xf32>, vector<8x32xf32>, vector<17x32xf32> -> vector<17x32xf32>
    %175 = vector.extract_strided_slice %71 {offsets = [17, 8], sizes = [17, 8], strides = [1, 1]} : vector<34x96xf32> to vector<17x8xf32>
    %176 = vector.extract_strided_slice %71 {offsets = [17, 40], sizes = [17, 8], strides = [1, 1]} : vector<34x96xf32> to vector<17x8xf32>
    %177 = vector.extract_strided_slice %71 {offsets = [17, 72], sizes = [17, 8], strides = [1, 1]} : vector<34x96xf32> to vector<17x8xf32>
    %cst_99 = arith.constant dense<0.000000e+00> : vector<17x17xf32>
    %178 = tpu.matmul %175, %176, %cst_99 {dimension_numbers = #tpu.dot_dimension_numbers<[1], [1], [0], [0], [0, 0, 1, 0], [], []>} : vector<17x8xf32>, vector<17x8xf32>, vector<17x17xf32> -> vector<17x17xf32>
    %cst_100 = arith.constant 0.353553385 : f32
    %179 = vector.broadcast %cst_100 : f32 to vector<17x17xf32>
    %180 = arith.mulf %178, %179 : vector<17x17xf32>
    %cst_101 = arith.constant dense<0xFF800000> : vector<17xf32>
    %181 = vector.multi_reduction <maximumf>, %180, %cst_101 [1] : vector<17x17xf32> to vector<17xf32>
    %182 = vector.shape_cast %181 : vector<17xf32> to vector<17x1xf32>
    %183 = vector.broadcast %182 : vector<17x1xf32> to vector<17x17xf32>
    %184 = arith.subf %180, %183 : vector<17x17xf32>
    %185 = math.exp %184 : vector<17x17xf32>
    %cst_102 = arith.constant dense<0.000000e+00> : vector<17xf32>
    %186 = vector.multi_reduction <add>, %185, %cst_102 [1] : vector<17x17xf32> to vector<17xf32>
    %187 = vector.shape_cast %186 : vector<17xf32> to vector<17x1xf32>
    %188 = tpu.reciprocal %187 : vector<17x1xf32> -> vector<17x1xf32>
    %189 = vector.broadcast %188 : vector<17x1xf32> to vector<17x17xf32>
    %190 = arith.mulf %185, %189 : vector<17x17xf32>
    %cst_103 = arith.constant dense<0.000000e+00> : vector<17x8xf32>
    %191 = tpu.matmul %190, %177, %cst_103 {dimension_numbers = #tpu.dot_dimension_numbers<[1], [0], [0], [1], [0, 0, 1, 1], [], []>} : vector<17x17xf32>, vector<17x8xf32>, vector<17x8xf32> -> vector<17x8xf32>
    %192 = vector.extract_strided_slice %31 {offsets = [8, 0], sizes = [8, 32], strides = [1, 1]} : vector<32x32xf32> to vector<8x32xf32>
    %cst_104 = arith.constant dense<0.000000e+00> : vector<17x32xf32>
    %193 = tpu.matmul %191, %192, %cst_104 {dimension_numbers = #tpu.dot_dimension_numbers<[1], [0], [0], [1], [0, 0, 1, 1], [], []>} : vector<17x8xf32>, vector<8x32xf32>, vector<17x32xf32> -> vector<17x32xf32>
    %194 = arith.addf %174, %193 : vector<17x32xf32>
    %195 = vector.extract_strided_slice %71 {offsets = [17, 16], sizes = [17, 8], strides = [1, 1]} : vector<34x96xf32> to vector<17x8xf32>
    %196 = vector.extract_strided_slice %71 {offsets = [17, 48], sizes = [17, 8], strides = [1, 1]} : vector<34x96xf32> to vector<17x8xf32>
    %197 = vector.extract_strided_slice %71 {offsets = [17, 80], sizes = [17, 8], strides = [1, 1]} : vector<34x96xf32> to vector<17x8xf32>
    %cst_105 = arith.constant dense<0.000000e+00> : vector<17x17xf32>
    %198 = tpu.matmul %195, %196, %cst_105 {dimension_numbers = #tpu.dot_dimension_numbers<[1], [1], [0], [0], [0, 0, 1, 0], [], []>} : vector<17x8xf32>, vector<17x8xf32>, vector<17x17xf32> -> vector<17x17xf32>
    %cst_106 = arith.constant 0.353553385 : f32
    %199 = vector.broadcast %cst_106 : f32 to vector<17x17xf32>
    %200 = arith.mulf %198, %199 : vector<17x17xf32>
    %cst_107 = arith.constant dense<0xFF800000> : vector<17xf32>
    %201 = vector.multi_reduction <maximumf>, %200, %cst_107 [1] : vector<17x17xf32> to vector<17xf32>
    %202 = vector.shape_cast %201 : vector<17xf32> to vector<17x1xf32>
    %203 = vector.broadcast %202 : vector<17x1xf32> to vector<17x17xf32>
    %204 = arith.subf %200, %203 : vector<17x17xf32>
    %205 = math.exp %204 : vector<17x17xf32>
    %cst_108 = arith.constant dense<0.000000e+00> : vector<17xf32>
    %206 = vector.multi_reduction <add>, %205, %cst_108 [1] : vector<17x17xf32> to vector<17xf32>
    %207 = vector.shape_cast %206 : vector<17xf32> to vector<17x1xf32>
    %208 = tpu.reciprocal %207 : vector<17x1xf32> -> vector<17x1xf32>
    %209 = vector.broadcast %208 : vector<17x1xf32> to vector<17x17xf32>
    %210 = arith.mulf %205, %209 : vector<17x17xf32>
    %cst_109 = arith.constant dense<0.000000e+00> : vector<17x8xf32>
    %211 = tpu.matmul %210, %197, %cst_109 {dimension_numbers = #tpu.dot_dimension_numbers<[1], [0], [0], [1], [0, 0, 1, 1], [], []>} : vector<17x17xf32>, vector<17x8xf32>, vector<17x8xf32> -> vector<17x8xf32>
    %212 = vector.extract_strided_slice %31 {offsets = [16, 0], sizes = [8, 32], strides = [1, 1]} : vector<32x32xf32> to vector<8x32xf32>
    %cst_110 = arith.constant dense<0.000000e+00> : vector<17x32xf32>
    %213 = tpu.matmul %211, %212, %cst_110 {dimension_numbers = #tpu.dot_dimension_numbers<[1], [0], [0], [1], [0, 0, 1, 1], [], []>} : vector<17x8xf32>, vector<8x32xf32>, vector<17x32xf32> -> vector<17x32xf32>
    %214 = arith.addf %194, %213 : vector<17x32xf32>
    %215 = vector.extract_strided_slice %71 {offsets = [17, 24], sizes = [17, 8], strides = [1, 1]} : vector<34x96xf32> to vector<17x8xf32>
    %216 = vector.extract_strided_slice %71 {offsets = [17, 56], sizes = [17, 8], strides = [1, 1]} : vector<34x96xf32> to vector<17x8xf32>
    %217 = vector.extract_strided_slice %71 {offsets = [17, 88], sizes = [17, 8], strides = [1, 1]} : vector<34x96xf32> to vector<17x8xf32>
    %cst_111 = arith.constant dense<0.000000e+00> : vector<17x17xf32>
    %218 = tpu.matmul %215, %216, %cst_111 {dimension_numbers = #tpu.dot_dimension_numbers<[1], [1], [0], [0], [0, 0, 1, 0], [], []>} : vector<17x8xf32>, vector<17x8xf32>, vector<17x17xf32> -> vector<17x17xf32>
    %cst_112 = arith.constant 0.353553385 : f32
    %219 = vector.broadcast %cst_112 : f32 to vector<17x17xf32>
    %220 = arith.mulf %218, %219 : vector<17x17xf32>
    %cst_113 = arith.constant dense<0xFF800000> : vector<17xf32>
    %221 = vector.multi_reduction <maximumf>, %220, %cst_113 [1] : vector<17x17xf32> to vector<17xf32>
    %222 = vector.shape_cast %221 : vector<17xf32> to vector<17x1xf32>
    %223 = vector.broadcast %222 : vector<17x1xf32> to vector<17x17xf32>
    %224 = arith.subf %220, %223 : vector<17x17xf32>
    %225 = math.exp %224 : vector<17x17xf32>
    %cst_114 = arith.constant dense<0.000000e+00> : vector<17xf32>
    %226 = vector.multi_reduction <add>, %225, %cst_114 [1] : vector<17x17xf32> to vector<17xf32>
    %227 = vector.shape_cast %226 : vector<17xf32> to vector<17x1xf32>
    %228 = tpu.reciprocal %227 : vector<17x1xf32> -> vector<17x1xf32>
    %229 = vector.broadcast %228 : vector<17x1xf32> to vector<17x17xf32>
    %230 = arith.mulf %225, %229 : vector<17x17xf32>
    %cst_115 = arith.constant dense<0.000000e+00> : vector<17x8xf32>
    %231 = tpu.matmul %230, %217, %cst_115 {dimension_numbers = #tpu.dot_dimension_numbers<[1], [0], [0], [1], [0, 0, 1, 1], [], []>} : vector<17x17xf32>, vector<17x8xf32>, vector<17x8xf32> -> vector<17x8xf32>
    %232 = vector.extract_strided_slice %31 {offsets = [24, 0], sizes = [8, 32], strides = [1, 1]} : vector<32x32xf32> to vector<8x32xf32>
    %cst_116 = arith.constant dense<0.000000e+00> : vector<17x32xf32>
    %233 = tpu.matmul %231, %232, %cst_116 {dimension_numbers = #tpu.dot_dimension_numbers<[1], [0], [0], [1], [0, 0, 1, 1], [], []>} : vector<17x8xf32>, vector<8x32xf32>, vector<17x32xf32> -> vector<17x32xf32>
    %234 = arith.addf %214, %233 : vector<17x32xf32>
    %c17_117 = arith.constant 17 : index
    %c0_118 = arith.constant 0 : index
    %235 = vector.load %arg23[%c17_117, %c0_118] : memref<34x32xf32, #tpu.memory_space<vmem>>, vector<17x32xf32>
    %236 = arith.addf %235, %234 : vector<17x32xf32>
    %237 = vector.broadcast %33 : vector<1x32xf32> to vector<17x32xf32>
    %238 = arith.addf %236, %237 : vector<17x32xf32>
    %c17_119 = arith.constant 17 : index
    %c0_120 = arith.constant 0 : index
    %239 = vector.load %arg23[%c17_119, %c0_120] : memref<34x32xf32, #tpu.memory_space<vmem>>, vector<17x32xf32>
    tpu.vector_store %arg23[%c17_119, %c0_120], %238 {strides = array<i32>} : memref<34x32xf32, #tpu.memory_space<vmem>>, vector<17x32xf32>,
    %c0_121 = arith.constant 0 : index
    %c0_122 = arith.constant 0 : index
    %240 = vector.load %arg23[%c0_121, %c0_122] : memref<34x32xf32, #tpu.memory_space<vmem>>, vector<34x32xf32>
    %cst_123 = arith.constant dense<0.000000e+00> : vector<34xf32>
    %241 = vector.multi_reduction <add>, %240, %cst_123 [1] : vector<34x32xf32> to vector<34xf32>
    %242 = vector.shape_cast %241 : vector<34xf32> to vector<34x1xf32>
    %cst_124 = arith.constant 3.200000e+01 : f32
    %243 = vector.broadcast %cst_124 : f32 to vector<34x1xf32>
    %244 = arith.divf %242, %243 : vector<34x1xf32>
    %245 = vector.broadcast %244 : vector<34x1xf32> to vector<34x32xf32>
    %246 = arith.subf %240, %245 : vector<34x32xf32>
    %247 = arith.mulf %246, %246 : vector<34x32xf32>
    %cst_125 = arith.constant dense<0.000000e+00> : vector<34xf32>
    %248 = vector.multi_reduction <add>, %247, %cst_125 [1] : vector<34x32xf32> to vector<34xf32>
    %249 = vector.shape_cast %248 : vector<34xf32> to vector<34x1xf32>
    %cst_126 = arith.constant 3.200000e+01 : f32
    %250 = vector.broadcast %cst_126 : f32 to vector<34x1xf32>
    %251 = arith.divf %249, %250 : vector<34x1xf32>
    %252 = vector.broadcast %244 : vector<34x1xf32> to vector<34x32xf32>
    %253 = arith.subf %240, %252 : vector<34x32xf32>
    %cst_127 = arith.constant 9.99999974E-6 : f32
    %254 = vector.broadcast %cst_127 : f32 to vector<34x1xf32>
    %255 = arith.addf %251, %254 : vector<34x1xf32>
    %256 = math.rsqrt %255 : vector<34x1xf32>
    %257 = vector.broadcast %256 : vector<34x1xf32> to vector<34x32xf32>
    %258 = arith.mulf %253, %257 : vector<34x32xf32>
    %259 = vector.broadcast %35 : vector<1x32xf32> to vector<34x32xf32>
    %260 = arith.mulf %258, %259 : vector<34x32xf32>
    %261 = vector.broadcast %37 : vector<1x32xf32> to vector<34x32xf32>
    %262 = arith.addf %260, %261 : vector<34x32xf32>
    %cst_128 = arith.constant dense<0.000000e+00> : vector<34x64xf32>
    %263 = tpu.matmul %262, %39, %cst_128 {dimension_numbers = #tpu.dot_dimension_numbers<[1], [0], [0], [1], [0, 0, 1, 1], [], []>} : vector<34x32xf32>, vector<32x64xf32>, vector<34x64xf32> -> vector<34x64xf32>
    %264 = vector.broadcast %41 : vector<1x64xf32> to vector<34x64xf32>
    %265 = arith.addf %263, %264 : vector<34x64xf32>
    %cst_129 = arith.constant 5.000000e-01 : f32
    %266 = vector.broadcast %cst_129 : f32 to vector<34x64xf32>
    %267 = arith.mulf %266, %265 : vector<34x64xf32>
    %cst_130 = arith.constant 0.707106769 : f32
    %268 = vector.broadcast %cst_130 : f32 to vector<34x64xf32>
    %269 = arith.mulf %265, %268 : vector<34x64xf32>
    %cst_131 = arith.constant 0.000000e+00 : f32
    %270 = vector.broadcast %cst_131 : f32 to vector<34x64xf32>
    %271 = arith.cmpf oge, %269, %270 : vector<34x64xf32>
    %cst_132 = arith.constant 1.000000e+00 : f32
    %cst_133 = arith.constant -1.000000e+00 : f32
    %272 = vector.broadcast %cst_132 : f32 to vector<34x64xf32>
    %273 = vector.broadcast %cst_133 : f32 to vector<34x64xf32>
    %274 = arith.select %271, %272, %273 : vector<34x64xi1>, vector<34x64xf32>
    %275 = math.absf %269 : vector<34x64xf32>
    %cst_134 = arith.constant 0.327591091 : f32
    %276 = vector.broadcast %cst_134 : f32 to vector<34x64xf32>
    %277 = arith.mulf %276, %275 : vector<34x64xf32>
    %cst_135 = arith.constant 1.000000e+00 : f32
    %278 = vector.broadcast %cst_135 : f32 to vector<34x64xf32>
    %279 = arith.addf %278, %277 : vector<34x64xf32>
    %cst_136 = arith.constant 1.000000e+00 : f32
    %280 = vector.broadcast %cst_136 : f32 to vector<34x64xf32>
    %281 = arith.divf %280, %279 : vector<34x64xf32>
    %cst_137 = arith.constant 1.06140542 : f32
    %282 = vector.broadcast %cst_137 : f32 to vector<34x64xf32>
    %283 = arith.mulf %282, %281 : vector<34x64xf32>
    %cst_138 = arith.constant -1.45315206 : f32
    %284 = vector.broadcast %cst_138 : f32 to vector<34x64xf32>
    %285 = arith.addf %283, %284 : vector<34x64xf32>
    %286 = arith.mulf %285, %281 : vector<34x64xf32>
    %cst_139 = arith.constant 1.42141378 : f32
    %287 = vector.broadcast %cst_139 : f32 to vector<34x64xf32>
    %288 = arith.addf %286, %287 : vector<34x64xf32>
    %289 = arith.mulf %288, %281 : vector<34x64xf32>
    %cst_140 = arith.constant -0.284496725 : f32
    %290 = vector.broadcast %cst_140 : f32 to vector<34x64xf32>
    %291 = arith.addf %289, %290 : vector<34x64xf32>
    %292 = arith.mulf %291, %281 : vector<34x64xf32>
    %cst_141 = arith.constant 0.254829586 : f32
    %293 = vector.broadcast %cst_141 : f32 to vector<34x64xf32>
    %294 = arith.addf %292, %293 : vector<34x64xf32>
    %295 = arith.mulf %294, %281 : vector<34x64xf32>
    %cst_142 = arith.constant 0.000000e+00 : f32
    %296 = vector.broadcast %cst_142 : f32 to vector<34x64xf32>
    %297 = arith.subf %296, %275 : vector<34x64xf32>
    %298 = arith.mulf %297, %275 : vector<34x64xf32>
    %299 = math.exp %298 : vector<34x64xf32>
    %300 = arith.mulf %295, %299 : vector<34x64xf32>
    %cst_143 = arith.constant 1.000000e+00 : f32
    %301 = vector.broadcast %cst_143 : f32 to vector<34x64xf32>
    %302 = arith.subf %301, %300 : vector<34x64xf32>
    %303 = arith.mulf %274, %302 : vector<34x64xf32>
    %cst_144 = arith.constant 1.000000e+00 : f32
    %304 = vector.broadcast %cst_144 : f32 to vector<34x64xf32>
    %305 = arith.addf %304, %303 : vector<34x64xf32>
    %306 = arith.mulf %267, %305 : vector<34x64xf32>
    %cst_145 = arith.constant dense<0.000000e+00> : vector<34x32xf32>
    %307 = tpu.matmul %306, %43, %cst_145 {dimension_numbers = #tpu.dot_dimension_numbers<[1], [0], [0], [1], [0, 0, 1, 1], [], []>} : vector<34x64xf32>, vector<64x32xf32>, vector<34x32xf32> -> vector<34x32xf32>
    %308 = arith.addf %240, %307 : vector<34x32xf32>
    %309 = vector.broadcast %45 : vector<1x32xf32> to vector<34x32xf32>
    %310 = arith.addf %308, %309 : vector<34x32xf32>
    %c0_146 = arith.constant 0 : index
    %c0_147 = arith.constant 0 : index
    %311 = vector.load %arg23[%c0_146, %c0_147] : memref<34x32xf32, #tpu.memory_space<vmem>>, vector<34x32xf32>
    tpu.vector_store %arg23[%c0_146, %c0_147], %310 {strides = array<i32>} : memref<34x32xf32, #tpu.memory_space<vmem>>, vector<34x32xf32>,
    %c1_148 = arith.constant 1 : index
    %c0_149 = arith.constant 0 : index
    %c0_150 = arith.constant 0 : index
    %312 = vector.load %arg6[%c1_148, %c0_149, %c0_150] : memref<2x1x32xf32, #tpu.memory_space<vmem>>, vector<1x1x32xf32>
    %313 = vector.shape_cast %312 : vector<1x1x32xf32> to vector<1x32xf32>
    %c1_151 = arith.constant 1 : index
    %c0_152 = arith.constant 0 : index
    %c0_153 = arith.constant 0 : index
    %314 = vector.load %arg7[%c1_151, %c0_152, %c0_153] : memref<2x1x32xf32, #tpu.memory_space<vmem>>, vector<1x1x32xf32>
    %315 = vector.shape_cast %314 : vector<1x1x32xf32> to vector<1x32xf32>
    %c1_154 = arith.constant 1 : index
    %c0_155 = arith.constant 0 : index
    %c0_156 = arith.constant 0 : index
    %316 = vector.load %arg8[%c1_154, %c0_155, %c0_156] : memref<2x32x96xf32, #tpu.memory_space<vmem>>, vector<1x32x96xf32>
    %317 = vector.shape_cast %316 : vector<1x32x96xf32> to vector<32x96xf32>
    %c1_157 = arith.constant 1 : index
    %c0_158 = arith.constant 0 : index
    %c0_159 = arith.constant 0 : index
    %318 = vector.load %arg9[%c1_157, %c0_158, %c0_159] : memref<2x1x96xf32, #tpu.memory_space<vmem>>, vector<1x1x96xf32>
    %319 = vector.shape_cast %318 : vector<1x1x96xf32> to vector<1x96xf32>
    %c1_160 = arith.constant 1 : index
    %c0_161 = arith.constant 0 : index
    %c0_162 = arith.constant 0 : index
    %320 = vector.load %arg10[%c1_160, %c0_161, %c0_162] : memref<2x32x32xf32, #tpu.memory_space<vmem>>, vector<1x32x32xf32>
    %321 = vector.shape_cast %320 : vector<1x32x32xf32> to vector<32x32xf32>
    %c1_163 = arith.constant 1 : index
    %c0_164 = arith.constant 0 : index
    %c0_165 = arith.constant 0 : index
    %322 = vector.load %arg11[%c1_163, %c0_164, %c0_165] : memref<2x1x32xf32, #tpu.memory_space<vmem>>, vector<1x1x32xf32>
    %323 = vector.shape_cast %322 : vector<1x1x32xf32> to vector<1x32xf32>
    %c1_166 = arith.constant 1 : index
    %c0_167 = arith.constant 0 : index
    %c0_168 = arith.constant 0 : index
    %324 = vector.load %arg12[%c1_166, %c0_167, %c0_168] : memref<2x1x32xf32, #tpu.memory_space<vmem>>, vector<1x1x32xf32>
    %325 = vector.shape_cast %324 : vector<1x1x32xf32> to vector<1x32xf32>
    %c1_169 = arith.constant 1 : index
    %c0_170 = arith.constant 0 : index
    %c0_171 = arith.constant 0 : index
    %326 = vector.load %arg13[%c1_169, %c0_170, %c0_171] : memref<2x1x32xf32, #tpu.memory_space<vmem>>, vector<1x1x32xf32>
    %327 = vector.shape_cast %326 : vector<1x1x32xf32> to vector<1x32xf32>
    %c1_172 = arith.constant 1 : index
    %c0_173 = arith.constant 0 : index
    %c0_174 = arith.constant 0 : index
    %328 = vector.load %arg14[%c1_172, %c0_173, %c0_174] : memref<2x32x64xf32, #tpu.memory_space<vmem>>, vector<1x32x64xf32>
    %329 = vector.shape_cast %328 : vector<1x32x64xf32> to vector<32x64xf32>
    %c1_175 = arith.constant 1 : index
    %c0_176 = arith.constant 0 : index
    %c0_177 = arith.constant 0 : index
    %330 = vector.load %arg15[%c1_175, %c0_176, %c0_177] : memref<2x1x64xf32, #tpu.memory_space<vmem>>, vector<1x1x64xf32>
    %331 = vector.shape_cast %330 : vector<1x1x64xf32> to vector<1x64xf32>
    %c1_178 = arith.constant 1 : index
    %c0_179 = arith.constant 0 : index
    %c0_180 = arith.constant 0 : index
    %332 = vector.load %arg16[%c1_178, %c0_179, %c0_180] : memref<2x64x32xf32, #tpu.memory_space<vmem>>, vector<1x64x32xf32>
    %333 = vector.shape_cast %332 : vector<1x64x32xf32> to vector<64x32xf32>
    %c1_181 = arith.constant 1 : index
    %c0_182 = arith.constant 0 : index
    %c0_183 = arith.constant 0 : index
    %334 = vector.load %arg17[%c1_181, %c0_182, %c0_183] : memref<2x1x32xf32, #tpu.memory_space<vmem>>, vector<1x1x32xf32>
    %335 = vector.shape_cast %334 : vector<1x1x32xf32> to vector<1x32xf32>
    %c0_184 = arith.constant 0 : index
    %c0_185 = arith.constant 0 : index
    %336 = vector.load %arg23[%c0_184, %c0_185] : memref<34x32xf32, #tpu.memory_space<vmem>>, vector<34x32xf32>
    %cst_186 = arith.constant dense<0.000000e+00> : vector<34xf32>
    %337 = vector.multi_reduction <add>, %336, %cst_186 [1] : vector<34x32xf32> to vector<34xf32>
    %338 = vector.shape_cast %337 : vector<34xf32> to vector<34x1xf32>
    %cst_187 = arith.constant 3.200000e+01 : f32
    %339 = vector.broadcast %cst_187 : f32 to vector<34x1xf32>
    %340 = arith.divf %338, %339 : vector<34x1xf32>
    %341 = vector.broadcast %340 : vector<34x1xf32> to vector<34x32xf32>
    %342 = arith.subf %336, %341 : vector<34x32xf32>
    %343 = arith.mulf %342, %342 : vector<34x32xf32>
    %cst_188 = arith.constant dense<0.000000e+00> : vector<34xf32>
    %344 = vector.multi_reduction <add>, %343, %cst_188 [1] : vector<34x32xf32> to vector<34xf32>
    %345 = vector.shape_cast %344 : vector<34xf32> to vector<34x1xf32>
    %cst_189 = arith.constant 3.200000e+01 : f32
    %346 = vector.broadcast %cst_189 : f32 to vector<34x1xf32>
    %347 = arith.divf %345, %346 : vector<34x1xf32>
    %348 = vector.broadcast %340 : vector<34x1xf32> to vector<34x32xf32>
    %349 = arith.subf %336, %348 : vector<34x32xf32>
    %cst_190 = arith.constant 9.99999974E-6 : f32
    %350 = vector.broadcast %cst_190 : f32 to vector<34x1xf32>
    %351 = arith.addf %347, %350 : vector<34x1xf32>
    %352 = math.rsqrt %351 : vector<34x1xf32>
    %353 = vector.broadcast %352 : vector<34x1xf32> to vector<34x32xf32>
    %354 = arith.mulf %349, %353 : vector<34x32xf32>
    %355 = vector.broadcast %313 : vector<1x32xf32> to vector<34x32xf32>
    %356 = arith.mulf %354, %355 : vector<34x32xf32>
    %357 = vector.broadcast %315 : vector<1x32xf32> to vector<34x32xf32>
    %358 = arith.addf %356, %357 : vector<34x32xf32>
    %cst_191 = arith.constant dense<0.000000e+00> : vector<34x96xf32>
    %359 = tpu.matmul %358, %317, %cst_191 {dimension_numbers = #tpu.dot_dimension_numbers<[1], [0], [0], [1], [0, 0, 1, 1], [], []>} : vector<34x32xf32>, vector<32x96xf32>, vector<34x96xf32> -> vector<34x96xf32>
    %360 = vector.broadcast %319 : vector<1x96xf32> to vector<34x96xf32>
    %361 = arith.addf %359, %360 : vector<34x96xf32>
    %362 = vector.extract_strided_slice %361 {offsets = [0, 0], sizes = [17, 8], strides = [1, 1]} : vector<34x96xf32> to vector<17x8xf32>
    %363 = vector.extract_strided_slice %361 {offsets = [0, 32], sizes = [17, 8], strides = [1, 1]} : vector<34x96xf32> to vector<17x8xf32>
    %364 = vector.extract_strided_slice %361 {offsets = [0, 64], sizes = [17, 8], strides = [1, 1]} : vector<34x96xf32> to vector<17x8xf32>
    %cst_192 = arith.constant dense<0.000000e+00> : vector<17x17xf32>
    %365 = tpu.matmul %362, %363, %cst_192 {dimension_numbers = #tpu.dot_dimension_numbers<[1], [1], [0], [0], [0, 0, 1, 0], [], []>} : vector<17x8xf32>, vector<17x8xf32>, vector<17x17xf32> -> vector<17x17xf32>
    %cst_193 = arith.constant 0.353553385 : f32
    %366 = vector.broadcast %cst_193 : f32 to vector<17x17xf32>
    %367 = arith.mulf %365, %366 : vector<17x17xf32>
    %cst_194 = arith.constant dense<0xFF800000> : vector<17xf32>
    %368 = vector.multi_reduction <maximumf>, %367, %cst_194 [1] : vector<17x17xf32> to vector<17xf32>
    %369 = vector.shape_cast %368 : vector<17xf32> to vector<17x1xf32>
    %370 = vector.broadcast %369 : vector<17x1xf32> to vector<17x17xf32>
    %371 = arith.subf %367, %370 : vector<17x17xf32>
    %372 = math.exp %371 : vector<17x17xf32>
    %cst_195 = arith.constant dense<0.000000e+00> : vector<17xf32>
    %373 = vector.multi_reduction <add>, %372, %cst_195 [1] : vector<17x17xf32> to vector<17xf32>
    %374 = vector.shape_cast %373 : vector<17xf32> to vector<17x1xf32>
    %375 = tpu.reciprocal %374 : vector<17x1xf32> -> vector<17x1xf32>
    %376 = vector.broadcast %375 : vector<17x1xf32> to vector<17x17xf32>
    %377 = arith.mulf %372, %376 : vector<17x17xf32>
    %cst_196 = arith.constant dense<0.000000e+00> : vector<17x8xf32>
    %378 = tpu.matmul %377, %364, %cst_196 {dimension_numbers = #tpu.dot_dimension_numbers<[1], [0], [0], [1], [0, 0, 1, 1], [], []>} : vector<17x17xf32>, vector<17x8xf32>, vector<17x8xf32> -> vector<17x8xf32>
    %379 = vector.extract_strided_slice %321 {offsets = [0, 0], sizes = [8, 32], strides = [1, 1]} : vector<32x32xf32> to vector<8x32xf32>
    %cst_197 = arith.constant dense<0.000000e+00> : vector<17x32xf32>
    %380 = tpu.matmul %378, %379, %cst_197 {dimension_numbers = #tpu.dot_dimension_numbers<[1], [0], [0], [1], [0, 0, 1, 1], [], []>} : vector<17x8xf32>, vector<8x32xf32>, vector<17x32xf32> -> vector<17x32xf32>
    %381 = vector.extract_strided_slice %361 {offsets = [0, 8], sizes = [17, 8], strides = [1, 1]} : vector<34x96xf32> to vector<17x8xf32>
    %382 = vector.extract_strided_slice %361 {offsets = [0, 40], sizes = [17, 8], strides = [1, 1]} : vector<34x96xf32> to vector<17x8xf32>
    %383 = vector.extract_strided_slice %361 {offsets = [0, 72], sizes = [17, 8], strides = [1, 1]} : vector<34x96xf32> to vector<17x8xf32>
    %cst_198 = arith.constant dense<0.000000e+00> : vector<17x17xf32>
    %384 = tpu.matmul %381, %382, %cst_198 {dimension_numbers = #tpu.dot_dimension_numbers<[1], [1], [0], [0], [0, 0, 1, 0], [], []>} : vector<17x8xf32>, vector<17x8xf32>, vector<17x17xf32> -> vector<17x17xf32>
    %cst_199 = arith.constant 0.353553385 : f32
    %385 = vector.broadcast %cst_199 : f32 to vector<17x17xf32>
    %386 = arith.mulf %384, %385 : vector<17x17xf32>
    %cst_200 = arith.constant dense<0xFF800000> : vector<17xf32>
    %387 = vector.multi_reduction <maximumf>, %386, %cst_200 [1] : vector<17x17xf32> to vector<17xf32>
    %388 = vector.shape_cast %387 : vector<17xf32> to vector<17x1xf32>
    %389 = vector.broadcast %388 : vector<17x1xf32> to vector<17x17xf32>
    %390 = arith.subf %386, %389 : vector<17x17xf32>
    %391 = math.exp %390 : vector<17x17xf32>
    %cst_201 = arith.constant dense<0.000000e+00> : vector<17xf32>
    %392 = vector.multi_reduction <add>, %391, %cst_201 [1] : vector<17x17xf32> to vector<17xf32>
    %393 = vector.shape_cast %392 : vector<17xf32> to vector<17x1xf32>
    %394 = tpu.reciprocal %393 : vector<17x1xf32> -> vector<17x1xf32>
    %395 = vector.broadcast %394 : vector<17x1xf32> to vector<17x17xf32>
    %396 = arith.mulf %391, %395 : vector<17x17xf32>
    %cst_202 = arith.constant dense<0.000000e+00> : vector<17x8xf32>
    %397 = tpu.matmul %396, %383, %cst_202 {dimension_numbers = #tpu.dot_dimension_numbers<[1], [0], [0], [1], [0, 0, 1, 1], [], []>} : vector<17x17xf32>, vector<17x8xf32>, vector<17x8xf32> -> vector<17x8xf32>
    %398 = vector.extract_strided_slice %321 {offsets = [8, 0], sizes = [8, 32], strides = [1, 1]} : vector<32x32xf32> to vector<8x32xf32>
    %cst_203 = arith.constant dense<0.000000e+00> : vector<17x32xf32>
    %399 = tpu.matmul %397, %398, %cst_203 {dimension_numbers = #tpu.dot_dimension_numbers<[1], [0], [0], [1], [0, 0, 1, 1], [], []>} : vector<17x8xf32>, vector<8x32xf32>, vector<17x32xf32> -> vector<17x32xf32>
    %400 = arith.addf %380, %399 : vector<17x32xf32>
    %401 = vector.extract_strided_slice %361 {offsets = [0, 16], sizes = [17, 8], strides = [1, 1]} : vector<34x96xf32> to vector<17x8xf32>
    %402 = vector.extract_strided_slice %361 {offsets = [0, 48], sizes = [17, 8], strides = [1, 1]} : vector<34x96xf32> to vector<17x8xf32>
    %403 = vector.extract_strided_slice %361 {offsets = [0, 80], sizes = [17, 8], strides = [1, 1]} : vector<34x96xf32> to vector<17x8xf32>
    %cst_204 = arith.constant dense<0.000000e+00> : vector<17x17xf32>
    %404 = tpu.matmul %401, %402, %cst_204 {dimension_numbers = #tpu.dot_dimension_numbers<[1], [1], [0], [0], [0, 0, 1, 0], [], []>} : vector<17x8xf32>, vector<17x8xf32>, vector<17x17xf32> -> vector<17x17xf32>
    %cst_205 = arith.constant 0.353553385 : f32
    %405 = vector.broadcast %cst_205 : f32 to vector<17x17xf32>
    %406 = arith.mulf %404, %405 : vector<17x17xf32>
    %cst_206 = arith.constant dense<0xFF800000> : vector<17xf32>
    %407 = vector.multi_reduction <maximumf>, %406, %cst_206 [1] : vector<17x17xf32> to vector<17xf32>
    %408 = vector.shape_cast %407 : vector<17xf32> to vector<17x1xf32>
    %409 = vector.broadcast %408 : vector<17x1xf32> to vector<17x17xf32>
    %410 = arith.subf %406, %409 : vector<17x17xf32>
    %411 = math.exp %410 : vector<17x17xf32>
    %cst_207 = arith.constant dense<0.000000e+00> : vector<17xf32>
    %412 = vector.multi_reduction <add>, %411, %cst_207 [1] : vector<17x17xf32> to vector<17xf32>
    %413 = vector.shape_cast %412 : vector<17xf32> to vector<17x1xf32>
    %414 = tpu.reciprocal %413 : vector<17x1xf32> -> vector<17x1xf32>
    %415 = vector.broadcast %414 : vector<17x1xf32> to vector<17x17xf32>
    %416 = arith.mulf %411, %415 : vector<17x17xf32>
    %cst_208 = arith.constant dense<0.000000e+00> : vector<17x8xf32>
    %417 = tpu.matmul %416, %403, %cst_208 {dimension_numbers = #tpu.dot_dimension_numbers<[1], [0], [0], [1], [0, 0, 1, 1], [], []>} : vector<17x17xf32>, vector<17x8xf32>, vector<17x8xf32> -> vector<17x8xf32>
    %418 = vector.extract_strided_slice %321 {offsets = [16, 0], sizes = [8, 32], strides = [1, 1]} : vector<32x32xf32> to vector<8x32xf32>
    %cst_209 = arith.constant dense<0.000000e+00> : vector<17x32xf32>
    %419 = tpu.matmul %417, %418, %cst_209 {dimension_numbers = #tpu.dot_dimension_numbers<[1], [0], [0], [1], [0, 0, 1, 1], [], []>} : vector<17x8xf32>, vector<8x32xf32>, vector<17x32xf32> -> vector<17x32xf32>
    %420 = arith.addf %400, %419 : vector<17x32xf32>
    %421 = vector.extract_strided_slice %361 {offsets = [0, 24], sizes = [17, 8], strides = [1, 1]} : vector<34x96xf32> to vector<17x8xf32>
    %422 = vector.extract_strided_slice %361 {offsets = [0, 56], sizes = [17, 8], strides = [1, 1]} : vector<34x96xf32> to vector<17x8xf32>
    %423 = vector.extract_strided_slice %361 {offsets = [0, 88], sizes = [17, 8], strides = [1, 1]} : vector<34x96xf32> to vector<17x8xf32>
    %cst_210 = arith.constant dense<0.000000e+00> : vector<17x17xf32>
    %424 = tpu.matmul %421, %422, %cst_210 {dimension_numbers = #tpu.dot_dimension_numbers<[1], [1], [0], [0], [0, 0, 1, 0], [], []>} : vector<17x8xf32>, vector<17x8xf32>, vector<17x17xf32> -> vector<17x17xf32>
    %cst_211 = arith.constant 0.353553385 : f32
    %425 = vector.broadcast %cst_211 : f32 to vector<17x17xf32>
    %426 = arith.mulf %424, %425 : vector<17x17xf32>
    %cst_212 = arith.constant dense<0xFF800000> : vector<17xf32>
    %427 = vector.multi_reduction <maximumf>, %426, %cst_212 [1] : vector<17x17xf32> to vector<17xf32>
    %428 = vector.shape_cast %427 : vector<17xf32> to vector<17x1xf32>
    %429 = vector.broadcast %428 : vector<17x1xf32> to vector<17x17xf32>
    %430 = arith.subf %426, %429 : vector<17x17xf32>
    %431 = math.exp %430 : vector<17x17xf32>
    %cst_213 = arith.constant dense<0.000000e+00> : vector<17xf32>
    %432 = vector.multi_reduction <add>, %431, %cst_213 [1] : vector<17x17xf32> to vector<17xf32>
    %433 = vector.shape_cast %432 : vector<17xf32> to vector<17x1xf32>
    %434 = tpu.reciprocal %433 : vector<17x1xf32> -> vector<17x1xf32>
    %435 = vector.broadcast %434 : vector<17x1xf32> to vector<17x17xf32>
    %436 = arith.mulf %431, %435 : vector<17x17xf32>
    %cst_214 = arith.constant dense<0.000000e+00> : vector<17x8xf32>
    %437 = tpu.matmul %436, %423, %cst_214 {dimension_numbers = #tpu.dot_dimension_numbers<[1], [0], [0], [1], [0, 0, 1, 1], [], []>} : vector<17x17xf32>, vector<17x8xf32>, vector<17x8xf32> -> vector<17x8xf32>
    %438 = vector.extract_strided_slice %321 {offsets = [24, 0], sizes = [8, 32], strides = [1, 1]} : vector<32x32xf32> to vector<8x32xf32>
    %cst_215 = arith.constant dense<0.000000e+00> : vector<17x32xf32>
    %439 = tpu.matmul %437, %438, %cst_215 {dimension_numbers = #tpu.dot_dimension_numbers<[1], [0], [0], [1], [0, 0, 1, 1], [], []>} : vector<17x8xf32>, vector<8x32xf32>, vector<17x32xf32> -> vector<17x32xf32>
    %440 = arith.addf %420, %439 : vector<17x32xf32>
    %c0_216 = arith.constant 0 : index
    %c0_217 = arith.constant 0 : index
    %441 = vector.load %arg23[%c0_216, %c0_217] : memref<34x32xf32, #tpu.memory_space<vmem>>, vector<17x32xf32>
    %442 = arith.addf %441, %440 : vector<17x32xf32>
    %443 = vector.broadcast %323 : vector<1x32xf32> to vector<17x32xf32>
    %444 = arith.addf %442, %443 : vector<17x32xf32>
    %c0_218 = arith.constant 0 : index
    %c0_219 = arith.constant 0 : index
    %445 = vector.load %arg23[%c0_218, %c0_219] : memref<34x32xf32, #tpu.memory_space<vmem>>, vector<17x32xf32>
    tpu.vector_store %arg23[%c0_218, %c0_219], %444 {strides = array<i32>} : memref<34x32xf32, #tpu.memory_space<vmem>>, vector<17x32xf32>,
    %446 = vector.extract_strided_slice %361 {offsets = [17, 0], sizes = [17, 8], strides = [1, 1]} : vector<34x96xf32> to vector<17x8xf32>
    %447 = vector.extract_strided_slice %361 {offsets = [17, 32], sizes = [17, 8], strides = [1, 1]} : vector<34x96xf32> to vector<17x8xf32>
    %448 = vector.extract_strided_slice %361 {offsets = [17, 64], sizes = [17, 8], strides = [1, 1]} : vector<34x96xf32> to vector<17x8xf32>
    %cst_220 = arith.constant dense<0.000000e+00> : vector<17x17xf32>
    %449 = tpu.matmul %446, %447, %cst_220 {dimension_numbers = #tpu.dot_dimension_numbers<[1], [1], [0], [0], [0, 0, 1, 0], [], []>} : vector<17x8xf32>, vector<17x8xf32>, vector<17x17xf32> -> vector<17x17xf32>
    %cst_221 = arith.constant 0.353553385 : f32
    %450 = vector.broadcast %cst_221 : f32 to vector<17x17xf32>
    %451 = arith.mulf %449, %450 : vector<17x17xf32>
    %cst_222 = arith.constant dense<0xFF800000> : vector<17xf32>
    %452 = vector.multi_reduction <maximumf>, %451, %cst_222 [1] : vector<17x17xf32> to vector<17xf32>
    %453 = vector.shape_cast %452 : vector<17xf32> to vector<17x1xf32>
    %454 = vector.broadcast %453 : vector<17x1xf32> to vector<17x17xf32>
    %455 = arith.subf %451, %454 : vector<17x17xf32>
    %456 = math.exp %455 : vector<17x17xf32>
    %cst_223 = arith.constant dense<0.000000e+00> : vector<17xf32>
    %457 = vector.multi_reduction <add>, %456, %cst_223 [1] : vector<17x17xf32> to vector<17xf32>
    %458 = vector.shape_cast %457 : vector<17xf32> to vector<17x1xf32>
    %459 = tpu.reciprocal %458 : vector<17x1xf32> -> vector<17x1xf32>
    %460 = vector.broadcast %459 : vector<17x1xf32> to vector<17x17xf32>
    %461 = arith.mulf %456, %460 : vector<17x17xf32>
    %cst_224 = arith.constant dense<0.000000e+00> : vector<17x8xf32>
    %462 = tpu.matmul %461, %448, %cst_224 {dimension_numbers = #tpu.dot_dimension_numbers<[1], [0], [0], [1], [0, 0, 1, 1], [], []>} : vector<17x17xf32>, vector<17x8xf32>, vector<17x8xf32> -> vector<17x8xf32>
    %463 = vector.extract_strided_slice %321 {offsets = [0, 0], sizes = [8, 32], strides = [1, 1]} : vector<32x32xf32> to vector<8x32xf32>
    %cst_225 = arith.constant dense<0.000000e+00> : vector<17x32xf32>
    %464 = tpu.matmul %462, %463, %cst_225 {dimension_numbers = #tpu.dot_dimension_numbers<[1], [0], [0], [1], [0, 0, 1, 1], [], []>} : vector<17x8xf32>, vector<8x32xf32>, vector<17x32xf32> -> vector<17x32xf32>
    %465 = vector.extract_strided_slice %361 {offsets = [17, 8], sizes = [17, 8], strides = [1, 1]} : vector<34x96xf32> to vector<17x8xf32>
    %466 = vector.extract_strided_slice %361 {offsets = [17, 40], sizes = [17, 8], strides = [1, 1]} : vector<34x96xf32> to vector<17x8xf32>
    %467 = vector.extract_strided_slice %361 {offsets = [17, 72], sizes = [17, 8], strides = [1, 1]} : vector<34x96xf32> to vector<17x8xf32>
    %cst_226 = arith.constant dense<0.000000e+00> : vector<17x17xf32>
    %468 = tpu.matmul %465, %466, %cst_226 {dimension_numbers = #tpu.dot_dimension_numbers<[1], [1], [0], [0], [0, 0, 1, 0], [], []>} : vector<17x8xf32>, vector<17x8xf32>, vector<17x17xf32> -> vector<17x17xf32>
    %cst_227 = arith.constant 0.353553385 : f32
    %469 = vector.broadcast %cst_227 : f32 to vector<17x17xf32>
    %470 = arith.mulf %468, %469 : vector<17x17xf32>
    %cst_228 = arith.constant dense<0xFF800000> : vector<17xf32>
    %471 = vector.multi_reduction <maximumf>, %470, %cst_228 [1] : vector<17x17xf32> to vector<17xf32>
    %472 = vector.shape_cast %471 : vector<17xf32> to vector<17x1xf32>
    %473 = vector.broadcast %472 : vector<17x1xf32> to vector<17x17xf32>
    %474 = arith.subf %470, %473 : vector<17x17xf32>
    %475 = math.exp %474 : vector<17x17xf32>
    %cst_229 = arith.constant dense<0.000000e+00> : vector<17xf32>
    %476 = vector.multi_reduction <add>, %475, %cst_229 [1] : vector<17x17xf32> to vector<17xf32>
    %477 = vector.shape_cast %476 : vector<17xf32> to vector<17x1xf32>
    %478 = tpu.reciprocal %477 : vector<17x1xf32> -> vector<17x1xf32>
    %479 = vector.broadcast %478 : vector<17x1xf32> to vector<17x17xf32>
    %480 = arith.mulf %475, %479 : vector<17x17xf32>
    %cst_230 = arith.constant dense<0.000000e+00> : vector<17x8xf32>
    %481 = tpu.matmul %480, %467, %cst_230 {dimension_numbers = #tpu.dot_dimension_numbers<[1], [0], [0], [1], [0, 0, 1, 1], [], []>} : vector<17x17xf32>, vector<17x8xf32>, vector<17x8xf32> -> vector<17x8xf32>
    %482 = vector.extract_strided_slice %321 {offsets = [8, 0], sizes = [8, 32], strides = [1, 1]} : vector<32x32xf32> to vector<8x32xf32>
    %cst_231 = arith.constant dense<0.000000e+00> : vector<17x32xf32>
    %483 = tpu.matmul %481, %482, %cst_231 {dimension_numbers = #tpu.dot_dimension_numbers<[1], [0], [0], [1], [0, 0, 1, 1], [], []>} : vector<17x8xf32>, vector<8x32xf32>, vector<17x32xf32> -> vector<17x32xf32>
    %484 = arith.addf %464, %483 : vector<17x32xf32>
    %485 = vector.extract_strided_slice %361 {offsets = [17, 16], sizes = [17, 8], strides = [1, 1]} : vector<34x96xf32> to vector<17x8xf32>
    %486 = vector.extract_strided_slice %361 {offsets = [17, 48], sizes = [17, 8], strides = [1, 1]} : vector<34x96xf32> to vector<17x8xf32>
    %487 = vector.extract_strided_slice %361 {offsets = [17, 80], sizes = [17, 8], strides = [1, 1]} : vector<34x96xf32> to vector<17x8xf32>
    %cst_232 = arith.constant dense<0.000000e+00> : vector<17x17xf32>
    %488 = tpu.matmul %485, %486, %cst_232 {dimension_numbers = #tpu.dot_dimension_numbers<[1], [1], [0], [0], [0, 0, 1, 0], [], []>} : vector<17x8xf32>, vector<17x8xf32>, vector<17x17xf32> -> vector<17x17xf32>
    %cst_233 = arith.constant 0.353553385 : f32
    %489 = vector.broadcast %cst_233 : f32 to vector<17x17xf32>
    %490 = arith.mulf %488, %489 : vector<17x17xf32>
    %cst_234 = arith.constant dense<0xFF800000> : vector<17xf32>
    %491 = vector.multi_reduction <maximumf>, %490, %cst_234 [1] : vector<17x17xf32> to vector<17xf32>
    %492 = vector.shape_cast %491 : vector<17xf32> to vector<17x1xf32>
    %493 = vector.broadcast %492 : vector<17x1xf32> to vector<17x17xf32>
    %494 = arith.subf %490, %493 : vector<17x17xf32>
    %495 = math.exp %494 : vector<17x17xf32>
    %cst_235 = arith.constant dense<0.000000e+00> : vector<17xf32>
    %496 = vector.multi_reduction <add>, %495, %cst_235 [1] : vector<17x17xf32> to vector<17xf32>
    %497 = vector.shape_cast %496 : vector<17xf32> to vector<17x1xf32>
    %498 = tpu.reciprocal %497 : vector<17x1xf32> -> vector<17x1xf32>
    %499 = vector.broadcast %498 : vector<17x1xf32> to vector<17x17xf32>
    %500 = arith.mulf %495, %499 : vector<17x17xf32>
    %cst_236 = arith.constant dense<0.000000e+00> : vector<17x8xf32>
    %501 = tpu.matmul %500, %487, %cst_236 {dimension_numbers = #tpu.dot_dimension_numbers<[1], [0], [0], [1], [0, 0, 1, 1], [], []>} : vector<17x17xf32>, vector<17x8xf32>, vector<17x8xf32> -> vector<17x8xf32>
    %502 = vector.extract_strided_slice %321 {offsets = [16, 0], sizes = [8, 32], strides = [1, 1]} : vector<32x32xf32> to vector<8x32xf32>
    %cst_237 = arith.constant dense<0.000000e+00> : vector<17x32xf32>
    %503 = tpu.matmul %501, %502, %cst_237 {dimension_numbers = #tpu.dot_dimension_numbers<[1], [0], [0], [1], [0, 0, 1, 1], [], []>} : vector<17x8xf32>, vector<8x32xf32>, vector<17x32xf32> -> vector<17x32xf32>
    %504 = arith.addf %484, %503 : vector<17x32xf32>
    %505 = vector.extract_strided_slice %361 {offsets = [17, 24], sizes = [17, 8], strides = [1, 1]} : vector<34x96xf32> to vector<17x8xf32>
    %506 = vector.extract_strided_slice %361 {offsets = [17, 56], sizes = [17, 8], strides = [1, 1]} : vector<34x96xf32> to vector<17x8xf32>
    %507 = vector.extract_strided_slice %361 {offsets = [17, 88], sizes = [17, 8], strides = [1, 1]} : vector<34x96xf32> to vector<17x8xf32>
    %cst_238 = arith.constant dense<0.000000e+00> : vector<17x17xf32>
    %508 = tpu.matmul %505, %506, %cst_238 {dimension_numbers = #tpu.dot_dimension_numbers<[1], [1], [0], [0], [0, 0, 1, 0], [], []>} : vector<17x8xf32>, vector<17x8xf32>, vector<17x17xf32> -> vector<17x17xf32>
    %cst_239 = arith.constant 0.353553385 : f32
    %509 = vector.broadcast %cst_239 : f32 to vector<17x17xf32>
    %510 = arith.mulf %508, %509 : vector<17x17xf32>
    %cst_240 = arith.constant dense<0xFF800000> : vector<17xf32>
    %511 = vector.multi_reduction <maximumf>, %510, %cst_240 [1] : vector<17x17xf32> to vector<17xf32>
    %512 = vector.shape_cast %511 : vector<17xf32> to vector<17x1xf32>
    %513 = vector.broadcast %512 : vector<17x1xf32> to vector<17x17xf32>
    %514 = arith.subf %510, %513 : vector<17x17xf32>
    %515 = math.exp %514 : vector<17x17xf32>
    %cst_241 = arith.constant dense<0.000000e+00> : vector<17xf32>
    %516 = vector.multi_reduction <add>, %515, %cst_241 [1] : vector<17x17xf32> to vector<17xf32>
    %517 = vector.shape_cast %516 : vector<17xf32> to vector<17x1xf32>
    %518 = tpu.reciprocal %517 : vector<17x1xf32> -> vector<17x1xf32>
    %519 = vector.broadcast %518 : vector<17x1xf32> to vector<17x17xf32>
    %520 = arith.mulf %515, %519 : vector<17x17xf32>
    %cst_242 = arith.constant dense<0.000000e+00> : vector<17x8xf32>
    %521 = tpu.matmul %520, %507, %cst_242 {dimension_numbers = #tpu.dot_dimension_numbers<[1], [0], [0], [1], [0, 0, 1, 1], [], []>} : vector<17x17xf32>, vector<17x8xf32>, vector<17x8xf32> -> vector<17x8xf32>
    %522 = vector.extract_strided_slice %321 {offsets = [24, 0], sizes = [8, 32], strides = [1, 1]} : vector<32x32xf32> to vector<8x32xf32>
    %cst_243 = arith.constant dense<0.000000e+00> : vector<17x32xf32>
    %523 = tpu.matmul %521, %522, %cst_243 {dimension_numbers = #tpu.dot_dimension_numbers<[1], [0], [0], [1], [0, 0, 1, 1], [], []>} : vector<17x8xf32>, vector<8x32xf32>, vector<17x32xf32> -> vector<17x32xf32>
    %524 = arith.addf %504, %523 : vector<17x32xf32>
    %c17_244 = arith.constant 17 : index
    %c0_245 = arith.constant 0 : index
    %525 = vector.load %arg23[%c17_244, %c0_245] : memref<34x32xf32, #tpu.memory_space<vmem>>, vector<17x32xf32>
    %526 = arith.addf %525, %524 : vector<17x32xf32>
    %527 = vector.broadcast %323 : vector<1x32xf32> to vector<17x32xf32>
    %528 = arith.addf %526, %527 : vector<17x32xf32>
    %c17_246 = arith.constant 17 : index
    %c0_247 = arith.constant 0 : index
    %529 = vector.load %arg23[%c17_246, %c0_247] : memref<34x32xf32, #tpu.memory_space<vmem>>, vector<17x32xf32>
    tpu.vector_store %arg23[%c17_246, %c0_247], %528 {strides = array<i32>} : memref<34x32xf32, #tpu.memory_space<vmem>>, vector<17x32xf32>,
    %c0_248 = arith.constant 0 : index
    %c0_249 = arith.constant 0 : index
    %530 = vector.load %arg23[%c0_248, %c0_249] : memref<34x32xf32, #tpu.memory_space<vmem>>, vector<34x32xf32>
    %cst_250 = arith.constant dense<0.000000e+00> : vector<34xf32>
    %531 = vector.multi_reduction <add>, %530, %cst_250 [1] : vector<34x32xf32> to vector<34xf32>
    %532 = vector.shape_cast %531 : vector<34xf32> to vector<34x1xf32>
    %cst_251 = arith.constant 3.200000e+01 : f32
    %533 = vector.broadcast %cst_251 : f32 to vector<34x1xf32>
    %534 = arith.divf %532, %533 : vector<34x1xf32>
    %535 = vector.broadcast %534 : vector<34x1xf32> to vector<34x32xf32>
    %536 = arith.subf %530, %535 : vector<34x32xf32>
    %537 = arith.mulf %536, %536 : vector<34x32xf32>
    %cst_252 = arith.constant dense<0.000000e+00> : vector<34xf32>
    %538 = vector.multi_reduction <add>, %537, %cst_252 [1] : vector<34x32xf32> to vector<34xf32>
    %539 = vector.shape_cast %538 : vector<34xf32> to vector<34x1xf32>
    %cst_253 = arith.constant 3.200000e+01 : f32
    %540 = vector.broadcast %cst_253 : f32 to vector<34x1xf32>
    %541 = arith.divf %539, %540 : vector<34x1xf32>
    %542 = vector.broadcast %534 : vector<34x1xf32> to vector<34x32xf32>
    %543 = arith.subf %530, %542 : vector<34x32xf32>
    %cst_254 = arith.constant 9.99999974E-6 : f32
    %544 = vector.broadcast %cst_254 : f32 to vector<34x1xf32>
    %545 = arith.addf %541, %544 : vector<34x1xf32>
    %546 = math.rsqrt %545 : vector<34x1xf32>
    %547 = vector.broadcast %546 : vector<34x1xf32> to vector<34x32xf32>
    %548 = arith.mulf %543, %547 : vector<34x32xf32>
    %549 = vector.broadcast %325 : vector<1x32xf32> to vector<34x32xf32>
    %550 = arith.mulf %548, %549 : vector<34x32xf32>
    %551 = vector.broadcast %327 : vector<1x32xf32> to vector<34x32xf32>
    %552 = arith.addf %550, %551 : vector<34x32xf32>
    %cst_255 = arith.constant dense<0.000000e+00> : vector<34x64xf32>
    %553 = tpu.matmul %552, %329, %cst_255 {dimension_numbers = #tpu.dot_dimension_numbers<[1], [0], [0], [1], [0, 0, 1, 1], [], []>} : vector<34x32xf32>, vector<32x64xf32>, vector<34x64xf32> -> vector<34x64xf32>
    %554 = vector.broadcast %331 : vector<1x64xf32> to vector<34x64xf32>
    %555 = arith.addf %553, %554 : vector<34x64xf32>
    %cst_256 = arith.constant 5.000000e-01 : f32
    %556 = vector.broadcast %cst_256 : f32 to vector<34x64xf32>
    %557 = arith.mulf %556, %555 : vector<34x64xf32>
    %cst_257 = arith.constant 0.707106769 : f32
    %558 = vector.broadcast %cst_257 : f32 to vector<34x64xf32>
    %559 = arith.mulf %555, %558 : vector<34x64xf32>
    %cst_258 = arith.constant 0.000000e+00 : f32
    %560 = vector.broadcast %cst_258 : f32 to vector<34x64xf32>
    %561 = arith.cmpf oge, %559, %560 : vector<34x64xf32>
    %cst_259 = arith.constant 1.000000e+00 : f32
    %cst_260 = arith.constant -1.000000e+00 : f32
    %562 = vector.broadcast %cst_259 : f32 to vector<34x64xf32>
    %563 = vector.broadcast %cst_260 : f32 to vector<34x64xf32>
    %564 = arith.select %561, %562, %563 : vector<34x64xi1>, vector<34x64xf32>
    %565 = math.absf %559 : vector<34x64xf32>
    %cst_261 = arith.constant 0.327591091 : f32
    %566 = vector.broadcast %cst_261 : f32 to vector<34x64xf32>
    %567 = arith.mulf %566, %565 : vector<34x64xf32>
    %cst_262 = arith.constant 1.000000e+00 : f32
    %568 = vector.broadcast %cst_262 : f32 to vector<34x64xf32>
    %569 = arith.addf %568, %567 : vector<34x64xf32>
    %cst_263 = arith.constant 1.000000e+00 : f32
    %570 = vector.broadcast %cst_263 : f32 to vector<34x64xf32>
    %571 = arith.divf %570, %569 : vector<34x64xf32>
    %cst_264 = arith.constant 1.06140542 : f32
    %572 = vector.broadcast %cst_264 : f32 to vector<34x64xf32>
    %573 = arith.mulf %572, %571 : vector<34x64xf32>
    %cst_265 = arith.constant -1.45315206 : f32
    %574 = vector.broadcast %cst_265 : f32 to vector<34x64xf32>
    %575 = arith.addf %573, %574 : vector<34x64xf32>
    %576 = arith.mulf %575, %571 : vector<34x64xf32>
    %cst_266 = arith.constant 1.42141378 : f32
    %577 = vector.broadcast %cst_266 : f32 to vector<34x64xf32>
    %578 = arith.addf %576, %577 : vector<34x64xf32>
    %579 = arith.mulf %578, %571 : vector<34x64xf32>
    %cst_267 = arith.constant -0.284496725 : f32
    %580 = vector.broadcast %cst_267 : f32 to vector<34x64xf32>
    %581 = arith.addf %579, %580 : vector<34x64xf32>
    %582 = arith.mulf %581, %571 : vector<34x64xf32>
    %cst_268 = arith.constant 0.254829586 : f32
    %583 = vector.broadcast %cst_268 : f32 to vector<34x64xf32>
    %584 = arith.addf %582, %583 : vector<34x64xf32>
    %585 = arith.mulf %584, %571 : vector<34x64xf32>
    %cst_269 = arith.constant 0.000000e+00 : f32
    %586 = vector.broadcast %cst_269 : f32 to vector<34x64xf32>
    %587 = arith.subf %586, %565 : vector<34x64xf32>
    %588 = arith.mulf %587, %565 : vector<34x64xf32>
    %589 = math.exp %588 : vector<34x64xf32>
    %590 = arith.mulf %585, %589 : vector<34x64xf32>
    %cst_270 = arith.constant 1.000000e+00 : f32
    %591 = vector.broadcast %cst_270 : f32 to vector<34x64xf32>
    %592 = arith.subf %591, %590 : vector<34x64xf32>
    %593 = arith.mulf %564, %592 : vector<34x64xf32>
    %cst_271 = arith.constant 1.000000e+00 : f32
    %594 = vector.broadcast %cst_271 : f32 to vector<34x64xf32>
    %595 = arith.addf %594, %593 : vector<34x64xf32>
    %596 = arith.mulf %557, %595 : vector<34x64xf32>
    %cst_272 = arith.constant dense<0.000000e+00> : vector<34x32xf32>
    %597 = tpu.matmul %596, %333, %cst_272 {dimension_numbers = #tpu.dot_dimension_numbers<[1], [0], [0], [1], [0, 0, 1, 1], [], []>} : vector<34x64xf32>, vector<64x32xf32>, vector<34x32xf32> -> vector<34x32xf32>
    %598 = arith.addf %530, %597 : vector<34x32xf32>
    %599 = vector.broadcast %335 : vector<1x32xf32> to vector<34x32xf32>
    %600 = arith.addf %598, %599 : vector<34x32xf32>
    %c0_273 = arith.constant 0 : index
    %c0_274 = arith.constant 0 : index
    %601 = vector.load %arg23[%c0_273, %c0_274] : memref<34x32xf32, #tpu.memory_space<vmem>>, vector<34x32xf32>
    tpu.vector_store %arg23[%c0_273, %c0_274], %600 {strides = array<i32>} : memref<34x32xf32, #tpu.memory_space<vmem>>, vector<34x32xf32>,
    %c0_275 = arith.constant 0 : index
    %c0_276 = arith.constant 0 : index
    %602 = vector.load %arg23[%c0_275, %c0_276] : memref<34x32xf32, #tpu.memory_space<vmem>>, vector<1x32xf32>
    %c17_277 = arith.constant 17 : index
    %c0_278 = arith.constant 0 : index
    %603 = vector.load %arg23[%c17_277, %c0_278] : memref<34x32xf32, #tpu.memory_space<vmem>>, vector<1x32xf32>
    %604 = tpu.concatenate %602, %603 in 0 : vector<1x32xf32>, vector<1x32xf32> -> vector<2x32xf32>
    %c0_279 = arith.constant 0 : index
    %c0_280 = arith.constant 0 : index
    %605 = vector.load %arg18[%c0_279, %c0_280] : memref<1x32xf32, #tpu.memory_space<vmem>>, vector<1x32xf32>
    %c0_281 = arith.constant 0 : index
    %c0_282 = arith.constant 0 : index
    %606 = vector.load %arg19[%c0_281, %c0_282] : memref<1x32xf32, #tpu.memory_space<vmem>>, vector<1x32xf32>
    %cst_283 = arith.constant dense<0.000000e+00> : vector<2xf32>
    %607 = vector.multi_reduction <add>, %604, %cst_283 [1] : vector<2x32xf32> to vector<2xf32>
    %608 = vector.shape_cast %607 : vector<2xf32> to vector<2x1xf32>
    %cst_284 = arith.constant 3.200000e+01 : f32
    %609 = vector.broadcast %cst_284 : f32 to vector<2x1xf32>
    %610 = arith.divf %608, %609 : vector<2x1xf32>
    %611 = vector.broadcast %610 : vector<2x1xf32> to vector<2x32xf32>
    %612 = arith.subf %604, %611 : vector<2x32xf32>
    %613 = arith.mulf %612, %612 : vector<2x32xf32>
    %cst_285 = arith.constant dense<0.000000e+00> : vector<2xf32>
    %614 = vector.multi_reduction <add>, %613, %cst_285 [1] : vector<2x32xf32> to vector<2xf32>
    %615 = vector.shape_cast %614 : vector<2xf32> to vector<2x1xf32>
    %cst_286 = arith.constant 3.200000e+01 : f32
    %616 = vector.broadcast %cst_286 : f32 to vector<2x1xf32>
    %617 = arith.divf %615, %616 : vector<2x1xf32>
    %618 = vector.broadcast %610 : vector<2x1xf32> to vector<2x32xf32>
    %619 = arith.subf %604, %618 : vector<2x32xf32>
    %cst_287 = arith.constant 9.99999974E-6 : f32
    %620 = vector.broadcast %cst_287 : f32 to vector<2x1xf32>
    %621 = arith.addf %617, %620 : vector<2x1xf32>
    %622 = math.rsqrt %621 : vector<2x1xf32>
    %623 = vector.broadcast %622 : vector<2x1xf32> to vector<2x32xf32>
    %624 = arith.mulf %619, %623 : vector<2x32xf32>
    %625 = vector.broadcast %605 : vector<1x32xf32> to vector<2x32xf32>
    %626 = arith.mulf %624, %625 : vector<2x32xf32>
    %627 = vector.broadcast %606 : vector<1x32xf32> to vector<2x32xf32>
    %628 = arith.addf %626, %627 : vector<2x32xf32>
    %c0_288 = arith.constant 0 : index
    %c0_289 = arith.constant 0 : index
    %629 = vector.load %arg20[%c0_288, %c0_289] : memref<32x128xf32, #tpu.memory_space<vmem>>, vector<32x128xf32>
    %cst_290 = arith.constant dense<0.000000e+00> : vector<2x128xf32>
    %630 = tpu.matmul %628, %629, %cst_290 {dimension_numbers = #tpu.dot_dimension_numbers<[1], [0], [0], [1], [0, 0, 1, 1], [], []>} : vector<2x32xf32>, vector<32x128xf32>, vector<2x128xf32> -> vector<2x128xf32>
    %c0_291 = arith.constant 0 : index
    %c0_292 = arith.constant 0 : index
    %631 = vector.load %arg21[%c0_291, %c0_292] : memref<1x128xf32, #tpu.memory_space<vmem>>, vector<1x128xf32>
    %632 = vector.broadcast %631 : vector<1x128xf32> to vector<2x128xf32>
    %633 = arith.addf %630, %632 : vector<2x128xf32>
    %c0_293 = arith.constant 0 : index
    %c0_294 = arith.constant 0 : index
    %c0_295 = arith.constant 0 : index
    %634 = vector.load %arg22[%c0_293, %c0_294, %c0_295] : memref<1x2x128xf32, #tpu.memory_space<vmem>>, vector<1x2x128xf32>
    %635 = vector.shape_cast %634 : vector<1x2x128xf32> to vector<2x128xf32>
    %636 = vector.shape_cast %633 : vector<2x128xf32> to vector<1x2x128xf32>
    tpu.vector_store %arg22[%c0_293, %c0_294, %c0_295], %636 {strides = array<i32>} : memref<1x2x128xf32, #tpu.memory_space<vmem>>, vector<1x2x128xf32>,
    return
  }
  func.func @transform_0(%arg0: i32) -> (i32, i32, i32) {
    %c0_i32 = arith.constant 0 : i32
    %c0_i32_0 = arith.constant 0 : i32
    %c0_i32_1 = arith.constant 0 : i32
    return %arg0, %c0_i32, %c0_i32_0 : i32, i32, i32
  }
  func.func @transform_1(%arg0: i32) -> (i32, i32) {
    %c0_i32 = arith.constant 0 : i32
    %c0_i32_0 = arith.constant 0 : i32
    %c0_i32_1 = arith.constant 0 : i32
    return %c0_i32, %c0_i32_0 : i32, i32
  }
  func.func @transform_2(%arg0: i32) -> (i32, i32) {
    %c0_i32 = arith.constant 0 : i32
    %c0_i32_0 = arith.constant 0 : i32
    %c0_i32_1 = arith.constant 0 : i32
    return %c0_i32, %c0_i32_0 : i32, i32
  }
  func.func @transform_3(%arg0: i32) -> (i32, i32) {
    %c0_i32 = arith.constant 0 : i32
    %c0_i32_0 = arith.constant 0 : i32
    %c0_i32_1 = arith.constant 0 : i32
    return %c0_i32, %c0_i32_0 : i32, i32
  }
  func.func @transform_4(%arg0: i32) -> (i32, i32) {
    %c0_i32 = arith.constant 0 : i32
    %c0_i32_0 = arith.constant 0 : i32
    %c0_i32_1 = arith.constant 0 : i32
    return %c0_i32, %c0_i32_0 : i32, i32
  }
  func.func @transform_5(%arg0: i32) -> (i32, i32, i32) {
    %c0_i32 = arith.constant 0 : i32
    %c0_i32_0 = arith.constant 0 : i32
    %c0_i32_1 = arith.constant 0 : i32
    %c0_i32_2 = arith.constant 0 : i32
    return %c0_i32, %c0_i32_0, %c0_i32_1 : i32, i32, i32
  }
  func.func @transform_6(%arg0: i32) -> (i32, i32, i32) {
    %c0_i32 = arith.constant 0 : i32
    %c0_i32_0 = arith.constant 0 : i32
    %c0_i32_1 = arith.constant 0 : i32
    %c0_i32_2 = arith.constant 0 : i32
    return %c0_i32, %c0_i32_0, %c0_i32_1 : i32, i32, i32
  }
  func.func @transform_7(%arg0: i32) -> (i32, i32, i32) {
    %c0_i32 = arith.constant 0 : i32
    %c0_i32_0 = arith.constant 0 : i32
    %c0_i32_1 = arith.constant 0 : i32
    %c0_i32_2 = arith.constant 0 : i32
    return %c0_i32, %c0_i32_0, %c0_i32_1 : i32, i32, i32
  }
  func.func @transform_8(%arg0: i32) -> (i32, i32, i32) {
    %c0_i32 = arith.constant 0 : i32
    %c0_i32_0 = arith.constant 0 : i32
    %c0_i32_1 = arith.constant 0 : i32
    %c0_i32_2 = arith.constant 0 : i32
    return %c0_i32, %c0_i32_0, %c0_i32_1 : i32, i32, i32
  }
  func.func @transform_9(%arg0: i32) -> (i32, i32, i32) {
    %c0_i32 = arith.constant 0 : i32
    %c0_i32_0 = arith.constant 0 : i32
    %c0_i32_1 = arith.constant 0 : i32
    %c0_i32_2 = arith.constant 0 : i32
    return %c0_i32, %c0_i32_0, %c0_i32_1 : i32, i32, i32
  }
  func.func @transform_10(%arg0: i32) -> (i32, i32, i32) {
    %c0_i32 = arith.constant 0 : i32
    %c0_i32_0 = arith.constant 0 : i32
    %c0_i32_1 = arith.constant 0 : i32
    %c0_i32_2 = arith.constant 0 : i32
    return %c0_i32, %c0_i32_0, %c0_i32_1 : i32, i32, i32
  }
  func.func @transform_11(%arg0: i32) -> (i32, i32, i32) {
    %c0_i32 = arith.constant 0 : i32
    %c0_i32_0 = arith.constant 0 : i32
    %c0_i32_1 = arith.constant 0 : i32
    %c0_i32_2 = arith.constant 0 : i32
    return %c0_i32, %c0_i32_0, %c0_i32_1 : i32, i32, i32
  }
  func.func @transform_12(%arg0: i32) -> (i32, i32, i32) {
    %c0_i32 = arith.constant 0 : i32
    %c0_i32_0 = arith.constant 0 : i32
    %c0_i32_1 = arith.constant 0 : i32
    %c0_i32_2 = arith.constant 0 : i32
    return %c0_i32, %c0_i32_0, %c0_i32_1 : i32, i32, i32
  }
  func.func @transform_13(%arg0: i32) -> (i32, i32, i32) {
    %c0_i32 = arith.constant 0 : i32
    %c0_i32_0 = arith.constant 0 : i32
    %c0_i32_1 = arith.constant 0 : i32
    %c0_i32_2 = arith.constant 0 : i32
    return %c0_i32, %c0_i32_0, %c0_i32_1 : i32, i32, i32
  }
  func.func @transform_14(%arg0: i32) -> (i32, i32, i32) {
    %c0_i32 = arith.constant 0 : i32
    %c0_i32_0 = arith.constant 0 : i32
    %c0_i32_1 = arith.constant 0 : i32
    %c0_i32_2 = arith.constant 0 : i32
    return %c0_i32, %c0_i32_0, %c0_i32_1 : i32, i32, i32
  }
  func.func @transform_15(%arg0: i32) -> (i32, i32, i32) {
    %c0_i32 = arith.constant 0 : i32
    %c0_i32_0 = arith.constant 0 : i32
    %c0_i32_1 = arith.constant 0 : i32
    %c0_i32_2 = arith.constant 0 : i32
    return %c0_i32, %c0_i32_0, %c0_i32_1 : i32, i32, i32
  }
  func.func @transform_16(%arg0: i32) -> (i32, i32, i32) {
    %c0_i32 = arith.constant 0 : i32
    %c0_i32_0 = arith.constant 0 : i32
    %c0_i32_1 = arith.constant 0 : i32
    %c0_i32_2 = arith.constant 0 : i32
    return %c0_i32, %c0_i32_0, %c0_i32_1 : i32, i32, i32
  }
  func.func @transform_17(%arg0: i32) -> (i32, i32) {
    %c0_i32 = arith.constant 0 : i32
    %c0_i32_0 = arith.constant 0 : i32
    %c0_i32_1 = arith.constant 0 : i32
    return %c0_i32, %c0_i32_0 : i32, i32
  }
  func.func @transform_18(%arg0: i32) -> (i32, i32) {
    %c0_i32 = arith.constant 0 : i32
    %c0_i32_0 = arith.constant 0 : i32
    %c0_i32_1 = arith.constant 0 : i32
    return %c0_i32, %c0_i32_0 : i32, i32
  }
  func.func @transform_19(%arg0: i32) -> (i32, i32) {
    %c0_i32 = arith.constant 0 : i32
    %c0_i32_0 = arith.constant 0 : i32
    %c0_i32_1 = arith.constant 0 : i32
    return %c0_i32, %c0_i32_0 : i32, i32
  }
  func.func @transform_20(%arg0: i32) -> (i32, i32) {
    %c0_i32 = arith.constant 0 : i32
    %c0_i32_0 = arith.constant 0 : i32
    %c0_i32_1 = arith.constant 0 : i32
    return %c0_i32, %c0_i32_0 : i32, i32
  }
  func.func @transform_21(%arg0: i32) -> (i32, i32, i32) {
    %c0_i32 = arith.constant 0 : i32
    %c0_i32_0 = arith.constant 0 : i32
    %c0_i32_1 = arith.constant 0 : i32
    return %arg0, %c0_i32, %c0_i32_0 : i32, i32, i32
  }
}

</mosaic_0001>

<bundles_post_ra>
// kernel: tpu_custom_call.1
= control target key start
LH: loop header
LB: loop body
LE: loop exit
PB: predicated region body
PF: predicated region fallthrough
CT: control target
= control target key end

     0   :  { %s12767_s0 = inlined_call_operand.vmem [shape: f32[4,16,48], index: 0, kind: input, shape index: {}]   ;;  %s12768_s1 = inlined_call_operand.vmem [shape: f32[48,32], index: 1, kind: input, shape index: {}]   ;;  %s12769_s2 = inlined_call_operand.vmem [shape: f32[1,32], index: 2, kind: input, shape index: {}]   ;;  %s12770_s3 = inlined_call_operand.hbm [shape: f32[1,32], index: 3, kind: input, shape index: {}]   ;;  %s12771_s4 = inlined_call_operand.hbm [shape: f32[17,32], index: 4, kind: input, shape index: {}]   ;;  %s12772_s5 = inlined_call_operand.hbm [shape: f32[2,1,32], index: 5, kind: input, shape index: {}]   ;;  %s12773_s6 = inlined_call_operand.hbm [shape: f32[2,1,32], index: 6, kind: input, shape index: {}]   ;;  %s12774_s7 = inlined_call_operand.vmem [shape: f32[2,32,96], index: 7, kind: input, shape index: {}]   ;;  %s12775_s8 = inlined_call_operand.hbm [shape: f32[2,1,96], index: 8, kind: input, shape index: {}]   ;;  %s12776_s9 = inlined_call_operand.vmem [shape: f32[2,32,32], index: 9, kind: input, shape index: {}]   ;;  %s12777_s10 = inlined_call_operand.hbm [shape: f32[2,1,32], index: 10, kind: input, shape index: {}]   ;;  %s12778_s11 = inlined_call_operand.hbm [shape: f32[2,1,32], index: 11, kind: input, shape index: {}]   ;;  %s12779_s12 = inlined_call_operand.hbm [shape: f32[2,1,32], index: 12, kind: input, shape index: {}]   ;;  %s12780_s13 = inlined_call_operand.vmem [shape: f32[2,32,64], index: 13, kind: input, shape index: {}]   ;;  %s12781_s14 = inlined_call_operand.vmem [shape: f32[2,1,64], index: 14, kind: input, shape index: {}]   ;;  %s12782_s15 = inlined_call_operand.vmem [shape: f32[2,64,32], index: 15, kind: input, shape index: {}]   ;;  %s12783_s16 = inlined_call_operand.vmem [shape: f32[2,1,32], index: 16, kind: input, shape index: {}]   ;;  %s12784_s17 = inlined_call_operand.vmem [shape: f32[1,32], index: 17, kind: input, shape index: {}]   ;;  %s12785_s18 = inlined_call_operand.vmem [shape: f32[1,32], index: 18, kind: input, shape index: {}]   ;;  %s12786_s19 = inlined_call_operand.hbm [shape: f32[32,128], index: 19, kind: input, shape index: {}]   ;;  %s12787_s20 = inlined_call_operand.vmem [shape: f32[1,128], index: 20, kind: input, shape index: {}]   ;;  %s12788_s21 = inlined_call_operand.hbm [shape: f32[2,2,128], index: 21, kind: output, shape index: {}]  }
   0x1   :  { %12820 = sst [smem:[#allocation33_spill]] %s12767_s0 }
   0x2   :  { %12821 = sst [smem:[#allocation34_spill]] %s12768_s1 }
   0x3   :  { %12822 = sst [smem:[#allocation35_spill]] %s12769_s2 }
   0x4   :  { %12823 = sst [smem:[#allocation36_spill]] %s12770_s3 }
   0x5   :  { %12824 = sst [smem:[#allocation37_spill]] %s12771_s4 }
   0x6   :  { %12825 = sst [smem:[#allocation38_spill]] %s12772_s5 }
   0x7   :  { %12826 = sst [smem:[#allocation39_spill]] %s12773_s6 }
   0x8   :  { %12827 = sst [smem:[#allocation40_spill]] %s12783_s16 }
   0x9   :  { %12828 = sst [smem:[#allocation41_spill]] %s12784_s17 }
   0xa   :  { %12829 = sst [smem:[#allocation42_spill]] %s12785_s18 }
   0xb   :  { %12830 = sst [smem:[#allocation43_spill]] %s12787_s20 }
   0xc   :  { %12831 = sst [smem:[#allocation44_spill]] %s12788_s21 }
   0xd   :  { %26 = vsyncpa [#allocation4], 0 }
   0xe   :  { %27 = vsyncpa [#allocation7], 0 }
   0xf   :  { %28 = vsyncpa [#allocation10], 0 }
  0x10   :  { %29 = vsyncpa [#allocation13], 0 }
  0x11   :  { %30 = vsyncpa [#allocation16], 0 }
  0x12   :  { %31 = vsyncpa [#allocation5], 0 }
  0x13   :  { %33 = vsyncpa [#allocation5 + $0x1], 0  ;;  %s10767_s2 = smov 0   ;;  %s10769_s25 = smov 0  }
  0x14   :  { %s10771_s26 = smov 0   ;;  %s10773_s27 = smov 0  }
  0x15 LB: > { %12832 = sst [smem:[#allocation25_spill]] %s10614_s2  ;;  %s10788_s3 = sadd.s32 4294967295, %s10626_s27   ;;  %s10626_s27 = sphi %s10773_s27, %s12885_s27   ;;  %s10622_s26 = sphi %s10771_s26, %s12888_s26   ;;  %s10618_s25 = sphi %s10769_s25, %s12887_s25   ;;  %s10614_s2 = sphi %s10767_s2, %s12886_s2  }
  0x16   : > { %12833 = sst [smem:[#allocation26_spill]] %s10618_s25  ;;  %s8006_s28 = sadd.s32 4294967294, %s10626_s27  }
  0x17   : > { %12834 = sst [smem:[#allocation27_spill]] %s10622_s26  ;;  %s10792_s29 = sadd.s32 1, %s10626_s27  }
  0x18   : > { %12835 = sst [smem:[#allocation28_spill]] %s10626_s27  ;;  %s492_s0 = sadd.s32 1, %s10622_s26 }
  0x19   : > { %12836 = sst [smem:[#allocation29_spill]] %s10792_s29  ;;  %s489_s4 = ssub.s32 %s10626_s27, %s10792_s29 }
  0x1a   : > { %p502_p0 = scmp.ne.s32.totalorder %s10622_s26, %s10618_s25  ;;  %p490_p1 = scmp.eq.s32.totalorder %s489_s4, 0 }
  0x1b   : > { %p503_p2 = scmp.eq.s32.totalorder %s10788_s3, 1  ;;  %p508_p3 = scmp.ne.s32.totalorder %s10618_s25, %s10614_s2 }
  0x1c   : > { %p509_p4 = scmp.eq.s32.totalorder %s8006_s28, 1  ;;  %p8007_p7 = scmp.ge.s32.totalorder %s10626_s27, 1 }
  0x1d   : > { %s10803_s30 = scalar_select %p490_p1, %s10622_s26, %s492_s0  }
  0x1e   : > { %p10805_p5 = por %p503_p2, %p502_p0  ;;  %p10809_p6 = por %p509_p4, %p508_p3 }
  0x1f   : > { %12837 = sst [smem:[#allocation30_spill]] %s10803_s30  ;;  %p516_p8 = scmp.lt.s32.totalorder %s10626_s27, 3 }
  0x20   : > { %s12838_s5 = scalar_select %p10805_p5, 1, 0 }
  0x21   : > { %s12840_s22 = scalar_select %p10809_p6, 1, 0 }
  0x22   : > { %12839 = sst [smem:[#allocation31_spill]] %s12838_s5  ;;  %p12800_p9 = scmp.eq.s32.totalorder %s10788_s3, 0 }
  0x23   : > { %12841 = sst [smem:[#allocation32_spill]] %s12840_s22  ;;  %p10816_p10 = pnand %p8007_p7, %p516_p8 }
  0x24   : > { %s10628_s1 = smov [#allocation6]   ;;  %s10629_s0 = smov [#allocation9]  }
  0x25   : > { %s12842_s23 = scalar_select %p10816_p10, 1, 0 }
  0x26   : > { %s545_s24 = sshll.u32 %s10628_s1, 4  ;;  %p9746_p11 = pneg %p10816_p10  ;;  %s546_s24 = int_to_ptr.vmem [resolvable:$true] %s545_s24 }
  0x27   : > { %s571_s4 = sshll.u32 %s10629_s0, 4  ;;  %s12844_s29 = sld [smem:[#allocation37_spill]]  ;;  %s572_s4 = int_to_ptr.vmem [resolvable:$true] %s571_s4 }
  0x28   : > { %p10824_p12 = pnand %p12800_p9, %p9746_p11 }
  0x2a   : > { %p10836_p0 = pneg %p10824_p12 }
  0x2d   : > { %s10292_s22 = scalar_lea.hbm %s12844_s29, 384 }
  0x2e   : > { %p10293_p13 = scmp.ne.s32.totalorder %s12844_s29, %s10292_s22  ;;  %p10299_p3 = scmp.lt.u32.totalorder %s10292_s22, %s12844_s29 }
  0x30   : > { %p10295_p1 = pnand %p10836_p0, %p10293_p13 }
  0x32   : > { %p10296_p2 = pneg %p10295_p1 }
  0x34   : > { %p10301_p4 = pnand %p10299_p3, %p10296_p2 }
  0x36   : > { %10304 = shalt.err (!%p10301_p4)
}
  0x37   : > { %s10305_s26 = scalar_lea.vmem %s546_s24, 384  ;;  %p10313_p9 = scmp.lt.s32.totalorder %s546_s24, %s546_s24 }
  0x38   : > { %p10306_p7 = scmp.ne.s32.totalorder %s546_s24, %s10305_s26  ;;  %p10314_p6 = scmp.lt.s32.totalorder %s10305_s26, %s10305_s26 }
  0x3a   : > { %p10308_p8 = pnand %p10306_p7, %p10836_p0  ;;  %p10315_p5 = por %p10314_p6, %p10313_p9 }
  0x3c   : > { %p10309_p11 = pneg %p10308_p8 }
  0x3e   : > { %p10316_p10 = pnand %p10315_p5, %p10309_p11 }
  0x40   : > { %10319 = shalt.err (!%p10316_p10)
}
  0x41   : > { %s12807_s2 = smov 128   ;;  %s12808_s27 = smov 8  }
  0x42   : > { %9752 = dma.hbm_to_vmem [thread:$0]  (!%p10824_p12), %s12844_s29, 384, %s546_s24, [#allocation7], %s12807_s2, %s12807_s2, %s12808_s27  }
  0x43   : > { %s10632_s30 = smov [#allocation12]   ;;  %s12846_s6 = sld [smem:[#allocation39_spill]] }
  0x44   : > { %s603_s22 = sshll.u32 %s10632_s30, 4  ;;  %s604_s22 = int_to_ptr.vmem [resolvable:$true] %s603_s22 }
  0x49   : > { %s10320_s5 = scalar_lea.hbm %s12846_s6, 32 }
  0x4a   : > { %p10321_p5 = scmp.ne.s32.totalorder %s12846_s6, %s10320_s5  ;;  %p10327_p10 = scmp.lt.u32.totalorder %s10320_s5, %s12846_s6 }
  0x4c   : > { %p10323_p6 = pnand %p10321_p5, %p10836_p0 }
  0x4e   : > { %p10324_p9 = pneg %p10323_p6 }
  0x50   : > { %p10329_p13 = pnand %p10327_p10, %p10324_p9 }
  0x52   : > { %10332 = shalt.err (!%p10329_p13)
}
  0x53   : > { %s10333_s24 = scalar_lea.vmem %s572_s4, 32  ;;  %p10341_p4 = scmp.lt.s32.totalorder %s572_s4, %s572_s4 }
  0x54   : > { %p10334_p1 = scmp.ne.s32.totalorder %s572_s4, %s10333_s24  ;;  %p10342_p7 = scmp.lt.s32.totalorder %s10333_s24, %s10333_s24 }
  0x56   : > { %p10336_p2 = pnand %p10334_p1, %p10836_p0  ;;  %p10343_p8 = por %p10342_p7, %p10341_p4 }
  0x58   : > { %p10337_p3 = pneg %p10336_p2 }
  0x5a   : > { %p10344_p11 = pnand %p10343_p8, %p10337_p3 }
  0x5c   : > { %10347 = shalt.err (!%p10344_p11)
}
  0x5d   : > { %s12809_s18 = smov 16   ;;  %s12811_s25 = smov 1  }
  0x5e   : > { %9758 = dma.hbm_to_vmem [thread:$0]  (!%p10824_p12), %s12846_s6, 32, %s572_s4, [#allocation10], %s12809_s18, %s12809_s18, %s12811_s25  }
  0x5f   : > { %s10348_s21 = scalar_lea.hbm %s12777_s10, 32 }
  0x60   : > { %p10349_p5 = scmp.ne.s32.totalorder %s12777_s10, %s10348_s21  ;;  %p10355_p10 = scmp.lt.u32.totalorder %s10348_s21, %s12777_s10 }
  0x62   : > { %p10351_p6 = pnand %p10349_p5, %p10836_p0 }
  0x64   : > { %p10352_p9 = pneg %p10351_p6 }
  0x66   : > { %p10357_p13 = pnand %p10355_p10, %p10352_p9 }
  0x68   : > { %10360 = shalt.err (!%p10357_p13)
}
  0x69   : > { %s10361_s16 = scalar_lea.vmem %s604_s22, 32  ;;  %p10369_p4 = scmp.lt.s32.totalorder %s604_s22, %s604_s22 }
  0x6a   : > { %p10362_p1 = scmp.ne.s32.totalorder %s604_s22, %s10361_s16  ;;  %p10370_p7 = scmp.lt.s32.totalorder %s10361_s16, %s10361_s16 }
  0x6c   : > { %p10364_p2 = pnand %p10362_p1, %p10836_p0  ;;  %p10371_p8 = por %p10370_p7, %p10369_p4 }
  0x6e   : > { %p10365_p3 = pneg %p10364_p2 }
  0x70   : > { %p10372_p11 = pnand %p10371_p8, %p10365_p3 }
  0x72   : > { %10375 = shalt.err (!%p10372_p11)
}
  0x73   : > { %9764 = dma.hbm_to_vmem [thread:$0]  (!%p10824_p12), %s12777_s10, 32, %s604_s22, [#allocation13], %s12809_s18, %s12809_s18, %s12811_s25  }
  0x74   : > { %s10635_s5 = smov [#allocation15]   ;;  %s10636_s21 = smov [#allocation3]  }
  0x75   : > { %s629_s20 = sshll.u32 %s10635_s5, 4  ;;  %s535_s30 = sshll.u32 %s10636_s21, 4  ;;  %s630_s20 = int_to_ptr.vmem [resolvable:$true] %s629_s20  ;;  %s536_s30 = int_to_ptr.vmem [resolvable:$true] %s535_s30 }
  0x76   : > { %s10376_s24 = scalar_lea.hbm %s12779_s12, 32 }
  0x77   : > { %p10377_p5 = scmp.ne.s32.totalorder %s12779_s12, %s10376_s24  ;;  %p10383_p10 = scmp.lt.u32.totalorder %s10376_s24, %s12779_s12 }
  0x79   : > { %p10379_p6 = pnand %p10377_p5, %p10836_p0 }
  0x7b   : > { %p10380_p9 = pneg %p10379_p6 }
  0x7d   : > { %p10385_p13 = pnand %p10383_p10, %p10380_p9 }
  0x7f   : > { %10388 = shalt.err (!%p10385_p13)
}
  0x80   : > { %s10389_s22 = scalar_lea.vmem %s630_s20, 32  ;;  %p10397_p4 = scmp.lt.s32.totalorder %s630_s20, %s630_s20 }
  0x81   : > { %p10390_p1 = scmp.ne.s32.totalorder %s630_s20, %s10389_s22  ;;  %p10398_p7 = scmp.lt.s32.totalorder %s10389_s22, %s10389_s22 }
  0x83   : > { %p10392_p2 = pnand %p10390_p1, %p10836_p0  ;;  %p10399_p8 = por %p10398_p7, %p10397_p4 }
  0x85   : > { %p10393_p3 = pneg %p10392_p2 }
  0x87   : > { %p10400_p11 = pnand %p10399_p8, %p10393_p3 }
  0x89   : > { %10403 = shalt.err (!%p10400_p11)
}
  0x8a   : > { %9770 = dma.hbm_to_vmem [thread:$0]  (!%p10824_p12), %s12779_s12, 32, %s630_s20, [#allocation16], %s12809_s18, %s12809_s18, %s12811_s25  }
  0x8b   : > { %s12847_s21 = sld [smem:[#allocation36_spill]] }
  0x91   : > { %s10404_s0 = scalar_lea.hbm %s12847_s21, 16 }
  0x92   : > { %p10405_p5 = scmp.ne.s32.totalorder %s12847_s21, %s10404_s0  ;;  %p10411_p10 = scmp.lt.u32.totalorder %s10404_s0, %s12847_s21 }
  0x94   : > { %p10407_p6 = pnand %p10405_p5, %p10836_p0 }
  0x96   : > { %p10408_p9 = pneg %p10407_p6 }
  0x98   : > { %p10413_p13 = pnand %p10411_p10, %p10408_p9 }
  0x9a   : > { %10416 = shalt.err (!%p10413_p13)
}
  0x9b   : > { %s10417_s22 = scalar_lea.vmem %s536_s30, 16  ;;  %s10424_s20 = scalar_lea.vmem %s536_s30, 32 }
  0x9c   : > { %p10418_p1 = scmp.ne.s32.totalorder %s536_s30, %s10417_s22  ;;  %p10425_p4 = scmp.lt.s32.totalorder %s536_s30, %s536_s30 }
  0x9d   : > { %p10426_p7 = scmp.lt.s32.totalorder %s10424_s20, %s10417_s22 }
  0x9e   : > { %p10420_p2 = pnand %p10418_p1, %p10836_p0 }
  0x9f   : > { %p10427_p8 = por %p10426_p7, %p10425_p4 }
  0xa0   : > { %p10421_p3 = pneg %p10420_p2 }
  0xa2   : > { %p10428_p11 = pnand %p10427_p8, %p10421_p3 }
  0xa4   : > { %10431 = shalt.err (!%p10428_p11)
}
  0xa5   : > { %9749 = dma.hbm_to_vmem [thread:$0]  (!%p10824_p12), %s12847_s21, 16, %s536_s30, [#allocation4]  }
  0xa6   : > { %s10637_s17 = smov [#allocation8]   ;;  %s10638_s0 = smov [#allocation11]  }
  0xa7   : > { %s558_s5 = sshll.u32 %s10637_s17, 4  ;;  %s587_s26 = sshll.u32 %s10638_s0, 4  ;;  %s559_s5 = int_to_ptr.vmem [resolvable:$true] %s558_s5  ;;  %s588_s26 = int_to_ptr.vmem [resolvable:$true] %s587_s26 }
  0xa8   : > { %s12848_s4 = sld [smem:[#allocation38_spill]] }
  0xae   : > { %s10432_s18 = scalar_lea.hbm %s12848_s4, 32 }
  0xaf   : > { %p10433_p5 = scmp.ne.s32.totalorder %s12848_s4, %s10432_s18  ;;  %p10439_p10 = scmp.lt.u32.totalorder %s10432_s18, %s12848_s4 }
  0xb1   : > { %p10435_p6 = pnand %p10433_p5, %p10836_p0 }
  0xb3   : > { %p10436_p9 = pneg %p10435_p6 }
  0xb5   : > { %p10441_p13 = pnand %p10439_p10, %p10436_p9 }
  0xb7   : > { %10444 = shalt.err (!%p10441_p13)
}
  0xb8   : > { %s10445_s30 = scalar_lea.vmem %s559_s5, 32  ;;  %p10453_p4 = scmp.lt.s32.totalorder %s559_s5, %s559_s5 }
  0xb9   : > { %p10446_p1 = scmp.ne.s32.totalorder %s559_s5, %s10445_s30  ;;  %p10454_p7 = scmp.lt.s32.totalorder %s10445_s30, %s10445_s30 }
  0xbb   : > { %p10448_p2 = pnand %p10446_p1, %p10836_p0  ;;  %p10455_p8 = por %p10454_p7, %p10453_p4 }
  0xbd   : > { %p10449_p3 = pneg %p10448_p2 }
  0xbf   : > { %p10456_p11 = pnand %p10455_p8, %p10449_p3 }
  0xc1   : > { %10459 = shalt.err (!%p10456_p11)
}
  0xc2   : > { %s12849_s27 = smov 1   ;;  %s12850_s17 = smov 16  }
  0xc3   : > { %9755 = dma.hbm_to_vmem [thread:$0]  (!%p10824_p12), %s12848_s4, 32, %s559_s5, [#allocation7], %s12850_s17, %s12850_s17, %s12849_s27  }
  0xc4   : > { %s10460_s16 = scalar_lea.hbm %s12775_s8, 32 }
  0xc5   : > { %p10461_p5 = scmp.ne.s32.totalorder %s12775_s8, %s10460_s16  ;;  %p10467_p10 = scmp.lt.u32.totalorder %s10460_s16, %s12775_s8 }
  0xc7   : > { %p10463_p6 = pnand %p10461_p5, %p10836_p0 }
  0xc9   : > { %p10464_p9 = pneg %p10463_p6 }
  0xcb   : > { %p10469_p13 = pnand %p10467_p10, %p10464_p9 }
  0xcd   : > { %10472 = shalt.err (!%p10469_p13)
}
  0xce   : > { %s10473_s25 = scalar_lea.vmem %s588_s26, 32  ;;  %p10481_p4 = scmp.lt.s32.totalorder %s588_s26, %s588_s26 }
  0xcf   : > { %p10474_p1 = scmp.ne.s32.totalorder %s588_s26, %s10473_s25  ;;  %p10482_p7 = scmp.lt.s32.totalorder %s10473_s25, %s10473_s25 }
  0xd1   : > { %p10476_p2 = pnand %p10474_p1, %p10836_p0  ;;  %p10483_p8 = por %p10482_p7, %p10481_p4 }
  0xd3   : > { %p10477_p3 = pneg %p10476_p2 }
  0xd5   : > { %p10484_p11 = pnand %p10483_p8, %p10477_p3 }
  0xd7   : > { %10487 = shalt.err (!%p10484_p11)
}
  0xd8   : > { %9761 = dma.hbm_to_vmem [thread:$0]  (!%p10824_p12), %s12775_s8, 32, %s588_s26, [#allocation10], %s12850_s17, %s12850_s17, %s12849_s27  }
  0xd9   : > { %s10639_s0 = smov [#allocation14]   ;;  %s10640_s16 = smov [#allocation17]  }
  0xda   : > { %s616_s24 = sshll.u32 %s10639_s0, 4  ;;  %s660_s22 = sshll.u32 %s10640_s16, 4  ;;  %s617_s24 = int_to_ptr.vmem [resolvable:$true] %s616_s24  ;;  %s661_s22 = int_to_ptr.vmem [resolvable:$true] %s660_s22 }
  0xdb   : > { %s10488_s30 = scalar_lea.hbm %s12778_s11, 32 }
  0xdc   : > { %p10489_p5 = scmp.ne.s32.totalorder %s12778_s11, %s10488_s30  ;;  %p10495_p10 = scmp.lt.u32.totalorder %s10488_s30, %s12778_s11 }
  0xde   : > { %p10491_p6 = pnand %p10489_p5, %p10836_p0 }
  0xe0   : > { %p10492_p9 = pneg %p10491_p6 }
  0xe2   : > { %p10497_p13 = pnand %p10495_p10, %p10492_p9 }
  0xe4   : > { %10500 = shalt.err (!%p10497_p13)
}
  0xe5   : > { %s10501_s26 = scalar_lea.vmem %s617_s24, 32  ;;  %p10509_p4 = scmp.lt.s32.totalorder %s617_s24, %s617_s24 }
  0xe6   : > { %p10502_p1 = scmp.ne.s32.totalorder %s617_s24, %s10501_s26  ;;  %p10510_p7 = scmp.lt.s32.totalorder %s10501_s26, %s10501_s26 }
  0xe8   : > { %p10504_p2 = pnand %p10502_p1, %p10836_p0  ;;  %p10511_p8 = por %p10510_p7, %p10509_p4 }
  0xea   : > { %p10505_p3 = pneg %p10504_p2 }
  0xec   : > { %p10512_p11 = pnand %p10511_p8, %p10505_p3 }
  0xee   : > { %10515 = shalt.err (!%p10512_p11)
}
  0xef   : > { %9767 = dma.hbm_to_vmem [thread:$0]  (!%p10824_p12), %s12778_s11, 32, %s617_s24, [#allocation13], %s12850_s17, %s12850_s17, %s12849_s27  }
  0xf0   : > { %s10516_s16 = scalar_lea.hbm %s12786_s19, 512 }
  0xf1   : > { %p10517_p5 = scmp.ne.s32.totalorder %s12786_s19, %s10516_s16  ;;  %p10523_p10 = scmp.lt.u32.totalorder %s10516_s16, %s12786_s19 }
  0xf3   : > { %p10519_p6 = pnand %p10517_p5, %p10836_p0 }
  0xf5   : > { %p10520_p9 = pneg %p10519_p6 }
  0xf7   : > { %p10525_p13 = pnand %p10523_p10, %p10520_p9 }
  0xf9   : > { %10528 = shalt.err (!%p10525_p13)
}
  0xfa   : > { %s10529_s5 = scalar_lea.vmem %s661_s22, 512  ;;  %p10537_p4 = scmp.lt.s32.totalorder %s661_s22, %s661_s22 }
  0xfb   : > { %p10530_p1 = scmp.ne.s32.totalorder %s661_s22, %s10529_s5  ;;  %p10538_p7 = scmp.lt.s32.totalorder %s10529_s5, %s10529_s5 }
  0xfd   : > { %p10532_p2 = pnand %p10530_p1, %p10836_p0  ;;  %p10539_p8 = por %p10538_p7, %p10537_p4 }
  0xff   : > { %p10533_p3 = pneg %p10532_p2 }
 0x101   : > { %p10540_p11 = pnand %p10539_p8, %p10533_p3 }
 0x103   : > { %10543 = shalt.err (!%p10540_p11)
}
 0x104   : > { %s12851_s27 = smov 8   ;;  %s12852_s17 = smov 128  }
 0x105   : > { %9773 = dma.hbm_to_vmem [thread:$0]  (!%p10824_p12), %s12786_s19, 512, %s661_s22, [#allocation16], %s12852_s17, %s12852_s17, %s12851_s27  }
 0x106   : > { %p12853_p5 = scmp.ne.s32.totalorder %s12842_s23, 0 }
 0x107   : > { %p12854_p0 = scmp.eq.s32.totalorder (!%p12853_p5), %s10788_s3, 0 }
 0x108   : > { %689 = sbr.rel (%p12853_p5) target bundleno = 12331 (0x302b), region = 104 }
 0x10f   : > { %10589 = dma.done.wait (%p12854_p0), [#allocation4], 16   ;;  %p12855_p6 = pmov %p12854_p0 }
 0x110   : > { %p12856_p9 = pmov %p12854_p0 }
 0x111   : > { %10591 = vsyncadd (%p12855_p6), [#allocation4], 4294967280 }
 0x112   : > { %10593 = dma.done.wait (%p12856_p9), [#allocation7], 416   ;;  %p12857_p10 = pmov %p12854_p0 }
 0x113   : > { %p12858_p13 = pmov %p12854_p0 }
 0x114   : > { %10595 = vsyncadd (%p12857_p10), [#allocation7], 4294966880 }
 0x115   : > { %10597 = dma.done.wait (%p12858_p13), [#allocation10], 64   ;;  %p12859_p12 = pmov %p12854_p0 }
 0x116   : > { %p12860_p1 = pmov %p12854_p0 }
 0x117   : > { %10599 = vsyncadd (%p12859_p12), [#allocation10], 4294967232 }
 0x118   : > { %10601 = dma.done.wait (%p12860_p1), [#allocation13], 64   ;;  %p12861_p2 = pmov %p12854_p0 }
 0x119   : > { %p12862_p3 = pmov %p12854_p0 }
 0x11a   : > { %10603 = vsyncadd (%p12861_p2), [#allocation13], 4294967232 }
 0x11b   : > { %10605 = dma.done.wait (%p12862_p3), [#allocation16], 544   ;;  %p12863_p4 = pmov %p12854_p0 }
 0x11c   : > { %s8029_s23 = sshll.u32 %s10788_s3, 1  ;;  %s12864_s6 = sld [smem:[#allocation34_spill]]  ;;  %vm809_vm0 = vcmask 392192   ;;  %v796_v13 = vld [vmem:[#allocation3] sm:$0x1]  ;;  %vm891_vm1 = vcmask 253952  }
 0x11d   : > { %10607 = vsyncadd (%p12863_p4), [#allocation16], 4294966752  ;;  %p783_p7 = scmp.lt.s32.totalorder %s8029_s23, 3  ;;  %s12865_s30 = sld [smem:[#allocation33_spill]]  ;;  %v797_v14 = vld [vmem:[#allocation6] sm:$0x1] }
 0x11e   : > { %v798_v15 = vadd.f32 %v797_v14, %v796_v13  ;;  %s12866_s22 = sld [smem:[#allocation35_spill]]  ;;  %v800_v17 = vld [vmem:[#allocation6 + $0x9] sm:$0xff]  ;;  %v799_v22 = vld [vmem:[#allocation6 + $0x1] sm:$0xff]  ;;  %vm895_vm2 = vcmask 261120   ;;  %vm1032_vm3 = vcmask 254976   ;;  %v989_v56 = vld [vmem:[%s12774_s7] sm:$0xff] }
 0x11f   : > { %s12890_s23 = smov (!%p783_p7, %s8029_s23), 3  ;;  %v990_v57 = vld [vmem:[%s12774_s7 + $0x8] sm:$0xff]  ;;  %v10641_v59 = vmov 0.0|0.0   ;;  %v991_v60 = vld [vmem:[%s12774_s7 + $0x10] sm:$0xff]  ;;  %v992_v61 = vld [vmem:[%s12774_s7 + $0x18] sm:$0xff]  ;;  %vm10642_vm4 = vmmov 0  }
 0x120   : > { %s8323_s28 = sshll.u32 %s12890_s23, 4  ;;  %982 = vst.msk [vmem:[#allocation2 + $0x11] sm:$0x1] %vm891_vm1, %v798_v15  ;;  %892 = vst.msk [vmem:[#allocation2] sm:$0x1] %vm891_vm1, %v798_v15  ;;  %v9539_v58 = vpack.c.bf16 %v990_v57, %v989_v56  ;;  %v9542_v62 = vpack.c.bf16 %v992_v61, %v991_v60  ;;  %v10643_v63 = vmov 0.0  }
 0x121   : > { %s10644_s5 = smov 96   ;;  %s10645_s27 = smov 120   ;;  %vm1229_vm5 = vcmask 64512   ;;  %vm1325_vm7 = vcmask 138240   ;;  %vm1332_vm8 = vcmask 131072   ;;  %vm1377_vm9 = vcmask 1040384  }
 0x122   : > { %v789_v0 = vld [vmem:[%s12864_s6] sm:$0xff]  ;;  %v790_v1 = vld [vmem:[%s12864_s6 + $0x8] sm:$0xff]  ;;  %v791_v2 = vld [vmem:[%s12864_s6 + $0x10] sm:$0xff]  ;;  %s10646_s17 = smov 88   ;;  %s10647_s24 = smov 64   ;;  %vm2559_vm10 = vcmask 1046528  }
 0x123   : > { %s787_s25 = scalar_lea.vmem %s12865_s30, %s8323_s28  ;;  %v9514_v3 = vpack.c.bf16 %v790_v1, %v789_v0  ;;  %v792_v4 = vld [vmem:[%s12864_s6 + $0x18] sm:$0xff]  ;;  %v793_v6 = vld [vmem:[%s12864_s6 + $0x20] sm:$0xff]  ;;  %v794_v7 = vld [vmem:[%s12864_s6 + $0x28] sm:$0xff]  ;;  %s10648_s26 = smov 56   ;;  %vm4227_vm13 = vcmask 523264  }
 0x124   : > { %v9518_v5 = vpack.c.bf16 %v792_v4, %v791_v2  ;;  %v801_v8 = vld [vmem:[%s787_s25] sm:$0xff]  ;;  %v8035_v9 = vld [vmem:[%s787_s25 + $0x10] sm:$0xff]  ;;  %v9522_v10 = vpack.c.bf16 %v794_v7, %v793_v6  ;;  %v802_v11 = vld [vmem:[%s787_s25 + $0x8] sm:$0xff]  ;;  %s10649_s23 = smov 80   ;;  %s10650_s28 = smov 112  }
 0x125   : > { %9515 = vmatprep.subr.bf16.mxu0 %v9514_v3  ;;  %9527 = vmatprep.subr.bf16.mxu1 %v9514_v3  ;;  %v8036_v12 = vld [vmem:[%s787_s25 + $0x18] sm:$0xff]  ;;  %v8032_v16 = vld [vmem:[%s12866_s22] ss:$0 sm:$0xff]  ;;  %vm11163_vm6 = vmpackc.low %vm1229_vm5, %vm1229_vm5  ;;  %s10651_s0 = smov 48   ;;  %s12818_s16 = smov 72  }
 0x126   : > { %9517 = vmatpush3.bf16.msra.mxu0 %v9514_v3  ;;  %9529 = vmatpush3.bf16.msra.mxu1 %v9514_v3  ;;  %s12816_s20 = smov 104   ;;  %s12814_s25 = smov 40  }
 0x127   : > { %9519 = vmatprep.subr.bf16.mxu0 %v9518_v5  ;;  %9531 = vmatprep.subr.bf16.mxu1 %v9518_v5  ;;  %s12869_s2 = sld [smem:[#allocation40_spill]]  ;;  %s12872_s4 = smov 104  }
 0x128   : > { %8675 = vmatprep.mubr.msk.f32.mxu0 %vm809_vm0, %v801_v8  ;;  %8690 = vmatprep.mubr.msk.f32.mxu1 %vm809_vm0, %v8035_v9 }
 0x12a   : > { %9521 = vmatpush3.bf16.msra.mxu0 %v9518_v5  ;;  %9533 = vmatpush3.bf16.msra.mxu1 %v9518_v5 }
 0x12b   : > { %9523 = vmatprep.subr.bf16.mxu0 %v9522_v10  ;;  %9535 = vmatprep.subr.bf16.mxu1 %v9522_v10 }
 0x12d   : > { %s12870_s30 = smov %s12869_s2 }
 0x12e   : > { %9525 = vmatpush3.bf16.msra.mxu0 %v9522_v10  ;;  %9537 = vmatpush3.bf16.msra.mxu1 %v9522_v10 }
 0x12f   : > { %9538 = vmatprep.subr.bf16.mxu0 %v10641_v59  ;;  %9544 = vmatprep.subr.bf16.mxu1 %v10641_v59 }
 0x131   : > { %8676 = vmatmul.mubr.msk.f32.vlgmr.msra.gmra.mrb[0].mxu0 %vm809_vm0, %v802_v11  ;;  %8691 = vmatmul.mubr.msk.f32.vlgmr.msra.gmra.mrb[0].mxu1 %vm809_vm0, %v8036_v12 }
 0x132   : > { %9540 = vmatpush3.bf16.msra.mxu0 %v9539_v58  ;;  %8701 = vmatprep.mubr.msk.f32.mxu0 %vm10642_vm4, %v10643_v63 }
 0x133   : > { %9541 = vmatprep.subr.bf16.mxu0 %v10641_v59  ;;  %8722 = vmatprep.mubr.msk.f32.mxu1 %vm10642_vm4, %v10643_v63 }
 0x136   : > { %9543 = vmatpush3.bf16.msra.mxu0 %v9542_v62 }
 0x137   : > { %9551 = vmatprep.subr.bf16.mxu0 %v10641_v59 }
 0x204   : > { %v8677_v18 = vpop.f32.mrb[0].mxu0  ;;  %v8692_v19 = vpop.f32.mrb[0].mxu1 }
 0x205   : > { %v888_v20 = vadd.f32 %v8677_v18, %v8032_v16  ;;  %v979_v21 = vadd.f32 %v8692_v19, %v8032_v16  ;;  %v882_v23 = vpop.f32.mrb[1].mxu0  ;;  %v973_v24 = vpop.f32.mrb[1].mxu1 }
 0x206   : > { %v883_v25 = vadd.f32 %v8032_v16, %v882_v23  ;;  %v974_v26 = vadd.f32 %v8032_v16, %v973_v24 }
 0x207   : > { %v894_v27 = vadd.f32 %v888_v20, %v800_v17  ;;  %v984_v28 = vadd.f32 %v979_v21, %v800_v17  ;;  %v8039_v20 = vld [vmem:[#allocation8] ss:$0 sm:$0xff] }
 0x208   : > { %v893_v29 = vadd.f32 %v883_v25, %v799_v22  ;;  %v983_v30 = vadd.f32 %v974_v26, %v799_v22  ;;  %v8040_v22 = vld [vmem:[#allocation9] ss:$0 sm:$0xff] }
 0x209   : > { %897 = vst.msk [vmem:[#allocation2 + $0x9] sm:$0xff] %vm895_vm2, %v894_v27  ;;  %986 = vst.msk [vmem:[#allocation2 + $0x1a] sm:$0xff] %vm895_vm2, %v984_v28 }
 0x20a   : > { %896 = vst.msk [vmem:[#allocation2 + $0x1] sm:$0xff] %vm895_vm2, %v893_v29  ;;  %985 = vst.msk [vmem:[#allocation2 + $0x12] sm:$0xff] %vm895_vm2, %v983_v30 }
 0x210   : > { %v1019_v52 = vld [vmem:[#allocation2 + $0x20] sm:$0x3] }
 0x211   : > { %v1017_v31 = vld [vmem:[#allocation2 + $0x10] sm:$0xff]  ;;  %v1015_v32 = vld [vmem:[#allocation2] sm:$0xff]  ;;  %v1016_v35 = vld [vmem:[#allocation2 + $0x8] sm:$0xff]  ;;  %v1033_v54 = vsel %vm1032_vm3, %v1019_v52, 0.0 }
 0x212   : > { %v1026_v33 = vsel %vm895_vm2, %v1017_v31, 0.0  ;;  %v1020_v34 = vsel %vm895_vm2, %v1015_v32, 0.0  ;;  %v1023_v36 = vsel %vm895_vm2, %v1016_v35, 0.0  ;;  %v1018_v53 = vld [vmem:[#allocation2 + $0x18] sm:$0xff] }
 0x213   : > { %1027 = vadd.xlane.f32.xlu1 %v1026_v33  ;;  %1021 = vadd.xlane.f32.xlu0 %v1020_v34  ;;  %v1029_v55 = vsel %vm895_vm2, %v1018_v53, 0.0 }
 0x217   : > { %1024 = vadd.xlane.f32.xlu0 %v1023_v36 }
 0x2a0   : > { %v1028_v37 = vpop.xlane.xlu1 %1027  ;;  %v1022_v38 = vpop.xlane.xlu0 %1021 }
 0x2a1   : > { %v1039_v39 = vmul.f32 0.03125, %v1028_v37  ;;  %v1037_v40 = vmul.f32 0.03125, %v1022_v38 }
 0x2a3   : > { %v11080_v41 = vsub.f32 %v1017_v31, %v1039_v39  ;;  %v1042_v42 = vsub.f32 %v1015_v32, %v1037_v40 }
 0x2a4   : > { %v1025_v43 = vpop.xlane.xlu0 %1024 }
 0x2a5   : > { %v1038_v44 = vmul.f32 0.03125, %v1025_v43  ;;  %v1047_v45 = vmul.f32 %v1042_v42, %v1042_v42  ;;  %v1049_v48 = vmul.f32 %v11080_v41, %v11080_v41 }
 0x2a7   : > { %v11082_v46 = vsub.f32 %v1016_v35, %v1038_v44  ;;  %v1052_v47 = vsel %vm895_vm2, %v1047_v45, 0.0  ;;  %v1058_v50 = vsel %vm895_vm2, %v1049_v48, 0.0 }
 0x2a8   : > { %1053 = vadd.xlane.f32.xlu1 %v1052_v47 }
 0x2a9   : > { %v1048_v49 = vmul.f32 %v11082_v46, %v11082_v46 }
 0x2ab   : > { %v1055_v51 = vsel %vm895_vm2, %v1048_v49, 0.0  ;;  %v11132_v49 = vld [vmem:[#allocation11] ss:$0 sm:$0xff] }
 0x2ac   : > { %1059 = vadd.xlane.f32.xlu1 %v1058_v50  ;;  %1056 = vadd.xlane.f32.xlu0 %v1055_v51 }
 0x2b0   : > { %1034 = vadd.xlane.f32.xlu1 %v1033_v54  ;;  %1030 = vadd.xlane.f32.xlu0 %v1029_v55 }
 0x335   : > { %v1054_v0 = vpop.xlane.xlu1 %1053 }
 0x336   : > { %v1067_v1 = vmul.f32 0.03125, %v1054_v0 }
 0x338   : > { %v1072_v2 = vadd.f32 1e-05, %v1067_v1 }
 0x339   : > { %v1060_v3 = vpop.xlane.xlu1 %1059  ;;  %v1057_v4 = vpop.xlane.xlu0 %1056 }
 0x33a   : > { %10017 = vrsqrt.f32 %v1072_v2  ;;  %v1069_v5 = vmul.f32 0.03125, %v1060_v3  ;;  %v1068_v6 = vmul.f32 0.03125, %v1057_v4 }
 0x33c   : > { %v1074_v7 = vadd.f32 1e-05, %v1069_v5  ;;  %v1073_v8 = vadd.f32 1e-05, %v1068_v6 }
 0x33d   : > { %v1035_v9 = vpop.xlane.xlu1 %1034  ;;  %v1031_v10 = vpop.xlane.xlu0 %1030 }
 0x33e   : > { %10019 = vrsqrt.f32 %v1074_v7  ;;  %v1041_v11 = vmul.f32 0.03125, %v1035_v9  ;;  %v1040_v12 = vmul.f32 0.03125, %v1031_v10 }
 0x33f   : > { %10021 = vrsqrt.f32 %v1073_v8 }
 0x340   : > { %v1046_v13 = vsub.f32 %v1019_v52, %v1041_v11  ;;  %v1045_v14 = vsub.f32 %v1018_v53, %v1040_v12 }
 0x342   : > { %v1051_v15 = vmul.f32 %v1046_v13, %v1046_v13  ;;  %v1050_v16 = vmul.f32 %v1045_v14, %v1045_v14 }
 0x344   : > { %v10018_v17 = vpop.eup %10017  ;;  %v1064_v18 = vsel %vm1032_vm3, %v1051_v15, 0.0  ;;  %v1061_v19 = vsel %vm895_vm2, %v1050_v16, 0.0 }
 0x345   : > { %v1082_v21 = vmul.f32 %v10018_v17, %v1042_v42  ;;  %1065 = vadd.xlane.f32.xlu1 %v1064_v18  ;;  %1062 = vadd.xlane.f32.xlu0 %v1061_v19 }
 0x347   : > { %v1093_v23 = vmul.f32 %v8039_v20, %v1082_v21 }
 0x348   : > { %v10020_v24 = vpop.eup %10019 }
 0x349   : > { %v10022_v25 = vpop.eup %10021  ;;  %v1104_v26 = vadd.f32 %v8040_v22, %v1093_v23  ;;  %v1084_v28 = vmul.f32 %v10020_v24, %v11080_v41 }
 0x34a   : > { %v1083_v27 = vmul.f32 %v10022_v25, %v11082_v46 }
 0x34b   : > { %8702 = vmatmul.mubr.msk.f32.vlgmr.msra.gmra.mrb[2].mxu0 %vm895_vm2, %v1104_v26  ;;  %v1095_v31 = vmul.f32 %v8039_v20, %v1084_v28 }
 0x34c   : > { %8704 = vmatprep.mubr.msk.f32.mxu0 %vm10642_vm4, %v10643_v63  ;;  %v1094_v29 = vmul.f32 %v8039_v20, %v1083_v27 }
 0x34d   : > { %v1106_v32 = vadd.f32 %v8040_v22, %v1095_v31 }
 0x34e   : > { %v1105_v30 = vadd.f32 %v8040_v22, %v1094_v29 }
 0x350   : > { %8705 = vmatmul.mubr.msk.f32.gmra.mrb[4].mxu0 %vm895_vm2, %v1105_v30 }
 0x351   : > { %8707 = vmatprep.mubr.msk.f32.mxu0 %vm10642_vm4, %v10643_v63 }
 0x354   : > { %8708 = vmatmul.mubr.msk.f32.gmra.mrb[6].mxu0 %vm895_vm2, %v1106_v32 }
 0x355   : > { %8710 = vmatprep.mubr.msk.f32.mxu0 %vm10642_vm4, %v10643_v63 }
 0x3d2   : > { %v1066_v33 = vpop.xlane.xlu1 %1065  ;;  %v1063_v34 = vpop.xlane.xlu0 %1062 }
 0x3d3   : > { %v1071_v35 = vmul.f32 0.03125, %v1066_v33  ;;  %v1070_v36 = vmul.f32 0.03125, %v1063_v34 }
 0x3d5   : > { %v1076_v37 = vadd.f32 1e-05, %v1071_v35  ;;  %v1075_v38 = vadd.f32 1e-05, %v1070_v36 }
 0x3d7   : > { %10023 = vrsqrt.f32 %v1076_v37 }
 0x3d8   : > { %10025 = vrsqrt.f32 %v1075_v38 }
 0x3e1   : > { %v10024_v39 = vpop.eup %10023 }
 0x3e2   : > { %v10026_v40 = vpop.eup %10025  ;;  %v1086_v42 = vmul.f32 %v10024_v39, %v1046_v13 }
 0x3e3   : > { %v1085_v41 = vmul.f32 %v10026_v40, %v1045_v14 }
 0x3e4   : > { %v1097_v45 = vmul.f32 %v8039_v20, %v1086_v42 }
 0x3e5   : > { %v1096_v43 = vmul.f32 %v8039_v20, %v1085_v41 }
 0x3e6   : > { %v1108_v46 = vadd.f32 %v8040_v22, %v1097_v45 }
 0x3e7   : > { %v1107_v44 = vadd.f32 %v8040_v22, %v1096_v43 }
 0x3e9   : > { %8711 = vmatmul.mubr.msk.f32.gmra.mrb[8].mxu0 %vm895_vm2, %v1107_v44 }
 0x3ea   : > { %8713 = vmatprep.mubr.msk.f32.mxu0 %vm10642_vm4, %v10643_v63 }
 0x3ed   : > { %8714 = vmatmul.mubr.msk.f32.gmra.mrb[10].mxu0 %vm895_vm2, %v1108_v46 }
 0x3ee   : > { %8752 = vmatprep.mubr.msk.f32.mxu0 %vm10642_vm4, %v10643_v63 }
 0x41e   : > { %v1196_v47 = vpop.f32.mrb[2].mxu0 }
 0x41f   : > { %v8703_v48 = vpop.f32.mrb[3].mxu0  ;;  %v11135_v51 = vadd.f32 %v11132_v49, %v1196_v47 }
 0x423   : > { %v1201_v50 = vpop.f32.mrb[4].mxu0 }
 0x424   : > { %v11138_v52 = vadd.f32 %v11132_v49, %v1201_v50  ;;  %v8706_v53 = vpop.f32.mrb[5].mxu0 }
 0x426   : > { %v11142_v54 = vpack.i.bf16 %v11138_v52, %v11135_v51 }
 0x427   : > { %v1206_v55 = vpop.f32.mrb[6].mxu0 }
 0x428   : > { %v11145_v56 = vadd.f32 %v11132_v49, %v1206_v55  ;;  %v8709_v57 = vpop.f32.mrb[7].mxu0  ;;  %9858 = vrot.lane.b32.xlu0 %v11142_v54, %s10644_s5 }
 0x42a   : > { %1227 = vrot.lane.b32.xlu1 %v11145_v56, %s10644_s5 }
 0x42c   : > { %1460 = vrot.lane.b32.xlu0 %v11135_v51, %s10645_s27 }
 0x42e   : > { %9863 = vrot.lane.b32.xlu1 %v11142_v54, %s10646_s17 }
 0x430   : > { %1464 = vrot.lane.b32.xlu0 %v11145_v56, %s10645_s27 }
 0x432   : > { %1470 = vrot.lane.b32.xlu1 %v11145_v56, %s10646_s17 }
 0x436   : > { %1462 = vrot.lane.b32.xlu1 %v11138_v52, %s10645_s27 }
 0x49a   : > { %v9859_v58 = vpop.permute.xlu0 %9858 }
 0x49b   : > { %v9861_v60 = vunpack.i.h.bf16 %v9859_v58  ;;  %v9860_v61 = vunpack.i.l.bf16 %v9859_v58 }
 0x49c   : > { %v1228_v62 = vpop.permute.xlu1 %1227 }
 0x49d   : > { %v9545_v1 = vpack.c.bf16 %v9861_v60, %v9860_v61 }
 0x49e   : > { %v1461_v7 = vpop.permute.xlu0 %1460 }
 0x49f   : > { %9547 = vmatpush3.bf16.xpose.msk.msra.mxu1 %vm11163_vm6, %v9545_v1 }
 0x4a0   : > { %v9864_v2 = vpop.permute.xlu1 %9863  ;;  %8720 = vmatprep.subr.mxu1 %v10643_v63 }
 0x4a1   : > { %v9866_v3 = vunpack.i.h.bf16 %v9864_v2  ;;  %v9865_v4 = vunpack.i.l.bf16 %v9864_v2 }
 0x4a2   : > { %v1465_v9 = vpop.permute.xlu0 %1464 }
 0x4a3   : > { %v9552_v5 = vpack.c.bf16 %v9866_v3, %v9865_v4 }
 0x4a4   : > { %v1471_v6 = vpop.permute.xlu1 %1470 }
 0x4a5   : > { %9554 = vmatpush3.bf16.xpose.msk.msra.mxu0 %vm11163_vm6, %v9552_v5 }
 0x4a6   : > { %8750 = vmatprep.subr.mxu0 %v10643_v63 }
 0x4a7   : > { %8721 = vmatpush3.xpose.msk.msra.mxu1 %vm1229_vm5, %v1228_v62 }
 0x4a8   : > { %9548 = vmatprep.subr.bf16.mxu1 %v10641_v59  ;;  %v1463_v8 = vpop.permute.xlu1 %1462 }
 0x4aa   : > { %8723 = vmatmul.mubr.msk.f32.vlgmr.msra.gmra.mrb[2].mxu1 %vm1229_vm5, %v11135_v51 }
 0x4ab   : > { %8725 = vmatprep.mubr.msk.f32.mxu1 %vm10642_vm4, %v10643_v63 }
 0x4ad   : > { %8751 = vmatpush3.xpose.msk.msra.mxu0 %vm1229_vm5, %v1471_v6 }
 0x4ae   : > { %8726 = vmatmul.mubr.msk.f32.gmra.mrb[4].mxu1 %vm1229_vm5, %v11138_v52  ;;  %8776 = vmatprep.subr.mxu0 %v10643_v63 }
 0x4af   : > { %8728 = vmatprep.mubr.msk.f32.mxu1 %vm10642_vm4, %v10643_v63 }
 0x4b0   : > { %8753 = vmatmul.mubr.msk.f32.vlgmr.msra.gmra.mrb[12].mxu0 %vm1229_vm5, %v1461_v7 }
 0x4b1   : > { %8755 = vmatprep.mubr.msk.f32.mxu0 %vm10642_vm4, %v10643_v63 }
 0x4b2   : > { %8729 = vmatmul.mubr.msk.f32.gmra.mrb[6].mxu1 %vm1229_vm5, %v11145_v56 }
 0x4b3   : > { %8737 = vmatprep.mubr.msk.f32.mxu1 %vm10642_vm4, %v10643_v63 }
 0x4b4   : > { %8756 = vmatmul.mubr.msk.f32.gmra.mrb[14].mxu0 %vm1229_vm5, %v1463_v8 }
 0x4b5   : > { %8758 = vmatprep.mubr.msk.f32.mxu0 %vm10642_vm4, %v10643_v63 }
 0x4b8   : > { %8759 = vmatmul.mubr.msk.f32.gmra.mrb[16].mxu0 %vm1229_vm5, %v1465_v9 }
 0x4b9   : > { %8778 = vmatprep.mubr.msk.f32.mxu0 %vm10642_vm4, %v10643_v63 }
 0x4bc   : > { %v11198_v10 = vpop.f32.mrb[8].mxu0 }
 0x4bd   : > { %v8712_v11 = vpop.f32.mrb[9].mxu0 }
 0x4c0   : > { %v11200_v12 = vpop.f32.mrb[10].mxu0 }
 0x4c1   : > { %v8715_v13 = vpop.f32.mrb[11].mxu0 }
 0x57d   : > { %v1308_v14 = vpop.f32.mrb[2].mxu1 }
 0x57e   : > { %v1322_v15 = vmul.f32 0.35355338, %v1308_v14  ;;  %v8724_v16 = vpop.f32.mrb[3].mxu1 }
 0x580   : > { %v1326_v17 = vsel %vm1325_vm7, %v1322_v15, -inf }
 0x581   : > { %1327 = vmax.xlane.f32.xlu1 %v1326_v17  ;;  %v1313_v18 = vpop.f32.mrb[4].mxu1 }
 0x582   : > { %v1323_v19 = vmul.f32 0.35355338, %v1313_v18  ;;  %v8727_v20 = vpop.f32.mrb[5].mxu1 }
 0x583   : > { %v1550_v21 = vpop.f32.mrb[12].mxu0 }
 0x584   : > { %v8754_v22 = vpop.f32.mrb[13].mxu0  ;;  %v1329_v23 = vsel %vm1325_vm7, %v1323_v19, -inf  ;;  %v1564_v28 = vmul.f32 0.35355338, %v1550_v21 }
 0x585   : > { %1330 = vmax.xlane.f32.xlu0 %v1329_v23  ;;  %v1318_v24 = vpop.f32.mrb[6].mxu1 }
 0x586   : > { %v1324_v25 = vmul.f32 0.35355338, %v1318_v24  ;;  %v8730_v26 = vpop.f32.mrb[7].mxu1  ;;  %v1567_v36 = vsel %vm1325_vm7, %v1564_v28, -inf }
 0x587   : > { %v1555_v27 = vpop.f32.mrb[14].mxu0 }
 0x588   : > { %v1565_v29 = vmul.f32 0.35355338, %v1555_v27  ;;  %v8757_v30 = vpop.f32.mrb[15].mxu0  ;;  %v1333_v31 = vsel %vm1332_vm8, %v1324_v25, -inf }
 0x589   : > { %1334 = vmax.xlane.f32.xlu0 %v1333_v31 }
 0x58a   : > { %v1570_v32 = vsel %vm1325_vm7, %v1565_v29, -inf }
 0x58b   : > { %v1560_v33 = vpop.f32.mrb[16].mxu0  ;;  %1571 = vmax.xlane.f32.xlu1 %v1570_v32 }
 0x58c   : > { %v1566_v34 = vmul.f32 0.35355338, %v1560_v33  ;;  %v8760_v35 = vpop.f32.mrb[17].mxu0 }
 0x58d   : > { %1568 = vmax.xlane.f32.xlu0 %v1567_v36 }
 0x58e   : > { %v1573_v37 = vsel %vm1332_vm8, %v1566_v34, -inf }
 0x591   : > { %1574 = vmax.xlane.f32.xlu0 %v1573_v37 }
 0x60e   : > { %v1328_v38 = vpop.xlane.xlu1 %1327 }
 0x60f   : > { %v1336_v39 = vsub.f32 %v1322_v15, %v1328_v38 }
 0x611   : > { %v1339_v40 = vmul.f32 1.442695, %v1336_v39 }
 0x612   : > { %v1331_v41 = vpop.xlane.xlu0 %1330 }
 0x613   : > { %10027 = vpow2.f32 %v1339_v40  ;;  %v1337_v43 = vsub.f32 %v1323_v19, %v1331_v41 }
 0x615   : > { %v1341_v47 = vmul.f32 1.442695, %v1337_v43  ;;  %v11274_v43 = vld [vmem:[%s12776_s9 + $0x8] sm:$0xff] }
 0x616   : > { %v1335_v42 = vpop.xlane.xlu0 %1334  ;;  %8777 = vmatpush3.msra.mxu0 %v11274_v43 }
 0x617   : > { %v1338_v62 = vsub.f32 %v1324_v25, %v1335_v42  ;;  %v11267_v42 = vld [vmem:[%s12776_s9] sm:$0xff]  ;;  %9558 = vmatprep.subr.bf16.mxu0 %v10641_v59 }
 0x618   : > { %v1572_v60 = vpop.xlane.xlu1 %1571 }
 0x619   : > { %v1577_v61 = vsub.f32 %v1565_v29, %v1572_v60  ;;  %v1343_v3 = vmul.f32 1.442695, %v1338_v62 }
 0x61a   : > { %v1569_v44 = vpop.xlane.xlu0 %1568 }
 0x61b   : > { %v1576_v45 = vsub.f32 %v1564_v28, %v1569_v44  ;;  %v1581_v1 = vmul.f32 1.442695, %v1577_v61 }
 0x61d   : > { %v10028_v46 = vpop.eup %10027  ;;  %v1579_v48 = vmul.f32 1.442695, %v1576_v45 }
 0x61e   : > { %v1345_v50 = vsel %vm1325_vm7, %v10028_v46, 0.0  ;;  %v1575_v2 = vpop.xlane.xlu0 %1574 }
 0x61f   : > { %10029 = vpow2.f32 %v1579_v48  ;;  %1346 = vadd.xlane.f32.xlu1 %v1345_v50  ;;  %v1578_v4 = vsub.f32 %v1566_v34, %v1575_v2 }
 0x620   : > { %10031 = vpow2.f32 %v1341_v47 }
 0x621   : > { %10033 = vpow2.f32 %v1581_v1  ;;  %v1583_v5 = vmul.f32 1.442695, %v1578_v4 }
 0x622   : > { %10035 = vpow2.f32 %v1343_v3 }
 0x623   : > { %10037 = vpow2.f32 %v1583_v5 }
 0x629   : > { %v11209_v53 = vpop.eup %10029 }
 0x62a   : > { %v1585_v55 = vsel %vm1325_vm7, %v11209_v53, 0.0  ;;  %v10032_v57 = vpop.eup %10031 }
 0x62b   : > { %1586 = vadd.xlane.f32.xlu0 %v1585_v55  ;;  %v1348_v58 = vsel %vm1325_vm7, %v10032_v57, 0.0  ;;  %v11222_v6 = vpop.eup %10033 }
 0x62c   : > { %v1588_v7 = vsel %vm1325_vm7, %v11222_v6, 0.0  ;;  %v10036_v8 = vpop.eup %10035 }
 0x62d   : > { %v1351_v9 = vsel %vm1332_vm8, %v10036_v8, 0.0  ;;  %v10038_v11 = vpop.eup %10037 }
 0x62e   : > { %v1591_v13 = vsel %vm1332_vm8, %v10038_v11, 0.0 }
 0x62f   : > { %1349 = vadd.xlane.f32.xlu0 %v1348_v58 }
 0x630   : > { %1364 = vrot.lane.b32.xlu1 %v11145_v56, %s10647_s24 }
 0x645   : > { %9868 = vrot.lane.b32.xlu0 %v11142_v54, %s10647_s24 }
 0x649   : > { %1604 = vrot.lane.b32.xlu0 %v11145_v56, %s10648_s26 }
 0x64d   : > { %1887 = vrot.lane.b32.xlu0 %v11145_v56, %s10649_s23 }
 0x651   : > { %1879 = vrot.lane.b32.xlu0 %v11138_v52, %s10650_s28 }
 0x654   : > { %1589 = vadd.xlane.f32.xlu1 %v1588_v7 }
 0x658   : > { %1352 = vadd.xlane.f32.xlu1 %v1351_v9 }
 0x65c   : > { %1592 = vadd.xlane.f32.xlu1 %v1591_v13 }
 0x66d   : > { %9873 = vrot.lane.b32.xlu1 %v11142_v54, %s10648_s26 }
 0x671   : > { %9878 = vrot.lane.b32.xlu1 %v11142_v54, %s10649_s23 }
 0x675   : > { %1877 = vrot.lane.b32.xlu1 %v11135_v51, %s10650_s28 }
 0x679   : > { %1881 = vrot.lane.b32.xlu1 %v11145_v56, %s10650_s28 }
 0x6ac   : > { %v1347_v14 = vpop.xlane.xlu1 %1346 }
 0x6ad   : > { %10039 = vrcp.f32 %v1347_v14 }
 0x6b0   : > { %v1365_v23 = vpop.permute.xlu1 %1364 }
 0x6b7   : > { %v10040_v21 = vpop.eup %10039 }
 0x6b8   : > { %v1587_v15 = vpop.xlane.xlu0 %1586  ;;  %v1357_v22 = vmul.f32 %v10040_v21, %v10028_v46 }
 0x6bc   : > { %v1350_v16 = vpop.xlane.xlu0 %1349 }
 0x6bd   : > { %10041 = vrcp.f32 %v1350_v16 }
 0x6c0   : > { %v9869_v17 = vpop.permute.xlu0 %9868 }
 0x6c1   : > { %v9871_v18 = vunpack.i.h.bf16 %v9869_v17  ;;  %v9870_v19 = vunpack.i.l.bf16 %v9869_v17 }
 0x6c3   : > { %v9549_v20 = vpack.c.bf16 %v9871_v18, %v9870_v19 }
 0x6c4   : > { %v1605_v37 = vpop.permute.xlu0 %1604 }
 0x6c5   : > { %9550 = vmatpush3.bf16.msra.mxu1 %v9549_v20 }
 0x6c6   : > { %8735 = vmatprep.subr.mxu1 %v10643_v63 }
 0x6c7   : > { %v10042_v24 = vpop.eup %10041 }
 0x6c8   : > { %v1358_v25 = vmul.f32 %v10042_v24, %v10032_v57  ;;  %v1888_v3 = vpop.permute.xlu0 %1887 }
 0x6c9   : > { %8736 = vmatpush3.msk.msra.mxu1 %vm1377_vm9, %v1365_v23 }
 0x6ca   : > { %8738 = vmatmul.mubr.msk.f32.vlgmr.msra.gmra.mrb[8].mxu1 %vm1325_vm7, %v1357_v22  ;;  %9555 = vmatprep.subr.bf16.mxu1 %v10641_v59 }
 0x6cb   : > { %8740 = vmatprep.mubr.msk.f32.mxu1 %vm10642_vm4, %v10643_v63 }
 0x6ce   : > { %8741 = vmatmul.mubr.msk.f32.gmra.mrb[10].mxu1 %vm1325_vm7, %v1358_v25 }
 0x6cf   : > { %8743 = vmatprep.mubr.msk.f32.mxu1 %vm10642_vm4, %v10643_v63 }
 0x6e1   : > { %v1590_v26 = vpop.xlane.xlu1 %1589 }
 0x6e5   : > { %v1353_v27 = vpop.xlane.xlu1 %1352 }
 0x6e6   : > { %10043 = vrcp.f32 %v1353_v27 }
 0x6e7   : > { %10045 = vrcp.f32 %v1587_v15 }
 0x6e8   : > { %10047 = vrcp.f32 %v1590_v26 }
 0x6e9   : > { %v1593_v28 = vpop.xlane.xlu1 %1592 }
 0x6ea   : > { %10049 = vrcp.f32 %v1593_v28 }
 0x6ed   : > { %v9874_v29 = vpop.permute.xlu1 %9873 }
 0x6ee   : > { %v9876_v30 = vunpack.i.h.bf16 %v9874_v29  ;;  %v9875_v31 = vunpack.i.l.bf16 %v9874_v29 }
 0x6f0   : > { %v10044_v32 = vpop.eup %10043  ;;  %v9556_v33 = vpack.c.bf16 %v9876_v30, %v9875_v31 }
 0x6f1   : > { %v1359_v34 = vmul.f32 %v10044_v32, %v10036_v8  ;;  %v10046_v35 = vpop.eup %10045  ;;  %v9879_v48 = vpop.permute.xlu1 %9878 }
 0x6f2   : > { %9557 = vmatpush3.bf16.msra.mxu1 %v9556_v33  ;;  %v1597_v36 = vmul.f32 %v10046_v35, %v11209_v53  ;;  %v10048_v38 = vpop.eup %10047  ;;  %v9881_v50 = vunpack.i.h.bf16 %v9879_v48  ;;  %v9880_v53 = vunpack.i.l.bf16 %v9879_v48 }
 0x6f3   : > { %8744 = vmatmul.mubr.msk.f32.gmra.mrb[12].mxu1 %vm1325_vm7, %v1359_v34  ;;  %8765 = vmatprep.subr.mxu1 %v10643_v63  ;;  %v1598_v39 = vmul.f32 %v10048_v38, %v11222_v6  ;;  %v1880_v6 = vpop.permute.xlu0 %1879 }
 0x6f4   : > { %8767 = vmatprep.mubr.msk.f32.mxu1 %vm10642_vm4, %v10643_v63  ;;  %v10050_v40 = vpop.eup %10049  ;;  %v9559_v58 = vpack.c.bf16 %v9881_v50, %v9880_v53 }
 0x6f5   : > { %v1599_v41 = vmul.f32 %v10050_v40, %v10038_v11  ;;  %v1878_v5 = vpop.permute.xlu1 %1877 }
 0x6f6   : > { %8766 = vmatpush3.msk.msra.mxu1 %vm1377_vm9, %v1605_v37 }
 0x6f7   : > { %8768 = vmatmul.mubr.msk.f32.vlgmr.msra.gmra.mrb[14].mxu1 %vm1325_vm7, %v1597_v36  ;;  %8787 = vmatprep.subr.mxu1 %v10643_v63 }
 0x6f8   : > { %8770 = vmatprep.mubr.msk.f32.mxu1 %vm10642_vm4, %v10643_v63  ;;  %8788 = vmatpush3.msra.mxu1 %v11267_v42 }
 0x6f9   : > { %9562 = vmatprep.subr.bf16.mxu1 %v10641_v59  ;;  %v1882_v7 = vpop.permute.xlu1 %1881 }
 0x6fb   : > { %8771 = vmatmul.mubr.msk.f32.gmra.mrb[16].mxu1 %vm1325_vm7, %v1598_v39 }
 0x6fc   : > { %8773 = vmatprep.mubr.msk.f32.mxu1 %vm10642_vm4, %v10643_v63 }
 0x6ff   : > { %8774 = vmatmul.mubr.msk.f32.gmra.mrb[18].mxu1 %vm1325_vm7, %v1599_v41 }
 0x700   : > { %8789 = vmatprep.mubr.msk.f32.mxu1 %vm10642_vm4, %v10643_v63 }
 0x79d   : > { %v1446_v44 = vpop.f32.mrb[8].mxu1 }
 0x79e   : > { %v8739_v45 = vpop.f32.mrb[9].mxu1  ;;  %8790 = vmatmul.mubr.msk.f32.vlgmr.msra.gmra.mrb[20].mxu1 %vm1229_vm5, %v1446_v44 }
 0x79f   : > { %8792 = vmatprep.mubr.msk.f32.mxu1 %vm10642_vm4, %v10643_v63 }
 0x7a1   : > { %v1451_v46 = vpop.f32.mrb[10].mxu1 }
 0x7a2   : > { %v8742_v47 = vpop.f32.mrb[11].mxu1  ;;  %8793 = vmatmul.mubr.msk.f32.gmra.mrb[22].mxu1 %vm1229_vm5, %v1451_v46 }
 0x7a3   : > { %8795 = vmatprep.mubr.msk.f32.mxu1 %vm10642_vm4, %v10643_v63 }
 0x7c6   : > { %v1456_v55 = vpop.f32.mrb[12].mxu1 }
 0x7c7   : > { %v8745_v57 = vpop.f32.mrb[13].mxu1  ;;  %8796 = vmatmul.mubr.msk.f32.gmra.mrb[24].mxu1 %vm1229_vm5, %v1456_v55 }
 0x7c8   : > { %8819 = vmatprep.mubr.msk.f32.mxu1 %vm10642_vm4, %v10643_v63 }
 0x7ca   : > { %v1685_v60 = vpop.f32.mrb[14].mxu1 }
 0x7cb   : > { %v8769_v61 = vpop.f32.mrb[15].mxu1  ;;  %8779 = vmatmul.mubr.msk.f32.vlgmr.msra.gmra.mrb[18].mxu0 %vm1229_vm5, %v1685_v60 }
 0x7cc   : > { %9561 = vmatpush3.bf16.xpose.msk.msra.mxu0 %vm11163_vm6, %v9559_v58  ;;  %8781 = vmatprep.mubr.msk.f32.mxu0 %vm10642_vm4, %v10643_v63 }
 0x7cd   : > { %8802 = vmatprep.subr.mxu0 %v10643_v63 }
 0x7ce   : > { %v1690_v62 = vpop.f32.mrb[16].mxu1 }
 0x7cf   : > { %v8772_v1 = vpop.f32.mrb[17].mxu1  ;;  %8782 = vmatmul.mubr.msk.f32.gmra.mrb[20].mxu0 %vm1229_vm5, %v1690_v62 }
 0x7d0   : > { %8784 = vmatprep.mubr.msk.f32.mxu0 %vm10642_vm4, %v10643_v63 }
 0x7d2   : > { %v1695_v2 = vpop.f32.mrb[18].mxu1 }
 0x7d3   : > { %v8775_v4 = vpop.f32.mrb[19].mxu1  ;;  %8785 = vmatmul.mubr.msk.f32.gmra.mrb[22].mxu0 %vm1229_vm5, %v1695_v2 }
 0x7d4   : > { %8803 = vmatpush3.xpose.msk.msra.mxu0 %vm1229_vm5, %v1888_v3  ;;  %8804 = vmatprep.mubr.msk.f32.mxu0 %vm10642_vm4, %v10643_v63 }
 0x7d5   : > { %8828 = vmatprep.subr.mxu0 %v10643_v63 }
 0x7d7   : > { %8805 = vmatmul.mubr.msk.f32.vlgmr.msra.gmra.mrb[24].mxu0 %vm1229_vm5, %v1878_v5 }
 0x7d8   : > { %8807 = vmatprep.mubr.msk.f32.mxu0 %vm10642_vm4, %v10643_v63 }
 0x7db   : > { %8808 = vmatmul.mubr.msk.f32.gmra.mrb[26].mxu0 %vm1229_vm5, %v1880_v6 }
 0x7dc   : > { %8810 = vmatprep.mubr.msk.f32.mxu0 %vm10642_vm4, %v10643_v63 }
 0x7df   : > { %8811 = vmatmul.mubr.msk.f32.gmra.mrb[28].mxu0 %vm1229_vm5, %v1882_v7 }
 0x7e0   : > { %8830 = vmatprep.mubr.msk.f32.mxu0 %vm10642_vm4, %v10643_v63 }
 0x871   : > { %v1863_v8 = vpop.f32.mrb[20].mxu1 }
 0x872   : > { %v8791_v9 = vpop.f32.mrb[21].mxu1 }
 0x875   : > { %v1868_v11 = vpop.f32.mrb[22].mxu1 }
 0x876   : > { %v8794_v13 = vpop.f32.mrb[23].mxu1 }
 0x89a   : > { %v1873_v14 = vpop.f32.mrb[24].mxu1 }
 0x89b   : > { %v8797_v15 = vpop.f32.mrb[25].mxu1 }
 0x89e   : > { %v1774_v16 = vpop.f32.mrb[18].mxu0 }
 0x89f   : > { %v11310_v17 = vadd.f32 %v1863_v8, %v1774_v16  ;;  %v8780_v18 = vpop.f32.mrb[19].mxu0 }
 0x8a2   : > { %v1779_v19 = vpop.f32.mrb[20].mxu0 }
 0x8a3   : > { %v11312_v20 = vadd.f32 %v1868_v11, %v1779_v19  ;;  %v8783_v21 = vpop.f32.mrb[21].mxu0 }
 0x8a6   : > { %v1784_v22 = vpop.f32.mrb[22].mxu0 }
 0x8a7   : > { %v11314_v23 = vadd.f32 %v1873_v14, %v1784_v22  ;;  %v8786_v24 = vpop.f32.mrb[23].mxu0  ;;  %v11365_v22 = vld [vmem:[%s12776_s9 + $0x10] sm:$0xff] }
 0x8a8   : > { %8829 = vmatpush3.msra.mxu0 %v11365_v22 }
 0x8a9   : > { %9569 = vmatprep.subr.bf16.mxu0 %v10641_v59 }
 0x8aa   : > { %v1967_v25 = vpop.f32.mrb[24].mxu0 }
 0x8ab   : > { %v1981_v26 = vmul.f32 0.35355338, %v1967_v25  ;;  %v8806_v27 = vpop.f32.mrb[25].mxu0 }
 0x8ad   : > { %v1984_v28 = vsel %vm1325_vm7, %v1981_v26, -inf }
 0x8ae   : > { %1985 = vmax.xlane.f32.xlu0 %v1984_v28  ;;  %v1972_v29 = vpop.f32.mrb[26].mxu0 }
 0x8af   : > { %v1982_v30 = vmul.f32 0.35355338, %v1972_v29  ;;  %v8809_v31 = vpop.f32.mrb[27].mxu0 }
 0x8b1   : > { %v1987_v32 = vsel %vm1325_vm7, %v1982_v30, -inf }
 0x8b2   : > { %1988 = vmax.xlane.f32.xlu1 %v1987_v32  ;;  %v1977_v33 = vpop.f32.mrb[28].mxu0 }
 0x8b3   : > { %v1983_v34 = vmul.f32 0.35355338, %v1977_v33  ;;  %v8812_v35 = vpop.f32.mrb[29].mxu0 }
 0x8b5   : > { %v1990_v36 = vsel %vm1332_vm8, %v1983_v34, -inf }
 0x8b6   : > { %1991 = vmax.xlane.f32.xlu0 %v1990_v36 }
 0x8c3   : > { %2021 = vrot.lane.b32.xlu1 %v11145_v56, %s10651_s0 }
 0x8c7   : > { %9888 = vrot.lane.b32.xlu1 %v11142_v54, %s12818_s16 }
 0x8cb   : > { %2218 = vrot.lane.b32.xlu1 %v11145_v56, %s12818_s16 }
 0x93b   : > { %v1986_v37 = vpop.xlane.xlu0 %1985 }
 0x93c   : > { %v1993_v38 = vsub.f32 %v1981_v26, %v1986_v37 }
 0x93e   : > { %v1996_v39 = vmul.f32 1.442695, %v1993_v38 }
 0x93f   : > { %v1989_v40 = vpop.xlane.xlu1 %1988 }
 0x940   : > { %10051 = vpow2.f32 %v1996_v39  ;;  %v1994_v41 = vsub.f32 %v1982_v30, %v1989_v40 }
 0x942   : > { %v1998_v44 = vmul.f32 1.442695, %v1994_v41 }
 0x943   : > { %v1992_v45 = vpop.xlane.xlu0 %1991  ;;  %v2022_v60 = vpop.permute.xlu1 %2021 }
 0x944   : > { %10053 = vpow2.f32 %v1998_v44  ;;  %v1995_v46 = vsub.f32 %v1983_v34, %v1992_v45 }
 0x946   : > { %v2000_v47 = vmul.f32 1.442695, %v1995_v46 }
 0x947   : > { %v9889_v61 = vpop.permute.xlu1 %9888 }
 0x948   : > { %10055 = vpow2.f32 %v2000_v47  ;;  %v9891_v9 = vunpack.i.h.bf16 %v9889_v61  ;;  %v9890_v11 = vunpack.i.l.bf16 %v9889_v61 }
 0x94a   : > { %v10052_v48 = vpop.eup %10051  ;;  %v9566_v15 = vpack.c.bf16 %v9891_v9, %v9890_v11 }
 0x94b   : > { %v2002_v50 = vsel %vm1325_vm7, %v10052_v48, 0.0  ;;  %v2219_v1 = vpop.permute.xlu1 %2218 }
 0x94c   : > { %2003 = vadd.xlane.f32.xlu0 %v2002_v50 }
 0x94e   : > { %v10054_v53 = vpop.eup %10053 }
 0x94f   : > { %v2005_v55 = vsel %vm1325_vm7, %v10054_v53, 0.0 }
 0x950   : > { %2006 = vadd.xlane.f32.xlu0 %v2005_v55 }
 0x952   : > { %v10056_v57 = vpop.eup %10055 }
 0x953   : > { %v2008_v58 = vsel %vm1332_vm8, %v10056_v57, 0.0 }
 0x954   : > { %2009 = vadd.xlane.f32.xlu1 %v2008_v58 }
 0x965   : > { %2210 = vrot.lane.b32.xlu1 %v11138_v52, %s12816_s20 }
 0x966   : > { %9883 = vrot.lane.b32.xlu0 %v11142_v54, %s10651_s0 }
 0x96a   : > { %2208 = vrot.lane.b32.xlu0 %v11135_v51, %s12816_s20 }
 0x96e   : > { %2212 = vrot.lane.b32.xlu0 %v11145_v56, %s12816_s20 }
 0x9d9   : > { %v2004_v62 = vpop.xlane.xlu0 %2003 }
 0x9da   : > { %10057 = vrcp.f32 %v2004_v62 }
 0x9dd   : > { %v2007_v2 = vpop.xlane.xlu0 %2006 }
 0x9de   : > { %10059 = vrcp.f32 %v2007_v2 }
 0x9e1   : > { %v2010_v3 = vpop.xlane.xlu1 %2009  ;;  %v9884_v4 = vpop.permute.xlu0 %9883 }
 0x9e2   : > { %v9886_v5 = vunpack.i.h.bf16 %v9884_v4  ;;  %v9885_v52 = vunpack.i.l.bf16 %v9884_v4  ;;  %10061 = vrcp.f32 %v2010_v3 }
 0x9e4   : > { %v9563_v6 = vpack.c.bf16 %v9886_v5, %v9885_v52  ;;  %v10058_v7 = vpop.eup %10057  ;;  %v1217_v52 = vadd.f32 %v11132_v49, %v11200_v12 }
 0x9e5   : > { %v2014_v51 = vmul.f32 %v10058_v7, %v10052_v48  ;;  %v2209_v18 = vpop.permute.xlu0 %2208  ;;  %v2211_v19 = vpop.permute.xlu1 %2210 }
 0x9e6   : > { %9564 = vmatpush3.bf16.msra.mxu1 %v9563_v6  ;;  %v1212_v6 = vadd.f32 %v11132_v49, %v11198_v10  ;;  %v11391_v7 = vrot.slane %v1217_v52, 1 }
 0x9e7   : > { %8817 = vmatprep.subr.mxu1 %v10643_v63 }
 0x9e8   : > { %v10060_v8 = vpop.eup %10059 }
 0x9e9   : > { %v2015_v13 = vmul.f32 %v10060_v8, %v10054_v53  ;;  %v2213_v21 = vpop.permute.xlu0 %2212  ;;  %v2560_v8 = vrot.slane %v11145_v56, 1 }
 0x9ea   : > { %8818 = vmatpush3.msk.msra.mxu1 %vm1377_vm9, %v2022_v60 }
 0x9eb   : > { %8820 = vmatmul.mubr.msk.f32.vlgmr.msra.gmra.mrb[26].mxu1 %vm1325_vm7, %v2014_v51  ;;  %9565 = vmatprep.subr.bf16.mxu1 %v10641_v59  ;;  %v2561_v51 = vrot.slane %v1212_v6, 1 }
 0x9ec   : > { %8822 = vmatprep.mubr.msk.f32.mxu1 %vm10642_vm4, %v10643_v63  ;;  %v10062_v14 = vpop.eup %10061 }
 0x9ed   : > { %v2016_v16 = vmul.f32 %v10062_v14, %v10056_v57  ;;  %v11396_v9 = vsel %vm2559_vm10, %v2561_v51, %v11391_v7  ;;  %v11399_v11 = vsel %vm2559_vm10, %v2560_v8, %v2561_v51 }
 0x9ee   : > { %v11403_v12 = vpack.i.bf16 %v11396_v9, %v11399_v11 }
 0x9ef   : > { %8823 = vmatmul.mubr.msk.f32.gmra.mrb[28].mxu1 %vm1325_vm7, %v2015_v13 }
 0x9f0   : > { %8825 = vmatprep.mubr.msk.f32.mxu1 %vm10642_vm4, %v10643_v63 }
 0x9f1   : > { %9568 = vmatpush3.bf16.xpose.msk.msra.mxu1 %vm11163_vm6, %v9566_v15 }
 0x9f2   : > { %8843 = vmatprep.subr.mxu1 %v10643_v63 }
 0x9f3   : > { %8826 = vmatmul.mubr.msk.f32.gmra.mrb[30].mxu1 %vm1325_vm7, %v2016_v16 }
 0x9f4   : > { %8845 = vmatprep.mubr.msk.f32.mxu1 %vm10642_vm4, %v10643_v63 }
 0x9f9   : > { %8844 = vmatpush3.xpose.msk.msra.mxu1 %vm1229_vm5, %v2219_v1 }
 0x9fa   : > { %8869 = vmatprep.subr.mxu1 %v10643_v63 }
 0x9fc   : > { %8846 = vmatmul.mubr.msk.f32.vlgmr.msra.gmra.mrb[32].mxu1 %vm1229_vm5, %v2209_v18 }
 0x9fd   : > { %8848 = vmatprep.mubr.msk.f32.mxu1 %vm10642_vm4, %v10643_v63 }
 0xa00   : > { %8849 = vmatmul.mubr.msk.f32.gmra.mrb[34].mxu1 %vm1229_vm5, %v2211_v19 }
 0xa01   : > { %8851 = vmatprep.mubr.msk.f32.mxu1 %vm10642_vm4, %v10643_v63 }
 0xa04   : > { %8852 = vmatmul.mubr.msk.f32.gmra.mrb[36].mxu1 %vm1229_vm5, %v2213_v21 }
 0xa05   : > { %8871 = vmatprep.mubr.msk.f32.mxu1 %vm10642_vm4, %v10643_v63 }
 0xabe   : > { %v2102_v24 = vpop.f32.mrb[26].mxu1 }
 0xabf   : > { %v8821_v25 = vpop.f32.mrb[27].mxu1  ;;  %8831 = vmatmul.mubr.msk.f32.vlgmr.msra.gmra.mrb[30].mxu0 %vm1229_vm5, %v2102_v24 }
 0xac0   : > { %8833 = vmatprep.mubr.msk.f32.mxu0 %vm10642_vm4, %v10643_v63 }
 0xac2   : > { %v2107_v26 = vpop.f32.mrb[28].mxu1 }
 0xac3   : > { %v8824_v27 = vpop.f32.mrb[29].mxu1  ;;  %8834 = vmatmul.mubr.msk.f32.gmra.mrb[32].mxu0 %vm1229_vm5, %v2107_v26 }
 0xac4   : > { %8836 = vmatprep.mubr.msk.f32.mxu0 %vm10642_vm4, %v10643_v63 }
 0xac6   : > { %v2112_v28 = vpop.f32.mrb[30].mxu1 }
 0xac7   : > { %v8827_v29 = vpop.f32.mrb[31].mxu1  ;;  %8837 = vmatmul.mubr.msk.f32.gmra.mrb[34].mxu0 %vm1229_vm5, %v2112_v28 }
 0xac8   : > { %8860 = vmatprep.mubr.msk.f32.mxu0 %vm10642_vm4, %v10643_v63 }
 0xacf   : > { %v2298_v30 = vpop.f32.mrb[32].mxu1 }
 0xad0   : > { %v2312_v31 = vmul.f32 0.35355338, %v2298_v30  ;;  %v8847_v32 = vpop.f32.mrb[33].mxu1 }
 0xad2   : > { %v2315_v33 = vsel %vm1325_vm7, %v2312_v31, -inf }
 0xad3   : > { %2316 = vmax.xlane.f32.xlu1 %v2315_v33  ;;  %v2303_v34 = vpop.f32.mrb[34].mxu1 }
 0xad4   : > { %v2313_v35 = vmul.f32 0.35355338, %v2303_v34  ;;  %v8850_v36 = vpop.f32.mrb[35].mxu1 }
 0xad6   : > { %v2318_v37 = vsel %vm1325_vm7, %v2313_v35, -inf }
 0xad7   : > { %2319 = vmax.xlane.f32.xlu0 %v2318_v37  ;;  %v2308_v38 = vpop.f32.mrb[36].mxu1 }
 0xad8   : > { %v2314_v39 = vmul.f32 0.35355338, %v2308_v38  ;;  %v8853_v40 = vpop.f32.mrb[37].mxu1 }
 0xada   : > { %v2321_v41 = vsel %vm1332_vm8, %v2314_v39, -inf }
 0xadb   : > { %2322 = vmax.xlane.f32.xlu0 %v2321_v41 }
 0xae4   : > { %9893 = vrot.lane.b32.xlu1 %v11142_v54, %s12814_s25 }
 0xb60   : > { %v2317_v44 = vpop.xlane.xlu1 %2316 }
 0xb61   : > { %v2324_v45 = vsub.f32 %v2312_v31, %v2317_v44 }
 0xb63   : > { %v2327_v46 = vmul.f32 1.442695, %v2324_v45  ;;  %v11477_v45 = vld [vmem:[%s12776_s9 + $0x18] sm:$0xff] }
 0xb64   : > { %v9894_v47 = vpop.permute.xlu1 %9893  ;;  %v2320_v48 = vpop.xlane.xlu0 %2319  ;;  %8870 = vmatpush3.msra.mxu1 %v11477_v45 }
 0xb65   : > { %10063 = vpow2.f32 %v2327_v46  ;;  %v9896_v50 = vunpack.i.h.bf16 %v9894_v47  ;;  %v9895_v53 = vunpack.i.l.bf16 %v9894_v47  ;;  %v2325_v55 = vsub.f32 %v2313_v35, %v2320_v48  ;;  %9576 = vmatprep.subr.bf16.mxu1 %v10641_v59 }
 0xb67   : > { %v9570_v57 = vpack.c.bf16 %v9896_v50, %v9895_v53  ;;  %v2329_v58 = vmul.f32 1.442695, %v2325_v55 }
 0xb68   : > { %v2323_v60 = vpop.xlane.xlu0 %2322 }
 0xb69   : > { %10065 = vpow2.f32 %v2329_v58  ;;  %v2326_v61 = vsub.f32 %v2314_v39, %v2323_v60  ;;  %9571 = vmatpush3.bf16.msra.mxu0 %v9570_v57 }
 0xb6a   : > { %8858 = vmatprep.subr.mxu0 %v10643_v63 }
 0xb6b   : > { %v2331_v62 = vmul.f32 1.442695, %v2326_v61 }
 0xb6d   : > { %10067 = vpow2.f32 %v2331_v62 }
 0xb6f   : > { %v10064_v54 = vpop.eup %10063 }
 0xb70   : > { %v2333_v1 = vsel %vm1325_vm7, %v10064_v54, 0.0 }
 0xb71   : > { %2334 = vadd.xlane.f32.xlu0 %v2333_v1 }
 0xb73   : > { %v10066_v2 = vpop.eup %10065 }
 0xb74   : > { %v2336_v3 = vsel %vm1325_vm7, %v10066_v2, 0.0 }
 0xb75   : > { %2337 = vadd.xlane.f32.xlu1 %v2336_v3 }
 0xb77   : > { %v10068_v4 = vpop.eup %10067 }
 0xb78   : > { %v2339_v5 = vsel %vm1332_vm8, %v10068_v4, 0.0 }
 0xb79   : > { %2340 = vadd.xlane.f32.xlu0 %v2339_v5 }
 0xb86   : > { %9898 = vrot.lane.b32.xlu1 %v11403_v12, %s10644_s5 }
 0xb8a   : > { %2569 = vrot.lane.b32.xlu1 %v11391_v7, %s10644_s5 }
 0xb8e   : > { %9903 = vrot.lane.b32.xlu1 %v11403_v12, %s10646_s17 }
 0xb8f   : > { %2352 = vrot.lane.b32.xlu0 %v11145_v56, %s12814_s25 }
 0xb92   : > { %v2191_v49 = vpop.f32.mrb[30].mxu0  ;;  %2798 = vrot.lane.b32.xlu1 %v11399_v11, %s10645_s27 }
 0xb93   : > { %v11416_v10 = vadd.f32 %v2191_v49, %v11310_v17  ;;  %v8832_v13 = vpop.f32.mrb[31].mxu0  ;;  %2808 = vrot.lane.b32.xlu0 %v11391_v7, %s10646_s17 }
 0xb96   : > { %v2196_v14 = vpop.f32.mrb[32].mxu0  ;;  %2802 = vrot.lane.b32.xlu1 %v11391_v7, %s10645_s27 }
 0xb97   : > { %v11423_v15 = vadd.f32 %v2196_v14, %v11312_v20  ;;  %v8835_v16 = vpop.f32.mrb[33].mxu0  ;;  %2800 = vrot.lane.b32.xlu0 %v11396_v9, %s10645_s27 }
 0xb9a   : > { %v2201_v56 = vpop.f32.mrb[34].mxu0 }
 0xb9b   : > { %v11428_v18 = vadd.f32 %v2201_v56, %v11314_v23  ;;  %v8838_v17 = vpop.f32.mrb[35].mxu0 }
 0xbfe   : > { %v2335_v19 = vpop.xlane.xlu0 %2334 }
 0xbff   : > { %10069 = vrcp.f32 %v2335_v19 }
 0xc02   : > { %v2338_v21 = vpop.xlane.xlu1 %2337 }
 0xc03   : > { %10071 = vrcp.f32 %v2338_v21 }
 0xc06   : > { %v2341_v24 = vpop.xlane.xlu0 %2340  ;;  %v9899_v26 = vpop.permute.xlu1 %9898 }
 0xc07   : > { %10073 = vrcp.f32 %v2341_v24  ;;  %v9901_v28 = vunpack.i.h.bf16 %v9899_v26  ;;  %v9900_v29 = vunpack.i.l.bf16 %v9899_v26 }
 0xc09   : > { %v10070_v25 = vpop.eup %10069  ;;  %v9573_v32 = vpack.c.bf16 %v9901_v28, %v9900_v29 }
 0xc0a   : > { %v2345_v27 = vmul.f32 %v10070_v25, %v10064_v54  ;;  %v2353_v20 = vpop.permute.xlu0 %2352  ;;  %v2570_v31 = vpop.permute.xlu1 %2569 }
 0xc0b   : > { %8859 = vmatpush3.msk.msra.mxu0 %vm1377_vm9, %v2353_v20 }
 0xc0c   : > { %8861 = vmatmul.mubr.msk.f32.vlgmr.msra.gmra.mrb[36].mxu0 %vm1325_vm7, %v2345_v27  ;;  %9572 = vmatprep.subr.bf16.mxu0 %v10641_v59 }
 0xc0d   : > { %v10072_v23 = vpop.eup %10071  ;;  %8863 = vmatprep.mubr.msk.f32.mxu0 %vm10642_vm4, %v10643_v63 }
 0xc0e   : > { %v2346_v30 = vmul.f32 %v10072_v23, %v10066_v2  ;;  %v9904_v35 = vpop.permute.xlu1 %9903  ;;  %v2809_v39 = vpop.permute.xlu0 %2808 }
 0xc0f   : > { %v9906_v36 = vunpack.i.h.bf16 %v9904_v35  ;;  %v9905_v37 = vunpack.i.l.bf16 %v9904_v35 }
 0xc10   : > { %8864 = vmatmul.mubr.msk.f32.gmra.mrb[38].mxu0 %vm1325_vm7, %v2346_v30 }
 0xc11   : > { %v10074_v33 = vpop.eup %10073  ;;  %8866 = vmatprep.mubr.msk.f32.mxu0 %vm10642_vm4, %v10643_v63  ;;  %v9580_v38 = vpack.c.bf16 %v9906_v36, %v9905_v37 }
 0xc12   : > { %9575 = vmatpush3.bf16.xpose.msk.msra.mxu0 %vm11163_vm6, %v9573_v32  ;;  %v2347_v34 = vmul.f32 %v10074_v33, %v10068_v4  ;;  %v2799_v40 = vpop.permute.xlu1 %2798  ;;  %v2801_v41 = vpop.permute.xlu0 %2800 }
 0xc13   : > { %8884 = vmatprep.subr.mxu0 %v10643_v63 }
 0xc14   : > { %8867 = vmatmul.mubr.msk.f32.gmra.mrb[40].mxu0 %vm1325_vm7, %v2347_v34 }
 0xc15   : > { %8886 = vmatprep.mubr.msk.f32.mxu0 %vm10642_vm4, %v10643_v63 }
 0xc16   : > { %v2803_v44 = vpop.permute.xlu1 %2802 }
 0xc1a   : > { %8885 = vmatpush3.xpose.msk.msra.mxu0 %vm1229_vm5, %v2570_v31 }
 0xc1b   : > { %9579 = vmatprep.subr.bf16.mxu0 %v10641_v59 }
 0xc1d   : > { %8887 = vmatmul.mubr.msk.f32.vlgmr.msra.gmra.mrb[42].mxu0 %vm1229_vm5, %v11399_v11 }
 0xc1e   : > { %9582 = vmatpush3.bf16.xpose.msk.msra.mxu0 %vm11163_vm6, %v9580_v38  ;;  %8889 = vmatprep.mubr.msk.f32.mxu0 %vm10642_vm4, %v10643_v63 }
 0xc1f   : > { %8914 = vmatprep.subr.mxu0 %v10643_v63 }
 0xc21   : > { %8890 = vmatmul.mubr.msk.f32.gmra.mrb[44].mxu0 %vm1229_vm5, %v11396_v9 }
 0xc22   : > { %8892 = vmatprep.mubr.msk.f32.mxu0 %vm10642_vm4, %v10643_v63 }
 0xc25   : > { %8893 = vmatmul.mubr.msk.f32.gmra.mrb[46].mxu0 %vm1229_vm5, %v11391_v7 }
 0xc26   : > { %8915 = vmatpush3.xpose.msk.msra.mxu0 %vm1229_vm5, %v2809_v39  ;;  %8916 = vmatprep.mubr.msk.f32.mxu0 %vm10642_vm4, %v10643_v63 }
 0xc27   : > { %8940 = vmatprep.subr.mxu0 %v10643_v63 }
 0xc29   : > { %8917 = vmatmul.mubr.msk.f32.vlgmr.msra.gmra.mrb[48].mxu0 %vm1229_vm5, %v2799_v40 }
 0xc2a   : > { %8919 = vmatprep.mubr.msk.f32.mxu0 %vm10642_vm4, %v10643_v63  ;;  %8941 = vmatpush3.msra.mxu0 %v11274_v43 }
 0xc2b   : > { %9586 = vmatprep.subr.bf16.mxu0 %v10641_v59 }
 0xc2d   : > { %8920 = vmatmul.mubr.msk.f32.gmra.mrb[50].mxu0 %vm1229_vm5, %v2801_v41 }
 0xc2e   : > { %8922 = vmatprep.mubr.msk.f32.mxu0 %vm10642_vm4, %v10643_v63 }
 0xc31   : > { %8923 = vmatmul.mubr.msk.f32.gmra.mrb[52].mxu0 %vm1229_vm5, %v2803_v44 }
 0xc32   : > { %8942 = vmatprep.mubr.msk.f32.mxu0 %vm10642_vm4, %v10643_v63 }
 0xcdf   : > { %v2433_v43 = vpop.f32.mrb[36].mxu0 }
 0xce0   : > { %v8862_v46 = vpop.f32.mrb[37].mxu0  ;;  %8872 = vmatmul.mubr.msk.f32.vlgmr.msra.gmra.mrb[38].mxu1 %vm1229_vm5, %v2433_v43 }
 0xce1   : > { %8874 = vmatprep.mubr.msk.f32.mxu1 %vm10642_vm4, %v10643_v63 }
 0xce3   : > { %v2438_v47 = vpop.f32.mrb[38].mxu0 }
 0xce4   : > { %v8865_v48 = vpop.f32.mrb[39].mxu0  ;;  %8875 = vmatmul.mubr.msk.f32.gmra.mrb[40].mxu1 %vm1229_vm5, %v2438_v47 }
 0xce5   : > { %8877 = vmatprep.mubr.msk.f32.mxu1 %vm10642_vm4, %v10643_v63 }
 0xce7   : > { %v2443_v50 = vpop.f32.mrb[40].mxu0 }
 0xce8   : > { %v8868_v53 = vpop.f32.mrb[41].mxu0  ;;  %8878 = vmatmul.mubr.msk.f32.gmra.mrb[42].mxu1 %vm1229_vm5, %v2443_v50 }
 0xce9   : > { %8901 = vmatprep.mubr.msk.f32.mxu1 %vm10642_vm4, %v10643_v63 }
 0xcf0   : > { %v2649_v55 = vpop.f32.mrb[42].mxu0 }
 0xcf1   : > { %v2663_v57 = vmul.f32 0.35355338, %v2649_v55  ;;  %v8888_v58 = vpop.f32.mrb[43].mxu0 }
 0xcf3   : > { %v2666_v60 = vsel %vm1325_vm7, %v2663_v57, -inf }
 0xcf4   : > { %2667 = vmax.xlane.f32.xlu0 %v2666_v60  ;;  %v2654_v61 = vpop.f32.mrb[44].mxu0 }
 0xcf5   : > { %v2664_v62 = vmul.f32 0.35355338, %v2654_v61  ;;  %v8891_v54 = vpop.f32.mrb[45].mxu0 }
 0xcf7   : > { %v2669_v1 = vsel %vm1325_vm7, %v2664_v62, -inf }
 0xcf8   : > { %2670 = vmax.xlane.f32.xlu1 %v2669_v1  ;;  %v2659_v2 = vpop.f32.mrb[46].mxu0 }
 0xcf9   : > { %v2665_v3 = vmul.f32 0.35355338, %v2659_v2  ;;  %v8894_v4 = vpop.f32.mrb[47].mxu0 }
 0xcfa   : > { %v11528_v4 = vld [vmem:[#allocation12] ss:$0 sm:$0xff] }
 0xcfb   : > { %v2672_v5 = vsel %vm1332_vm8, %v2665_v3, -inf }
 0xcfc   : > { %2673 = vmax.xlane.f32.xlu0 %v2672_v5  ;;  %v2888_v52 = vpop.f32.mrb[48].mxu0  ;;  %v2539_v5 = vld [vmem:[#allocation2] sm:$0xff] }
 0xcfd   : > { %v2902_v6 = vmul.f32 0.35355338, %v2888_v52  ;;  %v8918_v51 = vpop.f32.mrb[49].mxu0 }
 0xcff   : > { %v2905_v8 = vsel %vm1325_vm7, %v2902_v6, -inf }
 0xd00   : > { %2906 = vmax.xlane.f32.xlu0 %v2905_v8  ;;  %v2893_v49 = vpop.f32.mrb[50].mxu0 }
 0xd01   : > { %v2903_v13 = vmul.f32 0.35355338, %v2893_v49  ;;  %v8921_v14 = vpop.f32.mrb[51].mxu0 }
 0xd03   : > { %v2908_v16 = vsel %vm1325_vm7, %v2903_v13, -inf }
 0xd04   : > { %2909 = vmax.xlane.f32.xlu0 %v2908_v16  ;;  %v2898_v56 = vpop.f32.mrb[52].mxu0 }
 0xd05   : > { %v2904_v17 = vmul.f32 0.35355338, %v2898_v56  ;;  %v8924_v19 = vpop.f32.mrb[53].mxu0 }
 0xd06   : > { %v2541_v19 = vld [vmem:[#allocation2 + $0x10] sm:$0x1] }
 0xd07   : > { %v2911_v21 = vsel %vm1332_vm8, %v2904_v17, -inf }
 0xd08   : > { %2912 = vmax.xlane.f32.xlu1 %v2911_v21 }
 0xd19   : > { %9908 = vrot.lane.b32.xlu1 %v11403_v12, %s10647_s24 }
 0xd81   : > { %v2668_v24 = vpop.xlane.xlu0 %2667 }
 0xd82   : > { %v2675_v25 = vsub.f32 %v2663_v57, %v2668_v24 }
 0xd84   : > { %v2678_v26 = vmul.f32 1.442695, %v2675_v25 }
 0xd85   : > { %v2671_v27 = vpop.xlane.xlu1 %2670 }
 0xd86   : > { %10075 = vpow2.f32 %v2678_v26  ;;  %v2676_v20 = vsub.f32 %v2664_v62, %v2671_v27 }
 0xd88   : > { %v2680_v28 = vmul.f32 1.442695, %v2676_v20 }
 0xd89   : > { %v2674_v29 = vpop.xlane.xlu0 %2673 }
 0xd8a   : > { %10077 = vpow2.f32 %v2680_v28  ;;  %v2677_v23 = vsub.f32 %v2665_v3, %v2674_v29 }
 0xd8c   : > { %v2682_v30 = vmul.f32 1.442695, %v2677_v23 }
 0xd8d   : > { %v2907_v31 = vpop.xlane.xlu0 %2906 }
 0xd8e   : > { %10079 = vpow2.f32 %v2682_v30  ;;  %v2914_v32 = vsub.f32 %v2902_v6, %v2907_v31 }
 0xd90   : > { %v11498_v33 = vpop.eup %10075  ;;  %v2917_v34 = vmul.f32 1.442695, %v2914_v32 }
 0xd91   : > { %v2910_v35 = vpop.xlane.xlu0 %2909  ;;  %v2684_v36 = vsel %vm1325_vm7, %v11498_v33, 0.0 }
 0xd92   : > { %10081 = vpow2.f32 %v2917_v34  ;;  %v2915_v37 = vsub.f32 %v2903_v13, %v2910_v35  ;;  %2685 = vadd.xlane.f32.xlu0 %v2684_v36  ;;  %v2540_v13 = vld [vmem:[#allocation2 + $0x8] sm:$0xff] }
 0xd94   : > { %v11502_v38 = vpop.eup %10077  ;;  %v2919_v39 = vmul.f32 1.442695, %v2915_v37 }
 0xd95   : > { %v2913_v40 = vpop.xlane.xlu1 %2912  ;;  %v2687_v41 = vsel %vm1325_vm7, %v11502_v38, 0.0 }
 0xd96   : > { %10083 = vpow2.f32 %v2919_v39  ;;  %v2916_v44 = vsub.f32 %v2904_v17, %v2913_v40  ;;  %2688 = vadd.xlane.f32.xlu1 %v2687_v41 }
 0xd98   : > { %v11506_v43 = vpop.eup %10079  ;;  %v2921_v46 = vmul.f32 1.442695, %v2916_v44 }
 0xd99   : > { %v9909_v47 = vpop.permute.xlu1 %9908  ;;  %v2690_v48 = vsel %vm1332_vm8, %v11506_v43, 0.0 }
 0xd9a   : > { %10085 = vpow2.f32 %v2921_v46  ;;  %v9911_v50 = vunpack.i.h.bf16 %v9909_v47  ;;  %v9910_v53 = vunpack.i.l.bf16 %v9909_v47  ;;  %2691 = vadd.xlane.f32.xlu0 %v2690_v48 }
 0xd9c   : > { %v11510_v55 = vpop.eup %10081  ;;  %v9577_v57 = vpack.c.bf16 %v9911_v50, %v9910_v53 }
 0xd9d   : > { %v2923_v58 = vsel %vm1325_vm7, %v11510_v55, 0.0 }
 0xd9e   : > { %9578 = vmatpush3.bf16.msra.mxu1 %v9577_v57  ;;  %2924 = vadd.xlane.f32.xlu1 %v2923_v58 }
 0xd9f   : > { %8899 = vmatprep.subr.mxu1 %v10643_v63 }
 0xda0   : > { %v11515_v60 = vpop.eup %10083 }
 0xda1   : > { %v2926_v61 = vsel %vm1325_vm7, %v11515_v60, 0.0 }
 0xda2   : > { %2927 = vadd.xlane.f32.xlu0 %v2926_v61 }
 0xda4   : > { %v11519_v62 = vpop.eup %10085 }
 0xda5   : > { %v2929_v54 = vsel %vm1332_vm8, %v11519_v62, 0.0 }
 0xda6   : > { %2930 = vadd.xlane.f32.xlu0 %v2929_v54 }
 0xdaf   : > { %9913 = vrot.lane.b32.xlu1 %v11403_v12, %s10648_s26 }
 0xdb3   : > { %2942 = vrot.lane.b32.xlu1 %v11391_v7, %s10648_s26  ;;  %v2522_v1 = vpop.f32.mrb[38].mxu1 }
 0xdb4   : > { %v2536_v2 = vadd.f32 %v2522_v1, %v11416_v10  ;;  %v8873_v3 = vpop.f32.mrb[39].mxu1 }
 0xdb6   : > { %v2542_v52 = vadd.f32 %v2539_v5, %v2536_v2 }
 0xdb7   : > { %9918 = vrot.lane.b32.xlu1 %v11403_v12, %s10649_s23  ;;  %v2527_v6 = vpop.f32.mrb[40].mxu1 }
 0xdb8   : > { %v2551_v51 = vadd.f32 %v11528_v4, %v2542_v52  ;;  %v2537_v8 = vadd.f32 %v2527_v6, %v11423_v15  ;;  %v8876_v49 = vpop.f32.mrb[41].mxu1 }
 0xdba   : > { %2554 = vst.msk [vmem:[#allocation2] sm:$0xff] %vm895_vm2, %v2551_v51  ;;  %v2543_v14 = vadd.f32 %v2540_v13, %v2537_v8 }
 0xdbb   : > { %3225 = vrot.lane.b32.xlu1 %v11391_v7, %s10649_s23  ;;  %v2532_v10 = vpop.f32.mrb[42].mxu1 }
 0xdbc   : > { %v2552_v16 = vadd.f32 %v11528_v4, %v2543_v14  ;;  %v2538_v56 = vadd.f32 %v2532_v10, %v11428_v18  ;;  %2703 = vrot.lane.b32.xlu0 %v11391_v7, %s10647_s24  ;;  %v8879_v17 = vpop.f32.mrb[43].mxu1 }
 0xdbe   : > { %2555 = vst.msk [vmem:[#allocation2 + $0x8] sm:$0xff] %vm895_vm2, %v2552_v16  ;;  %v2544_v15 = vadd.f32 %v2541_v19, %v2538_v56 }
 0xdbf   : > { %3217 = vrot.lane.b32.xlu1 %v11396_v9, %s10650_s28 }
 0xdc0   : > { %v2553_v21 = vadd.f32 %v11528_v4, %v2544_v15  ;;  %3215 = vrot.lane.b32.xlu0 %v11399_v11, %s10650_s28 }
 0xdc2   : > { %2556 = vst.msk [vmem:[#allocation2 + $0x10] sm:$0x1] %vm891_vm1, %v2553_v21 }
 0xdc4   : > { %3219 = vrot.lane.b32.xlu0 %v11391_v7, %s10650_s28 }
 0xe1f   : > { %v2686_v18 = vpop.xlane.xlu0 %2685 }
 0xe20   : > { %10087 = vrcp.f32 %v2686_v18 }
 0xe23   : > { %v2689_v24 = vpop.xlane.xlu1 %2688 }
 0xe24   : > { %10089 = vrcp.f32 %v2689_v24 }
 0xe27   : > { %v2692_v25 = vpop.xlane.xlu0 %2691 }
 0xe28   : > { %10091 = vrcp.f32 %v2692_v25 }
 0xe2a   : > { %v10088_v29 = vpop.eup %10087 }
 0xe2b   : > { %v2925_v26 = vpop.xlane.xlu1 %2924  ;;  %v2696_v31 = vmul.f32 %v10088_v29, %v11498_v33 }
 0xe2c   : > { %10093 = vrcp.f32 %v2925_v26 }
 0xe2e   : > { %v10090_v34 = vpop.eup %10089 }
 0xe2f   : > { %v2928_v27 = vpop.xlane.xlu0 %2927  ;;  %v9914_v20 = vpop.permute.xlu1 %9913  ;;  %v2697_v36 = vmul.f32 %v10090_v34, %v11502_v38 }
 0xe30   : > { %v9916_v23 = vunpack.i.h.bf16 %v9914_v20  ;;  %v9915_v30 = vunpack.i.l.bf16 %v9914_v20  ;;  %10095 = vrcp.f32 %v2928_v27 }
 0xe32   : > { %v9584_v35 = vpack.c.bf16 %v9916_v23, %v9915_v30  ;;  %v10092_v37 = vpop.eup %10091 }
 0xe33   : > { %v2931_v28 = vpop.xlane.xlu0 %2930  ;;  %v2943_v33 = vpop.permute.xlu1 %2942  ;;  %v2698_v39 = vmul.f32 %v10092_v37, %v11506_v43 }
 0xe34   : > { %10097 = vrcp.f32 %v2931_v28 }
 0xe36   : > { %v10094_v40 = vpop.eup %10093 }
 0xe37   : > { %v2704_v32 = vpop.permute.xlu0 %2703  ;;  %v2935_v38 = vmul.f32 %v10094_v40, %v11510_v55  ;;  %v9919_v50 = vpop.permute.xlu1 %9918 }
 0xe38   : > { %8900 = vmatpush3.msk.msra.mxu1 %vm1377_vm9, %v2704_v32  ;;  %v9921_v55 = vunpack.i.h.bf16 %v9919_v50  ;;  %v9920_v57 = vunpack.i.l.bf16 %v9919_v50 }
 0xe39   : > { %8902 = vmatmul.mubr.msk.f32.vlgmr.msra.gmra.mrb[44].mxu1 %vm1325_vm7, %v2696_v31  ;;  %9583 = vmatprep.subr.bf16.mxu1 %v10641_v59 }
 0xe3a   : > { %9585 = vmatpush3.bf16.msra.mxu1 %v9584_v35  ;;  %8904 = vmatprep.mubr.msk.f32.mxu1 %vm10642_vm4, %v10643_v63  ;;  %v10096_v41 = vpop.eup %10095  ;;  %v9587_v61 = vpack.c.bf16 %v9921_v55, %v9920_v57 }
 0xe3b   : > { %8929 = vmatprep.subr.mxu1 %v10643_v63  ;;  %v2936_v44 = vmul.f32 %v10096_v41, %v11515_v60  ;;  %v3226_v5 = vpop.permute.xlu1 %3225  ;;  %v3216_v6 = vpop.permute.xlu0 %3215 }
 0xe3d   : > { %8905 = vmatmul.mubr.msk.f32.gmra.mrb[46].mxu1 %vm1325_vm7, %v2697_v36 }
 0xe3e   : > { %8930 = vmatpush3.msk.msra.mxu1 %vm1377_vm9, %v2943_v33  ;;  %8907 = vmatprep.mubr.msk.f32.mxu1 %vm10642_vm4, %v10643_v63  ;;  %v10098_v43 = vpop.eup %10097 }
 0xe3f   : > { %8951 = vmatprep.subr.mxu1 %v10643_v63  ;;  %v2937_v46 = vmul.f32 %v10098_v43, %v11519_v62  ;;  %v3218_v51 = vpop.permute.xlu1 %3217  ;;  %v3220_v8 = vpop.permute.xlu0 %3219 }
 0xe41   : > { %8908 = vmatmul.mubr.msk.f32.gmra.mrb[48].mxu1 %vm1325_vm7, %v2698_v39 }
 0xe42   : > { %8931 = vmatprep.mubr.msk.f32.mxu1 %vm10642_vm4, %v10643_v63 }
 0xe45   : > { %8932 = vmatmul.mubr.msk.f32.vlgmr.msra.gmra.mrb[50].mxu1 %vm1325_vm7, %v2935_v38 }
 0xe46   : > { %8934 = vmatprep.mubr.msk.f32.mxu1 %vm10642_vm4, %v10643_v63  ;;  %8952 = vmatpush3.msra.mxu1 %v11267_v42 }
 0xe47   : > { %9590 = vmatprep.subr.bf16.mxu1 %v10641_v59 }
 0xe49   : > { %8935 = vmatmul.mubr.msk.f32.gmra.mrb[52].mxu1 %vm1325_vm7, %v2936_v44 }
 0xe4a   : > { %8937 = vmatprep.mubr.msk.f32.mxu1 %vm10642_vm4, %v10643_v63 }
 0xe4d   : > { %8938 = vmatmul.mubr.msk.f32.gmra.mrb[54].mxu1 %vm1325_vm7, %v2937_v46 }
 0xe4e   : > { %8953 = vmatprep.mubr.msk.f32.mxu1 %vm10642_vm4, %v10643_v63 }
 0xf0c   : > { %v2784_v47 = vpop.f32.mrb[44].mxu1 }
 0xf0d   : > { %v8903_v48 = vpop.f32.mrb[45].mxu1  ;;  %8954 = vmatmul.mubr.msk.f32.vlgmr.msra.gmra.mrb[56].mxu1 %vm1229_vm5, %v2784_v47 }
 0xf0e   : > { %8956 = vmatprep.mubr.msk.f32.mxu1 %vm10642_vm4, %v10643_v63 }
 0xf10   : > { %v2789_v42 = vpop.f32.mrb[46].mxu1 }
 0xf11   : > { %v8906_v53 = vpop.f32.mrb[47].mxu1  ;;  %8957 = vmatmul.mubr.msk.f32.gmra.mrb[58].mxu1 %vm1229_vm5, %v2789_v42 }
 0xf12   : > { %8959 = vmatprep.mubr.msk.f32.mxu1 %vm10642_vm4, %v10643_v63 }
 0xf14   : > { %v2794_v58 = vpop.f32.mrb[48].mxu1 }
 0xf15   : > { %v8909_v60 = vpop.f32.mrb[49].mxu1  ;;  %8960 = vmatmul.mubr.msk.f32.gmra.mrb[60].mxu1 %vm1229_vm5, %v2794_v58 }
 0xf16   : > { %8983 = vmatprep.mubr.msk.f32.mxu1 %vm10642_vm4, %v10643_v63 }
 0xf18   : > { %v3023_v62 = vpop.f32.mrb[50].mxu1 }
 0xf19   : > { %v8933_v54 = vpop.f32.mrb[51].mxu1  ;;  %8943 = vmatmul.mubr.msk.f32.vlgmr.msra.gmra.mrb[54].mxu0 %vm1229_vm5, %v3023_v62 }
 0xf1a   : > { %9589 = vmatpush3.bf16.xpose.msk.msra.mxu0 %vm11163_vm6, %v9587_v61  ;;  %8945 = vmatprep.mubr.msk.f32.mxu0 %vm10642_vm4, %v10643_v63 }
 0xf1b   : > { %8966 = vmatprep.subr.mxu0 %v10643_v63 }
 0xf1c   : > { %v3028_v1 = vpop.f32.mrb[52].mxu1 }
 0xf1d   : > { %v8936_v2 = vpop.f32.mrb[53].mxu1  ;;  %8946 = vmatmul.mubr.msk.f32.gmra.mrb[56].mxu0 %vm1229_vm5, %v3028_v1 }
 0xf1e   : > { %8948 = vmatprep.mubr.msk.f32.mxu0 %vm10642_vm4, %v10643_v63 }
 0xf20   : > { %v3033_v3 = vpop.f32.mrb[54].mxu1 }
 0xf21   : > { %v8939_v52 = vpop.f32.mrb[55].mxu1  ;;  %8949 = vmatmul.mubr.msk.f32.gmra.mrb[58].mxu0 %vm1229_vm5, %v3033_v3 }
 0xf22   : > { %8967 = vmatpush3.xpose.msk.msra.mxu0 %vm1229_vm5, %v3226_v5  ;;  %8968 = vmatprep.mubr.msk.f32.mxu0 %vm10642_vm4, %v10643_v63 }
 0xf23   : > { %8992 = vmatprep.subr.mxu0 %v10643_v63 }
 0xf25   : > { %8969 = vmatmul.mubr.msk.f32.vlgmr.msra.gmra.mrb[60].mxu0 %vm1229_vm5, %v3216_v6 }
 0xf26   : > { %8971 = vmatprep.mubr.msk.f32.mxu0 %vm10642_vm4, %v10643_v63  ;;  %8993 = vmatpush3.msra.mxu0 %v11365_v22 }
 0xf27   : > { %9597 = vmatprep.subr.bf16.mxu0 %v10641_v59 }
 0xf29   : > { %8972 = vmatmul.mubr.msk.f32.gmra.mrb[62].mxu0 %vm1229_vm5, %v3218_v51 }
 0xf2a   : > { %8974 = vmatprep.mubr.msk.f32.mxu0 %vm10642_vm4, %v10643_v63 }
 0xf2d   : > { %8975 = vmatmul.mubr.msk.f32.gmra.mrb[64].mxu0 %vm1229_vm5, %v3220_v8 }
 0xf2e   : > { %8994 = vmatprep.mubr.msk.f32.mxu0 %vm10642_vm4, %v10643_v63 }
 0xfe0   : > { %v3201_v49 = vpop.f32.mrb[56].mxu1 }
 0xfe1   : > { %v8955_v13 = vpop.f32.mrb[57].mxu1 }
 0xfe4   : > { %v3206_v14 = vpop.f32.mrb[58].mxu1 }
 0xfe5   : > { %v8958_v10 = vpop.f32.mrb[59].mxu1 }
 0xfe8   : > { %v3211_v16 = vpop.f32.mrb[60].mxu1 }
 0xfe9   : > { %v8961_v22 = vpop.f32.mrb[61].mxu1 }
 0xfec   : > { %v3112_v56 = vpop.f32.mrb[54].mxu0 }
 0xfed   : > { %v11615_v17 = vadd.f32 %v3201_v49, %v3112_v56  ;;  %v8944_v19 = vpop.f32.mrb[55].mxu0 }
 0xff0   : > { %v3117_v15 = vpop.f32.mrb[56].mxu0 }
 0xff1   : > { %v11617_v21 = vadd.f32 %v3206_v14, %v3117_v15  ;;  %v8947_v18 = vpop.f32.mrb[57].mxu0 }
 0xff4   : > { %v3122_v24 = vpop.f32.mrb[58].mxu0 }
 0xff5   : > { %v11619_v25 = vadd.f32 %v3211_v16, %v3122_v24  ;;  %v8950_v26 = vpop.f32.mrb[59].mxu0 }
 0xff8   : > { %v3305_v27 = vpop.f32.mrb[60].mxu0 }
 0xff9   : > { %v3319_v20 = vmul.f32 0.35355338, %v3305_v27  ;;  %v8970_v28 = vpop.f32.mrb[61].mxu0 }
 0xffb   : > { %v3322_v29 = vsel %vm1325_vm7, %v3319_v20, -inf }
 0xffc   : > { %3323 = vmax.xlane.f32.xlu1 %v3322_v29  ;;  %v3310_v23 = vpop.f32.mrb[62].mxu0 }
 0xffd   : > { %v3320_v30 = vmul.f32 0.35355338, %v3310_v23  ;;  %v8973_v31 = vpop.f32.mrb[63].mxu0 }
 0xfff   : > { %v3325_v32 = vsel %vm1325_vm7, %v3320_v30, -inf }
0x1000   : > { %3326 = vmax.xlane.f32.xlu0 %v3325_v32  ;;  %v3315_v34 = vpop.f32.mrb[64].mxu0 }
0x1001   : > { %v3321_v35 = vmul.f32 0.35355338, %v3315_v34  ;;  %v8976_v36 = vpop.f32.mrb[65].mxu0 }
0x1003   : > { %v3328_v37 = vsel %vm1332_vm8, %v3321_v35, -inf }
0x1004   : > { %3329 = vmax.xlane.f32.xlu0 %v3328_v37 }
0x100d   : > { %9923 = vrot.lane.b32.xlu1 %v11403_v12, %s10651_s0 }
0x1089   : > { %v3324_v33 = vpop.xlane.xlu1 %3323 }
0x108a   : > { %v3331_v39 = vsub.f32 %v3319_v20, %v3324_v33 }
0x108c   : > { %v3334_v40 = vmul.f32 1.442695, %v3331_v39  ;;  %v11684_v39 = vld [vmem:[#allocation2] sm:$0xff] }
0x108d   : > { %v9924_v38 = vpop.permute.xlu1 %9923  ;;  %v3327_v41 = vpop.xlane.xlu0 %3326 }
0x108e   : > { %10099 = vpow2.f32 %v3334_v40  ;;  %v9926_v44 = vunpack.i.h.bf16 %v9924_v38  ;;  %v9925_v43 = vunpack.i.l.bf16 %v9924_v38  ;;  %v3332_v46 = vsub.f32 %v3320_v30, %v3327_v41  ;;  %v11688_v38 = vld [vmem:[#allocation2 + $0x8] sm:$0xff] }
0x108f   : > { %v3894_v40 = vsel %vm895_vm2, %v11684_v39, 0.0 }
0x1090   : > { %v9591_v47 = vpack.c.bf16 %v9926_v44, %v9925_v43  ;;  %v3336_v48 = vmul.f32 1.442695, %v3332_v46 }
0x1091   : > { %v3330_v42 = vpop.xlane.xlu0 %3329 }
0x1092   : > { %10101 = vpow2.f32 %v3336_v48  ;;  %v3333_v50 = vsub.f32 %v3321_v35, %v3330_v42  ;;  %9592 = vmatpush3.bf16.msra.mxu1 %v9591_v47 }
0x1093   : > { %8981 = vmatprep.subr.mxu1 %v10643_v63 }
0x1094   : > { %v3338_v53 = vmul.f32 1.442695, %v3333_v50 }
0x1096   : > { %10103 = vpow2.f32 %v3338_v53 }
0x1098   : > { %v10100_v55 = vpop.eup %10099 }
0x1099   : > { %v3340_v57 = vsel %vm1325_vm7, %v10100_v55, 0.0 }
0x109a   : > { %3341 = vadd.xlane.f32.xlu0 %v3340_v57 }
0x109c   : > { %v10102_v58 = vpop.eup %10101 }
0x109d   : > { %v3343_v60 = vsel %vm1325_vm7, %v10102_v58, 0.0 }
0x109e   : > { %3344 = vadd.xlane.f32.xlu1 %v3343_v60 }
0x10a0   : > { %v10104_v61 = vpop.eup %10103 }
0x10a1   : > { %v3346_v62 = vsel %vm1332_vm8, %v10104_v61, 0.0 }
0x10a2   : > { %3347 = vadd.xlane.f32.xlu0 %v3346_v62 }
0x10af   : > { %9928 = vrot.lane.b32.xlu1 %v11403_v12, %s12818_s16 }
0x10b3   : > { %3556 = vrot.lane.b32.xlu1 %v11391_v7, %s12818_s16  ;;  %s12873_s16 = smov 40  }
0x10b7   : > { %3546 = vrot.lane.b32.xlu1 %v11399_v11, %s12816_s20 }
0x10b8   : > { %3359 = vrot.lane.b32.xlu0 %v11391_v7, %s10651_s0 }
0x10bb   : > { %3550 = vrot.lane.b32.xlu1 %v11391_v7, %s12816_s20 }
0x10bc   : > { %3548 = vrot.lane.b32.xlu0 %v11396_v9, %s12816_s20  ;;  %s12878_s20 = sld [smem:[#allocation43_spill]] }
0x1127   : > { %v3342_v54 = vpop.xlane.xlu0 %3341 }
0x1128   : > { %10105 = vrcp.f32 %v3342_v54 }
0x112b   : > { %v3345_v1 = vpop.xlane.xlu1 %3344 }
0x112c   : > { %10107 = vrcp.f32 %v3345_v1 }
0x112f   : > { %v3348_v2 = vpop.xlane.xlu0 %3347  ;;  %v9929_v5 = vpop.permute.xlu1 %9928 }
0x1130   : > { %10109 = vrcp.f32 %v3348_v2  ;;  %v9931_v11 = vunpack.i.h.bf16 %v9929_v5  ;;  %v9930_v51 = vunpack.i.l.bf16 %v9929_v5 }
0x1132   : > { %v10106_v3 = vpop.eup %10105  ;;  %v9594_v49 = vpack.c.bf16 %v9931_v11, %v9930_v51 }
0x1133   : > { %v3352_v52 = vmul.f32 %v10106_v3, %v10100_v55  ;;  %v3360_v6 = vpop.permute.xlu0 %3359  ;;  %v3557_v10 = vpop.permute.xlu1 %3556 }
0x1134   : > { %8982 = vmatpush3.msk.msra.mxu1 %vm1377_vm9, %v3360_v6 }
0x1135   : > { %8984 = vmatmul.mubr.msk.f32.vlgmr.msra.gmra.mrb[62].mxu1 %vm1325_vm7, %v3352_v52  ;;  %9593 = vmatprep.subr.bf16.mxu1 %v10641_v59 }
0x1136   : > { %v10108_v8 = vpop.eup %10107  ;;  %8986 = vmatprep.mubr.msk.f32.mxu1 %vm10642_vm4, %v10643_v63 }
0x1137   : > { %v3353_v9 = vmul.f32 %v10108_v8, %v10102_v58  ;;  %v3547_v16 = vpop.permute.xlu1 %3546  ;;  %v3549_v22 = vpop.permute.xlu0 %3548 }
0x1139   : > { %8987 = vmatmul.mubr.msk.f32.gmra.mrb[64].mxu1 %vm1325_vm7, %v3353_v9 }
0x113a   : > { %v10110_v13 = vpop.eup %10109  ;;  %8989 = vmatprep.mubr.msk.f32.mxu1 %vm10642_vm4, %v10643_v63 }
0x113b   : > { %9596 = vmatpush3.bf16.xpose.msk.msra.mxu1 %vm11163_vm6, %v9594_v49  ;;  %v3354_v14 = vmul.f32 %v10110_v13, %v10104_v61  ;;  %v3551_v56 = vpop.permute.xlu1 %3550 }
0x113c   : > { %9007 = vmatprep.subr.mxu1 %v10643_v63 }
0x113d   : > { %8990 = vmatmul.mubr.msk.f32.gmra.mrb[66].mxu1 %vm1325_vm7, %v3354_v14 }
0x113e   : > { %9009 = vmatprep.mubr.msk.f32.mxu1 %vm10642_vm4, %v10643_v63 }
0x1143   : > { %9008 = vmatpush3.xpose.msk.msra.mxu1 %vm1229_vm5, %v3557_v10 }
0x1144   : > { %9704 = vmatprep.subr.bf16.mxu1 %v10641_v59 }
0x1146   : > { %9010 = vmatmul.mubr.msk.f32.vlgmr.msra.gmra.mrb[68].mxu1 %vm1229_vm5, %v3547_v16 }
0x1147   : > { %9012 = vmatprep.mubr.msk.f32.mxu1 %vm10642_vm4, %v10643_v63 }
0x114a   : > { %9013 = vmatmul.mubr.msk.f32.gmra.mrb[70].mxu1 %vm1229_vm5, %v3549_v22 }
0x114b   : > { %9015 = vmatprep.mubr.msk.f32.mxu1 %vm10642_vm4, %v10643_v63 }
0x114e   : > { %9016 = vmatmul.mubr.msk.f32.gmra.mrb[72].mxu1 %vm1229_vm5, %v3551_v56 }
0x114f   : > { %9030 = vmatprep.mubr.msk.f32.mxu1 %vm10642_vm4, %v10643_v63 }
0x1208   : > { %v3440_v19 = vpop.f32.mrb[62].mxu1 }
0x1209   : > { %v8985_v15 = vpop.f32.mrb[63].mxu1  ;;  %8995 = vmatmul.mubr.msk.f32.vlgmr.msra.gmra.mrb[66].mxu0 %vm1229_vm5, %v3440_v19 }
0x120a   : > { %8997 = vmatprep.mubr.msk.f32.mxu0 %vm10642_vm4, %v10643_v63 }
0x120c   : > { %v3445_v18 = vpop.f32.mrb[64].mxu1 }
0x120d   : > { %v8988_v24 = vpop.f32.mrb[65].mxu1  ;;  %8998 = vmatmul.mubr.msk.f32.gmra.mrb[68].mxu0 %vm1229_vm5, %v3445_v18 }
0x120e   : > { %9000 = vmatprep.mubr.msk.f32.mxu0 %vm10642_vm4, %v10643_v63 }
0x1210   : > { %v3450_v26 = vpop.f32.mrb[66].mxu1 }
0x1211   : > { %v8991_v27 = vpop.f32.mrb[67].mxu1  ;;  %9001 = vmatmul.mubr.msk.f32.gmra.mrb[70].mxu0 %vm1229_vm5, %v3450_v26 }
0x1212   : > { %9024 = vmatprep.mubr.msk.f32.mxu0 %vm10642_vm4, %v10643_v63 }
0x1219   : > { %v3636_v20 = vpop.f32.mrb[68].mxu1 }
0x121a   : > { %v3650_v28 = vmul.f32 0.35355338, %v3636_v20  ;;  %v9011_v29 = vpop.f32.mrb[69].mxu1 }
0x121c   : > { %v3653_v23 = vsel %vm1325_vm7, %v3650_v28, -inf }
0x121d   : > { %3654 = vmax.xlane.f32.xlu0 %v3653_v23  ;;  %v3641_v30 = vpop.f32.mrb[70].mxu1 }
0x121e   : > { %v9014_v31 = vpop.f32.mrb[71].mxu1  ;;  %v11679_v36 = vmul.f32 0.35355338, %v3641_v30 }
0x1220   : > { %v3656_v33 = vsel %vm1325_vm7, %v11679_v36, -inf }
0x1221   : > { %v3646_v32 = vpop.f32.mrb[72].mxu1 }
0x1222   : > { %v9017_v34 = vpop.f32.mrb[73].mxu1  ;;  %v3652_v35 = vmul.f32 0.35355338, %v3646_v32  ;;  %v3877_v32 = vld [vmem:[#allocation2 + $0x11] sm:$0xff] }
0x1224   : > { %v3659_v37 = vsel %vm1332_vm8, %v3652_v35, -inf }
0x1233   : > { %9933 = vrot.lane.b32.xlu0 %v11403_v12, %s12814_s25  ;;  %v3897_v12 = vsel %vm895_vm2, %v11688_v38, 0.0 }
0x1252   : > { %3660 = vmax.xlane.f32.xlu0 %v3659_v37 }
0x1256   : > { %3657 = vmax.xlane.f32.xlu0 %v3656_v33 }
0x125a   : > { %3895 = vadd.xlane.f32.xlu0 %v3894_v40 }
0x125e   : > { %3898 = vadd.xlane.f32.xlu0 %v3897_v12  ;;  %v1001_v12 = vld [vmem:[%s12780_s13] sm:$0xff] }
0x12aa   : > { %v3655_v41 = vpop.xlane.xlu0 %3654 }
0x12ab   : > { %v3662_v44 = vsub.f32 %v3650_v28, %v3655_v41 }
0x12ad   : > { %v3665_v43 = vmul.f32 1.442695, %v3662_v44  ;;  %v1003_v44 = vld [vmem:[%s12780_s13 + $0x10] sm:$0xff] }
0x12ae   : > { %v9934_v46 = vpop.permute.xlu0 %9933 }
0x12af   : > { %10111 = vpow2.f32 %v3665_v43  ;;  %v9936_v47 = vunpack.i.h.bf16 %v9934_v46  ;;  %v9935_v48 = vunpack.i.l.bf16 %v9934_v46  ;;  %v1004_v43 = vld [vmem:[%s12780_s13 + $0x18] sm:$0xff] }
0x12b0   : > { %v9604_v46 = vpack.c.bf16 %v1004_v43, %v1003_v44 }
0x12b1   : > { %v9598_v42 = vpack.c.bf16 %v9936_v47, %v9935_v48 }
0x12b3   : > { %9599 = vmatpush3.bf16.msra.mxu0 %v9598_v42  ;;  %9706 = vmatpush3.bf16.msra.mxu1 %v9598_v42 }
0x12b4   : > { %9022 = vmatprep.subr.mxu0 %v10643_v63  ;;  %9705 = vmatprep.subr.mxu1 %v10643_v63 }
0x12b9   : > { %v10112_v50 = vpop.eup %10111 }
0x12ba   : > { %v3671_v53 = vsel %vm1325_vm7, %v10112_v50, 0.0 }
0x12bb   : > { %3672 = vadd.xlane.f32.xlu1 %v3671_v53 }
0x12cc   : > { %3690 = vrot.lane.b32.xlu1 %v11391_v7, %s12814_s25  ;;  %s12871_s25 = smov 72  }
0x12dc   : > { %v3529_v55 = vpop.f32.mrb[66].mxu0 }
0x12dd   : > { %v3543_v57 = vadd.f32 %v3529_v55, %v11615_v17  ;;  %v8996_v58 = vpop.f32.mrb[67].mxu0 }
0x12df   : > { %v3661_v60 = vpop.xlane.xlu0 %3660 }
0x12e0   : > { %v3664_v61 = vsub.f32 %v3652_v35, %v3661_v60  ;;  %v3534_v62 = vpop.f32.mrb[68].mxu0 }
0x12e1   : > { %v11699_v54 = vadd.f32 %v3534_v62, %v11617_v21  ;;  %v8999_v1 = vpop.f32.mrb[69].mxu0 }
0x12e2   : > { %v3669_v2 = vmul.f32 1.442695, %v3664_v61 }
0x12e3   : > { %v3658_v3 = vpop.xlane.xlu0 %3657 }
0x12e4   : > { %10113 = vpow2.f32 %v3669_v2  ;;  %v3539_v5 = vpop.f32.mrb[70].mxu0  ;;  %v3663_v29 = vsub.f32 %v11679_v36, %v3658_v3 }
0x12e5   : > { %v11702_v52 = vadd.f32 %v3539_v5, %v11619_v25  ;;  %v9002_v6 = vpop.f32.mrb[71].mxu0 }
0x12e6   : > { %v3667_v31 = vmul.f32 1.442695, %v3663_v29  ;;  %v11759_v6 = vld [vmem:[#allocation14] ss:$0 sm:$0xff] }
0x12e7   : > { %v3896_v7 = vpop.xlane.xlu0 %3895 }
0x12e8   : > { %v3909_v11 = vmul.f32 0.03125, %v3896_v7 }
0x12ea   : > { %v11705_v17 = vsub.f32 %v11684_v39, %v3909_v11 }
0x12eb   : > { %v3899_v51 = vpop.xlane.xlu0 %3898 }
0x12ec   : > { %v3910_v8 = vmul.f32 0.03125, %v3899_v51  ;;  %v3919_v21 = vmul.f32 %v11705_v17, %v11705_v17 }
0x12ee   : > { %v10114_v9 = vpop.eup %10113  ;;  %v11710_v49 = vsub.f32 %v11688_v38, %v3910_v8  ;;  %v3924_v13 = vsel %vm895_vm2, %v3919_v21, 0.0  ;;  %v11763_v21 = vld [vmem:[#allocation15] ss:$0 sm:$0xff] }
0x12ef   : > { %3925 = vadd.xlane.f32.xlu0 %v3924_v13  ;;  %v3677_v25 = vsel %vm1332_vm8, %v10114_v9, 0.0 }
0x12f0   : > { %3678 = vadd.xlane.f32.xlu1 %v3677_v25  ;;  %v3920_v14 = vmul.f32 %v11710_v49, %v11710_v49  ;;  %v1007_v25 = vld [vmem:[%s12782_s15 + $0x8] sm:$0xff] }
0x12f2   : > { %v3927_v10 = vsel %vm895_vm2, %v3920_v14, 0.0 }
0x12f3   : > { %3928 = vadd.xlane.f32.xlu0 %v3927_v10  ;;  %v1008_v10 = vld [vmem:[%s12782_s15 + $0x10] sm:$0xff] }
0x1348   : > { %v3673_v16 = vpop.xlane.xlu1 %3672 }
0x1349   : > { %10115 = vrcp.f32 %v3673_v16  ;;  %v1009_v16 = vld [vmem:[%s12782_s15 + $0x18] sm:$0xff] }
0x134c   : > { %v3691_v22 = vpop.permute.xlu1 %3690 }
0x134d   : > { %9023 = vmatpush3.msk.msra.mxu0 %vm1377_vm9, %v3691_v22  ;;  %9707 = vmatpush3.msk.msra.mxu1 %vm1377_vm9, %v3691_v22  ;;  %v9610_v22 = vpack.c.bf16 %v1009_v16, %v1008_v10 }
0x134e   : > { %9033 = vmatprep.subr.mxu1 %v10643_v63  ;;  %9600 = vmatprep.subr.bf16.mxu0 %v10641_v59 }
0x1353   : > { %v10116_v56 = vpop.eup %10115 }
0x1354   : > { %v3683_v19 = vmul.f32 %v10116_v56, %v10112_v50  ;;  %v1010_v56 = vld [vmem:[%s12782_s15 + $0x20] sm:$0xff] }
0x1356   : > { %9025 = vmatmul.mubr.msk.f32.vlgmr.msra.gmra.mrb[72].mxu0 %vm1325_vm7, %v3683_v19  ;;  %v1011_v19 = vld [vmem:[%s12782_s15 + $0x28] sm:$0xff] }
0x1357   : > { %9027 = vmatprep.mubr.msk.f32.mxu0 %vm10642_vm4, %v10643_v63 }
0x137c   : > { %v3926_v47 = vpop.xlane.xlu0 %3925 }
0x137d   : > { %v3679_v15 = vpop.xlane.xlu1 %3678  ;;  %v3939_v48 = vmul.f32 0.03125, %v3926_v47 }
0x137e   : > { %10117 = vrcp.f32 %v3679_v15  ;;  %v9613_v15 = vpack.c.bf16 %v1011_v19, %v1010_v56 }
0x137f   : > { %10119 = vpow2.f32 %v3667_v31  ;;  %v3944_v50 = vadd.f32 1e-05, %v3939_v48 }
0x1380   : > { %v3929_v42 = vpop.xlane.xlu0 %3928 }
0x1381   : > { %v3940_v53 = vmul.f32 0.03125, %v3929_v42  ;;  %10121 = vrsqrt.f32 %v3944_v50 }
0x1383   : > { %v3945_v55 = vadd.f32 1e-05, %v3940_v53 }
0x1385   : > { %10123 = vrsqrt.f32 %v3945_v55 }
0x1388   : > { %v10118_v18 = vpop.eup %10117 }
0x1389   : > { %v3685_v24 = vmul.f32 %v10118_v18, %v10114_v9  ;;  %v10120_v40 = vpop.eup %10119 }
0x138a   : > { %v3674_v36 = vsel %vm1325_vm7, %v10120_v40, 0.0 }
0x138b   : > { %9031 = vmatmul.mubr.msk.f32.vlgmr.msra.gmra.mrb[74].mxu1 %vm1325_vm7, %v3685_v24  ;;  %v10122_v2 = vpop.eup %10121 }
0x138c   : > { %9034 = vmatpush3.msra.mxu1 %v11477_v45  ;;  %9035 = vmatprep.mubr.msk.f32.mxu1 %vm10642_vm4, %v10643_v63  ;;  %v3954_v3 = vmul.f32 %v10122_v2, %v11705_v17 }
0x138d   : > { %9606 = vmatprep.subr.bf16.mxu1 %v10641_v59 }
0x138e   : > { %v3965_v11 = vmul.f32 %v11759_v6, %v3954_v3 }
0x138f   : > { %v10124_v5 = vpop.eup %10123 }
0x1390   : > { %v3955_v8 = vmul.f32 %v10124_v5, %v11710_v49  ;;  %v3976_v9 = vadd.f32 %v11763_v21, %v3965_v11  ;;  %v1006_v49 = vld [vmem:[%s12782_s15] sm:$0xff] }
0x1391   : > { %v9607_v14 = vpack.c.bf16 %v1007_v25, %v1006_v49 }
0x1392   : > { %v3966_v17 = vmul.f32 %v11759_v6, %v3955_v8 }
0x1394   : > { %v3977_v13 = vadd.f32 %v11763_v21, %v3966_v17 }
0x1429   : > { %v3771_v26 = vpop.f32.mrb[72].mxu0 }
0x142a   : > { %v9026_v27 = vpop.f32.mrb[73].mxu0  ;;  %9036 = vmatmul.mubr.msk.f32.vlgmr.msra.gmra.mrb[76].mxu1 %vm1229_vm5, %v3771_v26  ;;  %v1012_v26 = vld [vmem:[%s12782_s15 + $0x30] sm:$0xff] }
0x142b   : > { %9038 = vmatprep.mubr.msk.f32.mxu1 %vm10642_vm4, %v10643_v63  ;;  %9608 = vmatpush3.bf16.msra.mxu1 %v9607_v14  ;;  %v1013_v27 = vld [vmem:[%s12782_s15 + $0x38] sm:$0xff] }
0x142c   : > { %9609 = vmatprep.subr.bf16.mxu1 %v10641_v59 }
0x142f   : > { %9611 = vmatpush3.bf16.msra.mxu1 %v9610_v22 }
0x1430   : > { %9612 = vmatprep.subr.bf16.mxu1 %v10641_v59 }
0x1433   : > { %9614 = vmatpush3.bf16.msra.mxu1 %v9613_v15 }
0x1434   : > { %9615 = vmatprep.subr.bf16.mxu1 %v10641_v59 }
0x145e   : > { %v11732_v20 = vpop.f32.mrb[74].mxu1 }
0x145f   : > { %v9032_v28 = vpop.f32.mrb[75].mxu1 }
0x1460   : > { %v9616_v28 = vpack.c.bf16 %v1013_v27, %v1012_v26  ;;  %v10655_v27 = vmov -1.0  }
0x1462   : > { %9617 = vmatpush3.bf16.msra.mxu1 %v9616_v28 }
0x1463   : > { %9624 = vmatprep.subr.bf16.mxu1 %v10641_v59 }
0x14fd   : > { %v3860_v23 = vpop.f32.mrb[76].mxu1 }
0x14fe   : > { %v3874_v30 = vadd.f32 %v3860_v23, %v3543_v57  ;;  %v9037_v45 = vpop.f32.mrb[77].mxu1 }
0x1500   : > { %v3880_v34 = vadd.f32 %v3877_v32, %v3874_v30 }
0x1502   : > { %v3883_v35 = vadd.f32 %v11528_v4, %v3880_v34  ;;  %v1002_v4 = vld [vmem:[%s12780_s13 + $0x8] sm:$0xff] }
0x1503   : > { %v9601_v41 = vpack.c.bf16 %v1002_v4, %v1001_v12 }
0x1504   : > { %3886 = vst.msk [vmem:[#allocation2 + $0x11] sm:$0xff] %vm895_vm2, %v3883_v35  ;;  %v11816_v35 = vld [vmem:[%s12781_s14] ss:$0 sm:$0xff] }
0x1505   : > { %9602 = vmatpush3.bf16.msra.mxu0 %v9601_v41 }
0x1506   : > { %9603 = vmatprep.subr.bf16.mxu0 %v10641_v59 }
0x1509   : > { %9605 = vmatpush3.bf16.msra.mxu0 %v9604_v46 }
0x150a   : > { %9618 = vmatprep.subr.bf16.mxu0 %v10641_v59 }
0x150b   : > { %v11737_v37 = vld [vmem:[#allocation2 + $0x10] sm:$0xff] }
0x150c   : > { %v3900_v33 = vsel %vm895_vm2, %v11737_v37, 0.0 }
0x150d   : > { %3901 = vadd.xlane.f32.xlu1 %v3900_v33 }
0x1511   : > { %3675 = vadd.xlane.f32.xlu1 %v3674_v36 }
0x159a   : > { %v3902_v57 = vpop.xlane.xlu1 %3901 }
0x159b   : > { %v3911_v58 = vmul.f32 0.03125, %v3902_v57 }
0x159d   : > { %v3916_v60 = vsub.f32 %v11737_v37, %v3911_v58 }
0x159e   : > { %v3676_v61 = vpop.xlane.xlu1 %3675 }
0x159f   : > { %10125 = vrcp.f32 %v3676_v61  ;;  %v3921_v62 = vmul.f32 %v3916_v60, %v3916_v60 }
0x15a1   : > { %v3930_v1 = vsel %vm895_vm2, %v3921_v62, 0.0 }
0x15a2   : > { %3931 = vadd.xlane.f32.xlu1 %v3930_v1 }
0x15a9   : > { %v10126_v7 = vpop.eup %10125 }
0x15aa   : > { %v3684_v51 = vmul.f32 %v10126_v7, %v10120_v40 }
0x15ac   : > { %9028 = vmatmul.mubr.msk.f32.gmra.mrb[74].mxu0 %vm1325_vm7, %v3684_v51 }
0x15ad   : > { %9052 = vmatprep.mubr.msk.f32.mxu0 %vm10642_vm4, %v10643_v63 }
0x15b0   : > { %9053 = vmatmul.mubr.msk.f32.vlgmr.msra.gmra.mrb[76].mxu0 %vm895_vm2, %v3976_v9 }
0x15b1   : > { %9055 = vmatprep.mubr.msk.f32.mxu0 %vm10642_vm4, %v10643_v63 }
0x15b4   : > { %9056 = vmatmul.mubr.msk.f32.gmra.mrb[78].mxu0 %vm895_vm2, %v3977_v13 }
0x15b5   : > { %9058 = vmatprep.mubr.msk.f32.mxu0 %vm10642_vm4, %v10643_v63 }
0x162f   : > { %v3932_v18 = vpop.xlane.xlu1 %3931 }
0x1630   : > { %v3941_v24 = vmul.f32 0.03125, %v3932_v18 }
0x1632   : > { %v3946_v29 = vadd.f32 1e-05, %v3941_v24 }
0x1634   : > { %10127 = vrsqrt.f32 %v3946_v29 }
0x163e   : > { %v10128_v23 = vpop.eup %10127 }
0x163f   : > { %v3956_v30 = vmul.f32 %v10128_v23, %v3916_v60 }
0x1641   : > { %v3967_v45 = vmul.f32 %v11759_v6, %v3956_v30 }
0x1643   : > { %v3978_v31 = vadd.f32 %v11763_v21, %v3967_v45 }
0x1645   : > { %9059 = vmatmul.mubr.msk.f32.gmra.mrb[80].mxu0 %vm895_vm2, %v3978_v31 }
0x1646   : > { %9061 = vmatprep.mubr.msk.f32.mxu0 %vm10642_vm4, %v10643_v63 }
0x167f   : > { %v3776_v32 = vpop.f32.mrb[74].mxu0 }
0x1680   : > { %v9029_v34 = vpop.f32.mrb[75].mxu0  ;;  %9039 = vmatmul.mubr.msk.f32.gmra.mrb[78].mxu1 %vm1229_vm5, %v3776_v32 }
0x1681   : > { %9041 = vmatprep.mubr.msk.f32.mxu1 %vm10642_vm4, %v10643_v63 }
0x1683   : > { %v4068_v33 = vpop.f32.mrb[76].mxu0 }
0x1684   : > { %v4069_v40 = vadd.f32 %v11816_v35, %v4068_v33  ;;  %9042 = vmatmul.mubr.msk.f32.gmra.mrb[80].mxu1 %vm1229_vm5, %v11732_v20  ;;  %v9054_v36 = vpop.f32.mrb[77].mxu0 }
0x1685   : > { %9083 = vmatprep.mubr.msk.f32.mxu1 %vm10642_vm4, %v10643_v63 }
0x1686   : > { %v4097_v12 = vmul.f32 0.70710677, %v4069_v40  ;;  %v4092_v30 = vmul.f32 0.5, %v4069_v40 }
0x1687   : > { %v4073_v4 = vpop.f32.mrb[78].mxu0 }
0x1688   : > { %v4112_v41 = vand.u32 2147483647, %v4097_v12  ;;  %v4074_v44 = vadd.f32 %v11816_v35, %v4073_v4  ;;  %v9057_v43 = vpop.f32.mrb[79].mxu0  ;;  %vm4102_vm11 = vcmp.ge.f32.partialorder %v4097_v12, 0.0 }
0x1689   : > { %v4107_v28 = vsel %vm4102_vm11, 1.0, %v10655_v27 }
0x168a   : > { %v4117_v46 = vmul.f32 0.3275911, %v4112_v41  ;;  %v4098_v47 = vmul.f32 0.70710677, %v4074_v44  ;;  %v4182_v55 = vsub.f32 0.0, %v4112_v41  ;;  %v4093_v36 = vmul.f32 0.5, %v4074_v44 }
0x168c   : > { %v4122_v48 = vadd.f32 1.0, %v4117_v46  ;;  %v4113_v42 = vand.u32 2147483647, %v4098_v47  ;;  %v4187_v57 = vmul.f32 %v4182_v55, %v4112_v41  ;;  %vm4103_vm12 = vcmp.ge.f32.partialorder %v4098_v47, 0.0 }
0x168d   : > { %v4108_v32 = vsel %vm4103_vm12, 1.0, %v10655_v27 }
0x168e   : > { %10129 = vrcp.f32 %v4122_v48  ;;  %v4118_v50 = vmul.f32 0.3275911, %v4113_v42  ;;  %v4183_v58 = vsub.f32 0.0, %v4113_v42  ;;  %v4192_v1 = vmul.f32 1.442695, %v4187_v57 }
0x1690   : > { %v4123_v53 = vadd.f32 1.0, %v4118_v50  ;;  %v4188_v2 = vmul.f32 %v4183_v58, %v4113_v42 }
0x1692   : > { %10131 = vrcp.f32 %v4123_v53  ;;  %v4194_v51 = vmul.f32 1.442695, %v4188_v2 }
0x1693   : > { %10133 = vpow2.f32 %v4192_v1 }
0x1694   : > { %10135 = vpow2.f32 %v4194_v51 }
0x1698   : > { %v10130_v20 = vpop.eup %10129 }
0x1699   : > { %v4137_v60 = vmul.f32 1.0614054, %v10130_v20 }
0x169b   : > { %v4142_v61 = vadd.f32 -1.4531521, %v4137_v60 }
0x169c   : > { %v10132_v62 = vpop.eup %10131 }
0x169d   : > { %v4147_v3 = vmul.f32 %v10130_v20, %v4142_v61  ;;  %v4138_v5 = vmul.f32 1.0614054, %v10132_v62  ;;  %v10134_v56 = vpop.eup %10133 }
0x169e   : > { %v10136_v26 = vpop.eup %10135 }
0x169f   : > { %v4152_v7 = vadd.f32 1.4214138, %v4147_v3  ;;  %v4143_v11 = vadd.f32 -1.4531521, %v4138_v5 }
0x16a1   : > { %v4157_v8 = vmul.f32 %v10130_v20, %v4152_v7  ;;  %v4148_v9 = vmul.f32 %v10132_v62, %v4143_v11 }
0x16a3   : > { %v4162_v17 = vadd.f32 -0.28449672, %v4157_v8  ;;  %v4153_v13 = vadd.f32 1.4214138, %v4148_v9 }
0x16a5   : > { %v4167_v49 = vmul.f32 %v10130_v20, %v4162_v17  ;;  %v4158_v25 = vmul.f32 %v10132_v62, %v4153_v13 }
0x16a7   : > { %v4172_v14 = vadd.f32 0.2548296, %v4167_v49  ;;  %v4163_v10 = vadd.f32 -0.28449672, %v4158_v25 }
0x16a9   : > { %v4177_v16 = vmul.f32 %v10130_v20, %v4172_v14  ;;  %v4168_v22 = vmul.f32 %v10132_v62, %v4163_v10  ;;  %v3878_v10 = vld [vmem:[#allocation2 + $0x19] sm:$0xff] }
0x16ab   : > { %v4202_v19 = vmul.f32 %v10134_v56, %v4177_v16  ;;  %v4173_v15 = vadd.f32 0.2548296, %v4168_v22  ;;  %v10291_v56 = vld [vmem:[#allocation12] ss:$0 sm:$0xff] }
0x16ad   : > { %v4207_v18 = vsub.f32 1.0, %v4202_v19  ;;  %v4178_v24 = vmul.f32 %v10132_v62, %v4173_v15 }
0x16af   : > { %v4212_v29 = vmul.f32 %v4207_v18, %v4107_v28  ;;  %v4203_v23 = vmul.f32 %v10136_v26, %v4178_v24  ;;  %v3879_v24 = vld [vmem:[#allocation2 + $0x21] sm:$0x1] }
0x16b1   : > { %v4217_v45 = vadd.f32 1.0, %v4212_v29  ;;  %v4208_v31 = vsub.f32 1.0, %v4203_v23 }
0x16b3   : > { %v4222_v34 = vmul.f32 %v4217_v45, %v4092_v30  ;;  %v4213_v33 = vmul.f32 %v4208_v31, %v4108_v32 }
0x16b5   : > { %v4218_v12 = vadd.f32 1.0, %v4213_v33  ;;  %9084 = vmatmul.mubr.msk.f32.vlgmr.msra.gmra.mrb[82].mxu1 %vm4227_vm13, %v4222_v34 }
0x16b6   : > { %9086 = vmatprep.mubr.msk.f32.mxu1 %vm10642_vm4, %v10643_v63 }
0x16b7   : > { %v4223_v4 = vmul.f32 %v4218_v12, %v4093_v36 }
0x16b9   : > { %9087 = vmatmul.mubr.msk.f32.gmra.mrb[84].mxu1 %vm4227_vm13, %v4223_v4 }
0x16ba   : > { %9089 = vmatprep.mubr.msk.f32.mxu1 %vm10642_vm4, %v10643_v63 }
0x1718   : > { %v4078_v40 = vpop.f32.mrb[80].mxu0 }
0x1719   : > { %v4079_v41 = vadd.f32 %v11816_v35, %v4078_v40  ;;  %v9060_v43 = vpop.f32.mrb[81].mxu0 }
0x171b   : > { %v4099_v46 = vmul.f32 0.70710677, %v4079_v41  ;;  %v4094_v9 = vmul.f32 0.5, %v4079_v41 }
0x171d   : > { %v4114_v47 = vand.u32 2147483647, %v4099_v46  ;;  %vm4104_vm14 = vcmp.ge.f32.partialorder %v4099_v46, 0.0 }
0x171e   : > { %v4109_v51 = vsel %vm4104_vm14, 1.0, %v10655_v27 }
0x171f   : > { %v4119_v48 = vmul.f32 0.3275911, %v4114_v47  ;;  %v4184_v42 = vsub.f32 0.0, %v4114_v47 }
0x1721   : > { %v4124_v44 = vadd.f32 1.0, %v4119_v48  ;;  %v4189_v53 = vmul.f32 %v4184_v42, %v4114_v47 }
0x1723   : > { %10137 = vrcp.f32 %v4124_v44  ;;  %v4196_v57 = vmul.f32 1.442695, %v4189_v53 }
0x1725   : > { %10139 = vpow2.f32 %v4196_v57 }
0x172d   : > { %v10138_v50 = vpop.eup %10137 }
0x172e   : > { %v4139_v55 = vmul.f32 1.0614054, %v10138_v50 }
0x172f   : > { %v10140_v5 = vpop.eup %10139 }
0x1730   : > { %v4144_v20 = vadd.f32 -1.4531521, %v4139_v55 }
0x1732   : > { %v4149_v58 = vmul.f32 %v10138_v50, %v4144_v20 }
0x1734   : > { %v4154_v60 = vadd.f32 1.4214138, %v4149_v58 }
0x1736   : > { %v4159_v61 = vmul.f32 %v10138_v50, %v4154_v60 }
0x1738   : > { %v4164_v62 = vadd.f32 -0.28449672, %v4159_v61 }
0x173a   : > { %v4169_v1 = vmul.f32 %v10138_v50, %v4164_v62 }
0x173c   : > { %v4174_v2 = vadd.f32 0.2548296, %v4169_v1 }
0x173e   : > { %v4179_v3 = vmul.f32 %v10138_v50, %v4174_v2 }
0x1740   : > { %v4204_v7 = vmul.f32 %v10140_v5, %v4179_v3 }
0x1742   : > { %v4209_v11 = vsub.f32 1.0, %v4204_v7 }
0x1744   : > { %v4214_v8 = vmul.f32 %v4209_v11, %v4109_v51 }
0x1746   : > { %v4219_v17 = vadd.f32 1.0, %v4214_v8 }
0x1748   : > { %v4224_v13 = vmul.f32 %v4219_v17, %v4094_v9 }
0x174a   : > { %9090 = vmatmul.mubr.msk.f32.gmra.mrb[86].mxu1 %vm4227_vm13, %v4224_v13  ;;  %v8166_v13 = vld [vmem:[%s12774_s7 + $0x20] sm:$0xff] }
0x174b   : > { %9092 = vmatprep.mubr.msk.f32.mxu1 %vm10642_vm4, %v10643_v63 }
0x1753   : > { %v3865_v49 = vpop.f32.mrb[78].mxu1 }
0x1754   : > { %v3875_v25 = vadd.f32 %v3865_v49, %v11699_v54  ;;  %v9040_v14 = vpop.f32.mrb[79].mxu1  ;;  %v8167_v49 = vld [vmem:[%s12774_s7 + $0x28] sm:$0xff] }
0x1755   : > { %v8168_v14 = vld [vmem:[%s12774_s7 + $0x30] sm:$0xff] }
0x1756   : > { %v3881_v16 = vadd.f32 %v3878_v10, %v3875_v25  ;;  %v9619_v25 = vpack.c.bf16 %v8167_v49, %v8166_v13  ;;  %v8169_v10 = vld [vmem:[%s12774_s7 + $0x38] sm:$0xff] }
0x1757   : > { %v3870_v22 = vpop.f32.mrb[80].mxu1 }
0x1758   : > { %v3884_v19 = vadd.f32 %v10291_v56, %v3881_v16  ;;  %v3876_v15 = vadd.f32 %v3870_v22, %v11702_v52  ;;  %v9043_v18 = vpop.f32.mrb[81].mxu1  ;;  %v11852_v52 = vld [vmem:[%s12869_s2] ss:$0 sm:$0xff]  ;;  %9620 = vmatpush3.bf16.msra.mxu0 %v9619_v25  ;;  %v9622_v16 = vpack.c.bf16 %v8169_v10, %v8168_v14 }
0x1759   : > { %9621 = vmatprep.subr.bf16.mxu0 %v10641_v59 }
0x175a   : > { %3887 = vst.msk [vmem:[#allocation2 + $0x19] sm:$0xff] %vm895_vm2, %v3884_v19  ;;  %v3882_v26 = vadd.f32 %v3879_v24, %v3876_v15 }
0x175c   : > { %v3885_v28 = vadd.f32 %v10291_v56, %v3882_v26  ;;  %9623 = vmatpush3.bf16.msra.mxu0 %v9622_v16 }
0x175d   : > { %9628 = vmatprep.subr.bf16.mxu0 %v10641_v59 }
0x175e   : > { %3888 = vst.msk [vmem:[#allocation2 + $0x21] sm:$0x1] %vm891_vm1, %v3885_v28 }
0x1761   : > { %v11841_v29 = vld [vmem:[#allocation2 + $0x18] sm:$0xff] }
0x1762   : > { %v3903_v54 = vsel %vm895_vm2, %v11841_v29, 0.0 }
0x1763   : > { %3904 = vadd.xlane.f32.xlu0 %v3903_v54 }
0x1765   : > { %v11845_v23 = vld [vmem:[#allocation2 + $0x20] sm:$0x3] }
0x1766   : > { %v3906_v30 = vsel %vm1032_vm3, %v11845_v23, 0.0 }
0x1767   : > { %3907 = vadd.xlane.f32.xlu1 %v3906_v30 }
0x1788   : > { %v4309_v45 = vpop.f32.mrb[82].mxu1 }
0x1789   : > { %v4333_v31 = vadd.f32 %v4309_v45, %v11684_v39  ;;  %v9085_v32 = vpop.f32.mrb[83].mxu1 }
0x178b   : > { %v4344_v34 = vadd.f32 %v11852_v52, %v4333_v31 }
0x178c   : > { %v4314_v33 = vpop.f32.mrb[84].mxu1 }
0x178d   : > { %4349 = vst.msk [vmem:[#allocation2] sm:$0xff] %vm895_vm2, %v4344_v34  ;;  %v4334_v36 = vadd.f32 %v4314_v33, %v11688_v38  ;;  %v9088_v12 = vpop.f32.mrb[85].mxu1 }
0x178f   : > { %v4345_v4 = vadd.f32 %v11852_v52, %v4334_v36 }
0x1791   : > { %4350 = vst.msk [vmem:[#allocation2 + $0x8] sm:$0xff] %vm895_vm2, %v4345_v4 }
0x1794   : > { %v4394_v40 = vld [vmem:[#allocation2] sm:$0xff] }
0x1795   : > { %v4399_v41 = vsel %vm895_vm2, %v4394_v40, 0.0 }
0x1796   : > { %4400 = vadd.xlane.f32.xlu0 %v4399_v41 }
0x1798   : > { %v4395_v43 = vld [vmem:[#allocation2 + $0x8] sm:$0xff] }
0x1799   : > { %v4402_v39 = vsel %vm895_vm2, %v4395_v43, 0.0 }
0x179a   : > { %4403 = vadd.xlane.f32.xlu1 %v4402_v39 }
0x17f0   : > { %v3905_v46 = vpop.xlane.xlu0 %3904 }
0x17f1   : > { %v3912_v47 = vmul.f32 0.03125, %v3905_v46 }
0x17f3   : > { %v3917_v48 = vsub.f32 %v11841_v29, %v3912_v47 }
0x17f4   : > { %v3908_v55 = vpop.xlane.xlu1 %3907 }
0x17f5   : > { %v3922_v44 = vmul.f32 %v3917_v48, %v3917_v48  ;;  %v3913_v57 = vmul.f32 0.03125, %v3908_v55 }
0x17f7   : > { %v3933_v38 = vsel %vm895_vm2, %v3922_v44, 0.0  ;;  %v3918_v61 = vsub.f32 %v11845_v23, %v3913_v57  ;;  %v11892_v44 = vld [vmem:[#allocation8 + $0x1] ss:$0 sm:$0xff] }
0x17f8   : > { %3934 = vadd.xlane.f32.xlu1 %v3933_v38 }
0x17f9   : > { %v3923_v51 = vmul.f32 %v3918_v61, %v3918_v61 }
0x17fb   : > { %v3936_v8 = vsel %vm1032_vm3, %v3923_v51, 0.0 }
0x181d   : > { %v4319_v42 = vpop.f32.mrb[86].mxu1 }
0x181e   : > { %v4335_v50 = vadd.f32 %v4319_v42, %v11737_v37  ;;  %v9091_v53 = vpop.f32.mrb[87].mxu1 }
0x1820   : > { %v4346_v20 = vadd.f32 %v11852_v52, %v4335_v50 }
0x1822   : > { %4351 = vst.msk [vmem:[#allocation2 + $0x10] sm:$0xff] %vm895_vm2, %v4346_v20  ;;  %v11897_v20 = vld [vmem:[#allocation9 + $0x1] ss:$0 sm:$0xff] }
0x1823   : > { %v4401_v58 = vpop.xlane.xlu0 %4400 }
0x1824   : > { %v4414_v60 = vmul.f32 0.03125, %v4401_v58 }
0x1826   : > { %v4419_v62 = vsub.f32 %v4394_v40, %v4414_v60 }
0x1827   : > { %v4404_v1 = vpop.xlane.xlu1 %4403 }
0x1828   : > { %v4415_v2 = vmul.f32 0.03125, %v4404_v1  ;;  %v4424_v3 = vmul.f32 %v4419_v62, %v4419_v62 }
0x1829   : > { %v4396_v5 = vld [vmem:[#allocation2 + $0x10] sm:$0xff] }
0x182a   : > { %v4420_v7 = vsub.f32 %v4395_v43, %v4415_v2  ;;  %v4429_v11 = vsel %vm895_vm2, %v4424_v3, 0.0  ;;  %v4405_v37 = vsel %vm895_vm2, %v4396_v5, 0.0 }
0x182b   : > { %4430 = vadd.xlane.f32.xlu1 %v4429_v11  ;;  %4406 = vadd.xlane.f32.xlu0 %v4405_v37 }
0x182c   : > { %v4425_v9 = vmul.f32 %v4420_v7, %v4420_v7 }
0x182e   : > { %v4432_v17 = vsel %vm895_vm2, %v4425_v9, 0.0 }
0x182f   : > { %3937 = vadd.xlane.f32.xlu0 %v3936_v8 }
0x1833   : > { %4433 = vadd.xlane.f32.xlu0 %v4432_v17 }
0x1885   : > { %v3935_v22 = vpop.xlane.xlu1 %3934 }
0x1886   : > { %v3942_v56 = vmul.f32 0.03125, %v3935_v22 }
0x1888   : > { %v3947_v19 = vadd.f32 1e-05, %v3942_v56 }
0x188a   : > { %10141 = vrsqrt.f32 %v3947_v19 }
0x1894   : > { %v10142_v15 = vpop.eup %10141 }
0x1895   : > { %v3957_v18 = vmul.f32 %v10142_v15, %v3917_v48 }
0x1897   : > { %v3968_v24 = vmul.f32 %v11759_v6, %v3957_v18 }
0x1899   : > { %v3979_v26 = vadd.f32 %v11763_v21, %v3968_v24 }
0x189b   : > { %9062 = vmatmul.mubr.msk.f32.gmra.mrb[82].mxu0 %vm895_vm2, %v3979_v26 }
0x189c   : > { %9064 = vmatprep.mubr.msk.f32.mxu0 %vm10642_vm4, %v10643_v63 }
0x18b8   : > { %v4431_v28 = vpop.xlane.xlu1 %4430  ;;  %v4407_v54 = vpop.xlane.xlu0 %4406 }
0x18b9   : > { %v4444_v30 = vmul.f32 0.03125, %v4431_v28  ;;  %v4416_v45 = vmul.f32 0.03125, %v4407_v54 }
0x18bb   : > { %v4449_v31 = vadd.f32 1e-05, %v4444_v30  ;;  %v4421_v32 = vsub.f32 %v4396_v5, %v4416_v45 }
0x18bc   : > { %v3938_v34 = vpop.xlane.xlu0 %3937 }
0x18bd   : > { %v3943_v33 = vmul.f32 0.03125, %v3938_v34  ;;  %v4426_v36 = vmul.f32 %v4421_v32, %v4421_v32  ;;  %10143 = vrsqrt.f32 %v4449_v31 }
0x18bf   : > { %v3948_v12 = vadd.f32 1e-05, %v3943_v33  ;;  %v4435_v4 = vsel %vm895_vm2, %v4426_v36, 0.0 }
0x18c0   : > { %4436 = vadd.xlane.f32.xlu1 %v4435_v4  ;;  %v4434_v40 = vpop.xlane.xlu0 %4433 }
0x18c1   : > { %10145 = vrsqrt.f32 %v3948_v12  ;;  %v4445_v41 = vmul.f32 0.03125, %v4434_v40 }
0x18c3   : > { %v4450_v43 = vadd.f32 1e-05, %v4445_v41 }
0x18c5   : > { %10147 = vrsqrt.f32 %v4450_v43 }
0x18c7   : > { %v10144_v39 = vpop.eup %10143 }
0x18c8   : > { %v4459_v47 = vmul.f32 %v10144_v39, %v4419_v62  ;;  %v11922_v39 = vld [vmem:[#allocation11 + $0x1] ss:$0 sm:$0xff] }
0x18ca   : > { %v4470_v50 = vmul.f32 %v11892_v44, %v4459_v47 }
0x18cb   : > { %v10146_v46 = vpop.eup %10145 }
0x18cc   : > { %v3958_v48 = vmul.f32 %v10146_v46, %v3918_v61  ;;  %v4481_v57 = vadd.f32 %v11897_v20, %v4470_v50 }
0x18ce   : > { %v3969_v38 = vmul.f32 %v11759_v6, %v3958_v48 }
0x18cf   : > { %v10148_v42 = vpop.eup %10147 }
0x18d0   : > { %v3980_v53 = vadd.f32 %v11763_v21, %v3969_v38  ;;  %v4460_v55 = vmul.f32 %v10148_v42, %v4420_v7 }
0x18d2   : > { %9065 = vmatmul.mubr.msk.f32.gmra.mrb[84].mxu0 %vm895_vm2, %v3980_v53  ;;  %v4471_v58 = vmul.f32 %v11892_v44, %v4460_v55 }
0x18d3   : > { %9106 = vmatprep.mubr.msk.f32.mxu0 %vm10642_vm4, %v10643_v63 }
0x18d4   : > { %v4482_v6 = vadd.f32 %v11897_v20, %v4471_v58 }
0x18d6   : > { %9107 = vmatmul.mubr.msk.f32.vlgmr.msra.gmra.mrb[86].mxu0 %vm895_vm2, %v4481_v57 }
0x18d7   : > { %9109 = vmatprep.mubr.msk.f32.mxu0 %vm10642_vm4, %v10643_v63 }
0x18da   : > { %9110 = vmatmul.mubr.msk.f32.gmra.mrb[88].mxu0 %vm895_vm2, %v4482_v6 }
0x18db   : > { %9112 = vmatprep.mubr.msk.f32.mxu0 %vm10642_vm4, %v10643_v63 }
0x194d   : > { %v4437_v21 = vpop.xlane.xlu1 %4436 }
0x194e   : > { %v4446_v60 = vmul.f32 0.03125, %v4437_v21 }
0x1950   : > { %v4451_v61 = vadd.f32 1e-05, %v4446_v60 }
0x1952   : > { %10149 = vrsqrt.f32 %v4451_v61 }
0x195c   : > { %v10150_v62 = vpop.eup %10149 }
0x195d   : > { %v4461_v1 = vmul.f32 %v10150_v62, %v4421_v32 }
0x195f   : > { %v4472_v2 = vmul.f32 %v11892_v44, %v4461_v1 }
0x1961   : > { %v4483_v3 = vadd.f32 %v11897_v20, %v4472_v2 }
0x1963   : > { %9113 = vmatmul.mubr.msk.f32.gmra.mrb[90].mxu0 %vm895_vm2, %v4483_v3 }
0x1964   : > { %9115 = vmatprep.mubr.msk.f32.mxu0 %vm10642_vm4, %v10643_v63 }
0x196e   : > { %v4083_v5 = vpop.f32.mrb[82].mxu0 }
0x196f   : > { %v4084_v7 = vadd.f32 %v11816_v35, %v4083_v5  ;;  %v9063_v11 = vpop.f32.mrb[83].mxu0 }
0x1971   : > { %v4100_v37 = vmul.f32 0.70710677, %v4084_v7  ;;  %v4095_v31 = vmul.f32 0.5, %v4084_v7 }
0x1973   : > { %v4115_v51 = vand.u32 2147483647, %v4100_v37  ;;  %vm4105_vm15 = vcmp.ge.f32.partialorder %v4100_v37, 0.0 }
0x1974   : > { %v4110_v30 = vsel %vm4105_vm15, 1.0, %v10655_v27 }
0x1975   : > { %v4120_v8 = vmul.f32 0.3275911, %v4115_v51  ;;  %v4185_v17 = vsub.f32 0.0, %v4115_v51 }
0x1977   : > { %v4125_v9 = vadd.f32 1.0, %v4120_v8  ;;  %v4190_v49 = vmul.f32 %v4185_v17, %v4115_v51 }
0x1979   : > { %10151 = vrcp.f32 %v4125_v9  ;;  %v4198_v10 = vmul.f32 1.442695, %v4190_v49 }
0x197b   : > { %10153 = vpow2.f32 %v4198_v10 }
0x1983   : > { %v10152_v13 = vpop.eup %10151 }
0x1984   : > { %v4140_v25 = vmul.f32 1.0614054, %v10152_v13 }
0x1985   : > { %v10154_v26 = vpop.eup %10153 }
0x1986   : > { %v4145_v14 = vadd.f32 -1.4531521, %v4140_v25 }
0x1988   : > { %v4150_v16 = vmul.f32 %v10152_v13, %v4145_v14 }
0x198a   : > { %v4155_v22 = vadd.f32 1.4214138, %v4150_v16 }
0x198c   : > { %v4160_v56 = vmul.f32 %v10152_v13, %v4155_v22 }
0x198e   : > { %v4165_v19 = vadd.f32 -0.28449672, %v4160_v56 }
0x1990   : > { %v4170_v15 = vmul.f32 %v10152_v13, %v4165_v19 }
0x1992   : > { %v4175_v18 = vadd.f32 0.2548296, %v4170_v15 }
0x1994   : > { %v4180_v24 = vmul.f32 %v10152_v13, %v4175_v18 }
0x1996   : > { %v4205_v28 = vmul.f32 %v10154_v26, %v4180_v24 }
0x1998   : > { %v4210_v54 = vsub.f32 1.0, %v4205_v28 }
0x199a   : > { %v4215_v45 = vmul.f32 %v4210_v54, %v4110_v30 }
0x199c   : > { %v4220_v32 = vadd.f32 1.0, %v4215_v45 }
0x199e   : > { %v4225_v34 = vmul.f32 %v4220_v32, %v4095_v31 }
0x19a0   : > { %9093 = vmatmul.mubr.msk.f32.gmra.mrb[88].mxu1 %vm4227_vm13, %v4225_v34 }
0x19a1   : > { %9095 = vmatprep.mubr.msk.f32.mxu1 %vm10642_vm4, %v10643_v63 }
0x19a5   : > { %v4088_v33 = vpop.f32.mrb[84].mxu0 }
0x19a6   : > { %v4089_v36 = vadd.f32 %v11816_v35, %v4088_v33  ;;  %v9066_v12 = vpop.f32.mrb[85].mxu0 }
0x19a8   : > { %v4101_v4 = vmul.f32 0.70710677, %v4089_v36  ;;  %v4096_v9 = vmul.f32 0.5, %v4089_v36 }
0x19a9   : > { %v4573_v40 = vpop.f32.mrb[86].mxu0 }
0x19aa   : > { %v4116_v41 = vand.u32 2147483647, %v4101_v4  ;;  %v9108_v43 = vpop.f32.mrb[87].mxu0  ;;  %v11925_v38 = vadd.f32 %v11922_v39, %v4573_v40  ;;  %vm4106_vm0 = vcmp.ge.f32.partialorder %v4101_v4, 0.0 }
0x19ab   : > { %v4111_v51 = vsel %vm4106_vm0, 1.0, %v10655_v27 }
0x19ac   : > { %v4121_v46 = vmul.f32 0.3275911, %v4116_v41  ;;  %v4186_v53 = vsub.f32 0.0, %v4116_v41 }
0x19ad   : > { %v4578_v47 = vpop.f32.mrb[88].mxu0 }
0x19ae   : > { %v4126_v48 = vadd.f32 1.0, %v4121_v46  ;;  %v11928_v42 = vadd.f32 %v11922_v39, %v4578_v47  ;;  %v9111_v50 = vpop.f32.mrb[89].mxu0  ;;  %v4191_v57 = vmul.f32 %v4186_v53, %v4116_v41 }
0x19b0   : > { %10155 = vrcp.f32 %v4126_v48  ;;  %v11932_v35 = vpack.i.bf16 %v11928_v42, %v11925_v38  ;;  %v4200_v21 = vmul.f32 1.442695, %v4191_v57 }
0x19b2   : > { %9938 = vrot.lane.b32.xlu0 %v11932_v35, %s10644_s5  ;;  %10157 = vpow2.f32 %v4200_v21 }
0x19b6   : > { %4833 = vrot.lane.b32.xlu0 %v11925_v38, %s10645_s27 }
0x19ba   : > { %v10156_v55 = vpop.eup %10155 }
0x19bb   : > { %v4141_v58 = vmul.f32 1.0614054, %v10156_v55 }
0x19bc   : > { %v10158_v7 = vpop.eup %10157 }
0x19bd   : > { %v4146_v6 = vadd.f32 -1.4531521, %v4141_v58 }
0x19bf   : > { %v4151_v60 = vmul.f32 %v10156_v55, %v4146_v6 }
0x19c1   : > { %v4156_v61 = vadd.f32 1.4214138, %v4151_v60 }
0x19c3   : > { %v4161_v62 = vmul.f32 %v10156_v55, %v4156_v61 }
0x19c5   : > { %v4166_v1 = vadd.f32 -0.28449672, %v4161_v62 }
0x19c7   : > { %v4171_v2 = vmul.f32 %v10156_v55, %v4166_v1 }
0x19c9   : > { %v4176_v3 = vadd.f32 0.2548296, %v4171_v2 }
0x19cb   : > { %v4181_v5 = vmul.f32 %v10156_v55, %v4176_v3 }
0x19cd   : > { %v4206_v11 = vmul.f32 %v10158_v7, %v4181_v5 }
0x19cf   : > { %v4211_v37 = vsub.f32 1.0, %v4206_v11 }
0x19d1   : > { %v4216_v8 = vmul.f32 %v4211_v37, %v4111_v51 }
0x19d3   : > { %v4221_v17 = vadd.f32 1.0, %v4216_v8 }
0x19d5   : > { %v4226_v13 = vmul.f32 %v4221_v17, %v4096_v9 }
0x19d7   : > { %9096 = vmatmul.mubr.msk.f32.gmra.mrb[90].mxu1 %vm4227_vm13, %v4226_v13 }
0x19d8   : > { %9127 = vmatprep.mubr.msk.f32.mxu1 %vm10642_vm4, %v10643_v63 }
0x1a24   : > { %v9939_v49 = vpop.permute.xlu0 %9938 }
0x1a25   : > { %v9941_v25 = vunpack.i.h.bf16 %v9939_v49  ;;  %v9940_v14 = vunpack.i.l.bf16 %v9939_v49 }
0x1a27   : > { %v9625_v10 = vpack.c.bf16 %v9941_v25, %v9940_v14 }
0x1a28   : > { %v4834_v4 = vpop.permute.xlu0 %4833 }
0x1a29   : > { %9627 = vmatpush3.bf16.xpose.msk.msra.mxu1 %vm11163_vm6, %v9625_v10 }
0x1a2a   : > { %9125 = vmatprep.subr.mxu1 %v10643_v63 }
0x1a36   : > { %v4583_v16 = vpop.f32.mrb[90].mxu0 }
0x1a37   : > { %v11946_v22 = vadd.f32 %v11922_v39, %v4583_v16  ;;  %v9114_v56 = vpop.f32.mrb[91].mxu0 }
0x1a39   : > { %4837 = vrot.lane.b32.xlu0 %v11946_v22, %s10645_s27  ;;  %4604 = vrot.lane.b32.xlu1 %v11946_v22, %s10644_s5 }
0x1a3d   : > { %9943 = vrot.lane.b32.xlu1 %v11932_v35, %s10646_s17 }
0x1a41   : > { %4843 = vrot.lane.b32.xlu1 %v11946_v22, %s10646_s17 }
0x1a45   : > { %4835 = vrot.lane.b32.xlu1 %v11928_v42, %s10645_s27 }
0x1a73   : > { %v4324_v19 = vpop.f32.mrb[88].mxu1 }
0x1a74   : > { %v4336_v15 = vadd.f32 %v4324_v19, %v11841_v29  ;;  %v9094_v18 = vpop.f32.mrb[89].mxu1 }
0x1a76   : > { %v4347_v24 = vadd.f32 %v11852_v52, %v4336_v15 }
0x1a78   : > { %4352 = vst.msk [vmem:[#allocation2 + $0x18] sm:$0xff] %vm895_vm2, %v4347_v24 }
0x1a7f   : > { %v4397_v26 = vld [vmem:[#allocation2 + $0x18] sm:$0xff] }
0x1a80   : > { %v4408_v28 = vsel %vm895_vm2, %v4397_v26, 0.0 }
0x1a81   : > { %4409 = vadd.xlane.f32.xlu1 %v4408_v28 }
0x1aaa   : > { %v4329_v54 = vpop.f32.mrb[90].mxu1 }
0x1aab   : > { %v4337_v30 = vadd.f32 %v4329_v54, %v11845_v23  ;;  %v4605_v45 = vpop.permute.xlu1 %4604  ;;  %v9097_v31 = vpop.f32.mrb[91].mxu1 }
0x1aac   : > { %9126 = vmatpush3.xpose.msk.msra.mxu1 %vm1229_vm5, %v4605_v45  ;;  %v4838_v41 = vpop.permute.xlu0 %4837 }
0x1aad   : > { %v4348_v32 = vadd.f32 %v11852_v52, %v4337_v30  ;;  %9631 = vmatprep.subr.bf16.mxu1 %v10641_v59 }
0x1aaf   : > { %4353 = vst.msk [vmem:[#allocation2 + $0x20] sm:$0x3] %vm1032_vm3, %v4348_v32  ;;  %9128 = vmatmul.mubr.msk.f32.vlgmr.msra.gmra.mrb[92].mxu1 %vm1229_vm5, %v11925_v38  ;;  %v9944_v29 = vpop.permute.xlu1 %9943 }
0x1ab0   : > { %v9946_v34 = vunpack.i.h.bf16 %v9944_v29  ;;  %v9945_v33 = vunpack.i.l.bf16 %v9944_v29  ;;  %9130 = vmatprep.mubr.msk.f32.mxu1 %vm10642_vm4, %v10643_v63 }
0x1ab2   : > { %v9632_v23 = vpack.c.bf16 %v9946_v34, %v9945_v33 }
0x1ab3   : > { %9131 = vmatmul.mubr.msk.f32.gmra.mrb[94].mxu1 %vm1229_vm5, %v11928_v42  ;;  %v4844_v12 = vpop.permute.xlu1 %4843 }
0x1ab4   : > { %9634 = vmatpush3.bf16.xpose.msk.msra.mxu1 %vm11163_vm6, %v9632_v23  ;;  %9133 = vmatprep.mubr.msk.f32.mxu1 %vm10642_vm4, %v10643_v63 }
0x1ab5   : > { %9155 = vmatprep.subr.mxu1 %v10643_v63 }
0x1ab6   : > { %v4398_v52 = vld [vmem:[#allocation2 + $0x20] sm:$0x3] }
0x1ab7   : > { %9134 = vmatmul.mubr.msk.f32.gmra.mrb[96].mxu1 %vm1229_vm5, %v11946_v22  ;;  %v4411_v36 = vsel %vm1032_vm3, %v4398_v52, 0.0  ;;  %v4836_v40 = vpop.permute.xlu1 %4835 }
0x1ab8   : > { %4412 = vadd.xlane.f32.xlu0 %v4411_v36  ;;  %9157 = vmatprep.mubr.msk.f32.mxu1 %vm10642_vm4, %v10643_v63 }
0x1abc   : > { %9156 = vmatpush3.xpose.msk.msra.mxu1 %vm1229_vm5, %v4844_v12 }
0x1abd   : > { %9181 = vmatprep.subr.mxu1 %v10643_v63 }
0x1abf   : > { %9158 = vmatmul.mubr.msk.f32.vlgmr.msra.gmra.mrb[98].mxu1 %vm1229_vm5, %v4834_v4 }
0x1ac0   : > { %9160 = vmatprep.mubr.msk.f32.mxu1 %vm10642_vm4, %v10643_v63 }
0x1ac3   : > { %9161 = vmatmul.mubr.msk.f32.gmra.mrb[100].mxu1 %vm1229_vm5, %v4836_v40 }
0x1ac4   : > { %9163 = vmatprep.mubr.msk.f32.mxu1 %vm10642_vm4, %v10643_v63 }
0x1ac7   : > { %9164 = vmatmul.mubr.msk.f32.gmra.mrb[102].mxu1 %vm1229_vm5, %v4838_v41 }
0x1ac8   : > { %9183 = vmatprep.mubr.msk.f32.mxu1 %vm10642_vm4, %v10643_v63 }
0x1b0e   : > { %v4410_v61 = vpop.xlane.xlu1 %4409 }
0x1b0f   : > { %v4417_v62 = vmul.f32 0.03125, %v4410_v61 }
0x1b11   : > { %v11997_v7 = vsub.f32 %v4397_v26, %v4417_v62 }
0x1b13   : > { %v4427_v49 = vmul.f32 %v11997_v7, %v11997_v7 }
0x1b15   : > { %v4438_v16 = vsel %vm895_vm2, %v4427_v49, 0.0 }
0x1b45   : > { %v4413_v1 = vpop.xlane.xlu0 %4412 }
0x1b46   : > { %v4418_v11 = vmul.f32 0.03125, %v4413_v1 }
0x1b48   : > { %v12000_v17 = vsub.f32 %v4398_v52, %v4418_v11 }
0x1b4a   : > { %v4428_v19 = vmul.f32 %v12000_v17, %v12000_v17 }
0x1b4c   : > { %v4441_v15 = vsel %vm1032_vm3, %v4428_v19, 0.0 }
0x1b82   : > { %v4684_v43 = vpop.f32.mrb[92].mxu1 }
0x1b83   : > { %v4698_v46 = vmul.f32 0.35355338, %v4684_v43  ;;  %v9129_v47 = vpop.f32.mrb[93].mxu1 }
0x1b85   : > { %v4701_v48 = vsel %vm1325_vm7, %v4698_v46, -inf }
0x1b86   : > { %4702 = vmax.xlane.f32.xlu0 %v4701_v48  ;;  %v4689_v50 = vpop.f32.mrb[94].mxu1 }
0x1b87   : > { %v4699_v53 = vmul.f32 0.35355338, %v4689_v50  ;;  %v9132_v55 = vpop.f32.mrb[95].mxu1 }
0x1b89   : > { %v4704_v57 = vsel %vm1325_vm7, %v4699_v53, -inf }
0x1b8a   : > { %4705 = vmax.xlane.f32.xlu0 %v4704_v57  ;;  %v4694_v58 = vpop.f32.mrb[96].mxu1 }
0x1b8b   : > { %v4700_v6 = vmul.f32 0.35355338, %v4694_v58  ;;  %v9135_v21 = vpop.f32.mrb[97].mxu1 }
0x1b8d   : > { %v4707_v60 = vsel %vm1332_vm8, %v4700_v6, -inf }
0x1b8e   : > { %4708 = vmax.xlane.f32.xlu1 %v4707_v60 }
0x1b92   : > { %v4923_v2 = vpop.f32.mrb[98].mxu1 }
0x1b93   : > { %v4937_v3 = vmul.f32 0.35355338, %v4923_v2  ;;  %v9159_v5 = vpop.f32.mrb[99].mxu1 }
0x1b95   : > { %v4940_v37 = vsel %vm1325_vm7, %v4937_v3, -inf }
0x1b96   : > { %4941 = vmax.xlane.f32.xlu0 %v4940_v37  ;;  %v4928_v51 = vpop.f32.mrb[100].mxu1 }
0x1b97   : > { %v4938_v8 = vmul.f32 0.35355338, %v4928_v51  ;;  %v9162_v9 = vpop.f32.mrb[101].mxu1 }
0x1b99   : > { %v4943_v13 = vsel %vm1325_vm7, %v4938_v8, -inf }
0x1b9a   : > { %4944 = vmax.xlane.f32.xlu1 %v4943_v13  ;;  %v4933_v25 = vpop.f32.mrb[102].mxu1 }
0x1b9b   : > { %v4939_v14 = vmul.f32 0.35355338, %v4933_v25  ;;  %v9165_v10 = vpop.f32.mrb[103].mxu1 }
0x1b9d   : > { %v4946_v56 = vsel %vm1332_vm8, %v4939_v14, -inf }
0x1b9e   : > { %4439 = vadd.xlane.f32.xlu1 %v4438_v16  ;;  %4947 = vmax.xlane.f32.xlu0 %v4946_v56 }
0x1ba2   : > { %4442 = vadd.xlane.f32.xlu0 %v4441_v15 }
0x1baf   : > { %4738 = vrot.lane.b32.xlu1 %v11946_v22, %s10647_s24 }
0x1bb8   : > { %9948 = vrot.lane.b32.xlu0 %v11932_v35, %s10647_s24 }
0x1c13   : > { %v4703_v18 = vpop.xlane.xlu0 %4702 }
0x1c14   : > { %v4710_v24 = vsub.f32 %v4698_v46, %v4703_v18 }
0x1c16   : > { %v4713_v26 = vmul.f32 1.442695, %v4710_v24 }
0x1c17   : > { %v4706_v28 = vpop.xlane.xlu0 %4705 }
0x1c18   : > { %10159 = vpow2.f32 %v4713_v26  ;;  %v4711_v54 = vsub.f32 %v4699_v53, %v4706_v28 }
0x1c1a   : > { %v4715_v30 = vmul.f32 1.442695, %v4711_v54 }
0x1c1b   : > { %v4709_v45 = vpop.xlane.xlu1 %4708 }
0x1c1c   : > { %10161 = vpow2.f32 %v4715_v30  ;;  %v4712_v31 = vsub.f32 %v4700_v6, %v4709_v45 }
0x1c1e   : > { %v4717_v32 = vmul.f32 1.442695, %v4712_v31 }
0x1c20   : > { %10163 = vpow2.f32 %v4717_v32 }
0x1c22   : > { %v12014_v29 = vpop.eup %10159 }
0x1c23   : > { %v4942_v34 = vpop.xlane.xlu0 %4941  ;;  %v4719_v33 = vsel %vm1325_vm7, %v12014_v29, 0.0 }
0x1c24   : > { %v4949_v23 = vsub.f32 %v4937_v3, %v4942_v34  ;;  %4720 = vadd.xlane.f32.xlu1 %v4719_v33 }
0x1c26   : > { %v12018_v52 = vpop.eup %10161  ;;  %v4952_v36 = vmul.f32 1.442695, %v4949_v23 }
0x1c27   : > { %v4945_v12 = vpop.xlane.xlu1 %4944  ;;  %v4722_v4 = vsel %vm1325_vm7, %v12018_v52, 0.0 }
0x1c28   : > { %10165 = vpow2.f32 %v4952_v36  ;;  %v4950_v40 = vsub.f32 %v4938_v8, %v4945_v12  ;;  %4723 = vadd.xlane.f32.xlu0 %v4722_v4 }
0x1c2a   : > { %v12022_v41 = vpop.eup %10163  ;;  %v4954_v43 = vmul.f32 1.442695, %v4950_v40  ;;  %v12097_v40 = vld [vmem:[%s12776_s9 + $0x20] sm:$0xff] }
0x1c2b   : > { %v4440_v46 = vpop.xlane.xlu1 %4439  ;;  %v4948_v47 = vpop.xlane.xlu0 %4947  ;;  %v4725_v48 = vsel %vm1332_vm8, %v12022_v41, 0.0 }
0x1c2c   : > { %10167 = vpow2.f32 %v4954_v43  ;;  %v4447_v50 = vmul.f32 0.03125, %v4440_v46  ;;  %v4951_v53 = vsub.f32 %v4939_v14, %v4948_v47  ;;  %4726 = vadd.xlane.f32.xlu1 %v4725_v48  ;;  %v12108_v48 = vld [vmem:[%s12776_s9 + $0x28] sm:$0xff] }
0x1c2d   : > { %9182 = vmatpush3.msra.mxu1 %v12108_v48 }
0x1c2e   : > { %v4452_v55 = vadd.f32 1e-05, %v4447_v50  ;;  %v4956_v57 = vmul.f32 1.442695, %v4951_v53  ;;  %9638 = vmatprep.subr.bf16.mxu1 %v10641_v59 }
0x1c2f   : > { %v4443_v58 = vpop.xlane.xlu0 %4442  ;;  %v4739_v8 = vpop.permute.xlu1 %4738 }
0x1c30   : > { %10169 = vrsqrt.f32 %v4452_v55  ;;  %v4448_v6 = vmul.f32 0.03125, %v4443_v58 }
0x1c31   : > { %10171 = vpow2.f32 %v4956_v57 }
0x1c32   : > { %v12026_v21 = vpop.eup %10165  ;;  %v4453_v60 = vadd.f32 1e-05, %v4448_v6 }
0x1c33   : > { %v9949_v61 = vpop.permute.xlu0 %9948  ;;  %v4958_v62 = vsel %vm1325_vm7, %v12026_v21, 0.0 }
0x1c34   : > { %10173 = vrsqrt.f32 %v4453_v60  ;;  %v9951_v1 = vunpack.i.h.bf16 %v9949_v61  ;;  %v9950_v2 = vunpack.i.l.bf16 %v9949_v61  ;;  %4959 = vadd.xlane.f32.xlu0 %v4958_v62 }
0x1c36   : > { %v12030_v3 = vpop.eup %10167  ;;  %v9629_v5 = vpack.c.bf16 %v9951_v1, %v9950_v2 }
0x1c37   : > { %v4961_v11 = vsel %vm1325_vm7, %v12030_v3, 0.0 }
0x1c38   : > { %4962 = vadd.xlane.f32.xlu1 %v4961_v11  ;;  %9630 = vmatpush3.bf16.msra.mxu0 %v9629_v5 }
0x1c39   : > { %9140 = vmatprep.subr.mxu0 %v10643_v63 }
0x1c3a   : > { %v10170_v37 = vpop.eup %10169 }
0x1c3b   : > { %v12035_v51 = vpop.eup %10171  ;;  %v4462_v9 = vmul.f32 %v10170_v37, %v11997_v7 }
0x1c3c   : > { %v4964_v13 = vsel %vm1332_vm8, %v12035_v51, 0.0  ;;  %9141 = vmatpush3.msk.msra.mxu0 %vm1377_vm9, %v4739_v8 }
0x1c3d   : > { %4965 = vadd.xlane.f32.xlu1 %v4964_v13  ;;  %v4473_v49 = vmul.f32 %v11892_v44, %v4462_v9  ;;  %9635 = vmatprep.subr.bf16.mxu0 %v10641_v59 }
0x1c3e   : > { %v10174_v25 = vpop.eup %10173 }
0x1c3f   : > { %v4484_v14 = vadd.f32 %v11897_v20, %v4473_v49  ;;  %v4463_v10 = vmul.f32 %v10174_v25, %v12000_v17 }
0x1c41   : > { %9116 = vmatmul.mubr.msk.f32.gmra.mrb[92].mxu0 %vm895_vm2, %v4484_v14  ;;  %v4474_v16 = vmul.f32 %v11892_v44, %v4463_v10 }
0x1c42   : > { %9118 = vmatprep.mubr.msk.f32.mxu0 %vm10642_vm4, %v10643_v63 }
0x1c43   : > { %v4485_v7 = vadd.f32 %v11897_v20, %v4474_v16 }
0x1c45   : > { %9119 = vmatmul.mubr.msk.f32.gmra.mrb[94].mxu0 %vm895_vm2, %v4485_v7 }
0x1c46   : > { %9142 = vmatprep.mubr.msk.f32.mxu0 %vm10642_vm4, %v10643_v63 }
0x1c4a   : > { %4977 = vrot.lane.b32.xlu0 %v11946_v22, %s10648_s26 }
0x1c4e   : > { %9953 = vrot.lane.b32.xlu1 %v11932_v35, %s10648_s26  ;;  %5260 = vrot.lane.b32.xlu0 %v11946_v22, %s10649_s23 }
0x1c52   : > { %9958 = vrot.lane.b32.xlu1 %v11932_v35, %s10649_s23  ;;  %5252 = vrot.lane.b32.xlu0 %v11928_v42, %s10650_s28 }
0x1c56   : > { %5250 = vrot.lane.b32.xlu1 %v11925_v38, %s10650_s28 }
0x1c5a   : > { %5254 = vrot.lane.b32.xlu1 %v11946_v22, %s10650_s28 }
0x1cb1   : > { %v4721_v44 = vpop.xlane.xlu1 %4720 }
0x1cb2   : > { %10175 = vrcp.f32 %v4721_v44 }
0x1cb5   : > { %v4724_v20 = vpop.xlane.xlu0 %4723 }
0x1cb6   : > { %10177 = vrcp.f32 %v4724_v20 }
0x1cb9   : > { %v4727_v17 = vpop.xlane.xlu1 %4726 }
0x1cba   : > { %10179 = vrcp.f32 %v4727_v17 }
0x1cbc   : > { %v10176_v56 = vpop.eup %10175 }
0x1cbd   : > { %v4731_v19 = vmul.f32 %v10176_v56, %v12014_v29 }
0x1cbf   : > { %9143 = vmatmul.mubr.msk.f32.vlgmr.msra.gmra.mrb[96].mxu0 %vm1325_vm7, %v4731_v19 }
0x1cc0   : > { %v10178_v15 = vpop.eup %10177  ;;  %9145 = vmatprep.mubr.msk.f32.mxu0 %vm10642_vm4, %v10643_v63 }
0x1cc1   : > { %v4732_v18 = vmul.f32 %v10178_v15, %v12018_v52  ;;  %v4960_v54 = vpop.xlane.xlu0 %4959 }
0x1cc2   : > { %10181 = vrcp.f32 %v4960_v54 }
0x1cc3   : > { %9146 = vmatmul.mubr.msk.f32.gmra.mrb[98].mxu0 %vm1325_vm7, %v4732_v18 }
0x1cc4   : > { %v10180_v24 = vpop.eup %10179  ;;  %9148 = vmatprep.mubr.msk.f32.mxu0 %vm10642_vm4, %v10643_v63 }
0x1cc5   : > { %v4963_v26 = vpop.xlane.xlu1 %4962  ;;  %v4733_v28 = vmul.f32 %v10180_v24, %v12022_v41  ;;  %v4978_v23 = vpop.permute.xlu0 %4977 }
0x1cc6   : > { %10183 = vrcp.f32 %v4963_v26 }
0x1cc7   : > { %9149 = vmatmul.mubr.msk.f32.gmra.mrb[100].mxu0 %vm1325_vm7, %v4733_v28 }
0x1cc8   : > { %9172 = vmatprep.mubr.msk.f32.mxu0 %vm10642_vm4, %v10643_v63 }
0x1cc9   : > { %v5261_v37 = vpop.permute.xlu0 %5260 }
0x1cca   : > { %v4966_v30 = vpop.xlane.xlu1 %4965 }
0x1ccb   : > { %10185 = vrcp.f32 %v4966_v30 }
0x1ccc   : > { %v10182_v34 = vpop.eup %10181 }
0x1ccd   : > { %v4970_v33 = vmul.f32 %v10182_v34, %v12026_v21  ;;  %v5253_v9 = vpop.permute.xlu0 %5252 }
0x1cce   : > { %v9954_v45 = vpop.permute.xlu1 %9953 }
0x1ccf   : > { %v9956_v31 = vunpack.i.h.bf16 %v9954_v45  ;;  %v9955_v32 = vunpack.i.l.bf16 %v9954_v45 }
0x1cd0   : > { %v10184_v52 = vpop.eup %10183 }
0x1cd1   : > { %v9636_v29 = vpack.c.bf16 %v9956_v31, %v9955_v32  ;;  %v4971_v36 = vmul.f32 %v10184_v52, %v12030_v3 }
0x1cd2   : > { %v9959_v21 = vpop.permute.xlu1 %9958 }
0x1cd3   : > { %9637 = vmatpush3.bf16.msra.mxu0 %v9636_v29  ;;  %v9961_v60 = vunpack.i.h.bf16 %v9959_v21  ;;  %v9960_v61 = vunpack.i.l.bf16 %v9959_v21 }
0x1cd4   : > { %9170 = vmatprep.subr.mxu0 %v10643_v63 }
0x1cd5   : > { %v10186_v12 = vpop.eup %10185  ;;  %v9639_v62 = vpack.c.bf16 %v9961_v60, %v9960_v61 }
0x1cd6   : > { %v4972_v4 = vmul.f32 %v10186_v12, %v12035_v51  ;;  %v5251_v8 = vpop.permute.xlu1 %5250 }
0x1cd7   : > { %9171 = vmatpush3.msk.msra.mxu0 %vm1377_vm9, %v4978_v23 }
0x1cd8   : > { %9173 = vmatmul.mubr.msk.f32.vlgmr.msra.gmra.mrb[102].mxu0 %vm1325_vm7, %v4970_v33  ;;  %9192 = vmatprep.subr.mxu0 %v10643_v63 }
0x1cd9   : > { %9175 = vmatprep.mubr.msk.f32.mxu0 %vm10642_vm4, %v10643_v63  ;;  %9193 = vmatpush3.msra.mxu0 %v12097_v40 }
0x1cda   : > { %9642 = vmatprep.subr.bf16.mxu0 %v10641_v59  ;;  %v5255_v13 = vpop.permute.xlu1 %5254 }
0x1cdc   : > { %9176 = vmatmul.mubr.msk.f32.gmra.mrb[104].mxu0 %vm1325_vm7, %v4971_v36 }
0x1cdd   : > { %9178 = vmatprep.mubr.msk.f32.mxu0 %vm10642_vm4, %v10643_v63 }
0x1ce0   : > { %9179 = vmatmul.mubr.msk.f32.gmra.mrb[106].mxu0 %vm1325_vm7, %v4972_v4 }
0x1ce1   : > { %9194 = vmatprep.mubr.msk.f32.mxu0 %vm10642_vm4, %v10643_v63 }
0x1d14   : > { %v12100_v41 = vpop.f32.mrb[92].mxu0 }
0x1d15   : > { %v9117_v43 = vpop.f32.mrb[93].mxu0 }
0x1d18   : > { %v12103_v46 = vpop.f32.mrb[94].mxu0 }
0x1d19   : > { %v9120_v47 = vpop.f32.mrb[95].mxu0 }
0x1d92   : > { %v4819_v50 = vpop.f32.mrb[96].mxu0 }
0x1d93   : > { %v9144_v53 = vpop.f32.mrb[97].mxu0  ;;  %9195 = vmatmul.mubr.msk.f32.vlgmr.msra.gmra.mrb[108].mxu0 %vm1229_vm5, %v4819_v50 }
0x1d94   : > { %9197 = vmatprep.mubr.msk.f32.mxu0 %vm10642_vm4, %v10643_v63 }
0x1d96   : > { %v4824_v55 = vpop.f32.mrb[98].mxu0 }
0x1d97   : > { %v9147_v57 = vpop.f32.mrb[99].mxu0  ;;  %9198 = vmatmul.mubr.msk.f32.gmra.mrb[110].mxu0 %vm1229_vm5, %v4824_v55 }
0x1d98   : > { %9200 = vmatprep.mubr.msk.f32.mxu0 %vm10642_vm4, %v10643_v63 }
0x1d9a   : > { %v4829_v58 = vpop.f32.mrb[100].mxu0 }
0x1d9b   : > { %v9150_v6 = vpop.f32.mrb[101].mxu0  ;;  %9201 = vmatmul.mubr.msk.f32.gmra.mrb[112].mxu0 %vm1229_vm5, %v4829_v58 }
0x1d9c   : > { %9224 = vmatprep.mubr.msk.f32.mxu0 %vm10642_vm4, %v10643_v63 }
0x1dab   : > { %v5058_v1 = vpop.f32.mrb[102].mxu0 }
0x1dac   : > { %v9174_v2 = vpop.f32.mrb[103].mxu0  ;;  %9184 = vmatmul.mubr.msk.f32.vlgmr.msra.gmra.mrb[104].mxu1 %vm1229_vm5, %v5058_v1 }
0x1dad   : > { %9641 = vmatpush3.bf16.xpose.msk.msra.mxu1 %vm11163_vm6, %v9639_v62  ;;  %9186 = vmatprep.mubr.msk.f32.mxu1 %vm10642_vm4, %v10643_v63 }
0x1dae   : > { %9207 = vmatprep.subr.mxu1 %v10643_v63 }
0x1daf   : > { %v5063_v3 = vpop.f32.mrb[104].mxu0 }
0x1db0   : > { %v9177_v5 = vpop.f32.mrb[105].mxu0  ;;  %9187 = vmatmul.mubr.msk.f32.gmra.mrb[106].mxu1 %vm1229_vm5, %v5063_v3 }
0x1db1   : > { %9189 = vmatprep.mubr.msk.f32.mxu1 %vm10642_vm4, %v10643_v63 }
0x1db3   : > { %v5068_v11 = vpop.f32.mrb[106].mxu0 }
0x1db4   : > { %v9180_v51 = vpop.f32.mrb[107].mxu0  ;;  %9190 = vmatmul.mubr.msk.f32.gmra.mrb[108].mxu1 %vm1229_vm5, %v5068_v11 }
0x1db5   : > { %9208 = vmatpush3.xpose.msk.msra.mxu1 %vm1229_vm5, %v5261_v37  ;;  %9209 = vmatprep.mubr.msk.f32.mxu1 %vm10642_vm4, %v10643_v63 }
0x1db6   : > { %9233 = vmatprep.subr.mxu1 %v10643_v63 }
0x1db8   : > { %9210 = vmatmul.mubr.msk.f32.vlgmr.msra.gmra.mrb[110].mxu1 %vm1229_vm5, %v5251_v8 }
0x1db9   : > { %9212 = vmatprep.mubr.msk.f32.mxu1 %vm10642_vm4, %v10643_v63 }
0x1dbc   : > { %9213 = vmatmul.mubr.msk.f32.gmra.mrb[112].mxu1 %vm1229_vm5, %v5253_v9 }
0x1dbd   : > { %9215 = vmatprep.mubr.msk.f32.mxu1 %vm10642_vm4, %v10643_v63 }
0x1dc0   : > { %9216 = vmatmul.mubr.msk.f32.gmra.mrb[114].mxu1 %vm1229_vm5, %v5255_v13 }
0x1dc1   : > { %9235 = vmatprep.mubr.msk.f32.mxu1 %vm10642_vm4, %v10643_v63 }
0x1e66   : > { %v5236_v49 = vpop.f32.mrb[108].mxu0 }
0x1e67   : > { %v9196_v25 = vpop.f32.mrb[109].mxu0 }
0x1e6a   : > { %v5241_v14 = vpop.f32.mrb[110].mxu0 }
0x1e6b   : > { %v9199_v10 = vpop.f32.mrb[111].mxu0 }
0x1e6e   : > { %v5246_v16 = vpop.f32.mrb[112].mxu0 }
0x1e6f   : > { %v9202_v7 = vpop.f32.mrb[113].mxu0 }
0x1e7f   : > { %v5147_v44 = vpop.f32.mrb[104].mxu1 }
0x1e80   : > { %v12144_v20 = vadd.f32 %v5236_v49, %v5147_v44  ;;  %v9185_v17 = vpop.f32.mrb[105].mxu1 }
0x1e83   : > { %v5152_v56 = vpop.f32.mrb[106].mxu1 }
0x1e84   : > { %v12146_v19 = vadd.f32 %v5241_v14, %v5152_v56  ;;  %v9188_v15 = vpop.f32.mrb[107].mxu1 }
0x1e87   : > { %v5157_v18 = vpop.f32.mrb[108].mxu1 }
0x1e88   : > { %v12148_v24 = vadd.f32 %v5246_v16, %v5157_v18  ;;  %v9191_v26 = vpop.f32.mrb[109].mxu1 }
0x1e89   : > { %v12199_v26 = vld [vmem:[%s12776_s9 + $0x30] sm:$0xff] }
0x1e8a   : > { %9234 = vmatpush3.msra.mxu1 %v12199_v26 }
0x1e8b   : > { %v5340_v28 = vpop.f32.mrb[110].mxu1  ;;  %9649 = vmatprep.subr.bf16.mxu1 %v10641_v59 }
0x1e8c   : > { %v5354_v54 = vmul.f32 0.35355338, %v5340_v28  ;;  %v9211_v30 = vpop.f32.mrb[111].mxu1 }
0x1e8e   : > { %v5357_v45 = vsel %vm1325_vm7, %v5354_v54, -inf }
0x1e8f   : > { %5358 = vmax.xlane.f32.xlu0 %v5357_v45  ;;  %v5345_v31 = vpop.f32.mrb[112].mxu1 }
0x1e90   : > { %v5355_v32 = vmul.f32 0.35355338, %v5345_v31  ;;  %v9214_v29 = vpop.f32.mrb[113].mxu1 }
0x1e92   : > { %v5360_v34 = vsel %vm1325_vm7, %v5355_v32, -inf }
0x1e93   : > { %5361 = vmax.xlane.f32.xlu1 %v5360_v34  ;;  %v5350_v33 = vpop.f32.mrb[114].mxu1 }
0x1e94   : > { %v5356_v23 = vmul.f32 0.35355338, %v5350_v33  ;;  %v9217_v52 = vpop.f32.mrb[115].mxu1 }
0x1e96   : > { %v5363_v36 = vsel %vm1332_vm8, %v5356_v23, -inf }
0x1e97   : > { %5364 = vmax.xlane.f32.xlu0 %v5363_v36 }
0x1ea4   : > { %5394 = vrot.lane.b32.xlu1 %v11946_v22, %s10651_s0 }
0x1ea8   : > { %9968 = vrot.lane.b32.xlu1 %v11932_v35, %s12871_s25 }
0x1eac   : > { %5591 = vrot.lane.b32.xlu1 %v11946_v22, %s12871_s25 }
0x1f1c   : > { %v5359_v12 = vpop.xlane.xlu0 %5358 }
0x1f1d   : > { %v5366_v4 = vsub.f32 %v5354_v54, %v5359_v12 }
0x1f1f   : > { %v5369_v43 = vmul.f32 1.442695, %v5366_v4 }
0x1f20   : > { %v5362_v47 = vpop.xlane.xlu1 %5361 }
0x1f21   : > { %10187 = vpow2.f32 %v5369_v43  ;;  %v5367_v50 = vsub.f32 %v5355_v32, %v5362_v47 }
0x1f23   : > { %v5371_v53 = vmul.f32 1.442695, %v5367_v50 }
0x1f24   : > { %v5365_v55 = vpop.xlane.xlu0 %5364  ;;  %v5395_v2 = vpop.permute.xlu1 %5394 }
0x1f25   : > { %10189 = vpow2.f32 %v5371_v53  ;;  %v5368_v57 = vsub.f32 %v5356_v23, %v5365_v55 }
0x1f27   : > { %v5373_v58 = vmul.f32 1.442695, %v5368_v57 }
0x1f28   : > { %v9969_v3 = vpop.permute.xlu1 %9968 }
0x1f29   : > { %10191 = vpow2.f32 %v5373_v58  ;;  %v9971_v14 = vunpack.i.h.bf16 %v9969_v3  ;;  %v9970_v10 = vunpack.i.l.bf16 %v9969_v3 }
0x1f2b   : > { %v10188_v6 = vpop.eup %10187  ;;  %v9646_v44 = vpack.c.bf16 %v9971_v14, %v9970_v10  ;;  %v5932_v14 = vrot.slane %v11946_v22, 1 }
0x1f2c   : > { %v5375_v21 = vsel %vm1325_vm7, %v10188_v6, 0.0  ;;  %v5592_v11 = vpop.permute.xlu1 %5591 }
0x1f2d   : > { %5376 = vadd.xlane.f32.xlu0 %v5375_v21 }
0x1f2f   : > { %v10190_v60 = vpop.eup %10189 }
0x1f30   : > { %v5378_v61 = vsel %vm1325_vm7, %v10190_v60, 0.0 }
0x1f31   : > { %5379 = vadd.xlane.f32.xlu0 %v5378_v61 }
0x1f33   : > { %v10192_v62 = vpop.eup %10191 }
0x1f34   : > { %v5381_v1 = vsel %vm1332_vm8, %v10192_v62, 0.0 }
0x1f35   : > { %5382 = vadd.xlane.f32.xlu1 %v5381_v1 }
0x1f46   : > { %5583 = vrot.lane.b32.xlu1 %v11928_v42, %s12872_s4 }
0x1f47   : > { %9963 = vrot.lane.b32.xlu0 %v11932_v35, %s10651_s0 }
0x1f4b   : > { %5581 = vrot.lane.b32.xlu0 %v11925_v38, %s12872_s4 }
0x1f4f   : > { %5585 = vrot.lane.b32.xlu0 %v11946_v22, %s12872_s4 }
0x1fba   : > { %v5377_v5 = vpop.xlane.xlu0 %5376 }
0x1fbb   : > { %10193 = vrcp.f32 %v5377_v5 }
0x1fbe   : > { %v5380_v37 = vpop.xlane.xlu0 %5379 }
0x1fbf   : > { %10195 = vrcp.f32 %v5380_v37 }
0x1fc2   : > { %v5383_v51 = vpop.xlane.xlu1 %5382  ;;  %v9964_v8 = vpop.permute.xlu0 %9963 }
0x1fc3   : > { %v9966_v9 = vunpack.i.h.bf16 %v9964_v8  ;;  %v9965_v42 = vunpack.i.l.bf16 %v9964_v8  ;;  %10197 = vrcp.f32 %v5383_v51 }
0x1fc5   : > { %v9643_v13 = vpack.c.bf16 %v9966_v9, %v9965_v42  ;;  %v10194_v49 = vpop.eup %10193 }
0x1fc6   : > { %v5387_v38 = vmul.f32 %v10194_v49, %v10188_v6  ;;  %v5582_v56 = vpop.permute.xlu0 %5581  ;;  %v5584_v15 = vpop.permute.xlu1 %5583  ;;  %v4589_v49 = vadd.f32 %v11922_v39, %v12100_v41 }
0x1fc7   : > { %9644 = vmatpush3.bf16.msra.mxu0 %v9643_v13  ;;  %v4594_v13 = vadd.f32 %v11922_v39, %v12103_v46 }
0x1fc8   : > { %9222 = vmatprep.subr.mxu0 %v10643_v63 }
0x1fc9   : > { %v10196_v25 = vpop.eup %10195 }
0x1fca   : > { %v5388_v16 = vmul.f32 %v10196_v25, %v10190_v60  ;;  %v5586_v18 = vpop.permute.xlu0 %5585  ;;  %v5933_v25 = vrot.slane %v4589_v49, 1 }
0x1fcb   : > { %9223 = vmatpush3.msk.msra.mxu0 %vm1377_vm9, %v5395_v2 }
0x1fcc   : > { %9225 = vmatmul.mubr.msk.f32.vlgmr.msra.gmra.mrb[114].mxu0 %vm1325_vm7, %v5387_v38  ;;  %9645 = vmatprep.subr.bf16.mxu0 %v10641_v59  ;;  %v12225_v38 = vrot.slane %v4594_v13, 1 }
0x1fcd   : > { %9227 = vmatprep.mubr.msk.f32.mxu0 %vm10642_vm4, %v10643_v63  ;;  %v10198_v7 = vpop.eup %10197 }
0x1fce   : > { %v5389_v17 = vmul.f32 %v10198_v7, %v10192_v62  ;;  %v12230_v10 = vsel %vm2559_vm10, %v5933_v25, %v12225_v38 }
0x1fd0   : > { %9228 = vmatmul.mubr.msk.f32.gmra.mrb[116].mxu0 %vm1325_vm7, %v5388_v16  ;;  %v12233_v16 = vsel %vm2559_vm10, %v5932_v14, %v5933_v25 }
0x1fd1   : > { %9230 = vmatprep.mubr.msk.f32.mxu0 %vm10642_vm4, %v10643_v63  ;;  %v12237_v7 = vpack.i.bf16 %v12230_v10, %v12233_v16 }
0x1fd2   : > { %9648 = vmatpush3.bf16.xpose.msk.msra.mxu0 %vm11163_vm6, %v9646_v44 }
0x1fd3   : > { %9248 = vmatprep.subr.mxu0 %v10643_v63 }
0x1fd4   : > { %9231 = vmatmul.mubr.msk.f32.gmra.mrb[118].mxu0 %vm1325_vm7, %v5389_v17 }
0x1fd5   : > { %9250 = vmatprep.mubr.msk.f32.mxu0 %vm10642_vm4, %v10643_v63 }
0x1fda   : > { %9249 = vmatpush3.xpose.msk.msra.mxu0 %vm1229_vm5, %v5592_v11 }
0x1fdb   : > { %9274 = vmatprep.subr.mxu0 %v10643_v63 }
0x1fdd   : > { %9251 = vmatmul.mubr.msk.f32.vlgmr.msra.gmra.mrb[120].mxu0 %vm1229_vm5, %v5582_v56 }
0x1fde   : > { %9253 = vmatprep.mubr.msk.f32.mxu0 %vm10642_vm4, %v10643_v63 }
0x1fe1   : > { %9254 = vmatmul.mubr.msk.f32.gmra.mrb[122].mxu0 %vm1229_vm5, %v5584_v15 }
0x1fe2   : > { %9256 = vmatprep.mubr.msk.f32.mxu0 %vm10642_vm4, %v10643_v63 }
0x1fe5   : > { %9257 = vmatmul.mubr.msk.f32.gmra.mrb[124].mxu0 %vm1229_vm5, %v5586_v18 }
0x1fe6   : > { %9276 = vmatprep.mubr.msk.f32.mxu0 %vm10642_vm4, %v10643_v63 }
0x209f   : > { %v5475_v28 = vpop.f32.mrb[114].mxu0 }
0x20a0   : > { %v9226_v54 = vpop.f32.mrb[115].mxu0  ;;  %9236 = vmatmul.mubr.msk.f32.vlgmr.msra.gmra.mrb[116].mxu1 %vm1229_vm5, %v5475_v28 }
0x20a1   : > { %9238 = vmatprep.mubr.msk.f32.mxu1 %vm10642_vm4, %v10643_v63 }
0x20a3   : > { %v5480_v30 = vpop.f32.mrb[116].mxu0 }
0x20a4   : > { %v9229_v45 = vpop.f32.mrb[117].mxu0  ;;  %9239 = vmatmul.mubr.msk.f32.gmra.mrb[118].mxu1 %vm1229_vm5, %v5480_v30 }
0x20a5   : > { %9241 = vmatprep.mubr.msk.f32.mxu1 %vm10642_vm4, %v10643_v63 }
0x20a7   : > { %v5485_v31 = vpop.f32.mrb[118].mxu0 }
0x20a8   : > { %v9232_v32 = vpop.f32.mrb[119].mxu0  ;;  %9242 = vmatmul.mubr.msk.f32.gmra.mrb[120].mxu1 %vm1229_vm5, %v5485_v31 }
0x20a9   : > { %9265 = vmatprep.mubr.msk.f32.mxu1 %vm10642_vm4, %v10643_v63 }
0x20b0   : > { %v5671_v29 = vpop.f32.mrb[120].mxu0 }
0x20b1   : > { %v5685_v34 = vmul.f32 0.35355338, %v5671_v29  ;;  %v9252_v33 = vpop.f32.mrb[121].mxu0 }
0x20b3   : > { %v5688_v23 = vsel %vm1325_vm7, %v5685_v34, -inf }
0x20b4   : > { %5689 = vmax.xlane.f32.xlu1 %v5688_v23  ;;  %v5676_v52 = vpop.f32.mrb[122].mxu0 }
0x20b5   : > { %v5686_v36 = vmul.f32 0.35355338, %v5676_v52  ;;  %v9255_v12 = vpop.f32.mrb[123].mxu0 }
0x20b7   : > { %v5691_v4 = vsel %vm1325_vm7, %v5686_v36, -inf }
0x20b8   : > { %5692 = vmax.xlane.f32.xlu0 %v5691_v4  ;;  %v5681_v43 = vpop.f32.mrb[124].mxu0 }
0x20b9   : > { %v5687_v47 = vmul.f32 0.35355338, %v5681_v43  ;;  %v9258_v50 = vpop.f32.mrb[125].mxu0 }
0x20bb   : > { %v5694_v53 = vsel %vm1332_vm8, %v5687_v47, -inf }
0x20bc   : > { %5695 = vmax.xlane.f32.xlu0 %v5694_v53 }
0x20c5   : > { %9973 = vrot.lane.b32.xlu1 %v11932_v35, %s12873_s16 }
0x2141   : > { %v5690_v55 = vpop.xlane.xlu1 %5689 }
0x2142   : > { %v5697_v57 = vsub.f32 %v5685_v34, %v5690_v55 }
0x2144   : > { %v5700_v58 = vmul.f32 1.442695, %v5697_v57 }
0x2145   : > { %v9974_v6 = vpop.permute.xlu1 %9973  ;;  %v5693_v21 = vpop.xlane.xlu0 %5692 }
0x2146   : > { %10199 = vpow2.f32 %v5700_v58  ;;  %v9976_v60 = vunpack.i.h.bf16 %v9974_v6  ;;  %v9975_v61 = vunpack.i.l.bf16 %v9974_v6  ;;  %v5698_v62 = vsub.f32 %v5686_v36, %v5693_v21  ;;  %v12311_v58 = vld [vmem:[%s12776_s9 + $0x38] sm:$0xff] }
0x2147   : > { %9275 = vmatpush3.msra.mxu0 %v12311_v58 }
0x2148   : > { %v9650_v1 = vpack.c.bf16 %v9976_v60, %v9975_v61  ;;  %v5702_v2 = vmul.f32 1.442695, %v5698_v62  ;;  %9656 = vmatprep.subr.bf16.mxu0 %v10641_v59 }
0x2149   : > { %v5696_v3 = vpop.xlane.xlu0 %5695 }
0x214a   : > { %10201 = vpow2.f32 %v5702_v2  ;;  %v5699_v5 = vsub.f32 %v5687_v47, %v5696_v3  ;;  %9651 = vmatpush3.bf16.msra.mxu1 %v9650_v1 }
0x214b   : > { %9263 = vmatprep.subr.mxu1 %v10643_v63 }
0x214c   : > { %v5704_v11 = vmul.f32 1.442695, %v5699_v5 }
0x214e   : > { %10203 = vpow2.f32 %v5704_v11 }
0x2150   : > { %v10200_v35 = vpop.eup %10199 }
0x2151   : > { %v5706_v37 = vsel %vm1325_vm7, %v10200_v35, 0.0 }
0x2152   : > { %5707 = vadd.xlane.f32.xlu0 %v5706_v37 }
0x2154   : > { %v10202_v51 = vpop.eup %10201 }
0x2155   : > { %v5709_v8 = vsel %vm1325_vm7, %v10202_v51, 0.0 }
0x2156   : > { %5710 = vadd.xlane.f32.xlu1 %v5709_v8 }
0x2158   : > { %v10204_v9 = vpop.eup %10203 }
0x2159   : > { %v5712_v42 = vsel %vm1332_vm8, %v10204_v9, 0.0 }
0x215a   : > { %5713 = vadd.xlane.f32.xlu0 %v5712_v42 }
0x2167   : > { %9978 = vrot.lane.b32.xlu1 %v12237_v7, %s10644_s5 }
0x216b   : > { %5941 = vrot.lane.b32.xlu1 %v12225_v38, %s10644_s5  ;;  %s12874_s5 = sld [smem:[#allocation41_spill]] }
0x216f   : > { %9983 = vrot.lane.b32.xlu1 %v12237_v7, %s10646_s17 }
0x2170   : > { %5725 = vrot.lane.b32.xlu0 %v11946_v22, %s12873_s16 }
0x2173   : > { %6170 = vrot.lane.b32.xlu1 %v12233_v16, %s10645_s27  ;;  %v5564_v39 = vpop.f32.mrb[116].mxu1 }
0x2174   : > { %v12250_v41 = vadd.f32 %v5564_v39, %v12144_v20  ;;  %6180 = vrot.lane.b32.xlu0 %v12225_v38, %s10646_s17  ;;  %v9237_v46 = vpop.f32.mrb[117].mxu1 }
0x2177   : > { %6174 = vrot.lane.b32.xlu1 %v12225_v38, %s10645_s27  ;;  %v5569_v44 = vpop.f32.mrb[118].mxu1 }
0x2178   : > { %v12257_v17 = vadd.f32 %v5569_v44, %v12146_v19  ;;  %6172 = vrot.lane.b32.xlu0 %v12230_v10, %s10645_s27  ;;  %v9240_v22 = vpop.f32.mrb[119].mxu1  ;;  %s12875_s27 = sld [smem:[#allocation26_spill]] }
0x217b   : > { %v5574_v56 = vpop.f32.mrb[120].mxu1 }
0x217c   : > { %v12262_v15 = vadd.f32 %v5574_v56, %v12148_v24  ;;  %v9243_v20 = vpop.f32.mrb[121].mxu1 }
0x21df   : > { %v5708_v18 = vpop.xlane.xlu0 %5707 }
0x21e0   : > { %10205 = vrcp.f32 %v5708_v18 }
0x21e3   : > { %v5711_v28 = vpop.xlane.xlu1 %5710 }
0x21e4   : > { %10207 = vrcp.f32 %v5711_v28 }
0x21e7   : > { %v5714_v54 = vpop.xlane.xlu0 %5713  ;;  %v9979_v45 = vpop.permute.xlu1 %9978 }
0x21e8   : > { %10209 = vrcp.f32 %v5714_v54  ;;  %v9981_v32 = vunpack.i.h.bf16 %v9979_v45  ;;  %v9980_v29 = vunpack.i.l.bf16 %v9979_v45 }
0x21ea   : > { %v10206_v30 = vpop.eup %10205  ;;  %v9653_v23 = vpack.c.bf16 %v9981_v32, %v9980_v29 }
0x21eb   : > { %v5718_v31 = vmul.f32 %v10206_v30, %v10200_v35  ;;  %v5726_v19 = vpop.permute.xlu0 %5725  ;;  %v5942_v33 = vpop.permute.xlu1 %5941 }
0x21ec   : > { %9264 = vmatpush3.msk.msra.mxu1 %vm1377_vm9, %v5726_v19 }
0x21ed   : > { %9266 = vmatmul.mubr.msk.f32.vlgmr.msra.gmra.mrb[122].mxu1 %vm1325_vm7, %v5718_v31  ;;  %9652 = vmatprep.subr.bf16.mxu1 %v10641_v59 }
0x21ee   : > { %v10208_v24 = vpop.eup %10207  ;;  %9268 = vmatprep.mubr.msk.f32.mxu1 %vm10642_vm4, %v10643_v63 }
0x21ef   : > { %v5719_v34 = vmul.f32 %v10208_v24, %v10202_v51  ;;  %v9984_v12 = vpop.permute.xlu1 %9983  ;;  %v6181_v50 = vpop.permute.xlu0 %6180 }
0x21f0   : > { %v9986_v4 = vunpack.i.h.bf16 %v9984_v12  ;;  %v9985_v43 = vunpack.i.l.bf16 %v9984_v12 }
0x21f1   : > { %9269 = vmatmul.mubr.msk.f32.gmra.mrb[124].mxu1 %vm1325_vm7, %v5719_v34 }
0x21f2   : > { %v10210_v52 = vpop.eup %10209  ;;  %9271 = vmatprep.mubr.msk.f32.mxu1 %vm10642_vm4, %v10643_v63  ;;  %v9660_v47 = vpack.c.bf16 %v9986_v4, %v9985_v43 }
0x21f3   : > { %9655 = vmatpush3.bf16.xpose.msk.msra.mxu1 %vm11163_vm6, %v9653_v23  ;;  %v5720_v36 = vmul.f32 %v10210_v52, %v10204_v9  ;;  %v6171_v53 = vpop.permute.xlu1 %6170  ;;  %v6173_v55 = vpop.permute.xlu0 %6172 }
0x21f4   : > { %9289 = vmatprep.subr.mxu1 %v10643_v63 }
0x21f5   : > { %9272 = vmatmul.mubr.msk.f32.gmra.mrb[126].mxu1 %vm1325_vm7, %v5720_v36 }
0x21f6   : > { %9291 = vmatprep.mubr.msk.f32.mxu1 %vm10642_vm4, %v10643_v63 }
0x21f7   : > { %v6175_v57 = vpop.permute.xlu1 %6174 }
0x21fb   : > { %9290 = vmatpush3.xpose.msk.msra.mxu1 %vm1229_vm5, %v5942_v33 }
0x21fc   : > { %9659 = vmatprep.subr.bf16.mxu1 %v10641_v59 }
0x21fe   : > { %9292 = vmatmul.mubr.msk.f32.vlgmr.msra.gmra.mrb[128].mxu1 %vm1229_vm5, %v12233_v16 }
0x21ff   : > { %9662 = vmatpush3.bf16.xpose.msk.msra.mxu1 %vm11163_vm6, %v9660_v47  ;;  %9294 = vmatprep.mubr.msk.f32.mxu1 %vm10642_vm4, %v10643_v63 }
0x2200   : > { %9319 = vmatprep.subr.mxu1 %v10643_v63 }
0x2202   : > { %9295 = vmatmul.mubr.msk.f32.gmra.mrb[130].mxu1 %vm1229_vm5, %v12230_v10 }
0x2203   : > { %9297 = vmatprep.mubr.msk.f32.mxu1 %vm10642_vm4, %v10643_v63 }
0x2206   : > { %9298 = vmatmul.mubr.msk.f32.gmra.mrb[132].mxu1 %vm1229_vm5, %v12225_v38 }
0x2207   : > { %9320 = vmatpush3.xpose.msk.msra.mxu1 %vm1229_vm5, %v6181_v50  ;;  %9321 = vmatprep.mubr.msk.f32.mxu1 %vm10642_vm4, %v10643_v63 }
0x2208   : > { %9345 = vmatprep.subr.mxu1 %v10643_v63 }
0x220a   : > { %9322 = vmatmul.mubr.msk.f32.vlgmr.msra.gmra.mrb[134].mxu1 %vm1229_vm5, %v6171_v53 }
0x220b   : > { %9324 = vmatprep.mubr.msk.f32.mxu1 %vm10642_vm4, %v10643_v63  ;;  %9346 = vmatpush3.msra.mxu1 %v12108_v48 }
0x220c   : > { %9666 = vmatprep.subr.bf16.mxu1 %v10641_v59 }
0x220e   : > { %9325 = vmatmul.mubr.msk.f32.gmra.mrb[136].mxu1 %vm1229_vm5, %v6173_v55 }
0x220f   : > { %9327 = vmatprep.mubr.msk.f32.mxu1 %vm10642_vm4, %v10643_v63 }
0x2212   : > { %9328 = vmatmul.mubr.msk.f32.gmra.mrb[138].mxu1 %vm1229_vm5, %v6175_v57 }
0x2213   : > { %9347 = vmatprep.mubr.msk.f32.mxu1 %vm10642_vm4, %v10643_v63 }
0x22c0   : > { %v5806_v48 = vpop.f32.mrb[122].mxu1 }
0x22c1   : > { %v9267_v6 = vpop.f32.mrb[123].mxu1  ;;  %9277 = vmatmul.mubr.msk.f32.vlgmr.msra.gmra.mrb[126].mxu0 %vm1229_vm5, %v5806_v48 }
0x22c2   : > { %9279 = vmatprep.mubr.msk.f32.mxu0 %vm10642_vm4, %v10643_v63 }
0x22c4   : > { %v5811_v21 = vpop.f32.mrb[124].mxu1 }
0x22c5   : > { %v9270_v60 = vpop.f32.mrb[125].mxu1  ;;  %9280 = vmatmul.mubr.msk.f32.gmra.mrb[128].mxu0 %vm1229_vm5, %v5811_v21 }
0x22c6   : > { %9282 = vmatprep.mubr.msk.f32.mxu0 %vm10642_vm4, %v10643_v63 }
0x22c8   : > { %v5816_v61 = vpop.f32.mrb[126].mxu1 }
0x22c9   : > { %v9273_v62 = vpop.f32.mrb[127].mxu1  ;;  %9283 = vmatmul.mubr.msk.f32.gmra.mrb[130].mxu0 %vm1229_vm5, %v5816_v61 }
0x22ca   : > { %9306 = vmatprep.mubr.msk.f32.mxu0 %vm10642_vm4, %v10643_v63 }
0x22d1   : > { %v6021_v1 = vpop.f32.mrb[128].mxu1 }
0x22d2   : > { %v6035_v2 = vmul.f32 0.35355338, %v6021_v1  ;;  %v9293_v3 = vpop.f32.mrb[129].mxu1 }
0x22d4   : > { %v6038_v5 = vsel %vm1325_vm7, %v6035_v2, -inf }
0x22d5   : > { %6039 = vmax.xlane.f32.xlu0 %v6038_v5  ;;  %v6026_v11 = vpop.f32.mrb[130].mxu1 }
0x22d6   : > { %v6036_v35 = vmul.f32 0.35355338, %v6026_v11  ;;  %v9296_v37 = vpop.f32.mrb[131].mxu1 }
0x22d8   : > { %v6041_v51 = vsel %vm1325_vm7, %v6036_v35, -inf }
0x22d9   : > { %6042 = vmax.xlane.f32.xlu1 %v6041_v51  ;;  %v6031_v8 = vpop.f32.mrb[132].mxu1 }
0x22da   : > { %v6037_v9 = vmul.f32 0.35355338, %v6031_v8  ;;  %v9299_v42 = vpop.f32.mrb[133].mxu1 }
0x22dc   : > { %v6044_v13 = vsel %vm1332_vm8, %v6037_v9, -inf }
0x22dd   : > { %6045 = vmax.xlane.f32.xlu0 %v6044_v13  ;;  %v6260_v49 = vpop.f32.mrb[134].mxu1  ;;  %v12362_v13 = vld [vmem:[#allocation12 + $0x1] ss:$0 sm:$0xff] }
0x22de   : > { %v6274_v25 = vmul.f32 0.35355338, %v6260_v49  ;;  %v9323_v14 = vpop.f32.mrb[135].mxu1  ;;  %v5912_v49 = vld [vmem:[#allocation2] sm:$0xff] }
0x22e0   : > { %v6277_v39 = vsel %vm1325_vm7, %v6274_v25, -inf }
0x22e1   : > { %6278 = vmax.xlane.f32.xlu0 %v6277_v39  ;;  %v6265_v46 = vpop.f32.mrb[136].mxu1 }
0x22e2   : > { %v6275_v44 = vmul.f32 0.35355338, %v6265_v46  ;;  %v9326_v22 = vpop.f32.mrb[137].mxu1 }
0x22e3   : > { %v5913_v22 = vld [vmem:[#allocation2 + $0x8] sm:$0xff] }
0x22e4   : > { %v6280_v56 = vsel %vm1325_vm7, %v6275_v44, -inf }
0x22e5   : > { %6281 = vmax.xlane.f32.xlu0 %v6280_v56  ;;  %v6270_v20 = vpop.f32.mrb[138].mxu1 }
0x22e6   : > { %v6276_v18 = vmul.f32 0.35355338, %v6270_v20  ;;  %v9329_v28 = vpop.f32.mrb[139].mxu1 }
0x22e8   : > { %v6283_v54 = vsel %vm1332_vm8, %v6276_v18, -inf }
0x22e9   : > { %6284 = vmax.xlane.f32.xlu1 %v6283_v54  ;;  %v5914_v54 = vld [vmem:[#allocation2 + $0x10] sm:$0x1] }
0x22fa   : > { %9988 = vrot.lane.b32.xlu1 %v12237_v7, %s10647_s24 }
0x2362   : > { %v6040_v30 = vpop.xlane.xlu0 %6039 }
0x2363   : > { %v6047_v45 = vsub.f32 %v6035_v2, %v6040_v30 }
0x2365   : > { %v6050_v31 = vmul.f32 1.442695, %v6047_v45 }
0x2366   : > { %v6043_v19 = vpop.xlane.xlu1 %6042 }
0x2367   : > { %10211 = vpow2.f32 %v6050_v31  ;;  %v6048_v32 = vsub.f32 %v6036_v35, %v6043_v19 }
0x2369   : > { %v6052_v29 = vmul.f32 1.442695, %v6048_v32 }
0x236a   : > { %v6046_v24 = vpop.xlane.xlu0 %6045 }
0x236b   : > { %10213 = vpow2.f32 %v6052_v29  ;;  %v6049_v34 = vsub.f32 %v6037_v9, %v6046_v24 }
0x236d   : > { %v6054_v33 = vmul.f32 1.442695, %v6049_v34 }
0x236e   : > { %v6279_v23 = vpop.xlane.xlu0 %6278 }
0x236f   : > { %10215 = vpow2.f32 %v6054_v33  ;;  %v6286_v52 = vsub.f32 %v6274_v25, %v6279_v23 }
0x2371   : > { %v12332_v36 = vpop.eup %10211  ;;  %v6289_v12 = vmul.f32 1.442695, %v6286_v52 }
0x2372   : > { %v6282_v4 = vpop.xlane.xlu0 %6281  ;;  %v6056_v43 = vsel %vm1325_vm7, %v12332_v36, 0.0 }
0x2373   : > { %10217 = vpow2.f32 %v6289_v12  ;;  %v6287_v47 = vsub.f32 %v6275_v44, %v6282_v4  ;;  %6057 = vadd.xlane.f32.xlu0 %v6056_v43 }
0x2375   : > { %v12336_v50 = vpop.eup %10213  ;;  %v6291_v53 = vmul.f32 1.442695, %v6287_v47 }
0x2376   : > { %v6285_v55 = vpop.xlane.xlu1 %6284  ;;  %v6059_v57 = vsel %vm1325_vm7, %v12336_v50, 0.0 }
0x2377   : > { %10219 = vpow2.f32 %v6291_v53  ;;  %v6288_v48 = vsub.f32 %v6276_v18, %v6285_v55  ;;  %6060 = vadd.xlane.f32.xlu1 %v6059_v57 }
0x2379   : > { %v12340_v6 = vpop.eup %10215  ;;  %v6293_v21 = vmul.f32 1.442695, %v6288_v48 }
0x237a   : > { %v9989_v60 = vpop.permute.xlu1 %9988  ;;  %v6062_v61 = vsel %vm1332_vm8, %v12340_v6, 0.0 }
0x237b   : > { %10221 = vpow2.f32 %v6293_v21  ;;  %v9991_v62 = vunpack.i.h.bf16 %v9989_v60  ;;  %v9990_v1 = vunpack.i.l.bf16 %v9989_v60  ;;  %6063 = vadd.xlane.f32.xlu0 %v6062_v61 }
0x237d   : > { %v12344_v2 = vpop.eup %10217  ;;  %v9657_v3 = vpack.c.bf16 %v9991_v62, %v9990_v1 }
0x237e   : > { %v6295_v5 = vsel %vm1325_vm7, %v12344_v2, 0.0 }
0x237f   : > { %6296 = vadd.xlane.f32.xlu1 %v6295_v5  ;;  %9658 = vmatpush3.bf16.msra.mxu0 %v9657_v3 }
0x2380   : > { %9304 = vmatprep.subr.mxu0 %v10643_v63 }
0x2381   : > { %v12349_v11 = vpop.eup %10219 }
0x2382   : > { %v6298_v35 = vsel %vm1325_vm7, %v12349_v11, 0.0 }
0x2383   : > { %6299 = vadd.xlane.f32.xlu0 %v6298_v35 }
0x2385   : > { %v12353_v37 = vpop.eup %10221 }
0x2386   : > { %v6301_v51 = vsel %vm1332_vm8, %v12353_v37, 0.0 }
0x2387   : > { %6302 = vadd.xlane.f32.xlu0 %v6301_v51 }
0x2390   : > { %9993 = vrot.lane.b32.xlu1 %v12237_v7, %s10648_s26 }
0x2394   : > { %v5895_v8 = vpop.f32.mrb[126].mxu0  ;;  %6314 = vrot.lane.b32.xlu1 %v12225_v38, %s10648_s26  ;;  %s12876_s26 = sld [smem:[#allocation42_spill]] }
0x2395   : > { %v5909_v9 = vadd.f32 %v5895_v8, %v12250_v41  ;;  %v9278_v42 = vpop.f32.mrb[127].mxu0 }
0x2397   : > { %v5915_v25 = vadd.f32 %v5912_v49, %v5909_v9 }
0x2398   : > { %v5900_v14 = vpop.f32.mrb[128].mxu0  ;;  %9998 = vrot.lane.b32.xlu1 %v12237_v7, %s10649_s23 }
0x2399   : > { %v5924_v39 = vadd.f32 %v12362_v13, %v5915_v25  ;;  %v5910_v46 = vadd.f32 %v5900_v14, %v12257_v17  ;;  %v9281_v44 = vpop.f32.mrb[129].mxu0 }
0x239b   : > { %5927 = vst.msk [vmem:[#allocation2] sm:$0xff] %vm895_vm2, %v5924_v39  ;;  %v5916_v56 = vadd.f32 %v5913_v22, %v5910_v46 }
0x239c   : > { %v5905_v20 = vpop.f32.mrb[130].mxu0  ;;  %6597 = vrot.lane.b32.xlu1 %v12225_v38, %s10649_s23  ;;  %s12877_s23 = sld [smem:[#allocation31_spill]] }
0x239d   : > { %v5925_v41 = vadd.f32 %v12362_v13, %v5916_v56  ;;  %v5911_v18 = vadd.f32 %v5905_v20, %v12262_v15  ;;  %v9284_v28 = vpop.f32.mrb[131].mxu0  ;;  %6075 = vrot.lane.b32.xlu0 %v12225_v38, %s10647_s24 }
0x239f   : > { %5928 = vst.msk [vmem:[#allocation2 + $0x8] sm:$0xff] %vm895_vm2, %v5925_v41  ;;  %v5917_v17 = vadd.f32 %v5914_v54, %v5911_v18 }
0x23a0   : > { %6589 = vrot.lane.b32.xlu1 %v12230_v10, %s10650_s28 }
0x23a1   : > { %v5926_v30 = vadd.f32 %v12362_v13, %v5917_v17  ;;  %6587 = vrot.lane.b32.xlu0 %v12233_v16, %s10650_s28 }
0x23a2   : > { %p12880_p11 = scmp.ne.s32.totalorder %s12877_s23, 0 }
0x23a3   : > { %5929 = vst.msk [vmem:[#allocation2 + $0x10] sm:$0x1] %vm891_vm1, %v5926_v30 }
0x23a5   : > { %6591 = vrot.lane.b32.xlu0 %v12225_v38, %s10650_s28  ;;  %s779_s28 = sand.u32 1, %s12875_s27  }
0x23a6   : > { %s7846_s27 = scalar_lea.sflag [#allocation5], %s779_s28 }
0x2400   : > { %v6058_v15 = vpop.xlane.xlu0 %6057 }
0x2401   : > { %10223 = vrcp.f32 %v6058_v15 }
0x2404   : > { %v6061_v45 = vpop.xlane.xlu1 %6060 }
0x2405   : > { %10225 = vrcp.f32 %v6061_v45 }
0x2408   : > { %v6064_v31 = vpop.xlane.xlu0 %6063 }
0x2409   : > { %10227 = vrcp.f32 %v6064_v31 }
0x240b   : > { %v10224_v34 = vpop.eup %10223 }
0x240c   : > { %v6297_v19 = vpop.xlane.xlu1 %6296  ;;  %v6068_v52 = vmul.f32 %v10224_v34, %v12332_v36 }
0x240d   : > { %10229 = vrcp.f32 %v6297_v19 }
0x240f   : > { %v10226_v4 = vpop.eup %10225 }
0x2410   : > { %v6300_v32 = vpop.xlane.xlu0 %6299  ;;  %v9994_v29 = vpop.permute.xlu1 %9993  ;;  %v6069_v47 = vmul.f32 %v10226_v4, %v12336_v50 }
0x2411   : > { %v9996_v33 = vunpack.i.h.bf16 %v9994_v29  ;;  %v9995_v23 = vunpack.i.l.bf16 %v9994_v29  ;;  %10231 = vrcp.f32 %v6300_v32 }
0x2413   : > { %v9664_v43 = vpack.c.bf16 %v9996_v33, %v9995_v23  ;;  %v10228_v53 = vpop.eup %10227 }
0x2414   : > { %v6303_v24 = vpop.xlane.xlu0 %6302  ;;  %v6315_v36 = vpop.permute.xlu1 %6314  ;;  %v6070_v55 = vmul.f32 %v10228_v53, %v12340_v6 }
0x2415   : > { %10233 = vrcp.f32 %v6303_v24 }
0x2417   : > { %v10230_v57 = vpop.eup %10229 }
0x2418   : > { %v6076_v12 = vpop.permute.xlu0 %6075  ;;  %v6307_v50 = vmul.f32 %v10230_v57, %v12344_v2  ;;  %v9999_v1 = vpop.permute.xlu1 %9998 }
0x2419   : > { %9305 = vmatpush3.msk.msra.mxu0 %vm1377_vm9, %v6076_v12  ;;  %v10001_v3 = vunpack.i.h.bf16 %v9999_v1  ;;  %v10000_v5 = vunpack.i.l.bf16 %v9999_v1 }
0x241a   : > { %9307 = vmatmul.mubr.msk.f32.vlgmr.msra.gmra.mrb[132].mxu0 %vm1325_vm7, %v6068_v52  ;;  %9663 = vmatprep.subr.bf16.mxu0 %v10641_v59 }
0x241b   : > { %9665 = vmatpush3.bf16.msra.mxu0 %v9664_v43  ;;  %9309 = vmatprep.mubr.msk.f32.mxu0 %vm10642_vm4, %v10643_v63  ;;  %v10232_v48 = vpop.eup %10231 }
0x241c   : > { %9334 = vmatprep.subr.mxu0 %v10643_v63  ;;  %v6308_v6 = vmul.f32 %v10232_v48, %v12349_v11  ;;  %v6598_v25 = vpop.permute.xlu1 %6597  ;;  %v6588_v39 = vpop.permute.xlu0 %6587 }
0x241e   : > { %9310 = vmatmul.mubr.msk.f32.gmra.mrb[134].mxu0 %vm1325_vm7, %v6069_v47 }
0x241f   : > { %9335 = vmatpush3.msk.msra.mxu0 %vm1377_vm9, %v6315_v36  ;;  %9312 = vmatprep.mubr.msk.f32.mxu0 %vm10642_vm4, %v10643_v63  ;;  %v10234_v21 = vpop.eup %10233 }
0x2420   : > { %9356 = vmatprep.subr.mxu0 %v10643_v63  ;;  %v6309_v60 = vmul.f32 %v10234_v21, %v12353_v37  ;;  %v9667_v37 = vpack.c.bf16 %v10001_v3, %v10000_v5  ;;  %v6590_v46 = vpop.permute.xlu1 %6589  ;;  %v6592_v44 = vpop.permute.xlu0 %6591 }
0x2422   : > { %9313 = vmatmul.mubr.msk.f32.gmra.mrb[136].mxu0 %vm1325_vm7, %v6070_v55 }
0x2423   : > { %9336 = vmatprep.mubr.msk.f32.mxu0 %vm10642_vm4, %v10643_v63 }
0x2426   : > { %9337 = vmatmul.mubr.msk.f32.vlgmr.msra.gmra.mrb[138].mxu0 %vm1325_vm7, %v6307_v50 }
0x2427   : > { %9339 = vmatprep.mubr.msk.f32.mxu0 %vm10642_vm4, %v10643_v63  ;;  %9357 = vmatpush3.msra.mxu0 %v12097_v40 }
0x2428   : > { %9670 = vmatprep.subr.bf16.mxu0 %v10641_v59 }
0x242a   : > { %9340 = vmatmul.mubr.msk.f32.gmra.mrb[140].mxu0 %vm1325_vm7, %v6308_v6 }
0x242b   : > { %9342 = vmatprep.mubr.msk.f32.mxu0 %vm10642_vm4, %v10643_v63 }
0x242e   : > { %9343 = vmatmul.mubr.msk.f32.gmra.mrb[142].mxu0 %vm1325_vm7, %v6309_v60 }
0x242f   : > { %9358 = vmatprep.mubr.msk.f32.mxu0 %vm10642_vm4, %v10643_v63 }
0x24ed   : > { %v6156_v61 = vpop.f32.mrb[132].mxu0 }
0x24ee   : > { %v9308_v62 = vpop.f32.mrb[133].mxu0  ;;  %9359 = vmatmul.mubr.msk.f32.vlgmr.msra.gmra.mrb[144].mxu0 %vm1229_vm5, %v6156_v61 }
0x24ef   : > { %9361 = vmatprep.mubr.msk.f32.mxu0 %vm10642_vm4, %v10643_v63 }
0x24f1   : > { %v6161_v40 = vpop.f32.mrb[134].mxu0 }
0x24f2   : > { %v9311_v2 = vpop.f32.mrb[135].mxu0  ;;  %9362 = vmatmul.mubr.msk.f32.gmra.mrb[146].mxu0 %vm1229_vm5, %v6161_v40 }
0x24f3   : > { %9364 = vmatprep.mubr.msk.f32.mxu0 %vm10642_vm4, %v10643_v63 }
0x24f5   : > { %v6166_v11 = vpop.f32.mrb[136].mxu0 }
0x24f6   : > { %v9314_v35 = vpop.f32.mrb[137].mxu0  ;;  %9365 = vmatmul.mubr.msk.f32.gmra.mrb[148].mxu0 %vm1229_vm5, %v6166_v11 }
0x24f7   : > { %9388 = vmatprep.mubr.msk.f32.mxu0 %vm10642_vm4, %v10643_v63 }
0x24f9   : > { %v6395_v51 = vpop.f32.mrb[138].mxu0 }
0x24fa   : > { %v9338_v8 = vpop.f32.mrb[139].mxu0  ;;  %9348 = vmatmul.mubr.msk.f32.vlgmr.msra.gmra.mrb[140].mxu1 %vm1229_vm5, %v6395_v51 }
0x24fb   : > { %9669 = vmatpush3.bf16.xpose.msk.msra.mxu1 %vm11163_vm6, %v9667_v37  ;;  %9350 = vmatprep.mubr.msk.f32.mxu1 %vm10642_vm4, %v10643_v63 }
0x24fc   : > { %9371 = vmatprep.subr.mxu1 %v10643_v63 }
0x24fd   : > { %v6400_v9 = vpop.f32.mrb[140].mxu0 }
0x24fe   : > { %v9341_v42 = vpop.f32.mrb[141].mxu0  ;;  %9351 = vmatmul.mubr.msk.f32.gmra.mrb[142].mxu1 %vm1229_vm5, %v6400_v9 }
0x24ff   : > { %9353 = vmatprep.mubr.msk.f32.mxu1 %vm10642_vm4, %v10643_v63 }
0x2501   : > { %v6405_v49 = vpop.f32.mrb[142].mxu0 }
0x2502   : > { %v9344_v14 = vpop.f32.mrb[143].mxu0  ;;  %9354 = vmatmul.mubr.msk.f32.gmra.mrb[144].mxu1 %vm1229_vm5, %v6405_v49 }
0x2503   : > { %9372 = vmatpush3.xpose.msk.msra.mxu1 %vm1229_vm5, %v6598_v25  ;;  %9373 = vmatprep.mubr.msk.f32.mxu1 %vm10642_vm4, %v10643_v63 }
0x2504   : > { %9397 = vmatprep.subr.mxu1 %v10643_v63 }
0x2506   : > { %9374 = vmatmul.mubr.msk.f32.vlgmr.msra.gmra.mrb[146].mxu1 %vm1229_vm5, %v6588_v39 }
0x2507   : > { %9376 = vmatprep.mubr.msk.f32.mxu1 %vm10642_vm4, %v10643_v63  ;;  %9398 = vmatpush3.msra.mxu1 %v12199_v26 }
0x2508   : > { %9677 = vmatprep.subr.bf16.mxu1 %v10641_v59 }
0x250a   : > { %9377 = vmatmul.mubr.msk.f32.gmra.mrb[148].mxu1 %vm1229_vm5, %v6590_v46 }
0x250b   : > { %9379 = vmatprep.mubr.msk.f32.mxu1 %vm10642_vm4, %v10643_v63 }
0x250e   : > { %9380 = vmatmul.mubr.msk.f32.gmra.mrb[150].mxu1 %vm1229_vm5, %v6592_v44 }
0x250f   : > { %9399 = vmatprep.mubr.msk.f32.mxu1 %vm10642_vm4, %v10643_v63 }
0x25c1   : > { %v6573_v22 = vpop.f32.mrb[144].mxu0 }
0x25c2   : > { %v9360_v56 = vpop.f32.mrb[145].mxu0 }
0x25c5   : > { %v6578_v20 = vpop.f32.mrb[146].mxu0 }
0x25c6   : > { %v9363_v41 = vpop.f32.mrb[147].mxu0 }
0x25c9   : > { %v6583_v18 = vpop.f32.mrb[148].mxu0 }
0x25ca   : > { %v9366_v26 = vpop.f32.mrb[149].mxu0 }
0x25cd   : > { %v6484_v28 = vpop.f32.mrb[140].mxu1 }
0x25ce   : > { %v12449_v54 = vadd.f32 %v6573_v22, %v6484_v28  ;;  %v9349_v17 = vpop.f32.mrb[141].mxu1 }
0x25d1   : > { %v6489_v30 = vpop.f32.mrb[142].mxu1 }
0x25d2   : > { %v12451_v15 = vadd.f32 %v6578_v20, %v6489_v30  ;;  %v9352_v45 = vpop.f32.mrb[143].mxu1 }
0x25d5   : > { %v6494_v31 = vpop.f32.mrb[144].mxu1 }
0x25d6   : > { %v12453_v19 = vadd.f32 %v6583_v18, %v6494_v31  ;;  %v9355_v32 = vpop.f32.mrb[145].mxu1 }
0x25d9   : > { %v6677_v29 = vpop.f32.mrb[146].mxu1 }
0x25da   : > { %v6691_v24 = vmul.f32 0.35355338, %v6677_v29  ;;  %v9375_v34 = vpop.f32.mrb[147].mxu1 }
0x25dc   : > { %v6694_v33 = vsel %vm1325_vm7, %v6691_v24, -inf }
0x25dd   : > { %6695 = vmax.xlane.f32.xlu1 %v6694_v33  ;;  %v6682_v23 = vpop.f32.mrb[148].mxu1 }
0x25de   : > { %v6692_v52 = vmul.f32 0.35355338, %v6682_v23  ;;  %v9378_v12 = vpop.f32.mrb[149].mxu1 }
0x25e0   : > { %v6697_v4 = vsel %vm1325_vm7, %v6692_v52, -inf }
0x25e1   : > { %6698 = vmax.xlane.f32.xlu0 %v6697_v4  ;;  %v6687_v43 = vpop.f32.mrb[150].mxu1 }
0x25e2   : > { %v6693_v47 = vmul.f32 0.35355338, %v6687_v43  ;;  %v9381_v53 = vpop.f32.mrb[151].mxu1 }
0x25e4   : > { %v6700_v36 = vsel %vm1332_vm8, %v6693_v47, -inf }
0x25e5   : > { %6701 = vmax.xlane.f32.xlu0 %v6700_v36 }
0x25ee   : > { %10003 = vrot.lane.b32.xlu1 %v12237_v7, %s10651_s0 }
0x266a   : > { %v6696_v55 = vpop.xlane.xlu1 %6695 }
0x266b   : > { %v6703_v57 = vsub.f32 %v6691_v24, %v6696_v55 }
0x266d   : > { %v6706_v50 = vmul.f32 1.442695, %v6703_v57 }
0x266e   : > { %v10004_v48 = vpop.permute.xlu1 %10003  ;;  %v6699_v6 = vpop.xlane.xlu0 %6698 }
0x266f   : > { %10235 = vpow2.f32 %v6706_v50  ;;  %v10006_v21 = vunpack.i.h.bf16 %v10004_v48  ;;  %v10005_v60 = vunpack.i.l.bf16 %v10004_v48  ;;  %v6704_v61 = vsub.f32 %v6692_v52, %v6699_v6 }
0x2671   : > { %v9671_v62 = vpack.c.bf16 %v10006_v21, %v10005_v60  ;;  %v6708_v40 = vmul.f32 1.442695, %v6704_v61 }
0x2672   : > { %v6702_v1 = vpop.xlane.xlu0 %6701 }
0x2673   : > { %10237 = vpow2.f32 %v6708_v40  ;;  %v6705_v2 = vsub.f32 %v6693_v47, %v6702_v1  ;;  %9672 = vmatpush3.bf16.msra.mxu0 %v9671_v62 }
0x2674   : > { %9386 = vmatprep.subr.mxu0 %v10643_v63 }
0x2675   : > { %v6710_v3 = vmul.f32 1.442695, %v6705_v2 }
0x2677   : > { %10239 = vpow2.f32 %v6710_v3 }
0x2679   : > { %v10236_v5 = vpop.eup %10235 }
0x267a   : > { %v6712_v11 = vsel %vm1325_vm7, %v10236_v5, 0.0 }
0x267b   : > { %6713 = vadd.xlane.f32.xlu0 %v6712_v11 }
0x267d   : > { %v10238_v35 = vpop.eup %10237 }
0x267e   : > { %v6715_v37 = vsel %vm1325_vm7, %v10238_v35, 0.0 }
0x267f   : > { %6716 = vadd.xlane.f32.xlu1 %v6715_v37 }
0x2681   : > { %v10240_v51 = vpop.eup %10239 }
0x2682   : > { %v6718_v8 = vsel %vm1332_vm8, %v10240_v51, 0.0 }
0x2683   : > { %6719 = vadd.xlane.f32.xlu0 %v6718_v8 }
0x2690   : > { %10008 = vrot.lane.b32.xlu1 %v12237_v7, %s12871_s25 }
0x2694   : > { %6928 = vrot.lane.b32.xlu1 %v12225_v38, %s12871_s25  ;;  %s8320_s25 = sshll.u32 %s10788_s3, 5  ;;  %s10656_s3 = smov [#allocation18]  }
0x2698   : > { %6918 = vrot.lane.b32.xlu1 %v12233_v16, %s12872_s4 }
0x2699   : > { %6731 = vrot.lane.b32.xlu0 %v12225_v38, %s10651_s0  ;;  %s8028_s0 = sshll.u32 %s779_s28, 1 }
0x2708   : > { %v6714_v9 = vpop.xlane.xlu0 %6713 }
0x2709   : > { %10241 = vrcp.f32 %v6714_v9 }
0x270c   : > { %v6717_v42 = vpop.xlane.xlu1 %6716 }
0x270d   : > { %10243 = vrcp.f32 %v6717_v42 }
0x2710   : > { %v6720_v49 = vpop.xlane.xlu0 %6719  ;;  %v10009_v14 = vpop.permute.xlu1 %10008 }
0x2711   : > { %10245 = vrcp.f32 %v6720_v49  ;;  %v10011_v44 = vunpack.i.h.bf16 %v10009_v14  ;;  %v10010_v22 = vunpack.i.l.bf16 %v10009_v14 }
0x2713   : > { %v10242_v25 = vpop.eup %10241  ;;  %v9674_v20 = vpack.c.bf16 %v10011_v44, %v10010_v22 }
0x2714   : > { %v6724_v39 = vmul.f32 %v10242_v25, %v10236_v5  ;;  %v6732_v46 = vpop.permute.xlu0 %6731  ;;  %v6929_v26 = vpop.permute.xlu1 %6928  ;;  %v12534_v25 = vld [vmem:[#allocation2 + $0x8] sm:$0xff] }
0x2715   : > { %9387 = vmatpush3.msk.msra.mxu0 %vm1377_vm9, %v6732_v46  ;;  %v7269_v46 = vsel %vm895_vm2, %v12534_v25, 0.0 }
0x2716   : > { %9389 = vmatmul.mubr.msk.f32.vlgmr.msra.gmra.mrb[150].mxu0 %vm1325_vm7, %v6724_v39  ;;  %9673 = vmatprep.subr.bf16.mxu0 %v10641_v59 }
0x2717   : > { %v10244_v16 = vpop.eup %10243  ;;  %9391 = vmatprep.mubr.msk.f32.mxu0 %vm10642_vm4, %v10643_v63 }
0x2718   : > { %v6725_v56 = vmul.f32 %v10244_v16, %v10238_v35  ;;  %v6919_v28 = vpop.permute.xlu1 %6918 }
0x271a   : > { %9392 = vmatmul.mubr.msk.f32.gmra.mrb[152].mxu0 %vm1325_vm7, %v6725_v56 }
0x271b   : > { %v10246_v41 = vpop.eup %10245  ;;  %9394 = vmatprep.mubr.msk.f32.mxu0 %vm10642_vm4, %v10643_v63 }
0x271c   : > { %9676 = vmatpush3.bf16.xpose.msk.msra.mxu0 %vm11163_vm6, %v9674_v20  ;;  %v6726_v18 = vmul.f32 %v10246_v41, %v10240_v51 }
0x271d   : > { %9412 = vmatprep.subr.mxu0 %v10643_v63 }
0x271e   : > { %9395 = vmatmul.mubr.msk.f32.gmra.mrb[154].mxu0 %vm1325_vm7, %v6726_v18 }
0x271f   : > { %9414 = vmatprep.mubr.msk.f32.mxu0 %vm10642_vm4, %v10643_v63 }
0x2724   : > { %9413 = vmatpush3.xpose.msk.msra.mxu0 %vm1229_vm5, %v6929_v26 }
0x2725   : > { %9438 = vmatprep.subr.mxu0 %v10643_v63 }
0x2727   : > { %9415 = vmatmul.mubr.msk.f32.vlgmr.msra.gmra.mrb[156].mxu0 %vm1229_vm5, %v6919_v28  ;;  %v12545_v28 = vld [vmem:[#allocation2] sm:$0xff] }
0x2728   : > { %9417 = vmatprep.mubr.msk.f32.mxu0 %vm10642_vm4, %v10643_v63  ;;  %9439 = vmatpush3.msra.mxu0 %v12311_v58 }
0x2729   : > { %9686 = vmatprep.subr.bf16.mxu0 %v10641_v59 }
0x27e9   : > { %v6812_v0 = vpop.f32.mrb[150].mxu0 }
0x27ea   : > { %v9390_v17 = vpop.f32.mrb[151].mxu0  ;;  %9400 = vmatmul.mubr.msk.f32.vlgmr.msra.gmra.mrb[152].mxu1 %vm1229_vm5, %v6812_v0  ;;  %v7266_v0 = vsel %vm895_vm2, %v12545_v28, 0.0 }
0x27eb   : > { %9402 = vmatprep.mubr.msk.f32.mxu1 %vm10642_vm4, %v10643_v63 }
0x27ed   : > { %v6817_v30 = vpop.f32.mrb[152].mxu0 }
0x27ee   : > { %v9393_v45 = vpop.f32.mrb[153].mxu0  ;;  %9403 = vmatmul.mubr.msk.f32.gmra.mrb[154].mxu1 %vm1229_vm5, %v6817_v30 }
0x27ef   : > { %9405 = vmatprep.mubr.msk.f32.mxu1 %vm10642_vm4, %v10643_v63 }
0x27f1   : > { %v6822_v31 = vpop.f32.mrb[154].mxu0 }
0x27f2   : > { %v9396_v32 = vpop.f32.mrb[155].mxu0  ;;  %9406 = vmatmul.mubr.msk.f32.gmra.mrb[156].mxu1 %vm1229_vm5, %v6822_v31  ;;  %v7249_v31 = vld [vmem:[#allocation2 + $0x11] sm:$0xff] }
0x27f3   : > { %9429 = vmatprep.mubr.msk.f32.mxu1 %vm10642_vm4, %v10643_v63 }
0x27fa   : > { %v7008_v58 = vpop.f32.mrb[156].mxu0 }
0x27fb   : > { %v7022_v29 = vmul.f32 0.35355338, %v7008_v58  ;;  %v9416_v24 = vpop.f32.mrb[157].mxu0 }
0x27fd   : > { %v7025_v34 = vsel %vm1325_vm7, %v7022_v29, -inf }
0x27fe   : > { %7026 = vmax.xlane.f32.xlu0 %v7025_v34 }
0x2814   : > { %10013 = vrot.lane.b32.xlu0 %v12237_v7, %s12873_s16 }
0x2818   : > { %6920 = vrot.lane.b32.xlu0 %v12230_v10, %s12872_s4 }
0x288b   : > { %v7027_v33 = vpop.xlane.xlu0 %7026 }
0x288c   : > { %v7034_v23 = vsub.f32 %v7022_v29, %v7027_v33 }
0x288e   : > { %v7037_v52 = vmul.f32 1.442695, %v7034_v23 }
0x288f   : > { %v10014_v12 = vpop.permute.xlu0 %10013 }
0x2890   : > { %10247 = vpow2.f32 %v7037_v52  ;;  %v10016_v4 = vunpack.i.h.bf16 %v10014_v12  ;;  %v10015_v43 = vunpack.i.l.bf16 %v10014_v12 }
0x2892   : > { %v9678_v47 = vpack.c.bf16 %v10016_v4, %v10015_v43 }
0x2893   : > { %v6921_v53 = vpop.permute.xlu0 %6920 }
0x2894   : > { %9418 = vmatmul.mubr.msk.f32.gmra.mrb[158].mxu0 %vm1229_vm5, %v6921_v53  ;;  %9679 = vmatpush3.bf16.msra.mxu1 %v9678_v47 }
0x2895   : > { %9427 = vmatprep.subr.mxu1 %v10643_v63  ;;  %9420 = vmatprep.mubr.msk.f32.mxu0 %vm10642_vm4, %v10643_v63 }
0x289a   : > { %v10248_v7 = vpop.eup %10247 }
0x289b   : > { %v7043_v10 = vsel %vm1325_vm7, %v10248_v7, 0.0 }
0x289c   : > { %7044 = vadd.xlane.f32.xlu1 %v7043_v10 }
0x28ad   : > { %7062 = vrot.lane.b32.xlu1 %v12225_v38, %s12873_s16 }
0x28b1   : > { %6922 = vrot.lane.b32.xlu1 %v12225_v38, %s12872_s4  ;;  %s781_s4 = scalar_lea.vmem [#allocation18], %s8028_s0 }
0x28b2   : > { %s7859_s18 = sshll.u32 %s781_s4, 4  ;;  %s12727_s18 = int_to_ptr.vmem [resolvable:$true] %s7859_s18 }
0x28b3   : > { %s10544_s24 = scalar_lea.vmem %s12727_s18, 32 }
0x28b4   : > { %p10545_p8 = scmp.ne.s32.totalorder %s12727_s18, %s10544_s24 }
0x28b6   : > { %p10546_p5 = pnand %p10545_p8, %p12880_p11 }
0x28b8   : > { %p10547_p0 = pneg %p10546_p5 }
0x28bd   : > { %v6901_v36 = vpop.f32.mrb[152].mxu1 }
0x28be   : > { %v6915_v55 = vadd.f32 %v6901_v36, %v12449_v54  ;;  %v9401_v57 = vpop.f32.mrb[153].mxu1 }
0x28bf   : > { %v8174_v57 = vld [vmem:[%s12780_s13 + $0x20] sm:$0xff] }
0x28c1   : > { %v6906_v50 = vpop.f32.mrb[154].mxu1 }
0x28c2   : > { %v12518_v48 = vadd.f32 %v6906_v50, %v12451_v15  ;;  %v9404_v6 = vpop.f32.mrb[155].mxu1  ;;  %v8175_v50 = vld [vmem:[%s12780_s13 + $0x28] sm:$0xff] }
0x28c3   : > { %v9681_v6 = vpack.c.bf16 %v8175_v50, %v8174_v57  ;;  %v8186_v57 = vld [vmem:[%s12782_s15 + $0x78] sm:$0xff] }
0x28c5   : > { %v6911_v21 = vpop.f32.mrb[156].mxu1 }
0x28c6   : > { %v12521_v60 = vadd.f32 %v6911_v21, %v12453_v19  ;;  %v9407_v61 = vpop.f32.mrb[157].mxu1  ;;  %v8176_v21 = vld [vmem:[%s12780_s13 + $0x30] sm:$0xff] }
0x28c7   : > { %v8177_v61 = vld [vmem:[%s12780_s13 + $0x38] sm:$0xff] }
0x2929   : > { %v7045_v62 = vpop.xlane.xlu1 %7044 }
0x292a   : > { %10249 = vrcp.f32 %v7045_v62  ;;  %v9684_v62 = vpack.c.bf16 %v8177_v61, %v8176_v21 }
0x292d   : > { %v7063_v40 = vpop.permute.xlu1 %7062 }
0x292e   : > { %9428 = vmatpush3.msk.msra.mxu1 %vm1377_vm9, %v7063_v40 }
0x292f   : > { %9680 = vmatprep.subr.bf16.mxu1 %v10641_v59 }
0x2931   : > { %v6923_v38 = vpop.permute.xlu1 %6922 }
0x2932   : > { %9421 = vmatmul.mubr.msk.f32.gmra.mrb[160].mxu0 %vm1229_vm5, %v6923_v38 }
0x2933   : > { %9440 = vmatprep.mubr.msk.f32.mxu0 %vm10642_vm4, %v10643_v63 }
0x2934   : > { %v10250_v54 = vpop.eup %10249 }
0x2935   : > { %v7055_v15 = vmul.f32 %v10250_v54, %v10248_v7 }
0x2937   : > { %9430 = vmatmul.mubr.msk.f32.vlgmr.msra.gmra.mrb[158].mxu1 %vm1325_vm7, %v7055_v15 }
0x2938   : > { %9432 = vmatprep.mubr.msk.f32.mxu1 %vm10642_vm4, %v10643_v63  ;;  %9682 = vmatpush3.bf16.msra.mxu1 %v9681_v6  ;;  %v12640_v6 = vld [vmem:[%s12781_s14 + $0x1] ss:$0 sm:$0xff] }
0x2939   : > { %9683 = vmatprep.subr.bf16.mxu1 %v10641_v59 }
0x293c   : > { %9685 = vmatpush3.bf16.msra.mxu1 %v9684_v62 }
0x293d   : > { %9698 = vmatprep.subr.bf16.mxu1 %v10641_v59 }
0x2967   : > { %v7013_v19 = vpop.f32.mrb[158].mxu0 }
0x2968   : > { %v7023_v1 = vmul.f32 0.35355338, %v7013_v19  ;;  %v9419_v2 = vpop.f32.mrb[159].mxu0 }
0x296a   : > { %v7028_v3 = vsel %vm1325_vm7, %v7023_v1, -inf }
0x296b   : > { %7029 = vmax.xlane.f32.xlu0 %v7028_v3 }
0x29f8   : > { %v7030_v5 = vpop.xlane.xlu0 %7029 }
0x29f9   : > { %v7035_v11 = vsub.f32 %v7023_v1, %v7030_v5 }
0x29fb   : > { %v7039_v35 = vmul.f32 1.442695, %v7035_v11 }
0x29fd   : > { %10251 = vpow2.f32 %v7039_v35 }
0x2a05   : > { %v7018_v37 = vpop.f32.mrb[160].mxu0 }
0x2a06   : > { %v7024_v51 = vmul.f32 0.35355338, %v7018_v37  ;;  %v9422_v8 = vpop.f32.mrb[161].mxu0 }
0x2a07   : > { %v10252_v9 = vpop.eup %10251 }
0x2a08   : > { %v7046_v42 = vsel %vm1325_vm7, %v10252_v9, 0.0  ;;  %v7031_v49 = vsel %vm1332_vm8, %v7024_v51, -inf }
0x2a09   : > { %7047 = vadd.xlane.f32.xlu0 %v7046_v42  ;;  %7032 = vmax.xlane.f32.xlu1 %v7031_v49 }
0x2a0a   : > { %v7143_v14 = vpop.f32.mrb[158].mxu1 }
0x2a0b   : > { %v9431_v39 = vpop.f32.mrb[159].mxu1  ;;  %9441 = vmatmul.mubr.msk.f32.vlgmr.msra.gmra.mrb[162].mxu0 %vm1229_vm5, %v7143_v14  ;;  %v12581_v14 = vld [vmem:[#allocation14 + $0x1] ss:$0 sm:$0xff] }
0x2a0c   : > { %9443 = vmatprep.mubr.msk.f32.mxu0 %vm10642_vm4, %v10643_v63 }
0x2a0d   : > { %7270 = vadd.xlane.f32.xlu1 %v7269_v46  ;;  %v12584_v46 = vld [vmem:[#allocation15 + $0x1] ss:$0 sm:$0xff] }
0x2a96   : > { %v7048_v44 = vpop.xlane.xlu0 %7047  ;;  %v7033_v22 = vpop.xlane.xlu1 %7032 }
0x2a97   : > { %10253 = vrcp.f32 %v7048_v44  ;;  %v7036_v16 = vsub.f32 %v7024_v51, %v7033_v22 }
0x2a99   : > { %v7041_v56 = vmul.f32 1.442695, %v7036_v16 }
0x2a9a   : > { %v7271_v58 = vpop.xlane.xlu1 %7270 }
0x2a9b   : > { %10255 = vpow2.f32 %v7041_v56  ;;  %v7282_v24 = vmul.f32 0.03125, %v7271_v58 }
0x2a9d   : > { %v7287_v34 = vsub.f32 %v12534_v25, %v7282_v24 }
0x2a9f   : > { %v7292_v52 = vmul.f32 %v7287_v34, %v7287_v34 }
0x2aa1   : > { %v10254_v20 = vpop.eup %10253  ;;  %v7299_v12 = vsel %vm895_vm2, %v7292_v52, 0.0  ;;  %v8180_v52 = vld [vmem:[%s12782_s15 + $0x48] sm:$0xff] }
0x2aa2   : > { %v7056_v41 = vmul.f32 %v10254_v20, %v10252_v9 }
0x2aa4   : > { %9433 = vmatmul.mubr.msk.f32.gmra.mrb[160].mxu1 %vm1325_vm7, %v7056_v41 }
0x2aa5   : > { %v10256_v18 = vpop.eup %10255  ;;  %9435 = vmatprep.mubr.msk.f32.mxu1 %vm10642_vm4, %v10643_v63 }
0x2aa6   : > { %v7049_v26 = vsel %vm1332_vm8, %v10256_v18, 0.0 }
0x2aa7   : > { %7050 = vadd.xlane.f32.xlu0 %v7049_v26 }
0x2aab   : > { %7267 = vadd.xlane.f32.xlu0 %v7266_v0 }
0x2ade   : > { %v7232_v17 = vpop.f32.mrb[162].mxu0 }
0x2adf   : > { %v7246_v30 = vadd.f32 %v7232_v17, %v6915_v55  ;;  %v9442_v45 = vpop.f32.mrb[163].mxu0 }
0x2ae1   : > { %v7252_v32 = vadd.f32 %v7249_v31, %v7246_v30 }
0x2ae3   : > { %v7255_v29 = vadd.f32 %v12362_v13, %v7252_v32 }
0x2ae5   : > { %7258 = vst.msk [vmem:[#allocation2 + $0x11] sm:$0xff] %vm895_vm2, %v7255_v29  ;;  %v7250_v29 = vld [vmem:[#allocation2 + $0x19] sm:$0xff] }
0x2aec   : > { %v12552_v33 = vld [vmem:[#allocation2 + $0x10] sm:$0xff] }
0x2aed   : > { %v7272_v23 = vsel %vm895_vm2, %v12552_v33, 0.0 }
0x2aee   : > { %7273 = vadd.xlane.f32.xlu0 %v7272_v23  ;;  %v8179_v23 = vld [vmem:[%s12782_s15 + $0x40] sm:$0xff] }
0x2af2   : > { %7300 = vadd.xlane.f32.xlu0 %v7299_v12  ;;  %v9687_v12 = vpack.c.bf16 %v8180_v52, %v8179_v23 }
0x2af4   : > { %9688 = vmatpush3.bf16.msra.mxu0 %v9687_v12 }
0x2af5   : > { %9689 = vmatprep.subr.bf16.mxu0 %v10641_v59 }
0x2b34   : > { %v7051_v4 = vpop.xlane.xlu0 %7050 }
0x2b35   : > { %10257 = vrcp.f32 %v7051_v4 }
0x2b38   : > { %v7268_v43 = vpop.xlane.xlu0 %7267 }
0x2b39   : > { %v7281_v47 = vmul.f32 0.03125, %v7268_v43  ;;  %v8181_v43 = vld [vmem:[%s12782_s15 + $0x50] sm:$0xff] }
0x2b3b   : > { %v7286_v53 = vsub.f32 %v12545_v28, %v7281_v47  ;;  %v8182_v47 = vld [vmem:[%s12782_s15 + $0x58] sm:$0xff] }
0x2b3d   : > { %v7291_v7 = vmul.f32 %v7286_v53, %v7286_v53 }
0x2b3f   : > { %v10258_v10 = vpop.eup %10257  ;;  %v7296_v36 = vsel %vm895_vm2, %v7291_v7, 0.0  ;;  %v8183_v7 = vld [vmem:[%s12782_s15 + $0x60] sm:$0xff] }
0x2b40   : > { %7297 = vadd.xlane.f32.xlu1 %v7296_v36  ;;  %v7057_v55 = vmul.f32 %v10258_v10, %v10256_v18  ;;  %v8184_v10 = vld [vmem:[%s12782_s15 + $0x68] sm:$0xff] }
0x2b41   : > { %v9693_v36 = vpack.c.bf16 %v8184_v10, %v8183_v7 }
0x2b42   : > { %9436 = vmatmul.mubr.msk.f32.gmra.mrb[162].mxu1 %vm1325_vm7, %v7057_v55  ;;  %v8185_v55 = vld [vmem:[%s12782_s15 + $0x70] sm:$0xff] }
0x2b43   : > { %9457 = vmatprep.mubr.msk.f32.mxu1 %vm10642_vm4, %v10643_v63  ;;  %v9696_v50 = vpack.c.bf16 %v8186_v57, %v8185_v55 }
0x2b77   : > { %v7148_v40 = vpop.f32.mrb[160].mxu1 }
0x2b78   : > { %v9434_v38 = vpop.f32.mrb[161].mxu1  ;;  %9444 = vmatmul.mubr.msk.f32.gmra.mrb[164].mxu0 %vm1229_vm5, %v7148_v40 }
0x2b79   : > { %9446 = vmatprep.mubr.msk.f32.mxu0 %vm10642_vm4, %v10643_v63 }
0x2b7b   : > { %v7274_v54 = vpop.xlane.xlu0 %7273 }
0x2b7c   : > { %v7283_v15 = vmul.f32 0.03125, %v7274_v54 }
0x2b7e   : > { %v7288_v19 = vsub.f32 %v12552_v33, %v7283_v15 }
0x2b7f   : > { %v7301_v3 = vpop.xlane.xlu0 %7300 }
0x2b80   : > { %v7293_v1 = vmul.f32 %v7288_v19, %v7288_v19  ;;  %v7312_v5 = vmul.f32 0.03125, %v7301_v3 }
0x2b82   : > { %v7302_v2 = vsel %vm895_vm2, %v7293_v1, 0.0  ;;  %v7317_v11 = vadd.f32 1e-05, %v7312_v5 }
0x2b83   : > { %7303 = vadd.xlane.f32.xlu1 %v7302_v2 }
0x2b84   : > { %10259 = vrsqrt.f32 %v7317_v11 }
0x2b8e   : > { %v10260_v8 = vpop.eup %10259 }
0x2b8f   : > { %v7327_v49 = vmul.f32 %v10260_v8, %v7287_v34 }
0x2b91   : > { %v7338_v22 = vmul.f32 %v12581_v14, %v7327_v49 }
0x2b93   : > { %v7349_v16 = vadd.f32 %v12584_v46, %v7338_v22 }
0x2bcd   : > { %v7298_v35 = vpop.xlane.xlu1 %7297 }
0x2bce   : > { %v7311_v37 = vmul.f32 0.03125, %v7298_v35 }
0x2bd0   : > { %v7316_v51 = vadd.f32 1e-05, %v7311_v37 }
0x2bd2   : > { %10261 = vrsqrt.f32 %v7316_v51 }
0x2bdc   : > { %v10262_v9 = vpop.eup %10261 }
0x2bdd   : > { %v7326_v42 = vmul.f32 %v10262_v9, %v7286_v53  ;;  %v9690_v53 = vpack.c.bf16 %v8182_v47, %v8181_v43 }
0x2bdf   : > { %v7337_v39 = vmul.f32 %v12581_v14, %v7326_v42  ;;  %9691 = vmatpush3.bf16.msra.mxu0 %v9690_v53 }
0x2be0   : > { %9692 = vmatprep.subr.bf16.mxu0 %v10641_v59 }
0x2be1   : > { %v7348_v44 = vadd.f32 %v12584_v46, %v7337_v39 }
0x2be3   : > { %9458 = vmatmul.mubr.msk.f32.vlgmr.msra.gmra.mrb[164].mxu1 %vm895_vm2, %v7348_v44  ;;  %9694 = vmatpush3.bf16.msra.mxu0 %v9693_v36 }
0x2be4   : > { %9460 = vmatprep.mubr.msk.f32.mxu1 %vm10642_vm4, %v10643_v63  ;;  %9695 = vmatprep.subr.bf16.mxu0 %v10641_v59 }
0x2be7   : > { %9461 = vmatmul.mubr.msk.f32.gmra.mrb[166].mxu1 %vm895_vm2, %v7349_v16  ;;  %9697 = vmatpush3.bf16.msra.mxu0 %v9696_v50 }
0x2be8   : > { %9463 = vmatprep.mubr.msk.f32.mxu1 %vm10642_vm4, %v10643_v63 }
0x2c10   : > { %v7304_v56 = vpop.xlane.xlu1 %7303 }
0x2c11   : > { %v7313_v20 = vmul.f32 0.03125, %v7304_v56 }
0x2c13   : > { %v7318_v41 = vadd.f32 1e-05, %v7313_v20 }
0x2c15   : > { %10263 = vrsqrt.f32 %v7318_v41  ;;  %v7153_v18 = vpop.f32.mrb[162].mxu1 }
0x2c16   : > { %v9437_v26 = vpop.f32.mrb[163].mxu1  ;;  %9447 = vmatmul.mubr.msk.f32.gmra.mrb[166].mxu0 %vm1229_vm5, %v7153_v18 }
0x2c17   : > { %9488 = vmatprep.mubr.msk.f32.mxu0 %vm10642_vm4, %v10643_v63 }
0x2c1f   : > { %v10264_v0 = vpop.eup %10263 }
0x2c20   : > { %v7328_v17 = vmul.f32 %v10264_v0, %v7288_v19 }
0x2c22   : > { %v7339_v30 = vmul.f32 %v12581_v14, %v7328_v17 }
0x2c24   : > { %v7350_v45 = vadd.f32 %v12584_v46, %v7339_v30 }
0x2c26   : > { %9464 = vmatmul.mubr.msk.f32.gmra.mrb[168].mxu1 %vm895_vm2, %v7350_v45 }
0x2c27   : > { %9466 = vmatprep.mubr.msk.f32.mxu1 %vm10642_vm4, %v10643_v63 }
0x2c4b   : > { %v7237_v31 = vpop.f32.mrb[164].mxu0 }
0x2c4c   : > { %v7247_v32 = vadd.f32 %v7237_v31, %v12518_v48  ;;  %v9445_v58 = vpop.f32.mrb[165].mxu0 }
0x2c4e   : > { %v7253_v24 = vadd.f32 %v7250_v29, %v7247_v32 }
0x2c50   : > { %v7256_v34 = vadd.f32 %v12362_v13, %v7253_v24 }
0x2c52   : > { %7259 = vst.msk [vmem:[#allocation2 + $0x19] sm:$0xff] %vm895_vm2, %v7256_v34 }
0x2c59   : > { %v12612_v4 = vld [vmem:[#allocation2 + $0x18] sm:$0xff] }
0x2c5a   : > { %v7275_v48 = vsel %vm895_vm2, %v12612_v4, 0.0 }
0x2c5b   : > { %7276 = vadd.xlane.f32.xlu0 %v7275_v48 }
0x2cb6   : > { %v7440_v21 = vpop.f32.mrb[164].mxu1 }
0x2cb7   : > { %v7441_v61 = vadd.f32 %v12640_v6, %v7440_v21  ;;  %v9459_v62 = vpop.f32.mrb[165].mxu1 }
0x2cb9   : > { %v7469_v40 = vmul.f32 0.70710677, %v7441_v61  ;;  %v7464_v10 = vmul.f32 0.5, %v7441_v61 }
0x2cba   : > { %v7445_v38 = vpop.f32.mrb[166].mxu1 }
0x2cbb   : > { %v7484_v54 = vand.u32 2147483647, %v7469_v40  ;;  %v7446_v15 = vadd.f32 %v12640_v6, %v7445_v38  ;;  %v9462_v19 = vpop.f32.mrb[167].mxu1  ;;  %vm7474_vm5 = vcmp.ge.f32.partialorder %v7469_v40, 0.0 }
0x2cbc   : > { %v7479_v47 = vsel %vm7474_vm5, 1.0, %v10655_v27 }
0x2cbd   : > { %v7489_v1 = vmul.f32 0.3275911, %v7484_v54  ;;  %v7470_v2 = vmul.f32 0.70710677, %v7446_v15  ;;  %v7554_v37 = vsub.f32 0.0, %v7484_v54  ;;  %v7465_v62 = vmul.f32 0.5, %v7446_v15 }
0x2cbf   : > { %v7494_v3 = vadd.f32 1.0, %v7489_v1  ;;  %v7485_v5 = vand.u32 2147483647, %v7470_v2  ;;  %v7559_v8 = vmul.f32 %v7554_v37, %v7484_v54  ;;  %vm7475_vm6 = vcmp.ge.f32.partialorder %v7470_v2, 0.0 }
0x2cc0   : > { %v7480_v57 = vsel %vm7475_vm6, 1.0, %v10655_v27 }
0x2cc1   : > { %10265 = vrcp.f32 %v7494_v3  ;;  %v7490_v11 = vmul.f32 0.3275911, %v7485_v5  ;;  %v7555_v9 = vsub.f32 0.0, %v7485_v5  ;;  %v7564_v44 = vmul.f32 1.442695, %v7559_v8 }
0x2cc3   : > { %v7495_v35 = vadd.f32 1.0, %v7490_v11  ;;  %v7560_v22 = vmul.f32 %v7555_v9, %v7485_v5  ;;  %v7251_v5 = vld [vmem:[#allocation2 + $0x21] sm:$0x1] }
0x2cc5   : > { %10267 = vrcp.f32 %v7495_v35  ;;  %v7566_v18 = vmul.f32 1.442695, %v7560_v22 }
0x2cc6   : > { %10269 = vpow2.f32 %v7564_v44 }
0x2cc7   : > { %10271 = vpow2.f32 %v7566_v18 }
0x2ccb   : > { %v10266_v51 = vpop.eup %10265 }
0x2ccc   : > { %v7509_v42 = vmul.f32 1.0614054, %v10266_v51 }
0x2cce   : > { %v7514_v49 = vadd.f32 -1.4531521, %v7509_v42 }
0x2ccf   : > { %v10268_v39 = vpop.eup %10267 }
0x2cd0   : > { %v7519_v16 = vmul.f32 %v10266_v51, %v7514_v49  ;;  %v7510_v56 = vmul.f32 1.0614054, %v10268_v39  ;;  %v10270_v34 = vpop.eup %10269 }
0x2cd1   : > { %v10272_v43 = vpop.eup %10271 }
0x2cd2   : > { %v7524_v20 = vadd.f32 1.4214138, %v7519_v16  ;;  %v7515_v41 = vadd.f32 -1.4531521, %v7510_v56 }
0x2cd4   : > { %v7529_v26 = vmul.f32 %v10266_v51, %v7524_v20  ;;  %v7520_v0 = vmul.f32 %v10268_v39, %v7515_v41 }
0x2cd6   : > { %v7534_v17 = vadd.f32 -0.28449672, %v7529_v26  ;;  %v7525_v30 = vadd.f32 1.4214138, %v7520_v0 }
0x2cd8   : > { %v7539_v45 = vmul.f32 %v10266_v51, %v7534_v17  ;;  %v7530_v31 = vmul.f32 %v10268_v39, %v7525_v30 }
0x2cda   : > { %v7544_v32 = vadd.f32 0.2548296, %v7539_v45  ;;  %v7535_v58 = vadd.f32 -0.28449672, %v7530_v31 }
0x2cdc   : > { %v7549_v29 = vmul.f32 %v10266_v51, %v7544_v32  ;;  %v7540_v24 = vmul.f32 %v10268_v39, %v7535_v58 }
0x2cde   : > { %v7574_v23 = vmul.f32 %v10270_v34, %v7549_v29  ;;  %v7545_v52 = vadd.f32 0.2548296, %v7540_v24 }
0x2ce0   : > { %v7579_v12 = vsub.f32 1.0, %v7574_v23  ;;  %v7550_v48 = vmul.f32 %v10268_v39, %v7545_v52 }
0x2ce2   : > { %v7584_v53 = vmul.f32 %v7579_v12, %v7479_v47  ;;  %v7575_v7 = vmul.f32 %v10272_v43, %v7550_v48 }
0x2ce4   : > { %v7589_v36 = vadd.f32 1.0, %v7584_v53  ;;  %v7580_v55 = vsub.f32 1.0, %v7575_v7 }
0x2ce6   : > { %v7594_v50 = vmul.f32 %v7589_v36, %v7464_v10  ;;  %v7585_v21 = vmul.f32 %v7580_v55, %v7480_v57 }
0x2ce8   : > { %v7590_v38 = vadd.f32 1.0, %v7585_v21  ;;  %v7277_v40 = vpop.xlane.xlu0 %7276  ;;  %9489 = vmatmul.mubr.msk.f32.vlgmr.msra.gmra.mrb[168].mxu0 %vm4227_vm13, %v7594_v50 }
0x2ce9   : > { %v7284_v54 = vmul.f32 0.03125, %v7277_v40  ;;  %v7242_v19 = vpop.f32.mrb[166].mxu0  ;;  %9491 = vmatprep.mubr.msk.f32.mxu0 %vm10642_vm4, %v10643_v63  ;;  %v12676_v40 = vld [vmem:[%s12870_s30 + $0x1] ss:$0 sm:$0xff] }
0x2cea   : > { %v7595_v1 = vmul.f32 %v7590_v38, %v7465_v62  ;;  %v7248_v2 = vadd.f32 %v7242_v19, %v12521_v60  ;;  %v9448_v61 = vpop.f32.mrb[167].mxu0 }
0x2ceb   : > { %v7289_v3 = vsub.f32 %v12612_v4, %v7284_v54 }
0x2cec   : > { %v7254_v11 = vadd.f32 %v7251_v5, %v7248_v2  ;;  %9492 = vmatmul.mubr.msk.f32.gmra.mrb[170].mxu0 %vm4227_vm13, %v7595_v1 }
0x2ced   : > { %v7294_v15 = vmul.f32 %v7289_v3, %v7289_v3  ;;  %9494 = vmatprep.mubr.msk.f32.mxu0 %vm10642_vm4, %v10643_v63 }
0x2cee   : > { %v7257_v35 = vadd.f32 %v12362_v13, %v7254_v11 }
0x2cef   : > { %v7305_v37 = vsel %vm895_vm2, %v7294_v15, 0.0 }
0x2cf0   : > { %7260 = vst.msk [vmem:[#allocation2 + $0x21] sm:$0x1] %vm891_vm1, %v7257_v35  ;;  %7306 = vadd.xlane.f32.xlu0 %v7305_v37 }
0x2cf7   : > { %v12657_v51 = vld [vmem:[#allocation2 + $0x20] sm:$0x3] }
0x2cf8   : > { %v7278_v60 = vsel %vm1032_vm3, %v12657_v51, 0.0 }
0x2cf9   : > { %7279 = vadd.xlane.f32.xlu1 %v7278_v60  ;;  %v7450_v8 = vpop.f32.mrb[168].mxu1 }
0x2cfa   : > { %v7451_v9 = vadd.f32 %v12640_v6, %v7450_v8  ;;  %v9465_v42 = vpop.f32.mrb[169].mxu1 }
0x2cfc   : > { %v7471_v49 = vmul.f32 0.70710677, %v7451_v9  ;;  %v7466_v52 = vmul.f32 0.5, %v7451_v9 }
0x2cfe   : > { %v7486_v39 = vand.u32 2147483647, %v7471_v49  ;;  %vm7476_vm1 = vcmp.ge.f32.partialorder %v7471_v49, 0.0 }
0x2cff   : > { %v7481_v34 = vsel %vm7476_vm1, 1.0, %v10655_v27 }
0x2d00   : > { %v7491_v44 = vmul.f32 0.3275911, %v7486_v39  ;;  %v7556_v13 = vsub.f32 0.0, %v7486_v39 }
0x2d02   : > { %v7496_v22 = vadd.f32 1.0, %v7491_v44  ;;  %v7561_v56 = vmul.f32 %v7556_v13, %v7486_v39 }
0x2d04   : > { %10273 = vrcp.f32 %v7496_v22  ;;  %v7568_v18 = vmul.f32 1.442695, %v7561_v56 }
0x2d06   : > { %10275 = vpow2.f32 %v7568_v18 }
0x2d0e   : > { %v10274_v16 = vpop.eup %10273 }
0x2d0f   : > { %v7511_v20 = vmul.f32 1.0614054, %v10274_v16 }
0x2d10   : > { %v10276_v58 = vpop.eup %10275 }
0x2d11   : > { %v7516_v41 = vadd.f32 -1.4531521, %v7511_v20 }
0x2d13   : > { %v7521_v26 = vmul.f32 %v10274_v16, %v7516_v41 }
0x2d15   : > { %v7526_v0 = vadd.f32 1.4214138, %v7521_v26 }
0x2d17   : > { %v7531_v17 = vmul.f32 %v10274_v16, %v7526_v0 }
0x2d19   : > { %v7536_v30 = vadd.f32 -0.28449672, %v7531_v17 }
0x2d1b   : > { %v7541_v45 = vmul.f32 %v10274_v16, %v7536_v30 }
0x2d1d   : > { %v7546_v31 = vadd.f32 0.2548296, %v7541_v45 }
0x2d1f   : > { %v7551_v32 = vmul.f32 %v10274_v16, %v7546_v31 }
0x2d21   : > { %v7576_v29 = vmul.f32 %v10276_v58, %v7551_v32 }
0x2d23   : > { %v7581_v24 = vsub.f32 1.0, %v7576_v29 }
0x2d25   : > { %v7586_v23 = vmul.f32 %v7581_v24, %v7481_v34 }
0x2d27   : > { %v7591_v12 = vadd.f32 1.0, %v7586_v23 }
0x2d29   : > { %v7596_v48 = vmul.f32 %v7591_v12, %v7466_v52 }
0x2d2b   : > { %9495 = vmatmul.mubr.msk.f32.gmra.mrb[172].mxu0 %vm4227_vm13, %v7596_v48 }
0x2d2c   : > { %9497 = vmatprep.mubr.msk.f32.mxu0 %vm10642_vm4, %v10643_v63 }
0x2d7d   : > { %v7307_v43 = vpop.xlane.xlu0 %7306 }
0x2d7e   : > { %v7314_v47 = vmul.f32 0.03125, %v7307_v43 }
0x2d80   : > { %v7319_v53 = vadd.f32 1e-05, %v7314_v47 }
0x2d82   : > { %10277 = vrsqrt.f32 %v7319_v53 }
0x2d86   : > { %v7280_v7 = vpop.xlane.xlu1 %7279 }
0x2d87   : > { %v7285_v10 = vmul.f32 0.03125, %v7280_v7 }
0x2d89   : > { %v7290_v36 = vsub.f32 %v12657_v51, %v7285_v10 }
0x2d8b   : > { %v7295_v55 = vmul.f32 %v7290_v36, %v7290_v36 }
0x2d8c   : > { %v10278_v57 = vpop.eup %10277 }
0x2d8d   : > { %v7308_v50 = vsel %vm1032_vm3, %v7295_v55, 0.0  ;;  %v7329_v21 = vmul.f32 %v10278_v57, %v7289_v3 }
0x2d8e   : > { %7309 = vadd.xlane.f32.xlu1 %v7308_v50 }
0x2d8f   : > { %v7340_v62 = vmul.f32 %v12581_v14, %v7329_v21 }
0x2d91   : > { %v7351_v38 = vadd.f32 %v12584_v46, %v7340_v62 }
0x2d93   : > { %9467 = vmatmul.mubr.msk.f32.gmra.mrb[170].mxu1 %vm895_vm2, %v7351_v38 }
0x2d94   : > { %9469 = vmatprep.mubr.msk.f32.mxu1 %vm10642_vm4, %v10643_v63 }
0x2dbb   : > { %v7680_v54 = vpop.f32.mrb[168].mxu0 }
0x2dbc   : > { %v7704_v19 = vadd.f32 %v7680_v54, %v12545_v28  ;;  %v9490_v1 = vpop.f32.mrb[169].mxu0  ;;  %v7760_v54 = vld [vmem:[#allocation17] sm:$0xff] }
0x2dbe   : > { %v7715_v2 = vadd.f32 %v12676_v40, %v7704_v19  ;;  %v7761_v19 = vld [vmem:[#allocation17 + $0x8] sm:$0xff] }
0x2dbf   : > { %v7685_v61 = vpop.f32.mrb[170].mxu0  ;;  %v9699_v1 = vpack.c.bf16 %v7761_v19, %v7760_v54 }
0x2dc0   : > { %7720 = vst.msk [vmem:[#allocation2] sm:$0xff] %vm895_vm2, %v7715_v2  ;;  %v7705_v3 = vadd.f32 %v7685_v61, %v12534_v25  ;;  %v9493_v5 = vpop.f32.mrb[171].mxu0  ;;  %v7762_v2 = vld [vmem:[#allocation17 + $0x10] sm:$0xff]  ;;  %v7763_v61 = vld [vmem:[#allocation17 + $0x18] sm:$0xff] }
0x2dc1   : > { %9700 = vmatpush3.bf16.msra.mxu1 %v9699_v1 }
0x2dc2   : > { %v7716_v11 = vadd.f32 %v12676_v40, %v7705_v3  ;;  %9701 = vmatprep.subr.bf16.mxu1 %v10641_v59  ;;  %v9702_v3 = vpack.c.bf16 %v7763_v61, %v7762_v2 }
0x2dc4   : > { %7721 = vst.msk [vmem:[#allocation2 + $0x8] sm:$0xff] %vm895_vm2, %v7716_v11 }
0x2dc5   : > { %9703 = vmatpush3.bf16.msra.mxu1 %v9702_v3 }
0x2dc7   : > { %v7725_v9 = vld [vmem:[#allocation2] sm:$0x1] }
0x2dfe   : > { %v7690_v15 = vpop.f32.mrb[172].mxu0 }
0x2dff   : > { %v7706_v35 = vadd.f32 %v7690_v15, %v12552_v33  ;;  %v9496_v37 = vpop.f32.mrb[173].mxu0 }
0x2e01   : > { %v7717_v60 = vadd.f32 %v12676_v40, %v7706_v35 }
0x2e03   : > { %7722 = vst.msk [vmem:[#allocation2 + $0x10] sm:$0xff] %vm895_vm2, %v7717_v60 }
0x2e0a   : > { %v7726_v28 = vld [vmem:[#allocation2 + $0x11] sm:$0x1] }
0x2e0b   : > { %v7728_v8 = vrot.slane %v7726_v28, 7 }
0x2e0d   : > { %v7730_v42 = vsel %vm1377_vm9, %v7725_v9, %v7728_v8 }
0x2e0e   : > { %v7733_v25 = vsel %vm1032_vm3, %v7730_v42, 0.0 }
0x2e0f   : > { %7734 = vadd.xlane.f32.xlu0 %v7733_v25 }
0x2e1b   : > { %v7310_v49 = vpop.xlane.xlu1 %7309 }
0x2e1c   : > { %v7315_v39 = vmul.f32 0.03125, %v7310_v49 }
0x2e1e   : > { %v7320_v44 = vadd.f32 1e-05, %v7315_v39 }
0x2e20   : > { %10279 = vrsqrt.f32 %v7320_v44 }
0x2e2a   : > { %v10280_v22 = vpop.eup %10279 }
0x2e2b   : > { %v7330_v13 = vmul.f32 %v10280_v22, %v7290_v36 }
0x2e2d   : > { %v7341_v33 = vmul.f32 %v12581_v14, %v7330_v13 }
0x2e2f   : > { %v7352_v16 = vadd.f32 %v12584_v46, %v7341_v33 }
0x2e31   : > { %9470 = vmatmul.mubr.msk.f32.gmra.mrb[172].mxu1 %vm895_vm2, %v7352_v16 }
0x2e32   : > { %9511 = vmatprep.mubr.msk.f32.mxu1 %vm10642_vm4, %v10643_v63 }
0x2e66   : > { %v7455_v56 = vpop.f32.mrb[170].mxu1 }
0x2e67   : > { %v7456_v20 = vadd.f32 %v12640_v6, %v7455_v56  ;;  %v9468_v41 = vpop.f32.mrb[171].mxu1 }
0x2e69   : > { %v7472_v18 = vmul.f32 0.70710677, %v7456_v20  ;;  %v7467_v10 = vmul.f32 0.5, %v7456_v20 }
0x2e6b   : > { %v7487_v26 = vand.u32 2147483647, %v7472_v18  ;;  %vm7477_vm7 = vcmp.ge.f32.partialorder %v7472_v18, 0.0 }
0x2e6c   : > { %v7482_v53 = vsel %vm7477_vm7, 1.0, %v10655_v27 }
0x2e6d   : > { %v7492_v0 = vmul.f32 0.3275911, %v7487_v26  ;;  %v7557_v30 = vsub.f32 0.0, %v7487_v26 }
0x2e6f   : > { %v7497_v17 = vadd.f32 1.0, %v7492_v0  ;;  %v7562_v31 = vmul.f32 %v7557_v30, %v7487_v26 }
0x2e71   : > { %10281 = vrcp.f32 %v7497_v17  ;;  %v7570_v46 = vmul.f32 1.442695, %v7562_v31 }
0x2e73   : > { %10283 = vpow2.f32 %v7570_v46 }
0x2e7b   : > { %v10282_v45 = vpop.eup %10281 }
0x2e7c   : > { %v7512_v14 = vmul.f32 1.0614054, %v10282_v45 }
0x2e7d   : > { %v10284_v48 = vpop.eup %10283 }
0x2e7e   : > { %v7517_v32 = vadd.f32 -1.4531521, %v7512_v14 }
0x2e80   : > { %v7522_v58 = vmul.f32 %v10282_v45, %v7517_v32  ;;  %v8315_v32 = vld [vmem:[%s12874_s5] ss:$0 sm:$0xff]  ;;  %s12879_s5 = sld [smem:[#allocation44_spill]] }
0x2e82   : > { %v7527_v29 = vadd.f32 1.4214138, %v7522_v58 }
0x2e84   : > { %v7532_v24 = vmul.f32 %v10282_v45, %v7527_v29 }
0x2e86   : > { %v7537_v34 = vadd.f32 -0.28449672, %v7532_v24  ;;  %s12725_s17 = scalar_lea.hbm %s12879_s5, %s8320_s25 }
0x2e88   : > { %v7542_v23 = vmul.f32 %v10282_v45, %v7537_v34 }
0x2e8a   : > { %v7547_v52 = vadd.f32 0.2548296, %v7542_v23 }
0x2e8c   : > { %v7552_v12 = vmul.f32 %v10282_v45, %v7547_v52 }
0x2e8e   : > { %v7577_v43 = vmul.f32 %v10284_v48, %v7552_v12 }
0x2e90   : > { %v7582_v47 = vsub.f32 1.0, %v7577_v43 }
0x2e92   : > { %v7587_v7 = vmul.f32 %v7582_v47, %v7482_v53 }
0x2e94   : > { %v7592_v36 = vadd.f32 1.0, %v7587_v7 }
0x2e96   : > { %v7597_v55 = vmul.f32 %v7592_v36, %v7467_v10 }
0x2e98   : > { %9498 = vmatmul.mubr.msk.f32.gmra.mrb[174].mxu0 %vm4227_vm13, %v7597_v55 }
0x2e99   : > { %9500 = vmatprep.mubr.msk.f32.mxu0 %vm10642_vm4, %v10643_v63 }
0x2e9c   : > { %v7735_v57 = vpop.xlane.xlu0 %7734 }
0x2e9d   : > { %v7736_v50 = vmul.f32 0.03125, %v7735_v57 }
0x2e9f   : > { %v7737_v21 = vsub.f32 %v7730_v42, %v7736_v50 }
0x2ea1   : > { %v7738_v62 = vmul.f32 %v7737_v21, %v7737_v21 }
0x2ea3   : > { %v7739_v38 = vsel %vm1032_vm3, %v7738_v62, 0.0 }
0x2ea4   : > { %7740 = vadd.xlane.f32.xlu1 %v7739_v38 }
0x2f04   : > { %v7460_v5 = vpop.f32.mrb[172].mxu1 }
0x2f05   : > { %v7461_v63 = vadd.f32 %v12640_v6, %v7460_v5  ;;  %v9471_v11 = vpop.f32.mrb[173].mxu1 }
0x2f07   : > { %v7473_v15 = vmul.f32 0.70710677, %v7461_v63  ;;  %v7468_v0 = vmul.f32 0.5, %v7461_v63 }
0x2f09   : > { %v7488_v35 = vand.u32 2147483647, %v7473_v15  ;;  %vm7478_vm4 = vcmp.ge.f32.partialorder %v7473_v15, 0.0 }
0x2f0a   : > { %v7483_v41 = vsel %vm7478_vm4, 1.0, %v10655_v27  ;;  %v8316_v27 = vld [vmem:[%s12876_s26] ss:$0 sm:$0xff]  ;;  %s10548_s26 = sshll.u32 %s10656_s3, 4  ;;  %s10549_s26 = int_to_ptr.vmem [resolvable:$false] %s10548_s26 }
0x2f0b   : > { %v7493_v37 = vmul.f32 0.3275911, %v7488_v35  ;;  %v7558_v28 = vsub.f32 0.0, %v7488_v35  ;;  %s10550_s0 = scalar_lea.vmem %s10549_s26, 64  ;;  %p10551_p6 = scmp.lt.s32.totalorder %s12727_s18, %s10549_s26 }
0x2f0c   : > { %p10552_p9 = scmp.lt.s32.totalorder %s10550_s0, %s10544_s24 }
0x2f0d   : > { %v7498_v60 = vadd.f32 1.0, %v7493_v37  ;;  %v7563_v9 = vmul.f32 %v7558_v28, %v7488_v35 }
0x2f0e   : > { %p10553_p10 = por %p10552_p9, %p10551_p6 }
0x2f0f   : > { %10285 = vrcp.f32 %v7498_v60  ;;  %v7572_v49 = vmul.f32 1.442695, %v7563_v9 }
0x2f10   : > { %p10554_p13 = pnand %p10553_p10, %p10547_p0 }
0x2f11   : > { %10287 = vpow2.f32 %v7572_v49 }
0x2f19   : > { %v10286_v8 = vpop.eup %10285 }
0x2f1a   : > { %v7513_v42 = vmul.f32 1.0614054, %v10286_v8 }
0x2f1b   : > { %v10288_v16 = vpop.eup %10287 }
0x2f1c   : > { %v7518_v25 = vadd.f32 -1.4531521, %v7513_v42 }
0x2f1e   : > { %v7523_v59 = vmul.f32 %v10286_v8, %v7518_v25 }
0x2f20   : > { %v7528_v39 = vadd.f32 1.4214138, %v7523_v59 }
0x2f22   : > { %v7533_v44 = vmul.f32 %v10286_v8, %v7528_v39 }
0x2f24   : > { %v7538_v22 = vadd.f32 -0.28449672, %v7533_v44 }
0x2f26   : > { %v7543_v13 = vmul.f32 %v10286_v8, %v7538_v22 }
0x2f28   : > { %v7548_v33 = vadd.f32 0.2548296, %v7543_v13 }
0x2f2a   : > { %v7553_v6 = vmul.f32 %v10286_v8, %v7548_v33 }
0x2f2c   : > { %v7578_v56 = vmul.f32 %v10288_v16, %v7553_v6 }
0x2f2e   : > { %v7583_v20 = vsub.f32 1.0, %v7578_v56 }
0x2f30   : > { %v7588_v18 = vmul.f32 %v7583_v20, %v7483_v41 }
0x2f31   : > { %v7741_v26 = vpop.xlane.xlu1 %7740 }
0x2f32   : > { %v7593_v17 = vadd.f32 1.0, %v7588_v18  ;;  %v7742_v30 = vmul.f32 0.03125, %v7741_v26 }
0x2f34   : > { %v7598_v45 = vmul.f32 %v7593_v17, %v7468_v0  ;;  %v7743_v31 = vadd.f32 1e-05, %v7742_v30 }
0x2f36   : > { %10289 = vrsqrt.f32 %v7743_v31  ;;  %9501 = vmatmul.mubr.msk.f32.gmra.mrb[176].mxu0 %vm4227_vm13, %v7598_v45 }
0x2f40   : > { %v10290_v14 = vpop.eup %10289 }
0x2f41   : > { %v7745_v46 = vmul.f32 %v10290_v14, %v7737_v21 }
0x2f43   : > { %v7752_v58 = vmul.f32 %v8315_v32, %v7745_v46 }
0x2f45   : > { %v7759_v29 = vadd.f32 %v8316_v27, %v7752_v58 }
0x2f47   : > { %9512 = vmatmul.mubr.msk.f32.vlgmr.msra.gmra.mrb[174].mxu1 %vm895_vm2, %v7759_v29 }
0x2f6b   : > { %v7695_v24 = vpop.f32.mrb[174].mxu0 }
0x2f6c   : > { %v7707_v34 = vadd.f32 %v7695_v24, %v12612_v4  ;;  %v9499_v23 = vpop.f32.mrb[175].mxu0  ;;  %v8317_v4 = vld [vmem:[%s12878_s20] ss:$0 sm:$0xff] }
0x2f6e   : > { %v7718_v52 = vadd.f32 %v12676_v40, %v7707_v34 }
0x2f70   : > { %7723 = vst.msk [vmem:[#allocation2 + $0x18] sm:$0xff] %vm895_vm2, %v7718_v52 }
0x3009   : > { %v7700_v12 = vpop.f32.mrb[176].mxu0 }
0x300a   : > { %v7708_v48 = vadd.f32 %v7700_v12, %v12657_v51  ;;  %v9502_v43 = vpop.f32.mrb[177].mxu0 }
0x300c   : > { %v7719_v47 = vadd.f32 %v12676_v40, %v7708_v48 }
0x300e   : > { %7724 = vst.msk [vmem:[#allocation2 + $0x20] sm:$0x3] %vm1032_vm3, %v7719_v47 }
0x301a   : > { %v7840_v53 = vpop.f32.mrb[174].mxu1 }
0x301b   : > { %v7841_v7 = vadd.f32 %v8317_v4, %v7840_v53  ;;  %v9513_v10 = vpop.f32.mrb[175].mxu1 }
0x301d   : > { %7844 = vst [vmem:[%s781_s4] sm:$0x3] %v7841_v7 }
0x301e   : > { %10557 = shalt.err (!%p10554_p13)
}
0x301f   : > { %s10558_s28 = scalar_lea.hbm %s12725_s17, 32  ;;  %s10562_s20 = scalar_lea.hbm %s12879_s5, 64 }
0x3020   : > { %p10559_p12 = scmp.ne.s32.totalorder %s12725_s17, %s10558_s28  ;;  %p10563_p3 = scmp.lt.u32.totalorder %s12725_s17, %s12879_s5 }
0x3021   : > { %p10564_p4 = scmp.lt.u32.totalorder %s10562_s20, %s10558_s28  ;;  %p10566_p8 = scmp.lt.u32.totalorder %s10558_s28, %s12725_s17 }
0x3022   : > { %p10560_p1 = pnand %p10559_p12, %p12880_p11 }
0x3023   : > { %p10565_p7 = por %p10564_p4, %p10563_p3 }
0x3024   : > { %p10561_p2 = pneg %p10560_p1 }
0x3025   : > { %p10567_p5 = por %p10566_p8, %p10565_p7 }
0x3027   : > { %p10568_p0 = pnand %p10567_p5, %p10561_p2 }
0x3029   : > { %10571 = shalt.err (!%p10568_p0)
}
0x302a   : > { %9744 = dma.vmem_to_hbm [thread:$0]  (%p12880_p11), %s12727_s18, 32, %s12725_s17, %s7846_s27  }
0x302b PF: > { %s12881_s2 = sld [smem:[#allocation28_spill]]  ;;  %s12882_s16 = sld [smem:[#allocation25_spill]] }
0x302c   : > { %s12883_s24 = sld [smem:[#allocation32_spill]] }
0x3031   : > { %p9796_p6 = scmp.ge.s32.totalorder %s12881_s2, 2  ;;  %s7871_s3 = sand.u32 1, %s12882_s16  }
0x3032   : > { %p12884_p9 = scmp.ne.s32.totalorder %s12883_s24, 0  ;;  %s7872_s26 = scalar_lea.sflag [#allocation5], %s7871_s3 }
0x3034   : > { %p9775_p10 = pnand %p9796_p6, %p12884_p9 }
0x3036   : > { %10609 = dma.done.wait (!%p9775_p10), %s7872_s26, 32  }
0x3037   : > { %10611 = vsyncadd (!%p9775_p10), %s7872_s26, 4294967264  ;;  %s12885_s27 = sld [smem:[#allocation29_spill]]  ;;  %s12886_s2 = sld [smem:[#allocation26_spill]] }
0x3038   : > { %s12887_s25 = sld [smem:[#allocation27_spill]]  ;;  %s12888_s26 = sld [smem:[#allocation30_spill]] }
0x303d   : > { %p36_p13 = scmp.ge.s32.totalorder %s12885_s27, 4  }
0x303f   :  { %38 = sbr.rel (!%p36_p13) target bundleno = 21 (0x15), region = 189 }
0x3046   :  { %7877 = vsyncpa [#allocation4], 1 }
0x3047   :  { %7879 = vsyncpa [#allocation4 + $0x1], 1 }
0x3048   :  { %7880 = vsyncpa [#allocation7], 1 }
0x3049   :  { %7881 = vsyncpa [#allocation10], 1 }
0x304a   :  { %7882 = vsyncpa [#allocation13], 1 }
0x304b   :  { %7883 = vsyncpa [#allocation16], 1 }
0x304c   :  { %7884 = vsyncpa [#allocation5], 1 }
0x304d   :  { %7886 = vsyncpa [#allocation5 + $0x1], 1 }

</bundles_post_ra>
